<compile_context>
chip_gen: v7x
topology: tpu7x:2x2x1
jax: 0.10.0
libtpu: 0.0.40
codegen_flags: <defaults>
</compile_context>

<pallas_src>
import functools

import jax
import jax.numpy as jnp
from jax import lax
from jax.experimental import pallas as pl
from jax.experimental.pallas import tpu as pltpu


def _round_up(x, m):
  return (x + m - 1) // m * m


def _resnet_block_kernel(
    x_ref, temb_ref, mask_ref,
    avg1_ref, g1_ref, b1_ref, w1_ref, c1b_ref,
    wt_ref, bt_ref,
    avg2_ref, g2_ref, b2_ref, w2_ref, c2b_ref,
    ws_ref, bs_ref,
    o_ref,
    pad1_ref, pad2_ref,
    *, H, W, EPS, SKIP):
  f32 = jnp.float32
  bf16 = jnp.bfloat16
  Wp = W + 2                      # padded row width
  L = H * Wp                      # "wide" flattened spatial length

  def silu(z):
    # sigmoid via EUP exp + approx reciprocal (keeps the divide off the VALU).
    return z * pl.reciprocal(1.0 + jnp.exp(-z), approx=True)

  def group_norm(h, avg_ref, gamma, beta):
    # h: (L, C) f32 whose wrap columns are exactly zero, so plain sums over the
    # L wide rows equal sums over the H*W valid pixels.  avg_ref is the (C, C)
    # block-diagonal group-averaging matrix with entries 1 / (C/G * H * W).
    mean = jnp.dot(jnp.sum(h, axis=0, keepdims=True), avg_ref[...],
                   preferred_element_type=f32)                        # (1, C)
    msq = jnp.dot(jnp.sum(h * h, axis=0, keepdims=True), avg_ref[...],
                  preferred_element_type=f32)                         # (1, C)
    var = jnp.maximum(msq - mean * mean, 0.0)
    return (h - mean) * lax.rsqrt(var + EPS) * gamma + beta

  def fill_padded(pad_ref, h_masked):
    # pad_ref holds the flattened (H+2, W+2) zero-padded image, shape (FLAT,C).
    # The wide activation (wrap columns already zero) drops straight into rows
    # [Wp+1, Wp+1+L); only the top/bottom halo strips need (re)zeroing.
    flat, c = pad_ref.shape
    pad_ref[0:Wp + 1, :] = jnp.zeros((Wp + 1, c), bf16)
    pad_ref[Wp + 1 + L:flat, :] = jnp.zeros((flat - (Wp + 1 + L), c), bf16)
    pad_ref[Wp + 1:Wp + 1 + L, :] = h_masked.astype(bf16)

  def conv3x3(pad_ref, w_ref):
    # 3x3 "same" conv as 9 shifted (L, Cin) @ (Cin, Cout) bf16 MXU matmuls over
    # the flat padded buffer (no window reshapes).  Wrap columns of the result
    # are garbage; they are masked before GroupNorm and sliced off in the
    # wrapper at the very end.
    cout = w_ref.shape[-1]
    acc = jnp.zeros((L, cout), f32)
    for ky in range(3):
      for kx in range(3):
        s = ky * Wp + kx
        acc = acc + jnp.dot(pad_ref[s:s + L, :], w_ref[ky, kx],
                            preferred_element_type=f32)
    return acc

  mask = mask_ref[...]                            # (L, 1): 1 real pixel, 0 wrap col

  # norm1 -> silu -> conv1
  xw = x_ref[0].astype(f32)                       # (L, Cin); wrap columns are zero
  h = silu(group_norm(xw, avg1_ref, g1_ref[...], b1_ref[...])) * mask
  fill_padded(pad1_ref, h)
  h = conv3x3(pad1_ref, w1_ref) + c1b_ref[...]

  # TODO(synk): resample='up'/'down' (nearest-upsample / avgpool) paths are not
  # implemented; this kernel covers resample='default'.

  # + time embedding: silu(temb) @ Wt + bt, broadcast over all pixels
  t = silu(temb_ref[0].astype(f32))               # (1, T)
  h = h + (jnp.dot(t, wt_ref[...], preferred_element_type=f32) + bt_ref[...])

  # norm2 -> silu -> conv2
  h = h * mask                                    # zero wrap cols -> exact GN stats
  h = silu(group_norm(h, avg2_ref, g2_ref[...], b2_ref[...])) * mask
  fill_padded(pad2_ref, h)
  h = conv3x3(pad2_ref, w2_ref) + c2b_ref[...]

  # shortcut (1x1 conv of the original input, re-read from VMEM) + skip scale
  res = jnp.dot(x_ref[0].astype(bf16), ws_ref[...],
                preferred_element_type=f32) + bs_ref[...]
  o_ref[0] = ((h + res) * SKIP).astype(o_ref.dtype)


def resnet_block_pallas(x_nchw, temb, params, *, groups, eps, skip_scale):
  B, Cin, H, W = x_nchw.shape
  Cout = params["w1"].shape[-1]
  T = temb.shape[1]
  assert Cin % groups == 0 and Cout % groups == 0
  Wp = W + 2
  L = H * Wp
  flat = _round_up((H + 2) * Wp + 2, 8)   # +2: slack read by the (ky=2,kx=2) tap

  # NCHW -> NHWC -> "wide" flattened layout (B, H*(W+2), C) with 2 zero wrap
  # columns per image row.  (In a fully-NHWC model the transpose would vanish.)
  x_nhwc = jnp.transpose(x_nchw, (0, 2, 3, 1))
  x_wide = jnp.pad(x_nhwc, ((0, 0), (0, 0), (0, 2), (0, 0))).reshape(B, L, Cin)
  temb3 = temb.reshape(B, 1, T)

  # 1 on real pixels, 0 on the 2 wrap columns of each row.
  mask = jnp.tile((jnp.arange(Wp) < W).astype(jnp.float32), H).reshape(L, 1)

  def group_avg(C):
    cpg = C // groups
    gid = jnp.arange(C) // cpg
    return (gid[:, None] == gid[None, :]).astype(jnp.float32) / float(cpg * H * W)

  avg1, avg2 = group_avg(Cin), group_avg(Cout)

  bf16 = jnp.bfloat16
  w1 = params["w1"].astype(bf16)        # conv / shortcut weights feed the MXU in bf16
  w2 = params["w2"].astype(bf16)
  ws = params["ws"].astype(bf16)
  g1 = params["g1"].reshape(1, Cin); b1 = params["b1"].reshape(1, Cin)
  c1b = params["c1b"].reshape(1, Cout); bt = params["bt"].reshape(1, Cout)
  g2 = params["g2"].reshape(1, Cout); b2 = params["b2"].reshape(1, Cout)
  c2b = params["c2b"].reshape(1, Cout); bs = params["bs"].reshape(1, Cout)

  kernel = functools.partial(_resnet_block_kernel, H=H, W=W,
                             EPS=float(eps), SKIP=float(skip_scale))

  # NOTE: for production channel counts on v7x (64 MiB VMEM) these constant
  # specs would additionally be single-buffered (pipeline_mode=pl.Buffered(1))
  # and Cout tiled with an extra grid axis; not needed at these sizes.
  def const(shape):
    rank = len(shape)
    return pl.BlockSpec(shape, lambda b, _r=rank: (0,) * _r)

  out_wide = pl.pallas_call(
      kernel,
      out_shape=jax.ShapeDtypeStruct((B, L, Cout), x_nchw.dtype),
      grid=(B,),
      in_specs=[
          pl.BlockSpec((1, L, Cin), lambda b: (b, 0, 0)),         # x (wide)
          pl.BlockSpec((1, 1, T), lambda b: (b, 0, 0)),           # temb
          const((L, 1)),                                          # wrap-column mask
          const((Cin, Cin)), const((1, Cin)), const((1, Cin)),    # GN1 avg/gamma/beta
          const((3, 3, Cin, Cout)), const((1, Cout)),             # conv1 w (bf16) / b
          const((T, Cout)), const((1, Cout)),                     # time proj w / b
          const((Cout, Cout)), const((1, Cout)), const((1, Cout)),# GN2 avg/gamma/beta
          const((3, 3, Cout, Cout)), const((1, Cout)),            # conv2 w (bf16) / b
          const((Cin, Cout)), const((1, Cout)),                   # shortcut w (bf16)/b
      ],
      out_specs=pl.BlockSpec((1, L, Cout), lambda b: (b, 0, 0)),
      scratch_shapes=[
          pltpu.VMEM((flat, Cin), jnp.bfloat16),   # flattened padded buffer, conv1
          pltpu.VMEM((flat, Cout), jnp.bfloat16),  # flattened padded buffer, conv2
      ],
      compiler_params=pltpu.CompilerParams(
          dimension_semantics=("parallel",),
          vmem_limit_bytes=64 * 1024 * 1024),
  )(x_wide, temb3, mask,
    avg1, g1, b1, w1, c1b,
    params["wt"], bt,
    avg2, g2, b2, w2, c2b,
    ws, bs)

  out = out_wide.reshape(B, H, Wp, Cout)[:, :, :W, :]   # drop the wrap columns
  return jnp.transpose(out, (0, 3, 1, 2))               # NHWC -> NCHW


def init_params(key, Cin, Cout, T):
  ks = jax.random.split(key, 12)
  s = 0.1
  return dict(
      g1=1.0 + s * jax.random.normal(ks[0], (Cin,), jnp.float32),
      b1=s * jax.random.normal(ks[1], (Cin,), jnp.float32),
      w1=s * jax.random.normal(ks[2], (3, 3, Cin, Cout), jnp.float32),
      c1b=s * jax.random.normal(ks[3], (Cout,), jnp.float32),
      wt=s * jax.random.normal(ks[4], (T, Cout), jnp.float32),
      bt=s * jax.random.normal(ks[5], (Cout,), jnp.float32),
      g2=1.0 + s * jax.random.normal(ks[6], (Cout,), jnp.float32),
      b2=s * jax.random.normal(ks[7], (Cout,), jnp.float32),
      w2=s * jax.random.normal(ks[8], (3, 3, Cout, Cout), jnp.float32),
      c2b=s * jax.random.normal(ks[9], (Cout,), jnp.float32),
      ws=s * jax.random.normal(ks[10], (Cin, Cout), jnp.float32),
      bs=s * jax.random.normal(ks[11], (Cout,), jnp.float32),
  )


def ref_forward(x, temb, p, *, groups, eps, skip_scale):
  # Pure-JAX f32 reference (matches the PyTorch forward, NCHW).
  def gn(h, gamma, beta):
    B_, C_, H_, W_ = h.shape
    hg = h.reshape(B_, groups, C_ // groups, H_, W_)
    mean = hg.mean(axis=(2, 3, 4), keepdims=True)
    var = ((hg - mean) ** 2).mean(axis=(2, 3, 4), keepdims=True)
    hn = ((hg - mean) / jnp.sqrt(var + eps)).reshape(B_, C_, H_, W_)
    return hn * gamma[None, :, None, None] + beta[None, :, None, None]

  def silu(z):
    return z * jax.nn.sigmoid(z)

  def conv(h, w, b):  # w is HWIO
    y = lax.conv_general_dilated(h, w, (1, 1), ((1, 1), (1, 1)),
                                 dimension_numbers=("NCHW", "HWIO", "NCHW"))
    return y + b[None, :, None, None]

  res = x
  h = conv(silu(gn(x, p["g1"], p["b1"])), p["w1"], p["c1b"])
  t = silu(temb) @ p["wt"] + p["bt"]
  h = h + t[:, :, None, None]
  h = conv(silu(gn(h, p["g2"], p["b2"])), p["w2"], p["c2b"])
  sc = jnp.einsum("bihw,io->bohw", res, p["ws"]) + p["bs"][None, :, None, None]
  return (h + sc) * skip_scale


if __name__ == "__main__":
  B, Cin, Cout, H, W, T, groups = 2, 8, 16, 16, 16, 32, 4
  eps, skip_scale = 1e-5, 1.0

  key = jax.random.PRNGKey(0)
  kx, kt, kp = jax.random.split(key, 3)
  x = jax.random.normal(kx, (B, Cin, H, W), jnp.float32)
  temb = jax.random.normal(kt, (B, T), jnp.float32)
  params = init_params(kp, Cin, Cout, T)

  out = resnet_block_pallas(x, temb, params, groups=groups, eps=eps,
                            skip_scale=skip_scale)
  out = jax.block_until_ready(out)
  assert out.shape == (B, Cout, H, W)

  ref = ref_forward(x, temb, params, groups=groups, eps=eps,
                    skip_scale=skip_scale)
  max_abs = float(jnp.max(jnp.abs(out - ref)))
  rel_l2 = float(jnp.linalg.norm(out - ref) / jnp.linalg.norm(ref))
  # bf16 MXU inputs + approx reciprocal => tolerances looser than pure f32.
  if not (max_abs < 8e-2 and rel_l2 < 2e-2):
    raise AssertionError(
        f"Pallas output mismatch vs reference: max|diff|={max_abs:e}, "
        f"rel_l2={rel_l2:e}")

  print("KERNEL_OK")
</pallas_src>

<mosaic_0001>
module attributes {stable_mosaic.version = 11 : i64} {
  func.func @_resnet_block_kernel(%arg0: i32, %arg1: memref<1x288x8xf32, #tpu.memory_space<vmem>>, %arg2: memref<1x1x32xf32, #tpu.memory_space<vmem>>, %arg3: memref<288x1xf32, #tpu.memory_space<vmem>>, %arg4: memref<8x8xf32, #tpu.memory_space<vmem>>, %arg5: memref<1x8xf32, #tpu.memory_space<vmem>>, %arg6: memref<1x8xf32, #tpu.memory_space<vmem>>, %arg7: memref<3x3x8x16xbf16, #tpu.memory_space<vmem>>, %arg8: memref<1x16xf32, #tpu.memory_space<vmem>>, %arg9: memref<32x16xf32, #tpu.memory_space<vmem>>, %arg10: memref<1x16xf32, #tpu.memory_space<vmem>>, %arg11: memref<16x16xf32, #tpu.memory_space<vmem>>, %arg12: memref<1x16xf32, #tpu.memory_space<vmem>>, %arg13: memref<1x16xf32, #tpu.memory_space<vmem>>, %arg14: memref<3x3x16x16xbf16, #tpu.memory_space<vmem>>, %arg15: memref<1x16xf32, #tpu.memory_space<vmem>>, %arg16: memref<8x16xbf16, #tpu.memory_space<vmem>>, %arg17: memref<1x16xf32, #tpu.memory_space<vmem>>, %arg18: memref<1x288x16xf32, #tpu.memory_space<vmem>>, %arg19: memref<328x8xbf16, #tpu.memory_space<vmem>>, %arg20: memref<328x16xbf16, #tpu.memory_space<vmem>>) attributes {dimension_semantics = [#tpu.dimension_semantics<parallel>], iteration_bounds = array<i64: 2>, scalar_prefetch = 0 : i64, scratch_operands = 2 : i64, tpu.core_type = #tpu.core_type<tc>, window_params = [{transform_indices = @transform_0, window_bounds = array<i64: 1, 288, 8>}, {transform_indices = @transform_1, window_bounds = array<i64: 1, 1, 32>}, {pipeline_mode = #tpu.pipeline_mode<synchronous>, transform_indices = @transform_2, window_bounds = array<i64: 288, 1>}, {pipeline_mode = #tpu.pipeline_mode<synchronous>, transform_indices = @transform_3, window_bounds = array<i64: 8, 8>}, {pipeline_mode = #tpu.pipeline_mode<synchronous>, transform_indices = @transform_4, window_bounds = array<i64: 1, 8>}, {pipeline_mode = #tpu.pipeline_mode<synchronous>, transform_indices = @transform_5, window_bounds = array<i64: 1, 8>}, {pipeline_mode = #tpu.pipeline_mode<synchronous>, transform_indices = @transform_6, window_bounds = array<i64: 3, 3, 8, 16>}, {pipeline_mode = #tpu.pipeline_mode<synchronous>, transform_indices = @transform_7, window_bounds = array<i64: 1, 16>}, {pipeline_mode = #tpu.pipeline_mode<synchronous>, transform_indices = @transform_8, window_bounds = array<i64: 32, 16>}, {pipeline_mode = #tpu.pipeline_mode<synchronous>, transform_indices = @transform_9, window_bounds = array<i64: 1, 16>}, {pipeline_mode = #tpu.pipeline_mode<synchronous>, transform_indices = @transform_10, window_bounds = array<i64: 16, 16>}, {pipeline_mode = #tpu.pipeline_mode<synchronous>, transform_indices = @transform_11, window_bounds = array<i64: 1, 16>}, {pipeline_mode = #tpu.pipeline_mode<synchronous>, transform_indices = @transform_12, window_bounds = array<i64: 1, 16>}, {pipeline_mode = #tpu.pipeline_mode<synchronous>, transform_indices = @transform_13, window_bounds = array<i64: 3, 3, 16, 16>}, {pipeline_mode = #tpu.pipeline_mode<synchronous>, transform_indices = @transform_14, window_bounds = array<i64: 1, 16>}, {pipeline_mode = #tpu.pipeline_mode<synchronous>, transform_indices = @transform_15, window_bounds = array<i64: 8, 16>}, {pipeline_mode = #tpu.pipeline_mode<synchronous>, transform_indices = @transform_16, window_bounds = array<i64: 1, 16>}, {transform_indices = @transform_17, window_bounds = array<i64: 1, 288, 16>}]} {
    %c0 = arith.constant 0 : index
    %c0_0 = arith.constant 0 : index
    %0 = vector.load %arg3[%c0, %c0_0] : memref<288x1xf32, #tpu.memory_space<vmem>>, vector<288x1xf32>
    %c0_1 = arith.constant 0 : index
    %c0_2 = arith.constant 0 : index
    %c0_3 = arith.constant 0 : index
    %1 = vector.load %arg1[%c0_1, %c0_2, %c0_3] : memref<1x288x8xf32, #tpu.memory_space<vmem>>, vector<1x288x8xf32>
    %2 = vector.shape_cast %1 : vector<1x288x8xf32> to vector<288x8xf32>
    %c0_4 = arith.constant 0 : index
    %c0_5 = arith.constant 0 : index
    %3 = vector.load %arg5[%c0_4, %c0_5] : memref<1x8xf32, #tpu.memory_space<vmem>>, vector<1x8xf32>
    %c0_6 = arith.constant 0 : index
    %c0_7 = arith.constant 0 : index
    %4 = vector.load %arg6[%c0_6, %c0_7] : memref<1x8xf32, #tpu.memory_space<vmem>>, vector<1x8xf32>
    %cst = arith.constant dense<0.000000e+00> : vector<8xf32>
    %5 = vector.multi_reduction <add>, %2, %cst [0] : vector<288x8xf32> to vector<8xf32>
    %6 = vector.shape_cast %5 : vector<8xf32> to vector<1x8xf32>
    %c0_8 = arith.constant 0 : index
    %c0_9 = arith.constant 0 : index
    %7 = vector.load %arg4[%c0_8, %c0_9] : memref<8x8xf32, #tpu.memory_space<vmem>>, vector<8x8xf32>
    %cst_10 = arith.constant dense<0.000000e+00> : vector<1x8xf32>
    %8 = tpu.matmul %6, %7, %cst_10 {dimension_numbers = #tpu.dot_dimension_numbers<[1], [0], [0], [1], [0, 0, 1, 1], [], []>} : vector<1x8xf32>, vector<8x8xf32>, vector<1x8xf32> -> vector<1x8xf32>
    %9 = arith.mulf %2, %2 : vector<288x8xf32>
    %cst_11 = arith.constant dense<0.000000e+00> : vector<8xf32>
    %10 = vector.multi_reduction <add>, %9, %cst_11 [0] : vector<288x8xf32> to vector<8xf32>
    %11 = vector.shape_cast %10 : vector<8xf32> to vector<1x8xf32>
    %c0_12 = arith.constant 0 : index
    %c0_13 = arith.constant 0 : index
    %12 = vector.load %arg4[%c0_12, %c0_13] : memref<8x8xf32, #tpu.memory_space<vmem>>, vector<8x8xf32>
    %cst_14 = arith.constant dense<0.000000e+00> : vector<1x8xf32>
    %13 = tpu.matmul %11, %12, %cst_14 {dimension_numbers = #tpu.dot_dimension_numbers<[1], [0], [0], [1], [0, 0, 1, 1], [], []>} : vector<1x8xf32>, vector<8x8xf32>, vector<1x8xf32> -> vector<1x8xf32>
    %14 = arith.mulf %8, %8 : vector<1x8xf32>
    %15 = arith.subf %13, %14 : vector<1x8xf32>
    %cst_15 = arith.constant 0.000000e+00 : f32
    %16 = vector.broadcast %cst_15 : f32 to vector<1x8xf32>
    %17 = arith.maximumf %15, %16 : vector<1x8xf32>
    %18 = vector.broadcast %8 : vector<1x8xf32> to vector<288x8xf32>
    %19 = arith.subf %2, %18 : vector<288x8xf32>
    %cst_16 = arith.constant 9.99999974E-6 : f32
    %20 = vector.broadcast %cst_16 : f32 to vector<1x8xf32>
    %21 = arith.addf %17, %20 : vector<1x8xf32>
    %22 = math.rsqrt %21 : vector<1x8xf32>
    %23 = vector.broadcast %22 : vector<1x8xf32> to vector<288x8xf32>
    %24 = arith.mulf %19, %23 : vector<288x8xf32>
    %25 = vector.broadcast %3 : vector<1x8xf32> to vector<288x8xf32>
    %26 = arith.mulf %24, %25 : vector<288x8xf32>
    %27 = vector.broadcast %4 : vector<1x8xf32> to vector<288x8xf32>
    %28 = arith.addf %26, %27 : vector<288x8xf32>
    %cst_17 = arith.constant 0.000000e+00 : f32
    %29 = vector.broadcast %cst_17 : f32 to vector<288x8xf32>
    %30 = arith.subf %29, %28 : vector<288x8xf32>
    %31 = math.exp %30 : vector<288x8xf32>
    %cst_18 = arith.constant 1.000000e+00 : f32
    %32 = vector.broadcast %cst_18 : f32 to vector<288x8xf32>
    %33 = arith.addf %32, %31 : vector<288x8xf32>
    %34 = tpu.reciprocal %33 {approx = true} : vector<288x8xf32> -> vector<288x8xf32>
    %35 = arith.mulf %28, %34 : vector<288x8xf32>
    %36 = vector.broadcast %0 : vector<288x1xf32> to vector<288x8xf32>
    %37 = arith.mulf %35, %36 : vector<288x8xf32>
    %cst_19 = arith.constant 0.000000e+00 : bf16
    %38 = vector.broadcast %cst_19 : bf16 to vector<19x8xbf16>
    %c0_20 = arith.constant 0 : index
    %c0_21 = arith.constant 0 : index
    %39 = vector.load %arg19[%c0_20, %c0_21] : memref<328x8xbf16, #tpu.memory_space<vmem>>, vector<19x8xbf16>
    tpu.vector_store %arg19[%c0_20, %c0_21], %38 {strides = array<i32>} : memref<328x8xbf16, #tpu.memory_space<vmem>>, vector<19x8xbf16>,
    %cst_22 = arith.constant 0.000000e+00 : bf16
    %40 = vector.broadcast %cst_22 : bf16 to vector<21x8xbf16>
    %c307 = arith.constant 307 : index
    %c0_23 = arith.constant 0 : index
    %41 = vector.load %arg19[%c307, %c0_23] : memref<328x8xbf16, #tpu.memory_space<vmem>>, vector<21x8xbf16>
    tpu.vector_store %arg19[%c307, %c0_23], %40 {strides = array<i32>} : memref<328x8xbf16, #tpu.memory_space<vmem>>, vector<21x8xbf16>,
    %42 = arith.truncf %37 : vector<288x8xf32> to vector<288x8xbf16>
    %c19 = arith.constant 19 : index
    %c0_24 = arith.constant 0 : index
    %43 = vector.load %arg19[%c19, %c0_24] : memref<328x8xbf16, #tpu.memory_space<vmem>>, vector<288x8xbf16>
    tpu.vector_store %arg19[%c19, %c0_24], %42 {strides = array<i32>} : memref<328x8xbf16, #tpu.memory_space<vmem>>, vector<288x8xbf16>,
    %cst_25 = arith.constant 0.000000e+00 : f32
    %44 = vector.broadcast %cst_25 : f32 to vector<288x16xf32>
    %c0_26 = arith.constant 0 : index
    %c0_27 = arith.constant 0 : index
    %45 = vector.load %arg19[%c0_26, %c0_27] : memref<328x8xbf16, #tpu.memory_space<vmem>>, vector<288x8xbf16>
    %c0_28 = arith.constant 0 : index
    %c0_29 = arith.constant 0 : index
    %c0_30 = arith.constant 0 : index
    %c0_31 = arith.constant 0 : index
    %46 = vector.load %arg7[%c0_28, %c0_29, %c0_30, %c0_31] : memref<3x3x8x16xbf16, #tpu.memory_space<vmem>>, vector<1x1x8x16xbf16>
    %47 = vector.shape_cast %46 : vector<1x1x8x16xbf16> to vector<8x16xbf16>
    %cst_32 = arith.constant dense<0.000000e+00> : vector<288x16xf32>
    %48 = tpu.matmul %45, %47, %cst_32 {dimension_numbers = #tpu.dot_dimension_numbers<[1], [0], [0], [1], [0, 0, 1, 1], [], []>} : vector<288x8xbf16>, vector<8x16xbf16>, vector<288x16xf32> -> vector<288x16xf32>
    %49 = arith.addf %44, %48 : vector<288x16xf32>
    %c1 = arith.constant 1 : index
    %c0_33 = arith.constant 0 : index
    %50 = vector.load %arg19[%c1, %c0_33] : memref<328x8xbf16, #tpu.memory_space<vmem>>, vector<288x8xbf16>
    %c0_34 = arith.constant 0 : index
    %c1_35 = arith.constant 1 : index
    %c0_36 = arith.constant 0 : index
    %c0_37 = arith.constant 0 : index
    %51 = vector.load %arg7[%c0_34, %c1_35, %c0_36, %c0_37] : memref<3x3x8x16xbf16, #tpu.memory_space<vmem>>, vector<1x1x8x16xbf16>
    %52 = vector.shape_cast %51 : vector<1x1x8x16xbf16> to vector<8x16xbf16>
    %cst_38 = arith.constant dense<0.000000e+00> : vector<288x16xf32>
    %53 = tpu.matmul %50, %52, %cst_38 {dimension_numbers = #tpu.dot_dimension_numbers<[1], [0], [0], [1], [0, 0, 1, 1], [], []>} : vector<288x8xbf16>, vector<8x16xbf16>, vector<288x16xf32> -> vector<288x16xf32>
    %54 = arith.addf %49, %53 : vector<288x16xf32>
    %c2 = arith.constant 2 : index
    %c0_39 = arith.constant 0 : index
    %55 = vector.load %arg19[%c2, %c0_39] : memref<328x8xbf16, #tpu.memory_space<vmem>>, vector<288x8xbf16>
    %c0_40 = arith.constant 0 : index
    %c2_41 = arith.constant 2 : index
    %c0_42 = arith.constant 0 : index
    %c0_43 = arith.constant 0 : index
    %56 = vector.load %arg7[%c0_40, %c2_41, %c0_42, %c0_43] : memref<3x3x8x16xbf16, #tpu.memory_space<vmem>>, vector<1x1x8x16xbf16>
    %57 = vector.shape_cast %56 : vector<1x1x8x16xbf16> to vector<8x16xbf16>
    %cst_44 = arith.constant dense<0.000000e+00> : vector<288x16xf32>
    %58 = tpu.matmul %55, %57, %cst_44 {dimension_numbers = #tpu.dot_dimension_numbers<[1], [0], [0], [1], [0, 0, 1, 1], [], []>} : vector<288x8xbf16>, vector<8x16xbf16>, vector<288x16xf32> -> vector<288x16xf32>
    %59 = arith.addf %54, %58 : vector<288x16xf32>
    %c18 = arith.constant 18 : index
    %c0_45 = arith.constant 0 : index
    %60 = vector.load %arg19[%c18, %c0_45] : memref<328x8xbf16, #tpu.memory_space<vmem>>, vector<288x8xbf16>
    %c1_46 = arith.constant 1 : index
    %c0_47 = arith.constant 0 : index
    %c0_48 = arith.constant 0 : index
    %c0_49 = arith.constant 0 : index
    %61 = vector.load %arg7[%c1_46, %c0_47, %c0_48, %c0_49] : memref<3x3x8x16xbf16, #tpu.memory_space<vmem>>, vector<1x1x8x16xbf16>
    %62 = vector.shape_cast %61 : vector<1x1x8x16xbf16> to vector<8x16xbf16>
    %cst_50 = arith.constant dense<0.000000e+00> : vector<288x16xf32>
    %63 = tpu.matmul %60, %62, %cst_50 {dimension_numbers = #tpu.dot_dimension_numbers<[1], [0], [0], [1], [0, 0, 1, 1], [], []>} : vector<288x8xbf16>, vector<8x16xbf16>, vector<288x16xf32> -> vector<288x16xf32>
    %64 = arith.addf %59, %63 : vector<288x16xf32>
    %c19_51 = arith.constant 19 : index
    %c0_52 = arith.constant 0 : index
    %65 = vector.load %arg19[%c19_51, %c0_52] : memref<328x8xbf16, #tpu.memory_space<vmem>>, vector<288x8xbf16>
    %c1_53 = arith.constant 1 : index
    %c1_54 = arith.constant 1 : index
    %c0_55 = arith.constant 0 : index
    %c0_56 = arith.constant 0 : index
    %66 = vector.load %arg7[%c1_53, %c1_54, %c0_55, %c0_56] : memref<3x3x8x16xbf16, #tpu.memory_space<vmem>>, vector<1x1x8x16xbf16>
    %67 = vector.shape_cast %66 : vector<1x1x8x16xbf16> to vector<8x16xbf16>
    %cst_57 = arith.constant dense<0.000000e+00> : vector<288x16xf32>
    %68 = tpu.matmul %65, %67, %cst_57 {dimension_numbers = #tpu.dot_dimension_numbers<[1], [0], [0], [1], [0, 0, 1, 1], [], []>} : vector<288x8xbf16>, vector<8x16xbf16>, vector<288x16xf32> -> vector<288x16xf32>
    %69 = arith.addf %64, %68 : vector<288x16xf32>
    %c20 = arith.constant 20 : index
    %c0_58 = arith.constant 0 : index
    %70 = vector.load %arg19[%c20, %c0_58] : memref<328x8xbf16, #tpu.memory_space<vmem>>, vector<288x8xbf16>
    %c1_59 = arith.constant 1 : index
    %c2_60 = arith.constant 2 : index
    %c0_61 = arith.constant 0 : index
    %c0_62 = arith.constant 0 : index
    %71 = vector.load %arg7[%c1_59, %c2_60, %c0_61, %c0_62] : memref<3x3x8x16xbf16, #tpu.memory_space<vmem>>, vector<1x1x8x16xbf16>
    %72 = vector.shape_cast %71 : vector<1x1x8x16xbf16> to vector<8x16xbf16>
    %cst_63 = arith.constant dense<0.000000e+00> : vector<288x16xf32>
    %73 = tpu.matmul %70, %72, %cst_63 {dimension_numbers = #tpu.dot_dimension_numbers<[1], [0], [0], [1], [0, 0, 1, 1], [], []>} : vector<288x8xbf16>, vector<8x16xbf16>, vector<288x16xf32> -> vector<288x16xf32>
    %74 = arith.addf %69, %73 : vector<288x16xf32>
    %c36 = arith.constant 36 : index
    %c0_64 = arith.constant 0 : index
    %75 = vector.load %arg19[%c36, %c0_64] : memref<328x8xbf16, #tpu.memory_space<vmem>>, vector<288x8xbf16>
    %c2_65 = arith.constant 2 : index
    %c0_66 = arith.constant 0 : index
    %c0_67 = arith.constant 0 : index
    %c0_68 = arith.constant 0 : index
    %76 = vector.load %arg7[%c2_65, %c0_66, %c0_67, %c0_68] : memref<3x3x8x16xbf16, #tpu.memory_space<vmem>>, vector<1x1x8x16xbf16>
    %77 = vector.shape_cast %76 : vector<1x1x8x16xbf16> to vector<8x16xbf16>
    %cst_69 = arith.constant dense<0.000000e+00> : vector<288x16xf32>
    %78 = tpu.matmul %75, %77, %cst_69 {dimension_numbers = #tpu.dot_dimension_numbers<[1], [0], [0], [1], [0, 0, 1, 1], [], []>} : vector<288x8xbf16>, vector<8x16xbf16>, vector<288x16xf32> -> vector<288x16xf32>
    %79 = arith.addf %74, %78 : vector<288x16xf32>
    %c37 = arith.constant 37 : index
    %c0_70 = arith.constant 0 : index
    %80 = vector.load %arg19[%c37, %c0_70] : memref<328x8xbf16, #tpu.memory_space<vmem>>, vector<288x8xbf16>
    %c2_71 = arith.constant 2 : index
    %c1_72 = arith.constant 1 : index
    %c0_73 = arith.constant 0 : index
    %c0_74 = arith.constant 0 : index
    %81 = vector.load %arg7[%c2_71, %c1_72, %c0_73, %c0_74] : memref<3x3x8x16xbf16, #tpu.memory_space<vmem>>, vector<1x1x8x16xbf16>
    %82 = vector.shape_cast %81 : vector<1x1x8x16xbf16> to vector<8x16xbf16>
    %cst_75 = arith.constant dense<0.000000e+00> : vector<288x16xf32>
    %83 = tpu.matmul %80, %82, %cst_75 {dimension_numbers = #tpu.dot_dimension_numbers<[1], [0], [0], [1], [0, 0, 1, 1], [], []>} : vector<288x8xbf16>, vector<8x16xbf16>, vector<288x16xf32> -> vector<288x16xf32>
    %84 = arith.addf %79, %83 : vector<288x16xf32>
    %c38 = arith.constant 38 : index
    %c0_76 = arith.constant 0 : index
    %85 = vector.load %arg19[%c38, %c0_76] : memref<328x8xbf16, #tpu.memory_space<vmem>>, vector<288x8xbf16>
    %c2_77 = arith.constant 2 : index
    %c2_78 = arith.constant 2 : index
    %c0_79 = arith.constant 0 : index
    %c0_80 = arith.constant 0 : index
    %86 = vector.load %arg7[%c2_77, %c2_78, %c0_79, %c0_80] : memref<3x3x8x16xbf16, #tpu.memory_space<vmem>>, vector<1x1x8x16xbf16>
    %87 = vector.shape_cast %86 : vector<1x1x8x16xbf16> to vector<8x16xbf16>
    %cst_81 = arith.constant dense<0.000000e+00> : vector<288x16xf32>
    %88 = tpu.matmul %85, %87, %cst_81 {dimension_numbers = #tpu.dot_dimension_numbers<[1], [0], [0], [1], [0, 0, 1, 1], [], []>} : vector<288x8xbf16>, vector<8x16xbf16>, vector<288x16xf32> -> vector<288x16xf32>
    %89 = arith.addf %84, %88 : vector<288x16xf32>
    %c0_82 = arith.constant 0 : index
    %c0_83 = arith.constant 0 : index
    %90 = vector.load %arg8[%c0_82, %c0_83] : memref<1x16xf32, #tpu.memory_space<vmem>>, vector<1x16xf32>
    %91 = vector.broadcast %90 : vector<1x16xf32> to vector<288x16xf32>
    %92 = arith.addf %89, %91 : vector<288x16xf32>
    %c0_84 = arith.constant 0 : index
    %c0_85 = arith.constant 0 : index
    %c0_86 = arith.constant 0 : index
    %93 = vector.load %arg2[%c0_84, %c0_85, %c0_86] : memref<1x1x32xf32, #tpu.memory_space<vmem>>, vector<1x1x32xf32>
    %94 = vector.shape_cast %93 : vector<1x1x32xf32> to vector<1x32xf32>
    %cst_87 = arith.constant 0.000000e+00 : f32
    %95 = vector.broadcast %cst_87 : f32 to vector<1x32xf32>
    %96 = arith.subf %95, %94 : vector<1x32xf32>
    %97 = math.exp %96 : vector<1x32xf32>
    %cst_88 = arith.constant 1.000000e+00 : f32
    %98 = vector.broadcast %cst_88 : f32 to vector<1x32xf32>
    %99 = arith.addf %98, %97 : vector<1x32xf32>
    %100 = tpu.reciprocal %99 {approx = true} : vector<1x32xf32> -> vector<1x32xf32>
    %101 = arith.mulf %94, %100 : vector<1x32xf32>
    %c0_89 = arith.constant 0 : index
    %c0_90 = arith.constant 0 : index
    %102 = vector.load %arg9[%c0_89, %c0_90] : memref<32x16xf32, #tpu.memory_space<vmem>>, vector<32x16xf32>
    %cst_91 = arith.constant dense<0.000000e+00> : vector<1x16xf32>
    %103 = tpu.matmul %101, %102, %cst_91 {dimension_numbers = #tpu.dot_dimension_numbers<[1], [0], [0], [1], [0, 0, 1, 1], [], []>} : vector<1x32xf32>, vector<32x16xf32>, vector<1x16xf32> -> vector<1x16xf32>
    %c0_92 = arith.constant 0 : index
    %c0_93 = arith.constant 0 : index
    %104 = vector.load %arg10[%c0_92, %c0_93] : memref<1x16xf32, #tpu.memory_space<vmem>>, vector<1x16xf32>
    %105 = arith.addf %103, %104 : vector<1x16xf32>
    %106 = vector.broadcast %105 : vector<1x16xf32> to vector<288x16xf32>
    %107 = arith.addf %92, %106 : vector<288x16xf32>
    %108 = vector.broadcast %0 : vector<288x1xf32> to vector<288x16xf32>
    %109 = arith.mulf %107, %108 : vector<288x16xf32>
    %c0_94 = arith.constant 0 : index
    %c0_95 = arith.constant 0 : index
    %110 = vector.load %arg12[%c0_94, %c0_95] : memref<1x16xf32, #tpu.memory_space<vmem>>, vector<1x16xf32>
    %c0_96 = arith.constant 0 : index
    %c0_97 = arith.constant 0 : index
    %111 = vector.load %arg13[%c0_96, %c0_97] : memref<1x16xf32, #tpu.memory_space<vmem>>, vector<1x16xf32>
    %cst_98 = arith.constant dense<0.000000e+00> : vector<16xf32>
    %112 = vector.multi_reduction <add>, %109, %cst_98 [0] : vector<288x16xf32> to vector<16xf32>
    %113 = vector.shape_cast %112 : vector<16xf32> to vector<1x16xf32>
    %c0_99 = arith.constant 0 : index
    %c0_100 = arith.constant 0 : index
    %114 = vector.load %arg11[%c0_99, %c0_100] : memref<16x16xf32, #tpu.memory_space<vmem>>, vector<16x16xf32>
    %cst_101 = arith.constant dense<0.000000e+00> : vector<1x16xf32>
    %115 = tpu.matmul %113, %114, %cst_101 {dimension_numbers = #tpu.dot_dimension_numbers<[1], [0], [0], [1], [0, 0, 1, 1], [], []>} : vector<1x16xf32>, vector<16x16xf32>, vector<1x16xf32> -> vector<1x16xf32>
    %116 = arith.mulf %109, %109 : vector<288x16xf32>
    %cst_102 = arith.constant dense<0.000000e+00> : vector<16xf32>
    %117 = vector.multi_reduction <add>, %116, %cst_102 [0] : vector<288x16xf32> to vector<16xf32>
    %118 = vector.shape_cast %117 : vector<16xf32> to vector<1x16xf32>
    %c0_103 = arith.constant 0 : index
    %c0_104 = arith.constant 0 : index
    %119 = vector.load %arg11[%c0_103, %c0_104] : memref<16x16xf32, #tpu.memory_space<vmem>>, vector<16x16xf32>
    %cst_105 = arith.constant dense<0.000000e+00> : vector<1x16xf32>
    %120 = tpu.matmul %118, %119, %cst_105 {dimension_numbers = #tpu.dot_dimension_numbers<[1], [0], [0], [1], [0, 0, 1, 1], [], []>} : vector<1x16xf32>, vector<16x16xf32>, vector<1x16xf32> -> vector<1x16xf32>
    %121 = arith.mulf %115, %115 : vector<1x16xf32>
    %122 = arith.subf %120, %121 : vector<1x16xf32>
    %cst_106 = arith.constant 0.000000e+00 : f32
    %123 = vector.broadcast %cst_106 : f32 to vector<1x16xf32>
    %124 = arith.maximumf %122, %123 : vector<1x16xf32>
    %125 = vector.broadcast %115 : vector<1x16xf32> to vector<288x16xf32>
    %126 = arith.subf %109, %125 : vector<288x16xf32>
    %cst_107 = arith.constant 9.99999974E-6 : f32
    %127 = vector.broadcast %cst_107 : f32 to vector<1x16xf32>
    %128 = arith.addf %124, %127 : vector<1x16xf32>
    %129 = math.rsqrt %128 : vector<1x16xf32>
    %130 = vector.broadcast %129 : vector<1x16xf32> to vector<288x16xf32>
    %131 = arith.mulf %126, %130 : vector<288x16xf32>
    %132 = vector.broadcast %110 : vector<1x16xf32> to vector<288x16xf32>
    %133 = arith.mulf %131, %132 : vector<288x16xf32>
    %134 = vector.broadcast %111 : vector<1x16xf32> to vector<288x16xf32>
    %135 = arith.addf %133, %134 : vector<288x16xf32>
    %cst_108 = arith.constant 0.000000e+00 : f32
    %136 = vector.broadcast %cst_108 : f32 to vector<288x16xf32>
    %137 = arith.subf %136, %135 : vector<288x16xf32>
    %138 = math.exp %137 : vector<288x16xf32>
    %cst_109 = arith.constant 1.000000e+00 : f32
    %139 = vector.broadcast %cst_109 : f32 to vector<288x16xf32>
    %140 = arith.addf %139, %138 : vector<288x16xf32>
    %141 = tpu.reciprocal %140 {approx = true} : vector<288x16xf32> -> vector<288x16xf32>
    %142 = arith.mulf %135, %141 : vector<288x16xf32>
    %143 = vector.broadcast %0 : vector<288x1xf32> to vector<288x16xf32>
    %144 = arith.mulf %142, %143 : vector<288x16xf32>
    %cst_110 = arith.constant 0.000000e+00 : bf16
    %145 = vector.broadcast %cst_110 : bf16 to vector<19x16xbf16>
    %c0_111 = arith.constant 0 : index
    %c0_112 = arith.constant 0 : index
    %146 = vector.load %arg20[%c0_111, %c0_112] : memref<328x16xbf16, #tpu.memory_space<vmem>>, vector<19x16xbf16>
    tpu.vector_store %arg20[%c0_111, %c0_112], %145 {strides = array<i32>} : memref<328x16xbf16, #tpu.memory_space<vmem>>, vector<19x16xbf16>,
    %cst_113 = arith.constant 0.000000e+00 : bf16
    %147 = vector.broadcast %cst_113 : bf16 to vector<21x16xbf16>
    %c307_114 = arith.constant 307 : index
    %c0_115 = arith.constant 0 : index
    %148 = vector.load %arg20[%c307_114, %c0_115] : memref<328x16xbf16, #tpu.memory_space<vmem>>, vector<21x16xbf16>
    tpu.vector_store %arg20[%c307_114, %c0_115], %147 {strides = array<i32>} : memref<328x16xbf16, #tpu.memory_space<vmem>>, vector<21x16xbf16>,
    %149 = arith.truncf %144 : vector<288x16xf32> to vector<288x16xbf16>
    %c19_116 = arith.constant 19 : index
    %c0_117 = arith.constant 0 : index
    %150 = vector.load %arg20[%c19_116, %c0_117] : memref<328x16xbf16, #tpu.memory_space<vmem>>, vector<288x16xbf16>
    tpu.vector_store %arg20[%c19_116, %c0_117], %149 {strides = array<i32>} : memref<328x16xbf16, #tpu.memory_space<vmem>>, vector<288x16xbf16>,
    %cst_118 = arith.constant 0.000000e+00 : f32
    %151 = vector.broadcast %cst_118 : f32 to vector<288x16xf32>
    %c0_119 = arith.constant 0 : index
    %c0_120 = arith.constant 0 : index
    %152 = vector.load %arg20[%c0_119, %c0_120] : memref<328x16xbf16, #tpu.memory_space<vmem>>, vector<288x16xbf16>
    %c0_121 = arith.constant 0 : index
    %c0_122 = arith.constant 0 : index
    %c0_123 = arith.constant 0 : index
    %c0_124 = arith.constant 0 : index
    %153 = vector.load %arg14[%c0_121, %c0_122, %c0_123, %c0_124] : memref<3x3x16x16xbf16, #tpu.memory_space<vmem>>, vector<1x1x16x16xbf16>
    %154 = vector.shape_cast %153 : vector<1x1x16x16xbf16> to vector<16x16xbf16>
    %cst_125 = arith.constant dense<0.000000e+00> : vector<288x16xf32>
    %155 = tpu.matmul %152, %154, %cst_125 {dimension_numbers = #tpu.dot_dimension_numbers<[1], [0], [0], [1], [0, 0, 1, 1], [], []>} : vector<288x16xbf16>, vector<16x16xbf16>, vector<288x16xf32> -> vector<288x16xf32>
    %156 = arith.addf %151, %155 : vector<288x16xf32>
    %c1_126 = arith.constant 1 : index
    %c0_127 = arith.constant 0 : index
    %157 = vector.load %arg20[%c1_126, %c0_127] : memref<328x16xbf16, #tpu.memory_space<vmem>>, vector<288x16xbf16>
    %c0_128 = arith.constant 0 : index
    %c1_129 = arith.constant 1 : index
    %c0_130 = arith.constant 0 : index
    %c0_131 = arith.constant 0 : index
    %158 = vector.load %arg14[%c0_128, %c1_129, %c0_130, %c0_131] : memref<3x3x16x16xbf16, #tpu.memory_space<vmem>>, vector<1x1x16x16xbf16>
    %159 = vector.shape_cast %158 : vector<1x1x16x16xbf16> to vector<16x16xbf16>
    %cst_132 = arith.constant dense<0.000000e+00> : vector<288x16xf32>
    %160 = tpu.matmul %157, %159, %cst_132 {dimension_numbers = #tpu.dot_dimension_numbers<[1], [0], [0], [1], [0, 0, 1, 1], [], []>} : vector<288x16xbf16>, vector<16x16xbf16>, vector<288x16xf32> -> vector<288x16xf32>
    %161 = arith.addf %156, %160 : vector<288x16xf32>
    %c2_133 = arith.constant 2 : index
    %c0_134 = arith.constant 0 : index
    %162 = vector.load %arg20[%c2_133, %c0_134] : memref<328x16xbf16, #tpu.memory_space<vmem>>, vector<288x16xbf16>
    %c0_135 = arith.constant 0 : index
    %c2_136 = arith.constant 2 : index
    %c0_137 = arith.constant 0 : index
    %c0_138 = arith.constant 0 : index
    %163 = vector.load %arg14[%c0_135, %c2_136, %c0_137, %c0_138] : memref<3x3x16x16xbf16, #tpu.memory_space<vmem>>, vector<1x1x16x16xbf16>
    %164 = vector.shape_cast %163 : vector<1x1x16x16xbf16> to vector<16x16xbf16>
    %cst_139 = arith.constant dense<0.000000e+00> : vector<288x16xf32>
    %165 = tpu.matmul %162, %164, %cst_139 {dimension_numbers = #tpu.dot_dimension_numbers<[1], [0], [0], [1], [0, 0, 1, 1], [], []>} : vector<288x16xbf16>, vector<16x16xbf16>, vector<288x16xf32> -> vector<288x16xf32>
    %166 = arith.addf %161, %165 : vector<288x16xf32>
    %c18_140 = arith.constant 18 : index
    %c0_141 = arith.constant 0 : index
    %167 = vector.load %arg20[%c18_140, %c0_141] : memref<328x16xbf16, #tpu.memory_space<vmem>>, vector<288x16xbf16>
    %c1_142 = arith.constant 1 : index
    %c0_143 = arith.constant 0 : index
    %c0_144 = arith.constant 0 : index
    %c0_145 = arith.constant 0 : index
    %168 = vector.load %arg14[%c1_142, %c0_143, %c0_144, %c0_145] : memref<3x3x16x16xbf16, #tpu.memory_space<vmem>>, vector<1x1x16x16xbf16>
    %169 = vector.shape_cast %168 : vector<1x1x16x16xbf16> to vector<16x16xbf16>
    %cst_146 = arith.constant dense<0.000000e+00> : vector<288x16xf32>
    %170 = tpu.matmul %167, %169, %cst_146 {dimension_numbers = #tpu.dot_dimension_numbers<[1], [0], [0], [1], [0, 0, 1, 1], [], []>} : vector<288x16xbf16>, vector<16x16xbf16>, vector<288x16xf32> -> vector<288x16xf32>
    %171 = arith.addf %166, %170 : vector<288x16xf32>
    %c19_147 = arith.constant 19 : index
    %c0_148 = arith.constant 0 : index
    %172 = vector.load %arg20[%c19_147, %c0_148] : memref<328x16xbf16, #tpu.memory_space<vmem>>, vector<288x16xbf16>
    %c1_149 = arith.constant 1 : index
    %c1_150 = arith.constant 1 : index
    %c0_151 = arith.constant 0 : index
    %c0_152 = arith.constant 0 : index
    %173 = vector.load %arg14[%c1_149, %c1_150, %c0_151, %c0_152] : memref<3x3x16x16xbf16, #tpu.memory_space<vmem>>, vector<1x1x16x16xbf16>
    %174 = vector.shape_cast %173 : vector<1x1x16x16xbf16> to vector<16x16xbf16>
    %cst_153 = arith.constant dense<0.000000e+00> : vector<288x16xf32>
    %175 = tpu.matmul %172, %174, %cst_153 {dimension_numbers = #tpu.dot_dimension_numbers<[1], [0], [0], [1], [0, 0, 1, 1], [], []>} : vector<288x16xbf16>, vector<16x16xbf16>, vector<288x16xf32> -> vector<288x16xf32>
    %176 = arith.addf %171, %175 : vector<288x16xf32>
    %c20_154 = arith.constant 20 : index
    %c0_155 = arith.constant 0 : index
    %177 = vector.load %arg20[%c20_154, %c0_155] : memref<328x16xbf16, #tpu.memory_space<vmem>>, vector<288x16xbf16>
    %c1_156 = arith.constant 1 : index
    %c2_157 = arith.constant 2 : index
    %c0_158 = arith.constant 0 : index
    %c0_159 = arith.constant 0 : index
    %178 = vector.load %arg14[%c1_156, %c2_157, %c0_158, %c0_159] : memref<3x3x16x16xbf16, #tpu.memory_space<vmem>>, vector<1x1x16x16xbf16>
    %179 = vector.shape_cast %178 : vector<1x1x16x16xbf16> to vector<16x16xbf16>
    %cst_160 = arith.constant dense<0.000000e+00> : vector<288x16xf32>
    %180 = tpu.matmul %177, %179, %cst_160 {dimension_numbers = #tpu.dot_dimension_numbers<[1], [0], [0], [1], [0, 0, 1, 1], [], []>} : vector<288x16xbf16>, vector<16x16xbf16>, vector<288x16xf32> -> vector<288x16xf32>
    %181 = arith.addf %176, %180 : vector<288x16xf32>
    %c36_161 = arith.constant 36 : index
    %c0_162 = arith.constant 0 : index
    %182 = vector.load %arg20[%c36_161, %c0_162] : memref<328x16xbf16, #tpu.memory_space<vmem>>, vector<288x16xbf16>
    %c2_163 = arith.constant 2 : index
    %c0_164 = arith.constant 0 : index
    %c0_165 = arith.constant 0 : index
    %c0_166 = arith.constant 0 : index
    %183 = vector.load %arg14[%c2_163, %c0_164, %c0_165, %c0_166] : memref<3x3x16x16xbf16, #tpu.memory_space<vmem>>, vector<1x1x16x16xbf16>
    %184 = vector.shape_cast %183 : vector<1x1x16x16xbf16> to vector<16x16xbf16>
    %cst_167 = arith.constant dense<0.000000e+00> : vector<288x16xf32>
    %185 = tpu.matmul %182, %184, %cst_167 {dimension_numbers = #tpu.dot_dimension_numbers<[1], [0], [0], [1], [0, 0, 1, 1], [], []>} : vector<288x16xbf16>, vector<16x16xbf16>, vector<288x16xf32> -> vector<288x16xf32>
    %186 = arith.addf %181, %185 : vector<288x16xf32>
    %c37_168 = arith.constant 37 : index
    %c0_169 = arith.constant 0 : index
    %187 = vector.load %arg20[%c37_168, %c0_169] : memref<328x16xbf16, #tpu.memory_space<vmem>>, vector<288x16xbf16>
    %c2_170 = arith.constant 2 : index
    %c1_171 = arith.constant 1 : index
    %c0_172 = arith.constant 0 : index
    %c0_173 = arith.constant 0 : index
    %188 = vector.load %arg14[%c2_170, %c1_171, %c0_172, %c0_173] : memref<3x3x16x16xbf16, #tpu.memory_space<vmem>>, vector<1x1x16x16xbf16>
    %189 = vector.shape_cast %188 : vector<1x1x16x16xbf16> to vector<16x16xbf16>
    %cst_174 = arith.constant dense<0.000000e+00> : vector<288x16xf32>
    %190 = tpu.matmul %187, %189, %cst_174 {dimension_numbers = #tpu.dot_dimension_numbers<[1], [0], [0], [1], [0, 0, 1, 1], [], []>} : vector<288x16xbf16>, vector<16x16xbf16>, vector<288x16xf32> -> vector<288x16xf32>
    %191 = arith.addf %186, %190 : vector<288x16xf32>
    %c38_175 = arith.constant 38 : index
    %c0_176 = arith.constant 0 : index
    %192 = vector.load %arg20[%c38_175, %c0_176] : memref<328x16xbf16, #tpu.memory_space<vmem>>, vector<288x16xbf16>
    %c2_177 = arith.constant 2 : index
    %c2_178 = arith.constant 2 : index
    %c0_179 = arith.constant 0 : index
    %c0_180 = arith.constant 0 : index
    %193 = vector.load %arg14[%c2_177, %c2_178, %c0_179, %c0_180] : memref<3x3x16x16xbf16, #tpu.memory_space<vmem>>, vector<1x1x16x16xbf16>
    %194 = vector.shape_cast %193 : vector<1x1x16x16xbf16> to vector<16x16xbf16>
    %cst_181 = arith.constant dense<0.000000e+00> : vector<288x16xf32>
    %195 = tpu.matmul %192, %194, %cst_181 {dimension_numbers = #tpu.dot_dimension_numbers<[1], [0], [0], [1], [0, 0, 1, 1], [], []>} : vector<288x16xbf16>, vector<16x16xbf16>, vector<288x16xf32> -> vector<288x16xf32>
    %196 = arith.addf %191, %195 : vector<288x16xf32>
    %c0_182 = arith.constant 0 : index
    %c0_183 = arith.constant 0 : index
    %197 = vector.load %arg15[%c0_182, %c0_183] : memref<1x16xf32, #tpu.memory_space<vmem>>, vector<1x16xf32>
    %198 = vector.broadcast %197 : vector<1x16xf32> to vector<288x16xf32>
    %199 = arith.addf %196, %198 : vector<288x16xf32>
    %c0_184 = arith.constant 0 : index
    %c0_185 = arith.constant 0 : index
    %c0_186 = arith.constant 0 : index
    %200 = vector.load %arg1[%c0_184, %c0_185, %c0_186] : memref<1x288x8xf32, #tpu.memory_space<vmem>>, vector<1x288x8xf32>
    %201 = vector.shape_cast %200 : vector<1x288x8xf32> to vector<288x8xf32>
    %202 = arith.truncf %201 : vector<288x8xf32> to vector<288x8xbf16>
    %c0_187 = arith.constant 0 : index
    %c0_188 = arith.constant 0 : index
    %203 = vector.load %arg16[%c0_187, %c0_188] : memref<8x16xbf16, #tpu.memory_space<vmem>>, vector<8x16xbf16>
    %cst_189 = arith.constant dense<0.000000e+00> : vector<288x16xf32>
    %204 = tpu.matmul %202, %203, %cst_189 {dimension_numbers = #tpu.dot_dimension_numbers<[1], [0], [0], [1], [0, 0, 1, 1], [], []>} : vector<288x8xbf16>, vector<8x16xbf16>, vector<288x16xf32> -> vector<288x16xf32>
    %c0_190 = arith.constant 0 : index
    %c0_191 = arith.constant 0 : index
    %205 = vector.load %arg17[%c0_190, %c0_191] : memref<1x16xf32, #tpu.memory_space<vmem>>, vector<1x16xf32>
    %206 = vector.broadcast %205 : vector<1x16xf32> to vector<288x16xf32>
    %207 = arith.addf %204, %206 : vector<288x16xf32>
    %208 = arith.addf %199, %207 : vector<288x16xf32>
    %cst_192 = arith.constant 1.000000e+00 : f32
    %209 = vector.broadcast %cst_192 : f32 to vector<288x16xf32>
    %210 = arith.mulf %208, %209 : vector<288x16xf32>
    %c0_193 = arith.constant 0 : index
    %c0_194 = arith.constant 0 : index
    %c0_195 = arith.constant 0 : index
    %211 = vector.load %arg18[%c0_193, %c0_194, %c0_195] : memref<1x288x16xf32, #tpu.memory_space<vmem>>, vector<1x288x16xf32>
    %212 = vector.shape_cast %211 : vector<1x288x16xf32> to vector<288x16xf32>
    %213 = vector.shape_cast %210 : vector<288x16xf32> to vector<1x288x16xf32>
    tpu.vector_store %arg18[%c0_193, %c0_194, %c0_195], %213 {strides = array<i32>} : memref<1x288x16xf32, #tpu.memory_space<vmem>>, vector<1x288x16xf32>,
    return
  }
  func.func @transform_0(%arg0: i32) -> (i32, i32, i32) {
    %c0_i32 = arith.constant 0 : i32
    %c0_i32_0 = arith.constant 0 : i32
    %c0_i32_1 = arith.constant 0 : i32
    return %arg0, %c0_i32, %c0_i32_0 : i32, i32, i32
  }
  func.func @transform_1(%arg0: i32) -> (i32, i32, i32) {
    %c0_i32 = arith.constant 0 : i32
    %c0_i32_0 = arith.constant 0 : i32
    %c0_i32_1 = arith.constant 0 : i32
    return %arg0, %c0_i32, %c0_i32_0 : i32, i32, i32
  }
  func.func @transform_2(%arg0: i32) -> (i32, i32) {
    %c0_i32 = arith.constant 0 : i32
    %c0_i32_0 = arith.constant 0 : i32
    %c0_i32_1 = arith.constant 0 : i32
    return %c0_i32, %c0_i32_0 : i32, i32
  }
  func.func @transform_3(%arg0: i32) -> (i32, i32) {
    %c0_i32 = arith.constant 0 : i32
    %c0_i32_0 = arith.constant 0 : i32
    %c0_i32_1 = arith.constant 0 : i32
    return %c0_i32, %c0_i32_0 : i32, i32
  }
  func.func @transform_4(%arg0: i32) -> (i32, i32) {
    %c0_i32 = arith.constant 0 : i32
    %c0_i32_0 = arith.constant 0 : i32
    %c0_i32_1 = arith.constant 0 : i32
    return %c0_i32, %c0_i32_0 : i32, i32
  }
  func.func @transform_5(%arg0: i32) -> (i32, i32) {
    %c0_i32 = arith.constant 0 : i32
    %c0_i32_0 = arith.constant 0 : i32
    %c0_i32_1 = arith.constant 0 : i32
    return %c0_i32, %c0_i32_0 : i32, i32
  }
  func.func @transform_6(%arg0: i32) -> (i32, i32, i32, i32) {
    %c0_i32 = arith.constant 0 : i32
    %c0_i32_0 = arith.constant 0 : i32
    %c0_i32_1 = arith.constant 0 : i32
    %c0_i32_2 = arith.constant 0 : i32
    %c0_i32_3 = arith.constant 0 : i32
    return %c0_i32, %c0_i32_0, %c0_i32_1, %c0_i32_2 : i32, i32, i32, i32
  }
  func.func @transform_7(%arg0: i32) -> (i32, i32) {
    %c0_i32 = arith.constant 0 : i32
    %c0_i32_0 = arith.constant 0 : i32
    %c0_i32_1 = arith.constant 0 : i32
    return %c0_i32, %c0_i32_0 : i32, i32
  }
  func.func @transform_8(%arg0: i32) -> (i32, i32) {
    %c0_i32 = arith.constant 0 : i32
    %c0_i32_0 = arith.constant 0 : i32
    %c0_i32_1 = arith.constant 0 : i32
    return %c0_i32, %c0_i32_0 : i32, i32
  }
  func.func @transform_9(%arg0: i32) -> (i32, i32) {
    %c0_i32 = arith.constant 0 : i32
    %c0_i32_0 = arith.constant 0 : i32
    %c0_i32_1 = arith.constant 0 : i32
    return %c0_i32, %c0_i32_0 : i32, i32
  }
  func.func @transform_10(%arg0: i32) -> (i32, i32) {
    %c0_i32 = arith.constant 0 : i32
    %c0_i32_0 = arith.constant 0 : i32
    %c0_i32_1 = arith.constant 0 : i32
    return %c0_i32, %c0_i32_0 : i32, i32
  }
  func.func @transform_11(%arg0: i32) -> (i32, i32) {
    %c0_i32 = arith.constant 0 : i32
    %c0_i32_0 = arith.constant 0 : i32
    %c0_i32_1 = arith.constant 0 : i32
    return %c0_i32, %c0_i32_0 : i32, i32
  }
  func.func @transform_12(%arg0: i32) -> (i32, i32) {
    %c0_i32 = arith.constant 0 : i32
    %c0_i32_0 = arith.constant 0 : i32
    %c0_i32_1 = arith.constant 0 : i32
    return %c0_i32, %c0_i32_0 : i32, i32
  }
  func.func @transform_13(%arg0: i32) -> (i32, i32, i32, i32) {
    %c0_i32 = arith.constant 0 : i32
    %c0_i32_0 = arith.constant 0 : i32
    %c0_i32_1 = arith.constant 0 : i32
    %c0_i32_2 = arith.constant 0 : i32
    %c0_i32_3 = arith.constant 0 : i32
    return %c0_i32, %c0_i32_0, %c0_i32_1, %c0_i32_2 : i32, i32, i32, i32
  }
  func.func @transform_14(%arg0: i32) -> (i32, i32) {
    %c0_i32 = arith.constant 0 : i32
    %c0_i32_0 = arith.constant 0 : i32
    %c0_i32_1 = arith.constant 0 : i32
    return %c0_i32, %c0_i32_0 : i32, i32
  }
  func.func @transform_15(%arg0: i32) -> (i32, i32) {
    %c0_i32 = arith.constant 0 : i32
    %c0_i32_0 = arith.constant 0 : i32
    %c0_i32_1 = arith.constant 0 : i32
    return %c0_i32, %c0_i32_0 : i32, i32
  }
  func.func @transform_16(%arg0: i32) -> (i32, i32) {
    %c0_i32 = arith.constant 0 : i32
    %c0_i32_0 = arith.constant 0 : i32
    %c0_i32_1 = arith.constant 0 : i32
    return %c0_i32, %c0_i32_0 : i32, i32
  }
  func.func @transform_17(%arg0: i32) -> (i32, i32, i32) {
    %c0_i32 = arith.constant 0 : i32
    %c0_i32_0 = arith.constant 0 : i32
    %c0_i32_1 = arith.constant 0 : i32
    return %arg0, %c0_i32, %c0_i32_0 : i32, i32, i32
  }
}

</mosaic_0001>

<bundles_post_ra>
// kernel: tpu_custom_call.1
= control target key start
LH: loop header
LB: loop body
LE: loop exit
PB: predicated region body
PF: predicated region fallthrough
CT: control target
= control target key end

     0   :  { %s20127_s0 = inlined_call_operand.hbm [shape: f32[2,288,8], index: 0, kind: input, shape index: {}]   ;;  %s20128_s1 = inlined_call_operand.hbm [shape: f32[2,1,32], index: 1, kind: input, shape index: {}]   ;;  %s20129_s2 = inlined_call_operand.hbm [shape: f32[288,1], index: 2, kind: input, shape index: {}]   ;;  %s20130_s3 = inlined_call_operand.hbm [shape: f32[8,8], index: 3, kind: input, shape index: {}]   ;;  %s20131_s4 = inlined_call_operand.hbm [shape: f32[1,8], index: 4, kind: input, shape index: {}]   ;;  %s20132_s5 = inlined_call_operand.hbm [shape: f32[1,8], index: 5, kind: input, shape index: {}]   ;;  %s20133_s6 = inlined_call_operand.hbm [shape: bf16[3,3,8,16], index: 6, kind: input, shape index: {}]   ;;  %s20134_s7 = inlined_call_operand.hbm [shape: f32[1,16], index: 7, kind: input, shape index: {}]   ;;  %s20135_s8 = inlined_call_operand.hbm [shape: f32[32,16], index: 8, kind: input, shape index: {}]   ;;  %s20136_s9 = inlined_call_operand.hbm [shape: f32[1,16], index: 9, kind: input, shape index: {}]   ;;  %s20137_s10 = inlined_call_operand.hbm [shape: f32[16,16], index: 10, kind: input, shape index: {}]   ;;  %s20138_s11 = inlined_call_operand.hbm [shape: f32[1,16], index: 11, kind: input, shape index: {}]   ;;  %s20139_s12 = inlined_call_operand.hbm [shape: f32[1,16], index: 12, kind: input, shape index: {}]   ;;  %s20140_s13 = inlined_call_operand.hbm [shape: bf16[3,3,16,16], index: 13, kind: input, shape index: {}]   ;;  %s20141_s14 = inlined_call_operand.hbm [shape: f32[1,16], index: 14, kind: input, shape index: {}]   ;;  %s20142_s15 = inlined_call_operand.hbm [shape: bf16[8,16], index: 15, kind: input, shape index: {}]   ;;  %s20143_s16 = inlined_call_operand.hbm [shape: f32[1,16], index: 16, kind: input, shape index: {}]   ;;  %s20144_s17 = inlined_call_operand.hbm [shape: f32[2,288,16], index: 17, kind: output, shape index: {}]  }
   0x1   :  { %20296 = sst [smem:[#allocation157_spill]] %s20127_s0 }
   0x2   :  { %20297 = sst [smem:[#allocation158_spill]] %s20128_s1 }
   0x3   :  { %20298 = sst [smem:[#allocation159_spill]] %s20129_s2 }
   0x4   :  { %20299 = sst [smem:[#allocation160_spill]] %s20130_s3 }
   0x5   :  { %20300 = sst [smem:[#allocation161_spill]] %s20131_s4 }
   0x6   :  { %20301 = sst [smem:[#allocation162_spill]] %s20132_s5 }
   0x7   :  { %20302 = sst [smem:[#allocation163_spill]] %s20133_s6 }
   0x8   :  { %20303 = sst [smem:[#allocation164_spill]] %s20134_s7 }
   0x9   :  { %20304 = sst [smem:[#allocation165_spill]] %s20135_s8 }
   0xa   :  { %20305 = sst [smem:[#allocation166_spill]] %s20144_s17 }
   0xb   :  { %22 = vsyncpa [#allocation5], 0 }
   0xc   :  { %24 = vsyncpa [#allocation5 + $0x1], 0 }
   0xd   :  { %25 = vsyncpa [#allocation8], 0 }
   0xe   :  { %27 = vsyncpa [#allocation8 + $0x1], 0 }
   0xf   :  { %28 = vsyncpa [#allocation11], 0 }
  0x10   :  { %29 = vsyncpa [#allocation14], 0 }
  0x11   :  { %30 = vsyncpa [#allocation17], 0 }
  0x12   :  { %31 = vsyncpa [#allocation20], 0 }
  0x13   :  { %32 = vsyncpa [#allocation23], 0 }
  0x14   :  { %33 = vsyncpa [#allocation26], 0 }
  0x15   :  { %34 = vsyncpa [#allocation29], 0 }
  0x16   :  { %35 = vsyncpa [#allocation6], 0 }
  0x17   :  { %37 = vsyncpa [#allocation6 + $0x1], 0  ;;  %s15368_s24 = smov 0   ;;  %s15370_s25 = smov 0  }
  0x18   :  { %s15372_s26 = smov 0   ;;  %s15374_s27 = smov 0  }
  0x19 LB: > { %20306 = sst [smem:[#allocation43_spill]] %s15236_s24  ;;  %s15250_s28 = smov [#allocation9]   ;;  %s15248_s27 = sphi %s15374_s27, %s20847_s27   ;;  %s15244_s26 = sphi %s15372_s26, %s20846_s26   ;;  %s15240_s25 = sphi %s15370_s25, %s20845_s25   ;;  %s15236_s24 = sphi %s15368_s24, %s20844_s24  }
  0x1a   : > { %20307 = sst [smem:[#allocation44_spill]] %s15240_s25  ;;  %s453_s29 = sshll.u32 %s15250_s28, 4  ;;  %s15394_s29 = int_to_ptr.vmem [resolvable:$true] %s453_s29 }
  0x1b   : > { %20308 = sst [smem:[#allocation45_spill]] %s15244_s26  ;;  %s15389_s0 = sadd.s32 4294967295, %s15248_s27  }
  0x1c   : > { %20309 = sst [smem:[#allocation46_spill]] %s15248_s27  ;;  %p11487_p0 = scmp.ge.s32.totalorder %s15248_s27, 1 }
  0x1d   : > { %20310 = sst [smem:[#allocation47_spill]] %s15389_s0  ;;  %p20158_p1 = scmp.eq.s32.totalorder %s15389_s0, 0 }
  0x1e   : > { %p441_p2 = scmp.lt.s32.totalorder %s15248_s27, 3  ;;  %s15251_s18 = smov [#allocation10]  }
  0x1f   : > { %s467_s19 = sshll.u32 %s15251_s18, 4  ;;  %s15252_s20 = smov [#allocation13]   ;;  %s15409_s19 = int_to_ptr.vmem [resolvable:$true] %s467_s19 }
  0x20   : > { %p15396_p3 = pnand %p11487_p0, %p441_p2  ;;  %s489_s21 = sshll.u32 %s15252_s20, 4  ;;  %s15411_s21 = int_to_ptr.vmem [resolvable:$true] %s489_s21 }
  0x21   : > { %s20314_s2 = sld [smem:[#allocation159_spill]] }
  0x22   : > { %s20311_s30 = scalar_select %p15396_p3, 1, 0 }
  0x23   : > { %p14067_p5 = pneg %p15396_p3 }
  0x24   : > { %20312 = sst [smem:[#allocation48_spill]] %s20311_s30 }
  0x25   : > { %p15405_p6 = pnand %p14067_p5, %p20158_p1 }
  0x27   : > { %s14666_s28 = scalar_lea.hbm %s20314_s2, 4608  ;;  %p15421_p8 = pneg %p15405_p6 }
  0x28   : > { %p14667_p7 = scmp.ne.s32.totalorder %s20314_s2, %s14666_s28  ;;  %p14673_p11 = scmp.lt.u32.totalorder %s14666_s28, %s20314_s2 }
  0x2a   : > { %p14669_p9 = pnand %p15421_p8, %p14667_p7 }
  0x2c   : > { %p14670_p10 = pneg %p14669_p9 }
  0x2e   : > { %p14675_p12 = pnand %p14673_p11, %p14670_p10 }
  0x30   : > { %14678 = shalt.err (!%p14675_p12)
}
  0x31   : > { %s14679_s17 = scalar_lea.vmem %s15394_s29, 4608  ;;  %p14687_p5 = scmp.lt.s32.totalorder %s15394_s29, %s15394_s29 }
  0x32   : > { %p14680_p13 = scmp.ne.s32.totalorder %s15394_s29, %s14679_s17  ;;  %p14688_p4 = scmp.lt.s32.totalorder %s14679_s17, %s14679_s17 }
  0x34   : > { %p14682_p0 = pnand %p14680_p13, %p15421_p8  ;;  %p14689_p7 = por %p14688_p4, %p14687_p5 }
  0x36   : > { %p14683_p2 = pneg %p14682_p0 }
  0x38   : > { %p14690_p9 = pnand %p14689_p7, %p14683_p2 }
  0x3a   : > { %14693 = shalt.err (!%p14690_p9)
}
  0x3b   : > { %s20156_s30 = smov 128   ;;  %s20160_s0 = smov 8  }
  0x3c   : > { %14070 = dma.hbm_to_vmem [thread:$0]  (!%p15405_p6), %s20314_s2, 4608, %s15394_s29, [#allocation8], %s20156_s30, %s20156_s30, %s20160_s0  }
  0x3d   : > { %s20316_s3 = sld [smem:[#allocation160_spill]] }
  0x43   : > { %s14694_s17 = scalar_lea.hbm %s20316_s3, 128 }
  0x44   : > { %p14695_p4 = scmp.ne.s32.totalorder %s20316_s3, %s14694_s17  ;;  %p14701_p12 = scmp.lt.u32.totalorder %s14694_s17, %s20316_s3 }
  0x46   : > { %p14697_p10 = pnand %p14695_p4, %p15421_p8 }
  0x48   : > { %p14698_p11 = pneg %p14697_p10 }
  0x4a   : > { %p14703_p13 = pnand %p14701_p12, %p14698_p11 }
  0x4c   : > { %14706 = shalt.err (!%p14703_p13)
}
  0x4d   : > { %s14707_s29 = scalar_lea.vmem %s15409_s19, 128  ;;  %p14715_p7 = scmp.lt.s32.totalorder %s15409_s19, %s15409_s19 }
  0x4e   : > { %p14708_p0 = scmp.ne.s32.totalorder %s15409_s19, %s14707_s29  ;;  %p14716_p9 = scmp.lt.s32.totalorder %s14707_s29, %s14707_s29 }
  0x50   : > { %p14710_p2 = pnand %p14708_p0, %p15421_p8  ;;  %p14717_p4 = por %p14716_p9, %p14715_p7 }
  0x52   : > { %p14711_p5 = pneg %p14710_p2 }
  0x54   : > { %p14718_p10 = pnand %p14717_p4, %p14711_p5 }
  0x56   : > { %14721 = shalt.err (!%p14718_p10)
}
  0x57   : > { %14073 = dma.hbm_to_vmem [thread:$0]  (!%p15405_p6), %s20316_s3, 128, %s15409_s19, [#allocation11]  }
  0x58   : > { %s20317_s5 = sld [smem:[#allocation162_spill]] }
  0x5e   : > { %s14722_s22 = scalar_lea.hbm %s20317_s5, 16 }
  0x5f   : > { %p14723_p11 = scmp.ne.s32.totalorder %s20317_s5, %s14722_s22  ;;  %p14729_p0 = scmp.lt.u32.totalorder %s14722_s22, %s20317_s5 }
  0x61   : > { %p14725_p12 = pnand %p14723_p11, %p15421_p8 }
  0x63   : > { %p14726_p13 = pneg %p14725_p12 }
  0x65   : > { %p14731_p2 = pnand %p14729_p0, %p14726_p13 }
  0x67   : > { %14734 = shalt.err (!%p14731_p2)
}
  0x68   : > { %s14735_s19 = scalar_lea.vmem %s15411_s21, 16  ;;  %s14742_s29 = scalar_lea.vmem %s15411_s21, 32 }
  0x69   : > { %p14736_p5 = scmp.ne.s32.totalorder %s15411_s21, %s14735_s19  ;;  %p14743_p4 = scmp.lt.s32.totalorder %s15411_s21, %s15411_s21 }
  0x6a   : > { %p14744_p10 = scmp.lt.s32.totalorder %s14742_s29, %s14735_s19 }
  0x6b   : > { %p14738_p7 = pnand %p14736_p5, %p15421_p8 }
  0x6c   : > { %p14745_p11 = por %p14744_p10, %p14743_p4 }
  0x6d   : > { %p14739_p9 = pneg %p14738_p7 }
  0x6f   : > { %p14746_p12 = pnand %p14745_p11, %p14739_p9 }
  0x71   : > { %14749 = shalt.err (!%p14746_p12)
}
  0x72   : > { %14079 = dma.hbm_to_vmem [thread:$0]  (!%p15405_p6), %s20317_s5, 16, %s15411_s21, [#allocation14]  }
  0x73   : > { %s15255_s26 = smov [#allocation16]   ;;  %s15256_s22 = smov [#allocation19]  }
  0x74   : > { %s513_s27 = sshll.u32 %s15255_s26, 4  ;;  %s537_s23 = sshll.u32 %s15256_s22, 4  ;;  %s514_s27 = int_to_ptr.vmem [resolvable:$true] %s513_s27  ;;  %s538_s23 = int_to_ptr.vmem [resolvable:$true] %s537_s23 }
  0x75   : > { %s20318_s7 = sld [smem:[#allocation164_spill]] }
  0x7b   : > { %s14750_s17 = scalar_lea.hbm %s20318_s7, 16 }
  0x7c   : > { %p14751_p13 = scmp.ne.s32.totalorder %s20318_s7, %s14750_s17  ;;  %p14757_p5 = scmp.lt.u32.totalorder %s14750_s17, %s20318_s7 }
  0x7e   : > { %p14753_p0 = pnand %p14751_p13, %p15421_p8 }
  0x80   : > { %p14754_p2 = pneg %p14753_p0 }
  0x82   : > { %p14759_p7 = pnand %p14757_p5, %p14754_p2 }
  0x84   : > { %14762 = shalt.err (!%p14759_p7)
}
  0x85   : > { %s14763_s21 = scalar_lea.vmem %s514_s27, 16  ;;  %s14770_s25 = scalar_lea.vmem %s514_s27, 32 }
  0x86   : > { %p14764_p9 = scmp.ne.s32.totalorder %s514_s27, %s14763_s21  ;;  %p14771_p11 = scmp.lt.s32.totalorder %s514_s27, %s514_s27 }
  0x87   : > { %p14772_p12 = scmp.lt.s32.totalorder %s14770_s25, %s14763_s21 }
  0x88   : > { %p14766_p4 = pnand %p14764_p9, %p15421_p8 }
  0x89   : > { %p14773_p1 = por %p14772_p12, %p14771_p11 }
  0x8a   : > { %p14767_p10 = pneg %p14766_p4 }
  0x8c   : > { %p14774_p3 = pnand %p14773_p1, %p14767_p10 }
  0x8e   : > { %14777 = shalt.err (!%p14774_p3)
}
  0x8f   : > { %14085 = dma.hbm_to_vmem [thread:$0]  (!%p15405_p6), %s20318_s7, 16, %s514_s27, [#allocation17]  }
  0x90   : > { %s14778_s20 = scalar_lea.hbm %s20136_s9, 16 }
  0x91   : > { %p14779_p13 = scmp.ne.s32.totalorder %s20136_s9, %s14778_s20  ;;  %p14785_p3 = scmp.lt.u32.totalorder %s14778_s20, %s20136_s9 }
  0x93   : > { %p14781_p0 = pnand %p14779_p13, %p15421_p8 }
  0x95   : > { %p14782_p1 = pneg %p14781_p0 }
  0x97   : > { %p14787_p2 = pnand %p14785_p3, %p14782_p1 }
  0x99   : > { %14790 = shalt.err (!%p14787_p2)
}
  0x9a   : > { %s14791_s21 = scalar_lea.vmem %s538_s23, 16  ;;  %s14798_s27 = scalar_lea.vmem %s538_s23, 32 }
  0x9b   : > { %p14792_p5 = scmp.ne.s32.totalorder %s538_s23, %s14791_s21  ;;  %p14799_p4 = scmp.lt.s32.totalorder %s538_s23, %s538_s23 }
  0x9c   : > { %p14800_p10 = scmp.lt.s32.totalorder %s14798_s27, %s14791_s21 }
  0x9d   : > { %p14794_p7 = pnand %p14792_p5, %p15421_p8 }
  0x9e   : > { %p14801_p11 = por %p14800_p10, %p14799_p4 }
  0x9f   : > { %p14795_p9 = pneg %p14794_p7 }
  0xa1   : > { %p14802_p12 = pnand %p14801_p11, %p14795_p9 }
  0xa3   : > { %14805 = shalt.err (!%p14802_p12)
}
  0xa4   : > { %14091 = dma.hbm_to_vmem [thread:$0]  (!%p15405_p6), %s20136_s9, 16, %s538_s23, [#allocation20]  }
  0xa5   : > { %s15257_s22 = smov [#allocation22]   ;;  %s14806_s17 = scalar_lea.hbm %s20138_s11, 16 }
  0xa6   : > { %s561_s30 = sshll.u32 %s15257_s22, 4  ;;  %p14807_p13 = scmp.ne.s32.totalorder %s20138_s11, %s14806_s17  ;;  %s562_s30 = int_to_ptr.vmem [resolvable:$true] %s561_s30 }
  0xa7   : > { %p14813_p3 = scmp.lt.u32.totalorder %s14806_s17, %s20138_s11 }
  0xa8   : > { %p14809_p0 = pnand %p14807_p13, %p15421_p8 }
  0xaa   : > { %p14810_p1 = pneg %p14809_p0 }
  0xac   : > { %p14815_p2 = pnand %p14813_p3, %p14810_p1 }
  0xae   : > { %14818 = shalt.err (!%p14815_p2)
}
  0xaf   : > { %s14819_s23 = scalar_lea.vmem %s562_s30, 16  ;;  %s14826_s27 = scalar_lea.vmem %s562_s30, 32 }
  0xb0   : > { %p14820_p5 = scmp.ne.s32.totalorder %s562_s30, %s14819_s23  ;;  %p14827_p4 = scmp.lt.s32.totalorder %s562_s30, %s562_s30 }
  0xb1   : > { %p14828_p10 = scmp.lt.s32.totalorder %s14826_s27, %s14819_s23 }
  0xb2   : > { %p14822_p7 = pnand %p14820_p5, %p15421_p8 }
  0xb3   : > { %p14829_p11 = por %p14828_p10, %p14827_p4 }
  0xb4   : > { %p14823_p9 = pneg %p14822_p7 }
  0xb6   : > { %p14830_p12 = pnand %p14829_p11, %p14823_p9 }
  0xb8   : > { %14833 = shalt.err (!%p14830_p12)
}
  0xb9   : > { %14097 = dma.hbm_to_vmem [thread:$0]  (!%p15405_p6), %s20138_s11, 16, %s562_s30, [#allocation23]  }
  0xba   : > { %s15258_s22 = smov [#allocation25]   ;;  %s15259_s20 = smov [#allocation28]  }
  0xbb   : > { %s582_s28 = sshll.u32 %s15258_s22, 4  ;;  %s607_s17 = sshll.u32 %s15259_s20, 4  ;;  %s583_s28 = int_to_ptr.vmem [resolvable:$true] %s582_s28  ;;  %s15546_s17 = int_to_ptr.vmem [resolvable:$true] %s607_s17 }
  0xbc   : > { %s14834_s24 = scalar_lea.hbm %s20140_s13, 1152 }
  0xbd   : > { %p14835_p13 = scmp.ne.s32.totalorder %s20140_s13, %s14834_s24  ;;  %p14841_p3 = scmp.lt.u32.totalorder %s14834_s24, %s20140_s13 }
  0xbf   : > { %p14837_p0 = pnand %p14835_p13, %p15421_p8 }
  0xc1   : > { %p14838_p1 = pneg %p14837_p0 }
  0xc3   : > { %p14843_p2 = pnand %p14841_p3, %p14838_p1 }
  0xc5   : > { %14846 = shalt.err (!%p14843_p2)
}
  0xc6   : > { %s14847_s25 = scalar_lea.vmem %s583_s28, 1152  ;;  %p14855_p4 = scmp.lt.s32.totalorder %s583_s28, %s583_s28 }
  0xc7   : > { %p14848_p5 = scmp.ne.s32.totalorder %s583_s28, %s14847_s25  ;;  %p14856_p10 = scmp.lt.s32.totalorder %s14847_s25, %s14847_s25 }
  0xc9   : > { %p14850_p7 = pnand %p14848_p5, %p15421_p8  ;;  %p14857_p11 = por %p14856_p10, %p14855_p4 }
  0xcb   : > { %p14851_p9 = pneg %p14850_p7 }
  0xcd   : > { %p14858_p12 = pnand %p14857_p11, %p14851_p9 }
  0xcf   : > { %14861 = shalt.err (!%p14858_p12)
}
  0xd0   : > { %s15260_s26 = smov 64   ;;  %s15261_s22 = smov 4  }
  0xd1   : > { %14103 = dma.hbm_to_vmem [thread:$0]  (!%p15405_p6), %s20140_s13, 1152, %s583_s28, [#allocation26], %s15260_s26, %s15260_s26, %s15261_s22  }
  0xd2   : > { %s14862_s21 = scalar_lea.hbm %s20142_s15, 64 }
  0xd3   : > { %p14863_p13 = scmp.ne.s32.totalorder %s20142_s15, %s14862_s21  ;;  %p14869_p3 = scmp.lt.u32.totalorder %s14862_s21, %s20142_s15 }
  0xd5   : > { %p14865_p0 = pnand %p14863_p13, %p15421_p8 }
  0xd7   : > { %p14866_p1 = pneg %p14865_p0 }
  0xd9   : > { %p14871_p2 = pnand %p14869_p3, %p14866_p1 }
  0xdb   : > { %14874 = shalt.err (!%p14871_p2)
}
  0xdc   : > { %s14875_s28 = scalar_lea.vmem %s15546_s17, 64  ;;  %p14883_p4 = scmp.lt.s32.totalorder %s15546_s17, %s15546_s17 }
  0xdd   : > { %p14876_p5 = scmp.ne.s32.totalorder %s15546_s17, %s14875_s28  ;;  %p14884_p10 = scmp.lt.s32.totalorder %s14875_s28, %s14875_s28 }
  0xdf   : > { %p14878_p7 = pnand %p14876_p5, %p15421_p8  ;;  %p14885_p11 = por %p14884_p10, %p14883_p4 }
  0xe1   : > { %p14879_p9 = pneg %p14878_p7 }
  0xe3   : > { %p14886_p12 = pnand %p14885_p11, %p14879_p9 }
  0xe5   : > { %14889 = shalt.err (!%p14886_p12)
}
  0xe6   : > { %14109 = dma.hbm_to_vmem [thread:$0]  (!%p15405_p6), %s20142_s15, 64, %s15546_s17, [#allocation29]  }
  0xe7   : > { %s15262_s29 = smov [#allocation12]   ;;  %s15263_s21 = smov [#allocation15]  }
  0xe8   : > { %s478_s24 = sshll.u32 %s15262_s29, 4  ;;  %s499_s23 = sshll.u32 %s15263_s21, 4  ;;  %s479_s24 = int_to_ptr.vmem [resolvable:$true] %s478_s24  ;;  %s15592_s23 = int_to_ptr.vmem [resolvable:$true] %s499_s23 }
  0xe9   : > { %s20319_s4 = sld [smem:[#allocation161_spill]] }
  0xef   : > { %s14890_s25 = scalar_lea.hbm %s20319_s4, 16 }
  0xf0   : > { %p14891_p13 = scmp.ne.s32.totalorder %s20319_s4, %s14890_s25  ;;  %p14897_p3 = scmp.lt.u32.totalorder %s14890_s25, %s20319_s4 }
  0xf2   : > { %p14893_p0 = pnand %p14891_p13, %p15421_p8 }
  0xf4   : > { %p14894_p1 = pneg %p14893_p0 }
  0xf6   : > { %p14899_p2 = pnand %p14897_p3, %p14894_p1 }
  0xf8   : > { %14902 = shalt.err (!%p14899_p2)
}
  0xf9   : > { %s14903_s19 = scalar_lea.vmem %s479_s24, 16  ;;  %s14910_s29 = scalar_lea.vmem %s479_s24, 32 }
  0xfa   : > { %p14904_p5 = scmp.ne.s32.totalorder %s479_s24, %s14903_s19  ;;  %p14911_p4 = scmp.lt.s32.totalorder %s479_s24, %s479_s24 }
  0xfb   : > { %p14912_p10 = scmp.lt.s32.totalorder %s14910_s29, %s14903_s19 }
  0xfc   : > { %p14906_p7 = pnand %p14904_p5, %p15421_p8 }
  0xfd   : > { %p14913_p11 = por %p14912_p10, %p14911_p4 }
  0xfe   : > { %p14907_p9 = pneg %p14906_p7 }
 0x100   : > { %p14914_p12 = pnand %p14913_p11, %p14907_p9 }
 0x102   : > { %14917 = shalt.err (!%p14914_p12)
}
 0x103   : > { %14076 = dma.hbm_to_vmem [thread:$0]  (!%p15405_p6), %s20319_s4, 16, %s479_s24, [#allocation11]  }
 0x104   : > { %s20320_s6 = sld [smem:[#allocation163_spill]] }
 0x10a   : > { %s14918_s25 = scalar_lea.hbm %s20320_s6, 576 }
 0x10b   : > { %p14919_p13 = scmp.ne.s32.totalorder %s20320_s6, %s14918_s25  ;;  %p14925_p3 = scmp.lt.u32.totalorder %s14918_s25, %s20320_s6 }
 0x10d   : > { %p14921_p0 = pnand %p14919_p13, %p15421_p8 }
 0x10f   : > { %p14922_p1 = pneg %p14921_p0 }
 0x111   : > { %p14927_p2 = pnand %p14925_p3, %p14922_p1 }
 0x113   : > { %14930 = shalt.err (!%p14927_p2)
}
 0x114   : > { %s14931_s24 = scalar_lea.vmem %s15592_s23, 576  ;;  %p14939_p4 = scmp.lt.s32.totalorder %s15592_s23, %s15592_s23 }
 0x115   : > { %p14932_p5 = scmp.ne.s32.totalorder %s15592_s23, %s14931_s24  ;;  %p14940_p10 = scmp.lt.s32.totalorder %s14931_s24, %s14931_s24 }
 0x117   : > { %p14934_p7 = pnand %p14932_p5, %p15421_p8  ;;  %p14941_p11 = por %p14940_p10, %p14939_p4 }
 0x119   : > { %p14935_p9 = pneg %p14934_p7 }
 0x11b   : > { %p14942_p12 = pnand %p14941_p11, %p14935_p9 }
 0x11d   : > { %14945 = shalt.err (!%p14942_p12)
}
 0x11e   : > { %14082 = dma.hbm_to_vmem [thread:$0]  (!%p15405_p6), %s20320_s6, 576, %s15592_s23, [#allocation14], %s15260_s26, %s15260_s26, %s15261_s22  }
 0x11f   : > { %s15264_s21 = smov [#allocation18]   ;;  %s15265_s30 = smov [#allocation21]  }
 0x120   : > { %s523_s27 = sshll.u32 %s15264_s21, 4  ;;  %s547_s25 = sshll.u32 %s15265_s30, 4  ;;  %s524_s27 = int_to_ptr.vmem [resolvable:$true] %s523_s27  ;;  %s15638_s25 = int_to_ptr.vmem [resolvable:$true] %s547_s25 }
 0x121   : > { %s20321_s8 = sld [smem:[#allocation165_spill]] }
 0x127   : > { %s14946_s17 = scalar_lea.hbm %s20321_s8, 512 }
 0x128   : > { %p14947_p13 = scmp.ne.s32.totalorder %s20321_s8, %s14946_s17  ;;  %p14953_p3 = scmp.lt.u32.totalorder %s14946_s17, %s20321_s8 }
 0x12a   : > { %p14949_p0 = pnand %p14947_p13, %p15421_p8 }
 0x12c   : > { %p14950_p1 = pneg %p14949_p0 }
 0x12e   : > { %p14955_p2 = pnand %p14953_p3, %p14950_p1 }
 0x130   : > { %14958 = shalt.err (!%p14955_p2)
}
 0x131   : > { %s14959_s22 = scalar_lea.vmem %s524_s27, 512  ;;  %p14967_p4 = scmp.lt.s32.totalorder %s524_s27, %s524_s27 }
 0x132   : > { %p14960_p5 = scmp.ne.s32.totalorder %s524_s27, %s14959_s22  ;;  %p14968_p10 = scmp.lt.s32.totalorder %s14959_s22, %s14959_s22 }
 0x134   : > { %p14962_p7 = pnand %p14960_p5, %p15421_p8  ;;  %p14969_p11 = por %p14968_p10, %p14967_p4 }
 0x136   : > { %p14963_p9 = pneg %p14962_p7 }
 0x138   : > { %p14970_p12 = pnand %p14969_p11, %p14963_p9 }
 0x13a   : > { %14973 = shalt.err (!%p14970_p12)
}
 0x13b   : > { %s20322_s23 = smov 8   ;;  %s20323_s0 = smov 128  }
 0x13c   : > { %14088 = dma.hbm_to_vmem [thread:$0]  (!%p15405_p6), %s20321_s8, 512, %s524_s27, [#allocation17], %s20323_s0, %s20323_s0, %s20322_s23  }
 0x13d   : > { %s14974_s17 = scalar_lea.hbm %s20137_s10, 256 }
 0x13e   : > { %p14975_p13 = scmp.ne.s32.totalorder %s20137_s10, %s14974_s17  ;;  %p14981_p3 = scmp.lt.u32.totalorder %s14974_s17, %s20137_s10 }
 0x140   : > { %p14977_p0 = pnand %p14975_p13, %p15421_p8 }
 0x142   : > { %p14978_p1 = pneg %p14977_p0 }
 0x144   : > { %p14983_p2 = pnand %p14981_p3, %p14978_p1 }
 0x146   : > { %14986 = shalt.err (!%p14983_p2)
}
 0x147   : > { %s14987_s27 = scalar_lea.vmem %s15638_s25, 256  ;;  %p14995_p4 = scmp.lt.s32.totalorder %s15638_s25, %s15638_s25 }
 0x148   : > { %p14988_p5 = scmp.ne.s32.totalorder %s15638_s25, %s14987_s27  ;;  %p14996_p10 = scmp.lt.s32.totalorder %s14987_s27, %s14987_s27 }
 0x14a   : > { %p14990_p7 = pnand %p14988_p5, %p15421_p8  ;;  %p14997_p11 = por %p14996_p10, %p14995_p4 }
 0x14c   : > { %p14991_p9 = pneg %p14990_p7 }
 0x14e   : > { %p14998_p12 = pnand %p14997_p11, %p14991_p9 }
 0x150   : > { %15001 = shalt.err (!%p14998_p12)
}
 0x151   : > { %14094 = dma.hbm_to_vmem [thread:$0]  (!%p15405_p6), %s20137_s10, 256, %s15638_s25, [#allocation20], %s20323_s0, %s20323_s0, %s20322_s23  }
 0x152   : > { %s15266_s30 = smov [#allocation24]   ;;  %s15267_s20 = smov [#allocation27]  }
 0x153   : > { %s572_s28 = sshll.u32 %s15266_s30, 4  ;;  %s596_s17 = sshll.u32 %s15267_s20, 4  ;;  %s573_s28 = int_to_ptr.vmem [resolvable:$true] %s572_s28  ;;  %s15687_s17 = int_to_ptr.vmem [resolvable:$true] %s596_s17 }
 0x154   : > { %s15002_s29 = scalar_lea.hbm %s20139_s12, 16 }
 0x155   : > { %p15003_p13 = scmp.ne.s32.totalorder %s20139_s12, %s15002_s29  ;;  %p15009_p3 = scmp.lt.u32.totalorder %s15002_s29, %s20139_s12 }
 0x157   : > { %p15005_p0 = pnand %p15003_p13, %p15421_p8 }
 0x159   : > { %p15006_p1 = pneg %p15005_p0 }
 0x15b   : > { %p15011_p2 = pnand %p15009_p3, %p15006_p1 }
 0x15d   : > { %15014 = shalt.err (!%p15011_p2)
}
 0x15e   : > { %s15015_s21 = scalar_lea.vmem %s573_s28, 16  ;;  %s15022_s30 = scalar_lea.vmem %s573_s28, 32 }
 0x15f   : > { %p15016_p5 = scmp.ne.s32.totalorder %s573_s28, %s15015_s21  ;;  %p15023_p4 = scmp.lt.s32.totalorder %s573_s28, %s573_s28 }
 0x160   : > { %p15024_p10 = scmp.lt.s32.totalorder %s15022_s30, %s15015_s21 }
 0x161   : > { %p15018_p7 = pnand %p15016_p5, %p15421_p8 }
 0x162   : > { %p15025_p11 = por %p15024_p10, %p15023_p4 }
 0x163   : > { %p15019_p9 = pneg %p15018_p7 }
 0x165   : > { %p15026_p12 = pnand %p15025_p11, %p15019_p9 }
 0x167   : > { %15029 = shalt.err (!%p15026_p12)
}
 0x168   : > { %14100 = dma.hbm_to_vmem [thread:$0]  (!%p15405_p6), %s20139_s12, 16, %s573_s28, [#allocation23]  }
 0x169   : > { %s15030_s26 = scalar_lea.hbm %s20141_s14, 16 }
 0x16a   : > { %p15031_p13 = scmp.ne.s32.totalorder %s20141_s14, %s15030_s26  ;;  %p15037_p3 = scmp.lt.u32.totalorder %s15030_s26, %s20141_s14 }
 0x16c   : > { %p15033_p0 = pnand %p15031_p13, %p15421_p8 }
 0x16e   : > { %p15034_p1 = pneg %p15033_p0 }
 0x170   : > { %p15039_p2 = pnand %p15037_p3, %p15034_p1 }
 0x172   : > { %15042 = shalt.err (!%p15039_p2)
}
 0x173   : > { %s15043_s28 = scalar_lea.vmem %s15687_s17, 16  ;;  %s15050_s30 = scalar_lea.vmem %s15687_s17, 32 }
 0x174   : > { %p15044_p5 = scmp.ne.s32.totalorder %s15687_s17, %s15043_s28  ;;  %p15051_p4 = scmp.lt.s32.totalorder %s15687_s17, %s15687_s17 }
 0x175   : > { %p15052_p10 = scmp.lt.s32.totalorder %s15050_s30, %s15043_s28 }
 0x176   : > { %p15046_p7 = pnand %p15044_p5, %p15421_p8 }
 0x177   : > { %p15053_p11 = por %p15052_p10, %p15051_p4 }
 0x178   : > { %p15047_p9 = pneg %p15046_p7 }
 0x17a   : > { %p15054_p12 = pnand %p15053_p11, %p15047_p9 }
 0x17c   : > { %15057 = shalt.err (!%p15054_p12)
}
 0x17d   : > { %14106 = dma.hbm_to_vmem [thread:$0]  (!%p15405_p6), %s20141_s14, 16, %s15687_s17, [#allocation26]  }
 0x17e   : > { %s15268_s24 = smov [#allocation30]   ;;  %s15058_s22 = scalar_lea.hbm %s20143_s16, 16 }
 0x17f   : > { %s618_s29 = sshll.u32 %s15268_s24, 4  ;;  %p15059_p13 = scmp.ne.s32.totalorder %s20143_s16, %s15058_s22  ;;  %s619_s29 = int_to_ptr.vmem [resolvable:$true] %s618_s29 }
 0x180   : > { %p15065_p3 = scmp.lt.u32.totalorder %s15058_s22, %s20143_s16 }
 0x181   : > { %p15061_p0 = pnand %p15059_p13, %p15421_p8 }
 0x183   : > { %p15062_p1 = pneg %p15061_p0 }
 0x185   : > { %p15067_p2 = pnand %p15065_p3, %p15062_p1 }
 0x187   : > { %15070 = shalt.err (!%p15067_p2)
}
 0x188   : > { %s15071_s17 = scalar_lea.vmem %s619_s29, 16  ;;  %s15078_s20 = scalar_lea.vmem %s619_s29, 32 }
 0x189   : > { %p15072_p5 = scmp.ne.s32.totalorder %s619_s29, %s15071_s17  ;;  %p15079_p4 = scmp.lt.s32.totalorder %s619_s29, %s619_s29 }
 0x18a   : > { %p15080_p10 = scmp.lt.s32.totalorder %s15078_s20, %s15071_s17 }
 0x18b   : > { %p15074_p7 = pnand %p15072_p5, %p15421_p8 }
 0x18c   : > { %p15081_p11 = por %p15080_p10, %p15079_p4 }
 0x18d   : > { %p15075_p9 = pneg %p15074_p7 }
 0x18f   : > { %p15082_p12 = pnand %p15081_p11, %p15075_p9 }
 0x191   : > { %15085 = shalt.err (!%p15082_p12)
}
 0x192   : > { %s20324_s26 = sld [smem:[#allocation46_spill]]  ;;  %s20325_s27 = sld [smem:[#allocation45_spill]] }
 0x193   : > { %s20326_s22 = sld [smem:[#allocation44_spill]]  ;;  %s20327_s18 = sld [smem:[#allocation43_spill]] }
 0x194   : > { %s20328_s25 = sld [smem:[#allocation47_spill]]  ;;  %s20334_s2 = sld [smem:[#allocation157_spill]] }
 0x195   : > { %14112 = dma.hbm_to_vmem [thread:$0]  (!%p15405_p6), %s20143_s16, 16, %s619_s29, [#allocation29]  }
 0x198   : > { %s11486_s21 = sadd.s32 4294967294, %s20324_s26   ;;  %s15751_s1 = sadd.s32 1, %s20324_s26  }
 0x199   : > { %s50_s28 = sadd.s32 1, %s20325_s27  ;;  %s47_s30 = ssub.s32 %s20324_s26, %s15751_s1 }
 0x19a   : > { %p57_p8 = scmp.ne.s32.totalorder %s20325_s27, %s20326_s22  ;;  %p48_p13 = scmp.eq.s32.totalorder %s47_s30, 0 }
 0x19b   : > { %p58_p0 = scmp.eq.s32.totalorder %s20324_s26, 0  ;;  %p63_p1 = scmp.ne.s32.totalorder %s20326_s22, %s20327_s18 }
 0x19c   : > { %p428_p3 = scmp.eq.s32.totalorder %s20328_s25, 1  ;;  %p20329_p5 = scmp.eq.s32.totalorder %s20328_s25, 0 }
 0x19d   : > { %s15763_s17 = scalar_select %p48_p13, %s20325_s27, %s50_s28  }
 0x19e   : > { %p59_p2 = por %p58_p0, %p57_p8  ;;  %p15767_p7 = por %p20329_p5, %p63_p1 }
 0x19f   : > { %p15771_p6 = por %p428_p3, %p57_p8  ;;  %p434_p9 = scmp.eq.s32.totalorder %s11486_s21, 1 }
 0x1a0   : > { %s20330_s29 = scalar_select %p15767_p7, 1, 0 }
 0x1a1   : > { %s20331_s20 = scalar_select %p15771_p6, 1, 0 }
 0x1a2   : > { %p14139_p4 = scmp.lt.s32.totalorder %s20324_s26, 2  ;;  %s15777_s19 = sand.u32 1, %s20325_s27  }
 0x1a3   : > { %p15779_p10 = por %p434_p9, %p63_p1  ;;  %s13997_s22 = smul.u32 288, %s15777_s19 }
 0x1a4   : > { %p15784_p11 = pnand %p14139_p4, %p59_p2  ;;  %s13998_s25 = smul.u32 4608, %s20324_s26 }
 0x1a5   : > { %s20332_s24 = scalar_select %p15779_p10, 1, 0 }
 0x1a6   : > { %s15793_s27 = scalar_lea.hbm %s20334_s2, %s13998_s25  ;;  %s633_s3 = scalar_lea.vmem [#allocation4], %s13997_s22 }
 0x1a7   : > { %s640_s4 = sshll.u32 %s633_s3, 4  ;;  %s630_s5 = scalar_lea.sflag [#allocation5], %s15777_s19  ;;  %s15795_s4 = int_to_ptr.vmem [resolvable:$true] %s640_s4 }
 0x1a8   : > { %s15086_s6 = scalar_lea.hbm %s15793_s27, 4608  ;;  %p15088_p8 = pneg %p15784_p11 }
 0x1a9   : > { %p15087_p12 = scmp.ne.s32.totalorder %s15793_s27, %s15086_s6  ;;  %s15091_s21 = scalar_lea.hbm %s20334_s2, 9216 }
 0x1aa   : > { %p15092_p1 = scmp.lt.u32.totalorder %s15793_s27, %s20334_s2  ;;  %p15093_p3 = scmp.lt.u32.totalorder %s15091_s21, %s15086_s6 }
 0x1ab   : > { %p15089_p13 = pnand %p15088_p8, %p15087_p12  ;;  %p15095_p5 = scmp.lt.u32.totalorder %s15086_s6, %s15793_s27 }
 0x1ac   : > { %p15094_p2 = por %p15093_p3, %p15092_p1 }
 0x1ad   : > { %p15090_p0 = pneg %p15089_p13 }
 0x1ae   : > { %p15096_p9 = por %p15095_p5, %p15094_p2 }
 0x1b0   : > { %p15097_p4 = pnand %p15096_p9, %p15090_p0 }
 0x1b2   : > { %15100 = shalt.err (!%p15097_p4)
}
 0x1b3   : > { %s15101_s3 = scalar_lea.vmem %s15795_s4, 4608  ;;  %s15269_s22 = smov [#allocation4]  }
 0x1b4   : > { %p15102_p12 = scmp.ne.s32.totalorder %s15795_s4, %s15101_s3  ;;  %s15106_s30 = sshll.u32 %s15269_s22, 4  ;;  %s15107_s30 = int_to_ptr.vmem [resolvable:$false] %s15106_s30 }
 0x1b5   : > { %s15108_s7 = scalar_lea.vmem %s15107_s30, 9216  ;;  %p15109_p6 = scmp.lt.s32.totalorder %s15795_s4, %s15107_s30 }
 0x1b6   : > { %p15104_p13 = pnand %p15102_p12, %p15088_p8  ;;  %p15110_p1 = scmp.lt.s32.totalorder %s15108_s7, %s15101_s3 }
 0x1b8   : > { %p15105_p10 = pneg %p15104_p13  ;;  %p15111_p3 = por %p15110_p1, %p15109_p6 }
 0x1ba   : > { %p15112_p2 = pnand %p15111_p3, %p15105_p10 }
 0x1bc   : > { %15115 = shalt.err (!%p15112_p2)
}
 0x1bd   : > { %14116 = dma.hbm_to_vmem [thread:$0]  (!%p15784_p11), %s15793_s27, 4608, %s15795_s4, %s630_s5, %s20323_s0, %s20323_s0, %s20322_s23  }
 0x1be   : > { %s11505_s6 = sshll.u32 %s20324_s26, 4  ;;  %s20335_s21 = sld [smem:[#allocation158_spill]] }
 0x1bf   : > { %s653_s22 = scalar_lea.vmem [#allocation7], %s15777_s19  ;;  %s20336_s7 = sand.u32 1, %s20324_s26  }
 0x1c0   : > { %s660_s30 = sshll.u32 %s653_s22, 4  ;;  %s651_s2 = scalar_lea.sflag [#allocation8], %s20336_s7  ;;  %s661_s30 = int_to_ptr.vmem [resolvable:$true] %s660_s30 }
 0x1c4   : > { %s15832_s3 = scalar_lea.hbm %s20335_s21, %s11505_s6  ;;  %s15121_s23 = scalar_lea.hbm %s20335_s21, 32 }
 0x1c5   : > { %s15116_s8 = scalar_lea.hbm %s15832_s3, 16  ;;  %p15122_p5 = scmp.lt.u32.totalorder %s15832_s3, %s20335_s21 }
 0x1c6   : > { %p15117_p6 = scmp.ne.s32.totalorder %s15832_s3, %s15116_s8  ;;  %p15123_p9 = scmp.lt.u32.totalorder %s15121_s23, %s15116_s8 }
 0x1c7   : > { %p15125_p12 = scmp.lt.u32.totalorder %s15116_s8, %s15832_s3 }
 0x1c8   : > { %p15119_p10 = pnand %p15117_p6, %p15088_p8  ;;  %p15124_p4 = por %p15123_p9, %p15122_p5 }
 0x1ca   : > { %p15120_p0 = pneg %p15119_p10  ;;  %p15126_p13 = por %p15125_p12, %p15124_p4 }
 0x1cc   : > { %p15127_p1 = pnand %p15126_p13, %p15120_p0 }
 0x1ce   : > { %15130 = shalt.err (!%p15127_p1)
}
 0x1cf   : > { %s15131_s26 = scalar_lea.vmem %s661_s30, 16  ;;  %s15270_s19 = smov [#allocation7]  }
 0x1d0   : > { %p15132_p3 = scmp.ne.s32.totalorder %s661_s30, %s15131_s26  ;;  %s15136_s6 = sshll.u32 %s15270_s19, 4  ;;  %s15137_s6 = int_to_ptr.vmem [resolvable:$false] %s15136_s6 }
 0x1d1   : > { %s15138_s28 = scalar_lea.vmem %s15137_s6, 32  ;;  %p15139_p10 = scmp.lt.s32.totalorder %s661_s30, %s15137_s6 }
 0x1d2   : > { %p15134_p2 = pnand %p15132_p3, %p15088_p8  ;;  %p15140_p7 = scmp.lt.s32.totalorder %s15138_s28, %s15131_s26 }
 0x1d4   : > { %p15135_p6 = pneg %p15134_p2  ;;  %p15141_p5 = por %p15140_p7, %p15139_p10 }
 0x1d6   : > { %p15142_p9 = pnand %p15141_p5, %p15135_p6 }
 0x1d8   : > { %15145 = shalt.err (!%p15142_p9)
}
 0x1d9   : > { %14119 = dma.hbm_to_vmem [thread:$0]  (!%p15784_p11), %s15832_s3, 16, %s661_s30, %s651_s2  }
 0x1da   : > { %s20337_s8 = sld [smem:[#allocation48_spill]] }
 0x1e0   : > { %p20338_p0 = scmp.ne.s32.totalorder %s20337_s8, 0 }
 0x1e2   : > { %669 = sbr.rel (%p20338_p0) target bundleno = 3327 (0xcff), region = 88 }
 0x1e9   : > { %s20339_s25 = sld [smem:[#allocation44_spill]]  ;;  %p20340_p7 = scmp.ne.s32.totalorder %s20330_s29, 0 }
 0x1ef   : > { %s15859_s22 = sand.u32 1, %s20339_s25  }
 0x1f0   : > { %s13999_s7 = smul.u32 288, %s15859_s22  ;;  %s672_s4 = scalar_lea.sflag [#allocation5], %s15859_s22 }
 0x1f2   : > { %s15865_s5 = scalar_lea.vmem [#allocation4], %s13999_s7 }
 0x1f3   : > { %15191 = dma.done.wait (%p20340_p7), %s672_s4, 4608  }
 0x1f4   : > { %15193 = vsyncadd (%p20340_p7), %s672_s4, 4294962688  ;;  %s20341_s2 = sld [smem:[#allocation47_spill]]  ;;  %s683_s30 = scalar_lea.vmem [#allocation7], %s15859_s22 }
 0x1fa   : > { %s680_s18 = sand.u32 1, %s20341_s2  }
 0x1fb   : > { %s681_s3 = scalar_lea.sflag [#allocation8], %s680_s18 }
 0x1fc   : > { %15195 = dma.done.wait (%p20340_p7), %s681_s3, 16  }
 0x1fd   : > { %15197 = vsyncadd (%p20340_p7), %s681_s3, 4294967280  ;;  %p20342_p11 = scmp.eq.s32.totalorder %s20341_s2, 0 }
 0x1ff   : > { %15199 = dma.done.wait (%p20342_p11), [#allocation8], 4608   ;;  %p20343_p8 = pmov %p20342_p11 }
 0x201   : > { %15201 = vsyncadd (%p20343_p8), [#allocation8], 4294962688  ;;  %p20344_p4 = pmov %p20343_p8 }
 0x203   : > { %15203 = dma.done.wait (%p20344_p4), [#allocation11], 144   ;;  %p20345_p12 = pmov %p20344_p4 }
 0x204   : > { %p20346_p13 = pmov %p20344_p4 }
 0x205   : > { %15205 = vsyncadd (%p20345_p12), [#allocation11], 4294967152 }
 0x206   : > { %15207 = dma.done.wait (%p20346_p13), [#allocation14], 592   ;;  %p20347_p1 = pmov %p20344_p4 }
 0x208   : > { %15209 = vsyncadd (%p20347_p1), [#allocation14], 4294966704  ;;  %p20348_p3 = pmov %p20347_p1 }
 0x209   : > { %p20349_p2 = pmov %p20347_p1 }
 0x20a   : > { %15211 = dma.done.wait (%p20348_p3), [#allocation17], 528  }
 0x20b   : > { %15213 = vsyncadd (%p20349_p2), [#allocation17], 4294966768  ;;  %p20350_p6 = pmov %p20347_p1 }
 0x20c   : > { %p20351_p10 = pmov %p20347_p1 }
 0x20d   : > { %15215 = dma.done.wait (%p20350_p6), [#allocation20], 272  }
 0x20e   : > { %15217 = vsyncadd (%p20351_p10), [#allocation20], 4294967024  ;;  %p20352_p5 = pmov %p20347_p1 }
 0x20f   : > { %p20353_p9 = pmov %p20347_p1 }
 0x210   : > { %15219 = dma.done.wait (%p20352_p5), [#allocation23], 32  }
 0x211   : > { %15221 = vsyncadd (%p20353_p9), [#allocation23], 4294967264  ;;  %p20354_p0 = pmov %p20347_p1 }
 0x213   : > { %15223 = dma.done.wait (%p20354_p0), [#allocation26], 1168   ;;  %p20355_p7 = pmov %p20354_p0 }
 0x214   : > { %p20356_p11 = pmov %p20354_p0 }
 0x215   : > { %15225 = vsyncadd (%p20355_p7), [#allocation26], 4294966128 }
 0x216   : > { %15227 = dma.done.wait (%p20356_p11), [#allocation29], 80   ;;  %p20357_p8 = pmov %p20354_p0 }
 0x217   : > { %v20167_v0 = vmov 0.0   ;;  %vm15272_vm0 = vmmov 0   ;;  %v20165_v1 = vmov 0   ;;  %vm873_vm1 = vcmask 64512   ;;  %v951_v2 = vld [vmem:[#allocation10] sm:$0xff]  ;;  %v15924_v5 = vld [vmem:[%s15865_s5 + $0x10] sm:$0xff] }
 0x218   : > { %15229 = vsyncadd (%p20357_p8), [#allocation29], 4294967216  ;;  %12532 = vmatprep.subr.mxu0 %v20167_v0  ;;  %12534 = vmatprep.mubr.msk.f32.mxu0 %vm15272_vm0, %v20167_v0  ;;  %v15918_v3 = vld [vmem:[%s15865_s5] sm:$0xff]  ;;  %v15921_v4 = vld [vmem:[%s15865_s5 + $0x8] sm:$0xff]  ;;  %v877_v11 = vsel %vm873_vm1, %v15924_v5, 0.0  ;;  %v1027_v42 = vmul.f32 %v15924_v5, %v15924_v5  ;;  %vm1815_vm2 = vcmask 58368  }
 0x219   : > { %12537 = vmatprep.subr.mxu1 %v20167_v0  ;;  %12539 = vmatprep.mubr.msk.f32.mxu1 %vm15272_vm0, %v20167_v0  ;;  %v15927_v6 = vld [vmem:[%s15865_s5 + $0x18] sm:$0xff]  ;;  %v874_v7 = vsel %vm873_vm1, %v15918_v3, 0.0  ;;  %v875_v8 = vsel %vm873_vm1, %v15921_v4, 0.0  ;;  %v15934_v9 = vld [vmem:[%s15865_s5 + $0x20] sm:$0xff]  ;;  %v15941_v13 = vld [vmem:[%s15865_s5 + $0x28] sm:$0xff]  ;;  %v1025_v38 = vmul.f32 %v15918_v3, %v15918_v3  ;;  %v1026_v39 = vmul.f32 %v15921_v4, %v15921_v4  ;;  %s19958_s29 = scalar_lea.vmem [#allocation31], %s13999_s7 }
 0x21a   : > { %14213 = vset.pattern.permute.xlu0 %v20165_v1  ;;  %14214 = vset.pattern.permute.xlu1 %v20165_v1  ;;  %v876_v10 = vadd.f32 %v875_v8, %v874_v7  ;;  %v879_v12 = vsel %vm873_vm1, %v15927_v6, 0.0  ;;  %v881_v15 = vsel %vm873_vm1, %v15934_v9, 0.0  ;;  %v15946_v16 = vld [vmem:[%s15865_s5 + $0x30] sm:$0xff]  ;;  %v883_v18 = vsel %vm873_vm1, %v15941_v13, 0.0  ;;  %v15951_v19 = vld [vmem:[%s15865_s5 + $0x38] sm:$0xff]  ;;  %v15956_v22 = vld [vmem:[%s15865_s5 + $0x40] sm:$0xff] }
 0x21b   : > { %12533 = vmatpush3.msra.mxu0 %v951_v2  ;;  %12538 = vmatpush3.msra.mxu1 %v951_v2  ;;  %v885_v21 = vsel %vm873_vm1, %v15946_v16, 0.0  ;;  %v887_v24 = vsel %vm873_vm1, %v15951_v19, 0.0  ;;  %v15961_v25 = vld [vmem:[%s15865_s5 + $0x48] sm:$0xff]  ;;  %v801_v28 = vld [vmem:[#allocation9 + $0x10] sm:$0xff]  ;;  %v889_v29 = vsel %vm873_vm1, %v15956_v22, 0.0  ;;  %v802_v34 = vld [vmem:[#allocation9 + $0x18] sm:$0xff]  ;;  %v1028_v45 = vmul.f32 %v15927_v6, %v15927_v6 }
 0x21c   : > { %v878_v14 = vadd.f32 %v877_v11, %v876_v10  ;;  %v799_v27 = vld [vmem:[#allocation9] sm:$0xff]  ;;  %1608 = vperm.xlu1 %14214, %v801_v28   ;;  %v15966_v30 = vld [vmem:[%s15865_s5 + $0x50] sm:$0xff]  ;;  %v891_v33 = vsel %vm873_vm1, %v15961_v25, 0.0  ;;  %v15971_v35 = vld [vmem:[%s15865_s5 + $0x58] sm:$0xff]  ;;  %vm1816_vm3 = vsmask.f32 1280  ;;  %v1029_v50 = vmul.f32 %v15934_v9, %v15934_v9 }
 0x21d   : > { %1598 = vperm.xlu0 %14213, %v799_v27   ;;  %v800_v32 = vld [vmem:[#allocation9 + $0x8] sm:$0xff]  ;;  %v893_v37 = vsel %vm873_vm1, %v15966_v30, 0.0  ;;  %v15980_v40 = vld [vmem:[%s15865_s5 + $0x60] sm:$0xff]  ;;  %v895_v44 = vsel %vm873_vm1, %v15971_v35, 0.0  ;;  %v1061_v51 = vsel %vm873_vm1, %v1025_v38, 0.0  ;;  %v1062_v52 = vsel %vm873_vm1, %v1026_v39, 0.0  ;;  %vm16030_vm7 = vmand %vm1815_vm2, %vm1816_vm3 }
 0x21e   : > { %v880_v17 = vadd.f32 %v879_v12, %v878_v14  ;;  %v803_v43 = vld [vmem:[#allocation9 + $0x20] sm:$0xff]  ;;  %v804_v46 = vld [vmem:[#allocation9 + $0x28] sm:$0xff]  ;;  %v897_v49 = vsel %vm873_vm1, %v15980_v40, 0.0  ;;  %v1063_v55 = vadd.f32 %v1062_v52, %v1061_v51  ;;  %v1064_v56 = vsel %vm873_vm1, %v1027_v42, 0.0  ;;  %v805_v57 = vld [vmem:[#allocation9 + $0x30] sm:$0xff]  ;;  %s14000_s23 = smul.u32 4608, %s20341_s2 }
 0x21f   : > { %v15989_v47 = vld [vmem:[%s15865_s5 + $0x68] sm:$0xff]  ;;  %v15998_v53 = vld [vmem:[%s15865_s5 + $0x70] sm:$0xff]  ;;  %vm1821_vm4 = vcmask 60417   ;;  %v1030_v59 = vmul.f32 %v15941_v13, %v15941_v13  ;;  %v1066_v60 = vsel %vm873_vm1, %v1028_v45, 0.0  ;;  %v806_v61 = vld [vmem:[#allocation9 + $0x38] sm:$0xff]  ;;  %vm6793_vm6 = vcmask 123904  }
 0x220   : > { %v882_v20 = vadd.f32 %v881_v15, %v880_v17  ;;  %1613 = vperm.xlu1 %14214, %v802_v34   ;;  %v899_v58 = vsel %vm873_vm1, %v15989_v47, 0.0  ;;  %vm1822_vm5 = vsmask.f32 7942  ;;  %v16007_v62 = vld [vmem:[%s15865_s5 + $0x78] sm:$0xff]  ;;  %v16010_v63 = vld [vmem:[%s15865_s5 + $0x80] sm:$0xff]  ;;  %v16013_v2 = vld [vmem:[%s15865_s5 + $0x88] sm:$0xff]  ;;  %v1065_v8 = vadd.f32 %v1064_v56, %v1063_v55 }
 0x221   : > { %1603 = vperm.xlu0 %14213, %v800_v32   ;;  %v16016_v10 = vld [vmem:[%s15865_s5 + $0x90] sm:$0xff]  ;;  %v16019_v11 = vld [vmem:[%s15865_s5 + $0x98] sm:$0xff]  ;;  %v901_v12 = vsel %vm873_vm1, %v15998_v53, 0.0  ;;  %v1031_v14 = vmul.f32 %v15946_v16, %v15946_v16  ;;  %v1032_v15 = vmul.f32 %v15951_v19, %v15951_v19  ;;  %v1068_v17 = vsel %vm873_vm1, %v1029_v50, 0.0  ;;  %vm16036_vm8 = vmand %vm1821_vm4, %vm1822_vm5  ;;  %s11251_s0 = sshll.u32 %s19958_s29, 4  ;;  %s20838_s19 = sld [smem:[#allocation166_spill]]  ;;  %s20079_s0 = int_to_ptr.vmem [resolvable:$true] %s11251_s0 }
 0x222   : > { %v884_v23 = vadd.f32 %v883_v18, %v882_v20  ;;  %v20358_v18 = vmov 0  ;;  %vm6798_vm9 = vcmask 125953   ;;  %v905_v27 = vsel %vm873_vm1, %v16010_v63, 0.0  ;;  %vm16049_vm10 = vmand %vm6793_vm6, %vm1816_vm3  ;;  %v809_v39 = vld [vmem:[#allocation9 + $0x50] sm:$0xff]  ;;  %v810_v45 = vld [vmem:[#allocation9 + $0x58] sm:$0xff]  ;;  %s11238_s28 = scalar_lea.sflag [#allocation6], %s15859_s22 }
 0x223   : > { %v20359_v18 = vsel %vm16030_vm7, 4294967295, %v20358_v18  ;;  %v907_v28 = vsel %vm873_vm1, %v16013_v2, 0.0  ;;  %v20363_v32 = vmov 0  ;;  %v1034_v42 = vmul.f32 %v15961_v25, %v15961_v25  ;;  %vm16068_vm11 = vmand %vm6798_vm9, %vm1822_vm5  ;;  %v1824_v51 = vld [vmem:[#allocation2 + $0x98] sm:$0xe]  ;;  %s15146_s8 = scalar_lea.vmem %s20079_s0, 4608 }
 0x224   : > { %v886_v26 = vadd.f32 %v885_v21, %v884_v23  ;;  %1623 = vperm.xlu1 %14214, %v804_v46   ;;  %20360 = vst [vmem:[#allocation49_spill] sm:$0xff] %v20359_v18  ;;  %v1067_v21 = vadd.f32 %v1066_v60, %v1065_v8  ;;  %v807_v23 = vld [vmem:[#allocation9 + $0x40] sm:$0xff]  ;;  %v20364_v32 = vsel %vm16049_vm10, 4294967295, %v20363_v32  ;;  %v1818_v46 = vld [vmem:[#allocation2 + $0x8] sm:$0x3]  ;;  %v1035_v52 = vmul.f32 %v15966_v30, %v15966_v30  ;;  %p15147_p4 = scmp.ne.s32.totalorder %s20079_s0, %s15146_s8  ;;  %p20839_p12 = scmp.ne.s32.totalorder %s20331_s20, 0 }
 0x225   : > { %1618 = vperm.xlu0 %14213, %v803_v43   ;;  %20365 = vst [vmem:[#allocation50_spill] sm:$0xff] %v20364_v32  ;;  %v1072_v43 = vsel %vm873_vm1, %v1031_v14, 0.0  ;;  %v6800_v55 = vld [vmem:[#allocation3 + $0x98] sm:$0xe]  ;;  %v1819_v8 = vsel %vm16030_vm7, 0, %v1818_v46  ;;  %v16083_v14 = vld [vmem:[%s15865_s5 + $0xa8] sm:$0xff] }
 0x226   : > { %v888_v31 = vadd.f32 %v887_v24, %v886_v26  ;;  %v903_v26 = vsel %vm873_vm1, %v16007_v62, 0.0  ;;  %v1069_v38 = vadd.f32 %v1068_v17, %v1067_v21  ;;  %1820 = vst [vmem:[#allocation2 + $0x8] sm:$0x3] %v1819_v8  ;;  %v6801_v21 = vsel %vm16068_vm11, 0, %v6800_v55  ;;  %p15148_p13 = pnand %p15147_p4, %p20839_p12  ;;  %s15275_s25 = smov [#allocation31]  }
 0x227   : > { %6802 = vst [vmem:[#allocation3 + $0x98] sm:$0xe] %v6801_v21  ;;  %vm1812_vm12 = vcmask 60416   ;;  %vm1937_vm13 = vsmask.f32 5392  ;;  %vm2712_vm15 = vcmask 1043456   ;;  %s20075_s6 = scalar_lea.hbm %s20838_s19, %s14000_s23 }
 0x228   : > { %v890_v36 = vadd.f32 %v889_v29, %v888_v31  ;;  %1633 = vperm.xlu1 %14214, %v806_v61   ;;  %v1070_v29 = vsel %vm873_vm1, %v1030_v59, 0.0  ;;  %v808_v31 = vld [vmem:[#allocation9 + $0x48] sm:$0xff]  ;;  %v811_v59 = vld [vmem:[#allocation9 + $0x60] sm:$0xff]  ;;  %v1078_v61 = vsel %vm873_vm1, %v1034_v42, 0.0  ;;  %1813 = vst.msk [vmem:[#allocation2] sm:$0xf] %vm1812_vm12, %v20165_v1  ;;  %vm16582_vm14 = vmor %vm1816_vm3, %vm1937_vm13  ;;  %p15149_p1 = pneg %p15148_p13 }
 0x229   : > { %1628 = vperm.xlu0 %14213, %v805_v57   ;;  %v1071_v50 = vadd.f32 %v1070_v29, %v1069_v38  ;;  %1814 = vst.msk [vmem:[#allocation2 + $0x4] sm:$0xf] %vm1812_vm12, %v20165_v1  ;;  %1827 = vst.msk [vmem:[#allocation2 + $0x9c] sm:$0xf] %vm1812_vm12, %v20165_v1  ;;  %v1037_v29 = vmul.f32 %v15980_v40, %v15980_v40  ;;  %v915_v42 = vsel %vm873_vm1, %v16083_v14, 0.0  ;;  %vm4315_vm4 = vcmask 1045504  }
 0x22a   : > { %v892_v41 = vadd.f32 %v891_v33, %v890_v36  ;;  %v16054_v33 = vld [vmem:[%s15865_s5 + $0xa0] sm:$0xff]  ;;  %v909_v36 = vsel %vm873_vm1, %v16016_v10, 0.0  ;;  %1828 = vst.msk [vmem:[#allocation2 + $0xa0] sm:$0xf] %vm1812_vm12, %v20165_v1  ;;  %vm2509_vm2 = vsmask.f32 7424 }
 0x22b   : > { %v913_v57 = vsel %vm873_vm1, %v16054_v33, 0.0  ;;  %vm3868_vm3 = vsmask.f32 6400  ;;  %vm5068_vm5 = vsmask.f32 5376  ;;  %vm5515_vm6 = vcmask 1044480  }
 0x22c   : > { %v894_v48 = vadd.f32 %v893_v37, %v892_v41  ;;  %v911_v37 = vsel %vm873_vm1, %v16019_v11, 0.0  ;;  %v1033_v41 = vmul.f32 %v15956_v22, %v15956_v22  ;;  %1643 = vperm.xlu1 %14214, %v808_v31   ;;  %v16103_v31 = vld [vmem:[%s15865_s5 + $0xb0] sm:$0xff]  ;;  %vm6790_vm9 = vcmask 125952   ;;  %s15150_s7 = sshll.u32 %s15275_s25, 4  ;;  %s15151_s7 = int_to_ptr.vmem [resolvable:$false] %s15150_s7 }
 0x22d   : > { %1638 = vperm.xlu0 %14213, %v807_v23   ;;  %v1036_v23 = vmul.f32 %v15971_v35, %v15971_v35  ;;  %s15152_s4 = scalar_lea.vmem %s15151_s7, 9216  ;;  %p15153_p3 = scmp.lt.s32.totalorder %s20079_s0, %s15151_s7 }
 0x22e   : > { %v896_v54 = vadd.f32 %v895_v44, %v894_v48  ;;  %v1074_v44 = vsel %vm873_vm1, %v1032_v15, 0.0  ;;  %v20366_v48 = vmov 0  ;;  %v1076_v60 = vsel %vm873_vm1, %v1033_v41, 0.0  ;;  %v16108_v41 = vld [vmem:[%s15865_s5 + $0xb8] sm:$0xff]  ;;  %p15154_p2 = scmp.lt.s32.totalorder %s15152_s4, %s15146_s8 }
 0x22f   : > { %v20367_v48 = vsel %vm16068_vm11, 4294967295, %v20366_v48 }
 0x230   : > { %v898_v7 = vadd.f32 %v897_v49, %v896_v54  ;;  %20368 = vst [vmem:[#allocation51_spill] sm:$0xff] %v20367_v48  ;;  %v6795_v54 = vld [vmem:[#allocation3 + $0x8] sm:$0x3]  ;;  %1653 = vperm.xlu1 %14214, %v810_v45   ;;  %p15155_p6 = por %p15154_p2, %p15153_p3 }
 0x231   : > { %1648 = vperm.xlu0 %14213, %v809_v39   ;;  %v813_v39 = vld [vmem:[#allocation9 + $0x70] sm:$0xff] }
 0x232   : > { %v900_v20 = vadd.f32 %v899_v58, %v898_v7  ;;  %v1073_v58 = vadd.f32 %v1072_v43, %v1071_v50  ;;  %v812_v7 = vld [vmem:[#allocation9 + $0x68] sm:$0xff]  ;;  %v1082_v43 = vsel %vm873_vm1, %v1036_v23, 0.0  ;;  %v1084_v50 = vsel %vm873_vm1, %v1037_v29, 0.0  ;;  %v817_v23 = vld [vmem:[#allocation9 + $0x90] sm:$0xff]  ;;  %v818_v29 = vld [vmem:[#allocation9 + $0x98] sm:$0xff]  ;;  %p15156_p10 = pnand %p15155_p6, %p15149_p1 }
 0x234   : > { %v902_v34 = vadd.f32 %v901_v12, %v900_v20  ;;  %v1825_v12 = vsel %vm16036_vm8, 0, %v1824_v51  ;;  %v1075_v17 = vadd.f32 %v1074_v44, %v1073_v58  ;;  %v6796_v20 = vsel %vm16049_vm10, 0, %v6795_v54  ;;  %1663 = vperm.xlu1 %14214, %v812_v7   ;;  %v814_v44 = vld [vmem:[#allocation9 + $0x78] sm:$0xff]  ;;  %v816_v58 = vld [vmem:[#allocation9 + $0x88] sm:$0xff] }
 0x235   : > { %1826 = vst [vmem:[#allocation2 + $0x98] sm:$0xe] %v1825_v12  ;;  %6797 = vst [vmem:[#allocation3 + $0x8] sm:$0x3] %v6796_v20  ;;  %1658 = vperm.xlu0 %14213, %v811_v59   ;;  %v16119_v51 = vld [vmem:[%s15865_s5 + $0xc0] sm:$0xff]  ;;  %v919_v54 = vsel %vm873_vm1, %v16108_v41, 0.0  ;;  %v1040_v59 = vmul.f32 %v16007_v62, %v16007_v62  ;;  %v1041_v12 = vmul.f32 %v16010_v63, %v16010_v63 }
 0x236   : > { %v904_v49 = vadd.f32 %v903_v26, %v902_v34  ;;  %v1080_v26 = vsel %vm873_vm1, %v1035_v52, 0.0  ;;  %v921_v8 = vsel %vm873_vm1, %v16119_v51, 0.0 }
 0x238   : > { %v906_v56 = vadd.f32 %v905_v27, %v904_v49  ;;  %v1039_v49 = vmul.f32 %v15998_v53, %v15998_v53  ;;  %1673 = vperm.xlu1 %14214, %v814_v44   ;;  %v16151_v44 = vld [vmem:[%s15865_s5 + $0xe0] sm:$0xff] }
 0x239   : > { %1668 = vperm.xlu0 %14213, %v813_v39  }
 0x23a   : > { %v908_v15 = vadd.f32 %v907_v28, %v906_v56  ;;  %v1077_v28 = vadd.f32 %v1076_v60, %v1075_v17  ;;  %v16127_v60 = vld [vmem:[%s15865_s5 + $0xc8] sm:$0xff]  ;;  %v16135_v17 = vld [vmem:[%s15865_s5 + $0xd0] sm:$0xff] }
 0x23b   : > { %v925_v39 = vsel %vm873_vm1, %v16135_v17, 0.0 }
 0x23c   : > { %v910_v27 = vadd.f32 %v909_v36, %v908_v15  ;;  %v1038_v36 = vmul.f32 %v15989_v47, %v15989_v47  ;;  %v1079_v38 = vadd.f32 %v1078_v61, %v1077_v28  ;;  %v1088_v15 = vsel %vm873_vm1, %v1039_v49, 0.0  ;;  %1683 = vperm.xlu1 %14214, %v816_v58  }
 0x23d   : > { %v1090_v28 = vsel %vm873_vm1, %v1040_v59, 0.0  ;;  %v929_v58 = vsel %vm873_vm1, %v16151_v44, 0.0  ;;  %v1045_v59 = vmul.f32 %v16054_v33, %v16054_v33 }
 0x23e   : > { %v912_v34 = vadd.f32 %v911_v37, %v910_v27  ;;  %v1081_v46 = vadd.f32 %v1080_v26, %v1079_v38  ;;  %v917_v37 = vsel %vm873_vm1, %v16103_v31, 0.0  ;;  %v1086_v56 = vsel %vm873_vm1, %v1038_v36, 0.0 }
 0x23f   : > { %v923_v26 = vsel %vm873_vm1, %v16127_v60, 0.0  ;;  %v1042_v27 = vmul.f32 %v16013_v2, %v16013_v2 }
 0x240   : > { %v914_v45 = vadd.f32 %v913_v57, %v912_v34  ;;  %v1083_v55 = vadd.f32 %v1082_v43, %v1081_v46  ;;  %v815_v57 = vld [vmem:[#allocation9 + $0x80] sm:$0xff]  ;;  %v16143_v34 = vld [vmem:[%s15865_s5 + $0xd8] sm:$0xff]  ;;  %v1092_v43 = vsel %vm873_vm1, %v1041_v12, 0.0  ;;  %1693 = vperm.xlu1 %14214, %v818_v29  }
 0x241   : > { %1678 = vperm.xlu0 %14213, %v815_v57   ;;  %v927_v49 = vsel %vm873_vm1, %v16143_v34, 0.0 }
 0x242   : > { %v916_v52 = vadd.f32 %v915_v42, %v914_v45  ;;  %v1085_v7 = vadd.f32 %v1084_v50, %v1083_v55  ;;  %v1043_v42 = vmul.f32 %v16016_v10, %v16016_v10  ;;  %v1044_v50 = vmul.f32 %v16019_v11, %v16019_v11  ;;  %v16159_v55 = vld [vmem:[%s15865_s5 + $0xe8] sm:$0xff] }
 0x243   : > { %20369 = vst [vmem:[#allocation52_spill] sm:$0xff] %v16159_v55 }
 0x244   : > { %v918_v61 = vadd.f32 %v917_v37, %v916_v52  ;;  %v1087_v21 = vadd.f32 %v1086_v56, %v1085_v7  ;;  %v819_v37 = vld [vmem:[#allocation9 + $0xa0] sm:$0xff]  ;;  %v1094_v52 = vsel %vm873_vm1, %v1042_v27, 0.0  ;;  %v16167_v7 = vld [vmem:[%s15865_s5 + $0xf0] sm:$0xff]  ;;  %v16175_v27 = vld [vmem:[%s15865_s5 + $0xf8] sm:$0xff] }
 0x245   : > { %1688 = vperm.xlu0 %14213, %v817_v23   ;;  %20370 = vst [vmem:[#allocation53_spill] sm:$0xff] %v16167_v7  ;;  %v1098_v23 = vsel %vm873_vm1, %v1044_v50, 0.0  ;;  %20371 = vst [vmem:[#allocation54_spill] sm:$0xff] %v16175_v27 }
 0x246   : > { %v920_v20 = vadd.f32 %v919_v54, %v918_v61  ;;  %v1089_v38 = vadd.f32 %v1088_v15, %v1087_v21  ;;  %v820_v54 = vld [vmem:[#allocation9 + $0xa8] sm:$0xff]  ;;  %v1096_v61 = vsel %vm873_vm1, %v1043_v42, 0.0  ;;  %v821_v15 = vld [vmem:[#allocation9 + $0xb0] sm:$0xff]  ;;  %v1046_v21 = vmul.f32 %v16083_v14, %v16083_v14  ;;  %v16183_v42 = vld [vmem:[%s15865_s5 + $0x100] sm:$0xff] }
 0x247   : > { %1703 = vperm.xlu1 %14214, %v820_v54   ;;  %20372 = vst [vmem:[#allocation55_spill] sm:$0xff] %v16183_v42  ;;  %v16191_v54 = vld [vmem:[%s15865_s5 + $0x108] sm:$0xff] }
 0x248   : > { %v922_v36 = vadd.f32 %v921_v8, %v920_v20  ;;  %v1091_v46 = vadd.f32 %v1090_v28, %v1089_v38  ;;  %v931_v20 = vsel %vm873_vm1, %v16159_v55, 0.0  ;;  %v1047_v38 = vmul.f32 %v16103_v31, %v16103_v31  ;;  %20373 = vst [vmem:[#allocation56_spill] sm:$0xff] %v16191_v54 }
 0x249   : > { %1698 = vperm.xlu0 %14213, %v819_v37   ;;  %v935_v37 = vsel %vm873_vm1, %v16175_v27, 0.0  ;;  %v1102_v50 = vsel %vm873_vm1, %v1046_v21, 0.0  ;;  %v939_v21 = vsel %vm873_vm1, %v16191_v54, 0.0 }
 0x24a   : > { %v924_v45 = vadd.f32 %v923_v26, %v922_v36  ;;  %v1093_v57 = vadd.f32 %v1092_v43, %v1091_v46  ;;  %v822_v26 = vld [vmem:[#allocation9 + $0xb8] sm:$0xff]  ;;  %v933_v36 = vsel %vm873_vm1, %v16167_v7, 0.0  ;;  %v823_v46 = vld [vmem:[#allocation9 + $0xc0] sm:$0xff] }
 0x24b   : > { %1713 = vperm.xlu1 %14214, %v822_v26  }
 0x24c   : > { %v926_v56 = vadd.f32 %v925_v39, %v924_v45  ;;  %v1095_v12 = vadd.f32 %v1094_v52, %v1093_v57  ;;  %v1100_v39 = vsel %vm873_vm1, %v1045_v59, 0.0  ;;  %v824_v52 = vld [vmem:[#allocation9 + $0xc8] sm:$0xff]  ;;  %v1049_v59 = vmul.f32 %v16119_v51, %v16119_v51 }
 0x24d   : > { %1708 = vperm.xlu0 %14213, %v821_v15  }
 0x24e   : > { %v928_v8 = vadd.f32 %v927_v49, %v926_v56  ;;  %v1097_v29 = vadd.f32 %v1096_v61, %v1095_v12  ;;  %v1048_v49 = vmul.f32 %v16108_v41, %v16108_v41  ;;  %v1104_v61 = vsel %vm873_vm1, %v1047_v38, 0.0 }
 0x24f   : > { %1723 = vperm.xlu1 %14214, %v824_v52   ;;  %v1052_v52 = vmul.f32 %v16143_v34, %v16143_v34 }
 0x250   : > { %v930_v28 = vadd.f32 %v929_v58, %v928_v8  ;;  %v1099_v45 = vadd.f32 %v1098_v23, %v1097_v29  ;;  %v937_v58 = vsel %vm873_vm1, %v16183_v42, 0.0  ;;  %v16199_v8 = vld [vmem:[%s15865_s5 + $0x110] sm:$0xff]  ;;  %v1050_v23 = vmul.f32 %v16127_v60, %v16127_v60  ;;  %v16207_v29 = vld [vmem:[%s15865_s5 + $0x118] sm:$0xff] }
 0x251   : > { %1718 = vperm.xlu0 %14213, %v823_v46   ;;  %20374 = vst [vmem:[#allocation57_spill] sm:$0xff] %v16199_v8  ;;  %v1106_v26 = vsel %vm873_vm1, %v1048_v49, 0.0  ;;  %20375 = vst [vmem:[#allocation58_spill] sm:$0xff] %v16207_v29  ;;  %v943_v49 = vsel %vm873_vm1, %v16207_v29, 0.0 }
 0x252   : > { %v932_v43 = vadd.f32 %v931_v20, %v930_v28  ;;  %v1101_v57 = vadd.f32 %v1100_v39, %v1099_v45  ;;  %v825_v20 = vld [vmem:[#allocation9 + $0xd0] sm:$0xff]  ;;  %v826_v28 = vld [vmem:[#allocation9 + $0xd8] sm:$0xff]  ;;  %v941_v39 = vsel %vm873_vm1, %v16199_v8, 0.0  ;;  %v1108_v45 = vsel %vm873_vm1, %v1049_v59, 0.0 }
 0x253   : > { %1733 = vperm.xlu1 %14214, %v826_v28   ;;  %v1114_v28 = vsel %vm873_vm1, %v1052_v52, 0.0 }
 0x254   : > { %v934_v56 = vadd.f32 %v933_v36, %v932_v43  ;;  %v1103_v15 = vadd.f32 %v1102_v50, %v1101_v57  ;;  %v1051_v43 = vmul.f32 %v16135_v17, %v16135_v17  ;;  %v827_v50 = vld [vmem:[#allocation9 + $0xe0] sm:$0xff]  ;;  %v828_v57 = vld [vmem:[#allocation9 + $0xe8] sm:$0xff] }
 0x255   : > { %1728 = vperm.xlu0 %14213, %v825_v20  }
 0x256   : > { %v936_v12 = vadd.f32 %v935_v37, %v934_v56  ;;  %v1105_v38 = vadd.f32 %v1104_v61, %v1103_v15  ;;  %v1110_v56 = vsel %vm873_vm1, %v1050_v23, 0.0  ;;  %v1112_v59 = vsel %vm873_vm1, %v1051_v43, 0.0 }
 0x257   : > { %1743 = vperm.xlu1 %14214, %v828_v57  }
 0x258   : > { %v938_v36 = vadd.f32 %v937_v58, %v936_v12  ;;  %v1107_v37 = vadd.f32 %v1106_v26, %v1105_v38  ;;  %v1053_v12 = vmul.f32 %v16151_v44, %v16151_v44  ;;  %v1054_v26 = vmul.f32 %v16159_v55, %v16159_v55 }
 0x259   : > { %1738 = vperm.xlu0 %14213, %v827_v50   ;;  %v1056_v50 = vmul.f32 %v16175_v27, %v16175_v27 }
 0x25a   : > { %v940_v46 = vadd.f32 %v939_v21, %v938_v36  ;;  %v1109_v61 = vadd.f32 %v1108_v45, %v1107_v37  ;;  %v829_v21 = vld [vmem:[#allocation9 + $0xf0] sm:$0xff]  ;;  %v830_v36 = vld [vmem:[#allocation9 + $0xf8] sm:$0xff]  ;;  %v1116_v45 = vsel %vm873_vm1, %v1053_v12, 0.0  ;;  %v831_v37 = vld [vmem:[#allocation9 + $0x100] sm:$0xff] }
 0x25b   : > { %1753 = vperm.xlu1 %14214, %v830_v36  }
 0x25c   : > { %v942_v58 = vadd.f32 %v941_v39, %v940_v46  ;;  %v1111_v20 = vadd.f32 %v1110_v56, %v1109_v61  ;;  %v1055_v39 = vmul.f32 %v16167_v7, %v16167_v7  ;;  %v832_v56 = vld [vmem:[#allocation9 + $0x108] sm:$0xff] }
 0x25d   : > { %1748 = vperm.xlu0 %14213, %v829_v21   ;;  %v1122_v21 = vsel %vm873_vm1, %v1056_v50, 0.0 }
 0x25e   : > { %v944_v15 = vadd.f32 %v943_v49, %v942_v58  ;;  %v1113_v38 = vadd.f32 %v1112_v59, %v1111_v20  ;;  %v1118_v49 = vsel %vm873_vm1, %v1054_v26, 0.0  ;;  %v1057_v58 = vmul.f32 %v16183_v42, %v16183_v42 }
 0x25f   : > { %v1120_v61 = vsel %vm873_vm1, %v1055_v39, 0.0  ;;  %1763 = vperm.xlu1 %14214, %v832_v56   ;;  %v1058_v20 = vmul.f32 %v16191_v54, %v16191_v54 }
 0x260   : > { %v945_v23 = vrot.slane %v944_v15, 4  ;;  %v1115_v46 = vadd.f32 %v1114_v28, %v1113_v38  ;;  %v834_v28 = vld [vmem:[#allocation9 + $0x118] sm:$0xff]  ;;  %v1124_v38 = vsel %vm873_vm1, %v1057_v58, 0.0 }
 0x261   : > { %1758 = vperm.xlu0 %14213, %v831_v37  }
 0x262   : > { %v946_v43 = vadd.f32 %v945_v23, %v944_v15  ;;  %v1117_v57 = vadd.f32 %v1116_v45, %v1115_v46  ;;  %v833_v15 = vld [vmem:[#allocation9 + $0x110] sm:$0xff]  ;;  %v1059_v23 = vmul.f32 %v16199_v8, %v16199_v8  ;;  %v1126_v46 = vsel %vm873_vm1, %v1058_v20, 0.0 }
 0x263   : > { %1773 = vperm.xlu1 %14214, %v834_v28  }
 0x264   : > { %v947_v52 = vrot.slane %v946_v43, 2  ;;  %v1119_v59 = vadd.f32 %v1118_v49, %v1117_v57  ;;  %v1128_v50 = vsel %vm873_vm1, %v1059_v23, 0.0 }
 0x265   : > { %1768 = vperm.xlu0 %14213, %v833_v15  }
 0x266   : > { %v948_v12 = vadd.f32 %v947_v52, %v946_v43  ;;  %v1121_v36 = vadd.f32 %v1120_v61, %v1119_v59  ;;  %v1060_v43 = vmul.f32 %v16207_v29, %v16207_v29 }
 0x268   : > { %v949_v26 = vrot.slane %v948_v12, 1  ;;  %v1123_v45 = vadd.f32 %v1122_v21, %v1121_v36  ;;  %v1130_v56 = vsel %vm873_vm1, %v1060_v43, 0.0 }
 0x26a   : > { %v950_v39 = vadd.f32 %v949_v26, %v948_v12  ;;  %v1125_v37 = vadd.f32 %v1124_v38, %v1123_v45  ;;  %v1214_v26 = vlaneseq }
 0x26c   : > { %12535 = vmatmul.mubr.msk.f32.vlgmr.msra.gmra.mrb[0].mxu0 %vm873_vm1, %v950_v39  ;;  %v1127_v49 = vadd.f32 %v1126_v46, %v1125_v37  ;;  %v1215_v23 = vshrl.u32 %v1214_v26, 7 }
 0x26e   : > { %v1129_v52 = vadd.f32 %v1128_v50, %v1127_v49  ;;  %v16249_v43 = vsub.s32 0, %v1215_v23 }
 0x270   : > { %v1131_v57 = vadd.f32 %v1130_v56, %v1129_v52  ;;  %20376 = vst [vmem:[#allocation59_spill] sm:$0xff] %v16249_v43 }
 0x272   : > { %v1132_v58 = vrot.slane %v1131_v57, 4 }
 0x274   : > { %v1133_v61 = vadd.f32 %v1132_v58, %v1131_v57 }
 0x276   : > { %v1134_v12 = vrot.slane %v1133_v61, 2 }
 0x278   : > { %v1135_v59 = vadd.f32 %v1134_v12, %v1133_v61 }
 0x27a   : > { %v1136_v15 = vrot.slane %v1135_v59, 1 }
 0x27c   : > { %v1137_v21 = vadd.f32 %v1136_v15, %v1135_v59 }
 0x27e   : > { %12540 = vmatmul.mubr.msk.f32.vlgmr.msra.gmra.mrb[0].mxu1 %vm873_vm1, %v1137_v21 }
 0x27f   : > { %12899 = vmatprep.mubr.msk.f32.mxu1 %vm15272_vm0, %v20167_v0 }
 0x33f   : > { %v1021_v20 = vpop.f32.mrb[0].mxu0 }
 0x340   : > { %v12536_v28 = vpop.f32.mrb[1].mxu0  ;;  %v1211_v36 = vmul.f32 %v1021_v20, %v1021_v20  ;;  %v16252_v50 = vrot.slane %v1021_v20, %v16249_v43 }
 0x341   : > { %v16335_v28 = vld [vmem:[#allocation13] ss:$0 sm:$0xff] }
 0x342   : > { %v1218_v49 = vsub.f32 %v15918_v3, %v16252_v50  ;;  %v1219_v56 = vsub.f32 %v15921_v4, %v16252_v50  ;;  %v1220_v52 = vsub.f32 %v15924_v5, %v16252_v50  ;;  %v1221_v57 = vsub.f32 %v15927_v6, %v16252_v50 }
 0x343   : > { %v1222_v58 = vsub.f32 %v15934_v9, %v16252_v50  ;;  %v1223_v61 = vsub.f32 %v15941_v13, %v16252_v50  ;;  %v1224_v12 = vsub.f32 %v15946_v16, %v16252_v50  ;;  %v1225_v3 = vsub.f32 %v15951_v19, %v16252_v50 }
 0x344   : > { %v1226_v4 = vsub.f32 %v15956_v22, %v16252_v50  ;;  %v1227_v5 = vsub.f32 %v15961_v25, %v16252_v50  ;;  %v1228_v6 = vsub.f32 %v15966_v30, %v16252_v50  ;;  %v20377_v30 = vsub.f32 %v15971_v35, %v16252_v50 }
 0x345   : > { %v20380_v35 = vsub.f32 %v15989_v47, %v16252_v50 }
 0x351   : > { %v1207_v38 = vpop.f32.mrb[0].mxu1 }
 0x352   : > { %v1212_v39 = vsub.f32 %v1207_v38, %v1211_v36  ;;  %v12541_v45 = vpop.f32.mrb[1].mxu1  ;;  %v16321_v36 = vld [vmem:[#allocation12] ss:$0 sm:$0xff] }
 0x354   : > { %v1213_v46 = vmax.f32 %v1212_v39, 0.0 }
 0x356   : > { %v1254_v37 = vadd.f32 1e-05, %v1213_v46 }
 0x358   : > { %14348 = vrsqrt.f32 %v1254_v37 }
 0x362   : > { %v14349_v38 = vpop.eup %14348 }
 0x363   : > { %v16313_v1 = vrot.slane %v14349_v38, %v16249_v43 }
 0x365   : > { %v1260_v45 = vmul.f32 %v16313_v1, %v1218_v49  ;;  %v1261_v23 = vmul.f32 %v16313_v1, %v1219_v56  ;;  %v1262_v39 = vmul.f32 %v16313_v1, %v1220_v52  ;;  %v1263_v26 = vmul.f32 %v16313_v1, %v1221_v57 }
 0x366   : > { %v1264_v46 = vmul.f32 %v16313_v1, %v1222_v58  ;;  %v1265_v37 = vmul.f32 %v16313_v1, %v1223_v61  ;;  %v1266_v20 = vmul.f32 %v16313_v1, %v1224_v12  ;;  %v1267_v38 = vmul.f32 %v16313_v1, %v1225_v3 }
 0x367   : > { %v1302_v0 = vmul.f32 %v16321_v36, %v1260_v45  ;;  %v1303_v49 = vmul.f32 %v16321_v36, %v1261_v23  ;;  %v1304_v56 = vmul.f32 %v16321_v36, %v1262_v39  ;;  %v1305_v52 = vmul.f32 %v16321_v36, %v1263_v26 }
 0x368   : > { %v1306_v57 = vmul.f32 %v16321_v36, %v1264_v46  ;;  %v1307_v21 = vmul.f32 %v16321_v36, %v1265_v37  ;;  %v1308_v58 = vmul.f32 %v16321_v36, %v1266_v20  ;;  %v1309_v61 = vmul.f32 %v16321_v36, %v1267_v38 }
 0x369   : > { %v1268_v12 = vmul.f32 %v16313_v1, %v1226_v4  ;;  %v16351_v3 = vadd.f32 %v16335_v28, %v1302_v0  ;;  %v16354_v45 = vadd.f32 %v16335_v28, %v1303_v49  ;;  %v16357_v23 = vadd.f32 %v16335_v28, %v1304_v56 }
 0x36a   : > { %v16360_v26 = vadd.f32 %v16335_v28, %v1309_v61  ;;  %v16363_v39 = vadd.f32 %v16335_v28, %v1305_v52  ;;  %v16366_v20 = vadd.f32 %v16335_v28, %v1306_v57  ;;  %v16369_v4 = vadd.f32 %v16335_v28, %v1307_v21 }
 0x36b   : > { %v1310_v0 = vmul.f32 %v16321_v36, %v1268_v12  ;;  %v16373_v46 = vadd.f32 %v16335_v28, %v1308_v58  ;;  %v1269_v37 = vmul.f32 %v16313_v1, %v1227_v5  ;;  %v1380_v38 = vsub.f32 0.0, %v16351_v3 }
 0x36c   : > { %v1387_v49 = vsub.f32 0.0, %v16360_v26  ;;  %v1381_v56 = vsub.f32 0.0, %v16354_v45  ;;  %v1382_v52 = vsub.f32 0.0, %v16357_v23  ;;  %v1383_v57 = vsub.f32 0.0, %v16363_v39 }
 0x36d   : > { %v16382_v21 = vadd.f32 %v16335_v28, %v1310_v0  ;;  %v1311_v61 = vmul.f32 %v16321_v36, %v1269_v37  ;;  %v1384_v58 = vsub.f32 0.0, %v16366_v20  ;;  %v1385_v12 = vsub.f32 0.0, %v16369_v4 }
 0x36e   : > { %v1430_v5 = vmul.f32 1.442695, %v1387_v49  ;;  %v1386_v15 = vsub.f32 0.0, %v16373_v46  ;;  %v1270_v59 = vmul.f32 %v16313_v1, %v1228_v6  ;;  %v1416_v25 = vmul.f32 1.442695, %v1380_v38 }
 0x36f   : > { %v1388_v22 = vsub.f32 0.0, %v16382_v21  ;;  %v16394_v0 = vadd.f32 %v16335_v28, %v1311_v61  ;;  %v1418_v19 = vmul.f32 1.442695, %v1381_v56  ;;  %v1420_v37 = vmul.f32 1.442695, %v1382_v52  ;;  %v16409_v52 = vpop.permute.xlu0 %1598 }
 0x370   : > { %14350 = vpow2.f32 %v1430_v5  ;;  %v1312_v16 = vmul.f32 %v16321_v36, %v1270_v59  ;;  %v1422_v13 = vmul.f32 1.442695, %v1383_v57  ;;  %v1424_v49 = vmul.f32 1.442695, %v1384_v58  ;;  %20379 = vst [vmem:[#allocation60_spill] sm:$0xff] %v16409_v52 }
 0x371   : > { %v1432_v9 = vmul.f32 1.442695, %v1388_v22  ;;  %v1389_v32 = vsub.f32 0.0, %v16394_v0  ;;  %v1426_v48 = vmul.f32 1.442695, %v1385_v12  ;;  %v1271_v6 = vmul.f32 %v16313_v1, %v20377_v30 }
 0x372   : > { %v16403_v38 = vadd.f32 %v16335_v28, %v1312_v16  ;;  %v1428_v61 = vmul.f32 1.442695, %v1386_v15  ;;  %14352 = vpow2.f32 %v1416_v25  ;;  %v20378_v56 = vsub.f32 %v15980_v40, %v16252_v50  ;;  %v16416_v16 = vpop.permute.xlu1 %1608 }
 0x373   : > { %14354 = vpow2.f32 %v1432_v9  ;;  %v1434_v22 = vmul.f32 1.442695, %v1389_v32  ;;  %v1313_v57 = vmul.f32 %v16321_v36, %v1271_v6  ;;  %v1273_v58 = vmul.f32 %v16313_v1, %v20380_v35  ;;  %20381 = vst [vmem:[#allocation61_spill] sm:$0xff] %v16416_v16  ;;  %v16449_v35 = vpop.permute.xlu0 %1603 }
 0x374   : > { %v1272_v59 = vmul.f32 %v16313_v1, %v20378_v56  ;;  %v1390_v25 = vsub.f32 0.0, %v16403_v38  ;;  %14356 = vpow2.f32 %v1418_v19  ;;  %v20382_v15 = vsub.f32 %v15998_v53, %v16252_v50  ;;  %20385 = vst [vmem:[#allocation62_spill] sm:$0xff] %v16449_v35 }
 0x375   : > { %14358 = vpow2.f32 %v1434_v22  ;;  %v16425_v32 = vadd.f32 %v16335_v28, %v1313_v57  ;;  %v1315_v47 = vmul.f32 %v16321_v36, %v1273_v58  ;;  %v20383_v12 = vsub.f32 %v16007_v62, %v16252_v50 }
 0x376   : > { %v1314_v40 = vmul.f32 %v16321_v36, %v1272_v59  ;;  %v1274_v9 = vmul.f32 %v16313_v1, %v20382_v15  ;;  %v1436_v30 = vmul.f32 1.442695, %v1390_v25  ;;  %14360 = vpow2.f32 %v1420_v37  ;;  %v16455_v15 = vpop.permute.xlu1 %1613 }
 0x377   : > { %v1275_v5 = vmul.f32 %v16313_v1, %v20383_v12  ;;  %v1391_v6 = vsub.f32 0.0, %v16425_v32  ;;  %14362 = vpow2.f32 %v1422_v13  ;;  %v16438_v56 = vadd.f32 %v16335_v28, %v1315_v47  ;;  %20386 = vst [vmem:[#allocation63_spill] sm:$0xff] %v16455_v15  ;;  %v16477_v43 = vpop.permute.xlu0 %1618 }
 0x378   : > { %v16433_v19 = vadd.f32 %v16335_v28, %v1314_v40  ;;  %v1316_v53 = vmul.f32 %v16321_v36, %v1274_v9  ;;  %14364 = vpow2.f32 %v1436_v30  ;;  %v20384_v37 = vsub.f32 %v16010_v63, %v16252_v50  ;;  %20389 = vst [vmem:[#allocation64_spill] sm:$0xff] %v16477_v43 }
 0x379   : > { %v1317_v59 = vmul.f32 %v16321_v36, %v1275_v5  ;;  %v1438_v58 = vmul.f32 1.442695, %v1391_v6  ;;  %14366 = vpow2.f32 %v1424_v49  ;;  %v1393_v13 = vsub.f32 0.0, %v16438_v56 }
 0x37a   : > { %v1392_v62 = vsub.f32 0.0, %v16433_v19  ;;  %v16443_v22 = vadd.f32 %v16335_v28, %v1316_v53  ;;  %v1276_v57 = vmul.f32 %v16313_v1, %v20384_v37  ;;  %v14351_v40 = vpop.eup %14350  ;;  %14368 = vpow2.f32 %v1426_v48 }
 0x37b   : > { %v16453_v25 = vadd.f32 %v16335_v28, %v1317_v59  ;;  %v1495_v12 = vadd.f32 1.0, %v14351_v40  ;;  %14370 = vpow2.f32 %v1438_v58  ;;  %v1442_v5 = vmul.f32 1.442695, %v1393_v13  ;;  %v16507_v54 = vpop.permute.xlu0 %1628 }
 0x37c   : > { %v1440_v9 = vmul.f32 1.442695, %v1392_v62  ;;  %v1394_v47 = vsub.f32 0.0, %v16443_v22  ;;  %v1318_v63 = vmul.f32 %v16321_v36, %v1276_v57  ;;  %v14353_v49 = vpop.eup %14352  ;;  %14372 = vpow2.f32 %v1428_v61  ;;  %20393 = vst [vmem:[#allocation66_spill] sm:$0xff] %v16507_v54 }
 0x37d   : > { %v1395_v30 = vsub.f32 0.0, %v16453_v25  ;;  %v20387_v48 = vsub.f32 %v16013_v2, %v16252_v50  ;;  %v14355_v62 = vpop.eup %14354  ;;  %14374 = vrcp.f32 %v1495_v12  ;;  %v1488_v37 = vadd.f32 1.0, %v14353_v49 }
 0x37e   : > { %v16460_v53 = vmul.f32 1.442695, %v1394_v47  ;;  %v16463_v6 = vadd.f32 %v16335_v28, %v1318_v63  ;;  %v20388_v58 = vsub.f32 %v16016_v10, %v16252_v50  ;;  %v14357_v13 = vpop.eup %14356  ;;  %v1496_v40 = vadd.f32 1.0, %v14355_v62 }
 0x37f   : > { %v1277_v59 = vmul.f32 %v16313_v1, %v20387_v48  ;;  %v16469_v57 = vmul.f32 1.442695, %v1395_v30  ;;  %14376 = vpow2.f32 %v1440_v9  ;;  %v14359_v2 = vpop.eup %14358  ;;  %v1489_v48 = vadd.f32 1.0, %v14357_v13 }
 0x380   : > { %v1278_v61 = vmul.f32 %v16313_v1, %v20388_v58  ;;  %v1396_v47 = vsub.f32 0.0, %v16463_v6  ;;  %14378 = vpow2.f32 %v1442_v5  ;;  %v20390_v30 = vsub.f32 %v16019_v11, %v16252_v50  ;;  %v14361_v49 = vpop.eup %14360  ;;  %v16484_v58 = vpop.permute.xlu1 %1623 }
 0x381   : > { %v1319_v63 = vmul.f32 %v16321_v36, %v1277_v59  ;;  %20391 = vst [vmem:[#allocation65_spill] sm:$0xff] %v16484_v58  ;;  %14380 = vrcp.f32 %v1496_v40  ;;  %v1497_v9 = vadd.f32 1.0, %v14359_v2  ;;  %v14363_v18 = vpop.eup %14362  ;;  %v1490_v13 = vadd.f32 1.0, %v14361_v49 }
 0x382   : > { %v1320_v12 = vmul.f32 %v16321_v36, %v1278_v61  ;;  %v1279_v10 = vmul.f32 %v16313_v1, %v20390_v30  ;;  %v16486_v62 = vmul.f32 1.442695, %v1396_v47  ;;  %14382 = vrcp.f32 %v1488_v37  ;;  %v14365_v61 = vpop.eup %14364 }
 0x383   : > { %v16489_v59 = vadd.f32 %v16335_v28, %v1319_v63  ;;  %14384 = vrcp.f32 %v1497_v9  ;;  %v1491_v30 = vadd.f32 1.0, %v14363_v18  ;;  %v20392_v40 = vsub.f32 %v16054_v33, %v16252_v50  ;;  %v14367_v63 = vpop.eup %14366 }
 0x384   : > { %v16492_v5 = vadd.f32 %v16335_v28, %v1320_v12  ;;  %v1321_v11 = vmul.f32 %v16321_v36, %v1279_v10  ;;  %v1498_v2 = vadd.f32 1.0, %v14365_v61  ;;  %14386 = vrcp.f32 %v1489_v48  ;;  %v14369_v49 = vpop.eup %14368  ;;  %v16512_v42 = vpop.permute.xlu1 %1633 }
 0x385   : > { %v1397_v29 = vsub.f32 0.0, %v16489_v59  ;;  %v1280_v47 = vmul.f32 %v16313_v1, %v20392_v40  ;;  %v1492_v10 = vadd.f32 1.0, %v14367_v63  ;;  %14388 = vrcp.f32 %v1490_v13  ;;  %v14371_v8 = vpop.eup %14370  ;;  %20394 = vst [vmem:[#allocation67_spill] sm:$0xff] %v16512_v42 }
 0x386   : > { %v1398_v37 = vsub.f32 0.0, %v16492_v5  ;;  %v16502_v12 = vadd.f32 %v16335_v28, %v1321_v11  ;;  %14390 = vrcp.f32 %v1498_v2  ;;  %v1493_v33 = vadd.f32 1.0, %v14369_v49  ;;  %v14373_v61 = vpop.eup %14372 }
 0x387   : > { %v16504_v9 = vmul.f32 1.442695, %v1397_v29  ;;  %v1322_v18 = vmul.f32 %v16321_v36, %v1280_v47  ;;  %v1499_v11 = vadd.f32 1.0, %v14371_v8  ;;  %14392 = vrcp.f32 %v1491_v30  ;;  %v14375_v63 = vpop.eup %14374 }
 0x388   : > { %v16509_v40 = vmul.f32 1.442695, %v1398_v37  ;;  %v1399_v48 = vsub.f32 0.0, %v16502_v12  ;;  %v20396_v29 = vsub.f32 %v16083_v14, %v16252_v50  ;;  %v1494_v2 = vadd.f32 1.0, %v14373_v61 }
 0x389   : > { %v16515_v13 = vadd.f32 %v16335_v28, %v1322_v18  ;;  %14394 = vrcp.f32 %v1492_v10  ;;  %v20397_v49 = vsub.f32 %v16103_v31, %v16252_v50  ;;  %v14377_v8 = vpop.eup %14376  ;;  %v1567_v30 = vmul.f32 %v14375_v63, %v16360_v26 }
 0x38a   : > { %v1281_v47 = vmul.f32 %v16313_v1, %v20396_v29  ;;  %v16521_v37 = vmul.f32 1.442695, %v1399_v48  ;;  %14396 = vrcp.f32 %v1499_v11  ;;  %v14379_v7 = vpop.eup %14378  ;;  %v1500_v29 = vadd.f32 1.0, %v14377_v8 }
 0x38b   : > { %20395 = vst [vmem:[#allocation68_spill] sm:$0xff] %v16515_v13  ;;  %v1282_v27 = vmul.f32 %v16313_v1, %v20397_v49  ;;  %v1400_v18 = vsub.f32 0.0, %v16515_v13  ;;  %14398 = vrcp.f32 %v1493_v33  ;;  %v20398_v48 = vsub.f32 %v16108_v41, %v16252_v50  ;;  %v14381_v61 = vpop.eup %14380  ;;  %v16539_v13 = vpop.permute.xlu0 %1638 }
 0x38c   : > { %v1323_v14 = vmul.f32 %v16321_v36, %v1281_v47  ;;  %v1783_v49 = vmul.f32 %v16512_v42, %v1567_v30  ;;  %v1501_v26 = vadd.f32 1.0, %v14379_v7  ;;  %14400 = vrcp.f32 %v1494_v2  ;;  %v14383_v63 = vpop.eup %14382  ;;  %20399 = vst [vmem:[#allocation69_spill] sm:$0xff] %v16539_v13 }
 0x38d   : > { %v1324_v10 = vmul.f32 %v16321_v36, %v1282_v27  ;;  %v1283_v31 = vmul.f32 %v16313_v1, %v20398_v48  ;;  %v16536_v11 = vmul.f32 1.442695, %v1400_v18  ;;  %v1568_v47 = vmul.f32 %v14381_v61, %v16382_v21  ;;  %v14385_v33 = vpop.eup %14384  ;;  %v16547_v48 = vpop.permute.xlu1 %1643 }
 0x38e   : > { %14402 = vrcp.f32 %v1500_v29  ;;  %v16542_v27 = vadd.f32 %v16335_v28, %v1323_v14  ;;  %v12091_v8 = vpack.c.bf16 %v1783_v49, %v1783_v49  ;;  %20400 = vst [vmem:[#allocation70_spill] sm:$0xff] %v16547_v48  ;;  %v1560_v7 = vmul.f32 %v14383_v63, %v16351_v3  ;;  %v14387_v21 = vpop.eup %14386 }
 0x38f   : > { %v16545_v41 = vadd.f32 %v16335_v28, %v1324_v10  ;;  %14404 = vrcp.f32 %v1501_v26  ;;  %v16551_v2 = vmul.f32 %v16321_v36, %v1283_v31  ;;  %v1784_v30 = vmul.f32 %v16539_v13, %v1568_v47  ;;  %v14389_v29 = vpop.eup %14388 }
 0x390   : > { %v1569_v18 = vmul.f32 %v14385_v33, %v16394_v0  ;;  %14406 = vpow2.f32 %v16460_v53  ;;  %v2009_v10 = vshrl.u32 %v12091_v8, 16  ;;  %v2012_v61 = vshll.u32 %v12091_v8, 16  ;;  %v14391_v3 = vpop.eup %14390 }
 0x391   : > { %v1561_v49 = vmul.f32 %v14387_v21, %v16354_v45  ;;  %14408 = vpow2.f32 %v16469_v57  ;;  %v12092_v26 = vpack.c.bf16 %v1784_v30, %v1784_v30  ;;  %v1562_v63 = vmul.f32 %v14389_v29, %v16357_v23  ;;  %v14393_v0 = vpop.eup %14392  ;;  %v16568_v30 = vpop.permute.xlu0 %1648 }
 0x392   : > { %v1785_v31 = vmul.f32 %v16547_v48, %v1569_v18  ;;  %v16562_v47 = vmul.f32 %v16409_v52, %v1560_v7  ;;  %v2011_v53 = vrot.slane %v2009_v10, 6  ;;  %v2014_v33 = vrot.slane %v2012_v61, 7  ;;  %20401 = vst [vmem:[#allocation71_spill] sm:$0xff] %v16568_v30  ;;  %v16574_v10 = vpop.permute.xlu1 %1653 }
 0x393   : > { %v1570_v14 = vmul.f32 %v14391_v3, %v16403_v38  ;;  %v16566_v8 = vmul.f32 %v16449_v35, %v1561_v49  ;;  %v14395_v45 = vpop.eup %14394  ;;  %v2019_v21 = vshrl.u32 %v12092_v26, 16  ;;  %v2022_v57 = vshll.u32 %v12092_v26, 16  ;;  %20402 = vst [vmem:[#allocation72_spill] sm:$0xff] %v16574_v10 }
 0x394   : > { %v12093_v13 = vpack.c.bf16 %v1785_v31, %v1785_v31  ;;  %v1563_v18 = vmul.f32 %v14393_v0, %v16363_v39  ;;  %v14397_v23 = vpop.eup %14396  ;;  %v16571_v29 = vor.u32 %v2014_v33, %v2011_v53  ;;  %v1564_v38 = vmul.f32 %v14395_v45, %v16366_v20 }
 0x395   : > { %v1786_v7 = vmul.f32 %v16568_v30, %v1570_v14  ;;  %v16578_v61 = vmul.f32 %v16416_v16, %v1562_v63  ;;  %v14399_v49 = vpop.eup %14398  ;;  %v2021_v3 = vrot.slane %v2019_v21, 6  ;;  %v2024_v26 = vrot.slane %v2022_v57, 7 }
 0x396   : > { %v2029_v31 = vshrl.u32 %v12093_v13, 16  ;;  %v2032_v48 = vshll.u32 %v12093_v13, 16  ;;  %v14401_v42 = vpop.eup %14400  ;;  %v20403_v39 = vmov 0  ;;  %v2017_v14 = vrot.slane %v16571_v29, 4 }
 0x397   : > { %v20404_v39 = vsel %vm16582_vm14, 4294967295, %v20403_v39  ;;  %v12094_v0 = vpack.c.bf16 %v1786_v7, %v1786_v7  ;;  %v1571_v20 = vmul.f32 %v14397_v23, %v16425_v32  ;;  %v1565_v63 = vmul.f32 %v14399_v49, %v16369_v4  ;;  %v16594_v4 = vpop.permute.xlu0 %1658 }
 0x398   : > { %20405 = vst [vmem:[#allocation73_spill] sm:$0xff] %v20404_v39  ;;  %v14403_v53 = vpop.eup %14402  ;;  %v2025_v33 = vor.u32 %v2024_v26, %v2021_v3  ;;  %v2031_v45 = vrot.slane %v2029_v31, 6  ;;  %v2034_v21 = vrot.slane %v2032_v48, 7  ;;  %v1566_v13 = vmul.f32 %v14401_v42, %v16373_v46  ;;  %20406 = vst [vmem:[#allocation74_spill] sm:$0xff] %v16594_v4  ;;  %v16599_v31 = vpop.permute.xlu1 %1663 }
 0x399   : > { %v14405_v57 = vpop.eup %14404  ;;  %v2039_v30 = vshrl.u32 %v12094_v0, 16  ;;  %v2042_v16 = vshll.u32 %v12094_v0, 16  ;;  %v1787_v35 = vmul.f32 %v16574_v10, %v1571_v20  ;;  %v1572_v52 = vmul.f32 %v14403_v53, %v16433_v19  ;;  %20407 = vst [vmem:[#allocation75_spill] sm:$0xff] %v16599_v31 }
 0x39a   : > { %v14407_v55 = vpop.eup %14406  ;;  %v2026_v7 = vsel %vm16582_vm14, %v2017_v14, %v2025_v33  ;;  %v2027_v32 = vrot.slane %v2025_v33, 4  ;;  %v2035_v23 = vor.u32 %v2034_v21, %v2031_v45  ;;  %v1573_v49 = vmul.f32 %v14405_v57, %v16438_v56 }
 0x39b   : > { %v14409_v48 = vpop.eup %14408  ;;  %2345 = vst.msk [vmem:[#allocation2 + $0x28] sm:$0xf] %vm1812_vm12, %v2026_v7  ;;  %v2041_v42 = vrot.slane %v2039_v30, 6  ;;  %v2044_v46 = vrot.slane %v2042_v16, 7  ;;  %v12095_v3 = vpack.c.bf16 %v1787_v35, %v1787_v35  ;;  %v1788_v26 = vmul.f32 %v16594_v4, %v1572_v52 }
 0x39c   : > { %v2036_v19 = vsel %vm16582_vm14, %v2027_v32, %v2035_v23  ;;  %v2037_v14 = vrot.slane %v2035_v23, 4  ;;  %v1789_v0 = vmul.f32 %v16599_v31, %v1573_v49  ;;  %v1502_v20 = vadd.f32 1.0, %v14407_v55 }
 0x39d   : > { %2346 = vst.msk [vmem:[#allocation2 + $0x2c] sm:$0xf] %vm1812_vm12, %v2036_v19  ;;  %v2045_v56 = vor.u32 %v2044_v46, %v2041_v42  ;;  %v2049_v53 = vshrl.u32 %v12095_v3, 16  ;;  %v2052_v33 = vshll.u32 %v12095_v3, 16  ;;  %v12096_v45 = vpack.c.bf16 %v1788_v26, %v1788_v26 }
 0x39e   : > { %v12097_v30 = vpack.c.bf16 %v1789_v0, %v1789_v0  ;;  %14410 = vrcp.f32 %v1502_v20  ;;  %v1503_v16 = vadd.f32 1.0, %v14409_v48  ;;  %v1779_v52 = vmul.f32 %v16455_v15, %v1563_v18 }
 0x39f   : > { %v2046_v35 = vsel %vm16582_vm14, %v2037_v14, %v2045_v56  ;;  %v2047_v21 = vrot.slane %v2045_v56, 4  ;;  %v2051_v57 = vrot.slane %v2049_v53, 6  ;;  %v2054_v7 = vrot.slane %v2052_v33, 7 }
 0x3a0   : > { %2347 = vst.msk [vmem:[#allocation2 + $0x30] sm:$0xf] %vm1812_vm12, %v2046_v35  ;;  %v2059_v55 = vshrl.u32 %v12096_v45, 16  ;;  %v2062_v32 = vshll.u32 %v12096_v45, 16  ;;  %v2069_v23 = vshrl.u32 %v12097_v30, 16  ;;  %v2072_v49 = vshll.u32 %v12097_v30, 16 }
 0x3a1   : > { %v2055_v42 = vor.u32 %v2054_v7, %v2051_v57  ;;  %14412 = vrcp.f32 %v1503_v16  ;;  %v1780_v46 = vmul.f32 %v16477_v43, %v1564_v38  ;;  %v1781_v48 = vmul.f32 %v16484_v58, %v1565_v63 }
 0x3a2   : > { %v2061_v3 = vrot.slane %v2059_v55, 6  ;;  %v2064_v18 = vrot.slane %v2062_v32, 7  ;;  %v2071_v26 = vrot.slane %v2069_v23, 6  ;;  %v2074_v19 = vrot.slane %v2072_v49, 7 }
 0x3a3   : > { %v2056_v14 = vsel %vm16582_vm14, %v2047_v21, %v2055_v42  ;;  %v2057_v0 = vrot.slane %v2055_v42, 4  ;;  %v1782_v20 = vmul.f32 %v16507_v54, %v1566_v13  ;;  %14414 = vpow2.f32 %v16486_v62 }
 0x3a4   : > { %2348 = vst.msk [vmem:[#allocation2 + $0x34] sm:$0xf] %vm1812_vm12, %v2056_v14  ;;  %v2065_v56 = vor.u32 %v2064_v18, %v2061_v3  ;;  %v16616_v53 = vor.u32 %v2074_v19, %v2071_v26  ;;  %v12084_v38 = vpack.c.bf16 %v16562_v47, %v16562_v47  ;;  %v12085_v63 = vpack.c.bf16 %v16566_v8, %v16566_v8 }
 0x3a5   : > { %v12086_v33 = vpack.c.bf16 %v16578_v61, %v16578_v61  ;;  %v12087_v45 = vpack.c.bf16 %v1779_v52, %v1779_v52  ;;  %v12088_v30 = vpack.c.bf16 %v1780_v46, %v1780_v46  ;;  %v12089_v16 = vpack.c.bf16 %v1781_v48, %v1781_v48  ;;  %v16634_v48 = vpop.permute.xlu0 %1668 }
 0x3a6   : > { %v2066_v62 = vsel %vm16582_vm14, %v2057_v0, %v2065_v56  ;;  %v2067_v13 = vrot.slane %v2065_v56, 4  ;;  %v12090_v21 = vpack.c.bf16 %v1782_v20, %v1782_v20  ;;  %14416 = vpow2.f32 %v16504_v9  ;;  %20408 = vst [vmem:[#allocation76_spill] sm:$0xff] %v16634_v48 }
 0x3a7   : > { %2349 = vst.msk [vmem:[#allocation2 + $0x38] sm:$0xf] %vm1812_vm12, %v2066_v62  ;;  %v1940_v47 = vshrl.u32 %v12084_v38, 16  ;;  %v1943_v57 = vshll.u32 %v12084_v38, 16  ;;  %v1949_v8 = vshrl.u32 %v12085_v63, 16  ;;  %v1952_v52 = vshll.u32 %v12085_v63, 16  ;;  %v16639_v62 = vpop.permute.xlu1 %1673 }
 0x3a8   : > { %v14411_v7 = vpop.eup %14410  ;;  %v2076_v61 = vsel %vm16582_vm14, %v2067_v13, %v16616_v53  ;;  %v1959_v55 = vshrl.u32 %v12086_v33, 16  ;;  %v1962_v32 = vshll.u32 %v12086_v33, 16  ;;  %v1969_v49 = vshrl.u32 %v12087_v45, 16  ;;  %20409 = vst [vmem:[#allocation77_spill] sm:$0xff] %v16639_v62 }
 0x3a9   : > { %2350 = vst.msk [vmem:[#allocation2 + $0x3c] sm:$0xf] %vm1812_vm12, %v2076_v61  ;;  %v1574_v23 = vmul.f32 %v14411_v7, %v16443_v22  ;;  %v1972_v42 = vshll.u32 %v12087_v45, 16  ;;  %v1979_v46 = vshrl.u32 %v12088_v30, 16  ;;  %v1982_v9 = vshll.u32 %v12088_v30, 16 }
 0x3aa   : > { %v1989_v3 = vshrl.u32 %v12089_v16, 16  ;;  %v1992_v18 = vshll.u32 %v12089_v16, 16  ;;  %v1999_v26 = vshrl.u32 %v12090_v21, 16  ;;  %v2002_v0 = vshll.u32 %v12090_v21, 16 }
 0x3ab   : > { %v14413_v19 = vpop.eup %14412  ;;  %v1790_v14 = vmul.f32 %v16634_v48, %v1574_v23  ;;  %14418 = vpow2.f32 %v16509_v40  ;;  %v1942_v20 = vrot.slane %v1940_v47, 6  ;;  %v1945_v38 = vrot.slane %v1943_v57, 7 }
 0x3ac   : > { %v1575_v56 = vmul.f32 %v14413_v19, %v16453_v25  ;;  %v1951_v22 = vrot.slane %v1949_v8, 6  ;;  %v1954_v63 = vrot.slane %v1952_v52, 7  ;;  %v1961_v30 = vrot.slane %v1959_v55, 6 }
 0x3ad   : > { %v14415_v33 = vpop.eup %14414  ;;  %v12098_v45 = vpack.c.bf16 %v1790_v14, %v1790_v14  ;;  %v1964_v13 = vrot.slane %v1962_v32, 7  ;;  %v1971_v16 = vrot.slane %v1969_v49, 6  ;;  %v1974_v23 = vrot.slane %v1972_v42, 7 }
 0x3ae   : > { %v1791_v7 = vmul.f32 %v16639_v62, %v1575_v56  ;;  %v1504_v61 = vadd.f32 1.0, %v14415_v33  ;;  %v1981_v21 = vrot.slane %v1979_v46, 6  ;;  %v1984_v47 = vrot.slane %v1982_v9, 7 }
 0x3af   : > { %v2079_v35 = vshrl.u32 %v12098_v45, 16  ;;  %v2082_v40 = vshll.u32 %v12098_v45, 16  ;;  %v1991_v48 = vrot.slane %v1989_v3, 6  ;;  %v1994_v57 = vrot.slane %v1992_v18, 7 }
 0x3b0   : > { %v12099_v25 = vpack.c.bf16 %v1791_v7, %v1791_v7  ;;  %14420 = vrcp.f32 %v1504_v61  ;;  %v2001_v8 = vrot.slane %v1999_v26, 6  ;;  %v14417_v52 = vpop.eup %14416  ;;  %v2004_v31 = vrot.slane %v2002_v0, 7 }
 0x3b1   : > { %v2081_v19 = vrot.slane %v2079_v35, 6  ;;  %v2084_v14 = vrot.slane %v2082_v40, 7  ;;  %14422 = vpow2.f32 %v16521_v37  ;;  %v1505_v49 = vadd.f32 1.0, %v14417_v52  ;;  %v2335_v40 = vld [vmem:[#allocation2 + $0x8] sm:$0xe] }
 0x3b2   : > { %v2089_v55 = vshrl.u32 %v12099_v25, 16  ;;  %v2092_v32 = vshll.u32 %v12099_v25, 16  ;;  %v1946_v56 = vor.u32 %v1945_v38, %v1942_v20  ;;  %v1955_v46 = vor.u32 %v1954_v63, %v1951_v22 }
 0x3b3   : > { %v2085_v42 = vor.u32 %v2084_v14, %v2081_v19  ;;  %v1965_v33 = vor.u32 %v1964_v13, %v1961_v30  ;;  %v1975_v45 = vor.u32 %v1974_v23, %v1971_v16  ;;  %14424 = vrcp.f32 %v1505_v49 }
 0x3b4   : > { %v2091_v9 = vrot.slane %v2089_v55, 6  ;;  %v2094_v3 = vrot.slane %v2092_v32, 7  ;;  %v1985_v7 = vor.u32 %v1984_v47, %v1981_v21  ;;  %v20410_v26 = vrot.slane %v16616_v53, 4 }
 0x3b5   : > { %v14419_v18 = vpop.eup %14418  ;;  %v2087_v0 = vrot.slane %v2085_v42, 4  ;;  %v1995_v37 = vor.u32 %v1994_v57, %v1991_v48  ;;  %v2005_v61 = vor.u32 %v2004_v31, %v2001_v8  ;;  %14426 = vpow2.f32 %v16536_v11 }
 0x3b6   : > { %v2086_v35 = vsel %vm16582_vm14, %v20410_v26, %v2085_v42  ;;  %v16648_v20 = vor.u32 %v2094_v3, %v2091_v9  ;;  %v1506_v38 = vadd.f32 1.0, %v14419_v18  ;;  %v1947_v22 = vrot.slane %v1946_v56, 4 }
 0x3b7   : > { %2351 = vst.msk [vmem:[#allocation2 + $0x40] sm:$0xf] %vm1812_vm12, %v2086_v35  ;;  %v1957_v63 = vrot.slane %v1955_v46, 4  ;;  %v1967_v30 = vrot.slane %v1965_v33, 4  ;;  %v1977_v13 = vrot.slane %v1975_v45, 4  ;;  %v1987_v16 = vrot.slane %v1985_v7, 4 }
 0x3b8   : > { %v2096_v53 = vsel %vm16582_vm14, %v2087_v0, %v16648_v20  ;;  %v2097_v48 = vrot.slane %v16648_v20, 4  ;;  %14428 = vrcp.f32 %v1506_v38  ;;  %v1997_v31 = vrot.slane %v1995_v37, 4 }
 0x3b9   : > { %2352 = vst.msk [vmem:[#allocation2 + $0x44] sm:$0xf] %vm1812_vm12, %v2096_v53  ;;  %v2007_v23 = vrot.slane %v2005_v61, 4  ;;  %v2336_v21 = vsel %vm16036_vm8, %v1946_v56, %v2335_v40  ;;  %v20411_v11 = vsub.f32 0.0, %v16542_v27  ;;  %v1956_v25 = vsel %vm16582_vm14, %v1947_v22, %v1955_v46  ;;  %v16681_v56 = vpop.permute.xlu0 %1678  ;;  %v16712_v22 = vpop.permute.xlu1 %1683 }
 0x3ba   : > { %v14421_v57 = vpop.eup %14420  ;;  %v1966_v8 = vsel %vm16582_vm14, %v1957_v63, %v1965_v33  ;;  %v1976_v52 = vsel %vm16582_vm14, %v1967_v30, %v1975_v45  ;;  %v1986_v19 = vsel %vm16582_vm14, %v1977_v13, %v1985_v7  ;;  %v1996_v24 = vsel %vm16582_vm14, %v1987_v16, %v1995_v37  ;;  %2337 = vst [vmem:[#allocation2 + $0x8] sm:$0xe] %v2336_v21 }
 0x3bb   : > { %v1458_v47 = vmul.f32 1.442695, %v20411_v11  ;;  %2338 = vst.msk [vmem:[#allocation2 + $0xc] sm:$0xf] %vm1812_vm12, %v1956_v25  ;;  %v14423_v14 = vpop.eup %14422  ;;  %v1576_v55 = vmul.f32 %v14421_v57, %v16463_v6  ;;  %v2006_v32 = vsel %vm16582_vm14, %v1997_v31, %v2005_v61  ;;  %v2016_v49 = vsel %vm16582_vm14, %v2007_v23, %v16571_v29  ;;  %2339 = vst.msk [vmem:[#allocation2 + $0x10] sm:$0xf] %vm1812_vm12, %v1966_v8 }
 0x3bc   : > { %2340 = vst.msk [vmem:[#allocation2 + $0x14] sm:$0xf] %vm1812_vm12, %v1976_v52  ;;  %2341 = vst.msk [vmem:[#allocation2 + $0x18] sm:$0xf] %vm1812_vm12, %v1986_v19  ;;  %v1507_v42 = vadd.f32 1.0, %v14423_v14  ;;  %v1402_v6 = vsub.f32 0.0, %v16545_v41  ;;  %v16688_v29 = vadd.f32 %v16335_v28, %v16551_v2  ;;  %v20413_v46 = vsub.f32 %v16119_v51, %v16252_v50 }
 0x3bd   : > { %14430 = vpow2.f32 %v1458_v47  ;;  %2342 = vst.msk [vmem:[#allocation2 + $0x1c] sm:$0xf] %vm1812_vm12, %v1996_v24  ;;  %20412 = vst [vmem:[#allocation78_spill] sm:$0xff] %v16681_v56  ;;  %v1792_v45 = vmul.f32 %v16681_v56, %v1576_v55  ;;  %v20414_v9 = vsub.f32 %v16127_v60, %v16252_v50  ;;  %v20415_v7 = vsub.f32 %v16135_v17, %v16252_v50  ;;  %v14425_v51 = vpop.eup %14424  ;;  %v16727_v8 = vpop.permute.xlu0 %1688 }
 0x3be   : > { %2343 = vst.msk [vmem:[#allocation2 + $0x20] sm:$0xf] %vm1812_vm12, %v2006_v32  ;;  %2344 = vst.msk [vmem:[#allocation2 + $0x24] sm:$0xf] %vm1812_vm12, %v2016_v49  ;;  %v1284_v33 = vmul.f32 %v16313_v1, %v20413_v46  ;;  %v20416_v2 = vsub.f32 %v16143_v34, %v16252_v50  ;;  %14432 = vrcp.f32 %v1507_v42  ;;  %v1460_v35 = vmul.f32 1.442695, %v1402_v6 }
 0x3bf   : > { %v1285_v3 = vmul.f32 %v16313_v1, %v20414_v9  ;;  %v1286_v18 = vmul.f32 %v16313_v1, %v20415_v7  ;;  %v1403_v0 = vsub.f32 0.0, %v16688_v29  ;;  %v12100_v60 = vpack.c.bf16 %v1792_v45, %v1792_v45  ;;  %v14427_v38 = vpop.eup %14426  ;;  %20417 = vst [vmem:[#allocation79_spill] sm:$0xff] %v16712_v22  ;;  %20418 = vst [vmem:[#allocation80_spill] sm:$0xff] %v16727_v8 }
 0x3c0   : > { %v1287_v26 = vmul.f32 %v16313_v1, %v20416_v2  ;;  %v1326_v37 = vmul.f32 %v16321_v36, %v1284_v33  ;;  %v1577_v61 = vmul.f32 %v14425_v51, %v16489_v59  ;;  %14434 = vpow2.f32 %v1460_v35 }
 0x3c1   : > { %v1327_v40 = vmul.f32 %v16321_v36, %v1285_v3  ;;  %v1328_v17 = vmul.f32 %v16321_v36, %v1286_v18  ;;  %v1462_v34 = vmul.f32 1.442695, %v1403_v0  ;;  %v2099_v13 = vshrl.u32 %v12100_v60, 16 }
 0x3c2   : > { %v16715_v63 = vadd.f32 %v16335_v28, %v1326_v37  ;;  %v1329_v30 = vmul.f32 %v16321_v36, %v1287_v26  ;;  %v2102_v16 = vshll.u32 %v12100_v60, 16  ;;  %v1793_v53 = vmul.f32 %v16712_v22, %v1577_v61  ;;  %v14429_v59 = vpop.eup %14428 }
 0x3c3   : > { %v1508_v31 = vadd.f32 1.0, %v14427_v38  ;;  %14436 = vpow2.f32 %v1462_v34  ;;  %v16721_v21 = vadd.f32 %v16335_v28, %v1327_v40  ;;  %v16724_v11 = vadd.f32 %v16335_v28, %v1328_v17  ;;  %v16749_v17 = vpop.permute.xlu1 %1693 }
 0x3c4   : > { %v1404_v23 = vsub.f32 0.0, %v16715_v63  ;;  %v2101_v47 = vrot.slane %v2099_v13, 6  ;;  %v2104_v25 = vrot.slane %v2102_v16, 7  ;;  %v12101_v57 = vpack.c.bf16 %v1793_v53, %v1793_v53 }
 0x3c5   : > { %v1578_v36 = vmul.f32 %v14429_v59, %v16492_v5  ;;  %14438 = vrcp.f32 %v1508_v31  ;;  %v1405_v19 = vsub.f32 0.0, %v16721_v21  ;;  %v1406_v24 = vsub.f32 0.0, %v16724_v11  ;;  %v16756_v31 = vld [vmem:[#allocation12] ss:$0 sm:$0xff] }
 0x3c6   : > { %v1464_v52 = vmul.f32 1.442695, %v1404_v23  ;;  %v2105_v55 = vor.u32 %v2104_v25, %v2101_v47  ;;  %v2109_v32 = vshrl.u32 %v12101_v57, 16  ;;  %v2112_v49 = vshll.u32 %v12101_v57, 16 }
 0x3c7   : > { %v14431_v14 = vpop.eup %14430  ;;  %v1794_v42 = vmul.f32 %v16727_v8, %v1578_v36  ;;  %v1466_v46 = vmul.f32 1.442695, %v1405_v19  ;;  %v1468_v33 = vmul.f32 1.442695, %v1406_v24  ;;  %v16738_v2 = vadd.f32 %v16335_v28, %v1329_v30  ;;  %v20423_v24 = vld [vmem:[#allocation53_spill] sm:$0xff] }
 0x3c8   : > { %v1509_v6 = vadd.f32 1.0, %v14431_v14  ;;  %14440 = vpow2.f32 %v1464_v52  ;;  %v2106_v5 = vsel %vm16582_vm14, %v2097_v48, %v2105_v55  ;;  %v2107_v45 = vrot.slane %v2105_v55, 4  ;;  %v14433_v7 = vpop.eup %14432  ;;  %v20420_v48 = vld [vmem:[#allocation52_spill] sm:$0xff]  ;;  %v16760_v52 = vld [vmem:[#allocation13] ss:$0 sm:$0xff] }
 0x3c9   : > { %v2111_v9 = vrot.slane %v2109_v32, 6  ;;  %v2114_v3 = vrot.slane %v2112_v49, 7  ;;  %2353 = vst.msk [vmem:[#allocation2 + $0x48] sm:$0xf] %vm1812_vm12, %v2106_v5  ;;  %v12102_v18 = vpack.c.bf16 %v1794_v42, %v1794_v42  ;;  %v20419_v26 = vsub.f32 %v16151_v44, %v16252_v50  ;;  %20422 = vst [vmem:[#allocation52_spill] sm:$0xff] %v16749_v17  ;;  %v20425_v42 = vld [vmem:[#allocation68_spill] sm:$0xff] }
 0x3ca   : > { %14442 = vrcp.f32 %v1509_v6  ;;  %v1579_v35 = vmul.f32 %v14433_v7, %v16502_v12  ;;  %v20421_v0 = vsub.f32 %v20420_v48, %v16252_v50  ;;  %v14435_v60 = vpop.eup %14434  ;;  %v1407_v28 = vsub.f32 0.0, %v16738_v2 }
 0x3cb   : > { %v1288_v51 = vmul.f32 %v16313_v1, %v20419_v26  ;;  %v2115_v20 = vor.u32 %v2114_v3, %v2111_v9  ;;  %14444 = vpow2.f32 %v1466_v46  ;;  %v2119_v61 = vshrl.u32 %v12102_v18, 16 }
 0x3cc   : > { %v1289_v37 = vmul.f32 %v16313_v1, %v20421_v0  ;;  %v2122_v40 = vshll.u32 %v12102_v18, 16  ;;  %14446 = vpow2.f32 %v1468_v33  ;;  %v1795_v12 = vmul.f32 %v16749_v17, %v1579_v35 }
 0x3cd   : > { %v2116_v44 = vsel %vm16582_vm14, %v2107_v45, %v2115_v20  ;;  %v2117_v38 = vrot.slane %v2115_v20, 4  ;;  %v1510_v34 = vadd.f32 1.0, %v14435_v60  ;;  %v14437_v30 = vpop.eup %14436  ;;  %v2121_v13 = vrot.slane %v2119_v61, 6  ;;  %v16772_v45 = vpop.permute.xlu0 %1698 }
 0x3ce   : > { %2354 = vst.msk [vmem:[#allocation2 + $0x4c] sm:$0xf] %vm1812_vm12, %v2116_v44  ;;  %v2124_v16 = vrot.slane %v2122_v40, 7  ;;  %v1470_v53 = vmul.f32 1.442695, %v1407_v28  ;;  %v1330_v59 = vmul.f32 %v16756_v31, %v1288_v51  ;;  %v12103_v23 = vpack.c.bf16 %v1795_v12, %v1795_v12  ;;  %20426 = vst [vmem:[#allocation53_spill] sm:$0xff] %v16772_v45 }
 0x3cf   : > { %14448 = vrcp.f32 %v1510_v34  ;;  %v1511_v47 = vadd.f32 1.0, %v14437_v30  ;;  %v1331_v25 = vmul.f32 %v16756_v31, %v1289_v37  ;;  %v14439_v57 = vpop.eup %14438  ;;  %v20424_v14 = vsub.f32 %v20423_v24, %v16252_v50  ;;  %v20427_v37 = vld [vmem:[#allocation54_spill] sm:$0xff] }
 0x3d0   : > { %v2125_v36 = vor.u32 %v2124_v16, %v2121_v13  ;;  %14450 = vpow2.f32 %v1470_v53  ;;  %v16763_v19 = vadd.f32 %v16760_v52, %v1330_v59  ;;  %v2129_v32 = vshrl.u32 %v12103_v23, 16 }
 0x3d1   : > { %v1290_v55 = vmul.f32 %v16313_v1, %v20424_v14  ;;  %v2132_v49 = vshll.u32 %v12103_v23, 16  ;;  %v1580_v6 = vmul.f32 %v14439_v57, %v20425_v42  ;;  %14452 = vrcp.f32 %v1511_v47  ;;  %v16792_v47 = vpop.permute.xlu1 %1703 }
 0x3d2   : > { %v14441_v46 = vpop.eup %14440  ;;  %v2126_v33 = vsel %vm16582_vm14, %v2117_v38, %v2125_v36  ;;  %v2127_v5 = vrot.slane %v2125_v36, 4  ;;  %v1408_v9 = vsub.f32 0.0, %v16763_v19  ;;  %v16776_v3 = vadd.f32 %v16760_v52, %v1331_v25  ;;  %20429 = vst [vmem:[#allocation68_spill] sm:$0xff] %v16792_v47 }
 0x3d3   : > { %2355 = vst.msk [vmem:[#allocation2 + $0x50] sm:$0xf] %vm1812_vm12, %v2126_v33  ;;  %v2131_v7 = vrot.slane %v2129_v32, 6  ;;  %v2134_v18 = vrot.slane %v2132_v49, 7  ;;  %v1796_v26 = vmul.f32 %v16772_v45, %v1580_v6  ;;  %v1512_v51 = vadd.f32 1.0, %v14441_v46 }
 0x3d4   : > { %v14443_v20 = vpop.eup %14442  ;;  %v1472_v35 = vmul.f32 1.442695, %v1408_v9  ;;  %v1409_v48 = vsub.f32 0.0, %v16776_v3  ;;  %v1332_v0 = vmul.f32 %v16756_v31, %v1290_v55  ;;  %v20428_v60 = vsub.f32 %v20427_v37, %v16252_v50 }
 0x3d5   : > { %v14445_v40 = vpop.eup %14444  ;;  %v2135_v28 = vor.u32 %v2134_v18, %v2131_v7  ;;  %v12104_v44 = vpack.c.bf16 %v1796_v26, %v1796_v26  ;;  %v1581_v38 = vmul.f32 %v14443_v20, %v16542_v27  ;;  %14454 = vrcp.f32 %v1512_v51  ;;  %v20431_v18 = vld [vmem:[#allocation55_spill] sm:$0xff] }
 0x3d6   : > { %v1291_v61 = vmul.f32 %v16313_v1, %v20428_v60  ;;  %v14447_v12 = vpop.eup %14446  ;;  %v1513_v34 = vadd.f32 1.0, %v14445_v40  ;;  %14456 = vpow2.f32 %v1472_v35  ;;  %v1474_v30 = vmul.f32 1.442695, %v1409_v48  ;;  %v16812_v60 = vpop.permute.xlu1 %1713 }
 0x3d7   : > { %v16788_v13 = vadd.f32 %v16760_v52, %v1332_v0  ;;  %v2136_v16 = vsel %vm16582_vm14, %v2127_v5, %v2135_v28  ;;  %v2137_v53 = vrot.slane %v2135_v28, 4  ;;  %v2139_v59 = vshrl.u32 %v12104_v44, 16  ;;  %v16799_v5 = vpop.permute.xlu0 %1708  ;;  %20433 = vst [vmem:[#allocation55_spill] sm:$0xff] %v16812_v60 }
 0x3d8   : > { %v2142_v23 = vshll.u32 %v12104_v44, 16  ;;  %2356 = vst.msk [vmem:[#allocation2 + $0x54] sm:$0xf] %vm1812_vm12, %v2136_v16  ;;  %v1797_v27 = vmul.f32 %v16792_v47, %v1581_v38  ;;  %14458 = vrcp.f32 %v1513_v34  ;;  %v1514_v25 = vadd.f32 1.0, %v14447_v12  ;;  %20430 = vst [vmem:[#allocation54_spill] sm:$0xff] %v16799_v5 }
 0x3d9   : > { %v1410_v57 = vsub.f32 0.0, %v16788_v13  ;;  %v14449_v36 = vpop.eup %14448  ;;  %v2141_v24 = vrot.slane %v2139_v59, 6  ;;  %14460 = vpow2.f32 %v1474_v30  ;;  %v1333_v55 = vmul.f32 %v16756_v31, %v1291_v61  ;;  %v20434_v30 = vld [vmem:[#allocation56_spill] sm:$0xff] }
 0x3da   : > { %v2144_v14 = vrot.slane %v2142_v23, 7  ;;  %v14451_v32 = vpop.eup %14450  ;;  %v12105_v49 = vpack.c.bf16 %v1797_v27, %v1797_v27  ;;  %v1582_v42 = vmul.f32 %v14449_v36, %v16545_v41  ;;  %14462 = vrcp.f32 %v1514_v25 }
 0x3db   : > { %v1476_v6 = vmul.f32 1.442695, %v1410_v57  ;;  %v14453_v46 = vpop.eup %14452  ;;  %v1515_v9 = vadd.f32 1.0, %v14451_v32  ;;  %v16802_v7 = vadd.f32 %v16760_v52, %v1333_v55  ;;  %v20432_v26 = vsub.f32 %v20431_v18, %v16252_v50 }
 0x3dc   : > { %v2145_v33 = vor.u32 %v2144_v14, %v2141_v24  ;;  %v2149_v20 = vshrl.u32 %v12105_v49, 16  ;;  %v2152_v35 = vshll.u32 %v12105_v49, 16  ;;  %v1798_v48 = vmul.f32 %v16799_v5, %v1582_v42  ;;  %v16823_v24 = vpop.permute.xlu0 %1718 }
 0x3dd   : > { %v1292_v51 = vmul.f32 %v16313_v1, %v20432_v26  ;;  %v1583_v41 = vmul.f32 %v14453_v46, %v16688_v29  ;;  %14464 = vrcp.f32 %v1515_v9  ;;  %v1411_v61 = vsub.f32 0.0, %v16802_v7  ;;  %20436 = vst [vmem:[#allocation56_spill] sm:$0xff] %v16823_v24 }
 0x3de   : > { %v2146_v0 = vsel %vm16582_vm14, %v2137_v53, %v2145_v33  ;;  %v2147_v37 = vrot.slane %v2145_v33, 4  ;;  %v2151_v40 = vrot.slane %v2149_v20, 6  ;;  %v2154_v28 = vrot.slane %v2152_v35, 7 }
 0x3df   : > { %2357 = vst.msk [vmem:[#allocation2 + $0x58] sm:$0xf] %vm1812_vm12, %v2146_v0  ;;  %v12106_v44 = vpack.c.bf16 %v1798_v48, %v1798_v48  ;;  %v1799_v38 = vmul.f32 %v16812_v60, %v1583_v41  ;;  %v14455_v12 = vpop.eup %14454  ;;  %14466 = vpow2.f32 %v1476_v6  ;;  %v1478_v34 = vmul.f32 1.442695, %v1411_v61 }
 0x3e0   : > { %v1334_v29 = vmul.f32 %v16756_v31, %v1292_v51  ;;  %v20435_v16 = vsub.f32 %v20434_v30, %v16252_v50  ;;  %v14457_v59 = vpop.eup %14456  ;;  %v2155_v23 = vor.u32 %v2154_v28, %v2151_v40  ;;  %v1584_v36 = vmul.f32 %v14455_v12, %v16715_v63  ;;  %v16833_v51 = vpop.permute.xlu1 %1723 }
 0x3e1   : > { %v2159_v27 = vshrl.u32 %v12106_v44, 16  ;;  %v2162_v25 = vshll.u32 %v12106_v44, 16  ;;  %v12107_v57 = vpack.c.bf16 %v1799_v38, %v1799_v38  ;;  %v1516_v14 = vadd.f32 1.0, %v14457_v59  ;;  %20437 = vst [vmem:[#allocation81_spill] sm:$0xff] %v16833_v51 }
 0x3e2   : > { %v1293_v53 = vmul.f32 %v16313_v1, %v20435_v16  ;;  %14468 = vpow2.f32 %v1478_v34  ;;  %v16826_v55 = vadd.f32 %v16760_v52, %v1334_v29  ;;  %v14459_v32 = vpop.eup %14458  ;;  %v2156_v49 = vsel %vm16582_vm14, %v2147_v37, %v2155_v23  ;;  %v16841_v16 = vpop.permute.xlu0 %1728 }
 0x3e3   : > { %v2157_v42 = vrot.slane %v2155_v23, 4  ;;  %v2161_v6 = vrot.slane %v2159_v27, 6  ;;  %v2164_v46 = vrot.slane %v2162_v25, 7  ;;  %v14461_v33 = vpop.eup %14460  ;;  %2358 = vst.msk [vmem:[#allocation2 + $0x5c] sm:$0xf] %vm1812_vm12, %v2156_v49  ;;  %v2169_v9 = vshrl.u32 %v12107_v57, 16 }
 0x3e4   : > { %v2172_v18 = vshll.u32 %v12107_v57, 16  ;;  %v1800_v63 = vmul.f32 %v16823_v24, %v1584_v36  ;;  %v1585_v26 = vmul.f32 %v14459_v32, %v16721_v21  ;;  %v14463_v20 = vpop.eup %14462  ;;  %14470 = vrcp.f32 %v1516_v14  ;;  %20438 = vst [vmem:[#allocation82_spill] sm:$0xff] %v16841_v16  ;;  %v16848_v49 = vpop.permute.xlu1 %1733 }
 0x3e5   : > { %v2165_v35 = vor.u32 %v2164_v46, %v2161_v6  ;;  %v1517_v48 = vadd.f32 1.0, %v14461_v33  ;;  %v1412_v41 = vsub.f32 0.0, %v16826_v55  ;;  %v2171_v0 = vrot.slane %v2169_v9, 6  ;;  %20439 = vst [vmem:[#allocation83_spill] sm:$0xff] %v16848_v49 }
 0x3e6   : > { %v2174_v37 = vrot.slane %v2172_v18, 7  ;;  %v12108_v61 = vpack.c.bf16 %v1800_v63, %v1800_v63  ;;  %v1801_v40 = vmul.f32 %v16833_v51, %v1585_v26  ;;  %v1586_v38 = vmul.f32 %v14463_v20, %v16724_v11  ;;  %v17098_v51 = vld [vmem:[#allocation2 + $0x40] sm:$0xff]  }
 0x3e7   : > { %v2166_v28 = vsel %vm16582_vm14, %v2157_v42, %v2165_v35  ;;  %v2167_v44 = vrot.slane %v2165_v35, 4  ;;  %14472 = vrcp.f32 %v1517_v48  ;;  %v14465_v21 = vpop.eup %14464  ;;  %v1480_v27 = vmul.f32 1.442695, %v1412_v41 }
 0x3e8   : > { %2359 = vst.msk [vmem:[#allocation2 + $0x60] sm:$0xf] %vm1812_vm12, %v2166_v28  ;;  %v2175_v12 = vor.u32 %v2174_v37, %v2171_v0  ;;  %v2179_v34 = vshrl.u32 %v12108_v61, 16  ;;  %v2182_v29 = vshll.u32 %v12108_v61, 16  ;;  %v12109_v30 = vpack.c.bf16 %v1801_v40, %v1801_v40 }
 0x3e9   : > { %v1802_v59 = vmul.f32 %v16841_v16, %v1586_v38  ;;  %v1587_v23 = vmul.f32 %v14465_v21, %v16738_v2  ;;  %v1335_v25 = vmul.f32 %v16756_v31, %v1293_v53  ;;  %v14467_v57 = vpop.eup %14466  ;;  %14474 = vpow2.f32 %v1480_v27  ;;  %v16862_v27 = vpop.permute.xlu0 %1738 }
 0x3ea   : > { %v2176_v11 = vsel %vm16582_vm14, %v2167_v44, %v2175_v12  ;;  %v2177_v36 = vrot.slane %v2175_v12, 4  ;;  %v2181_v14 = vrot.slane %v2179_v34, 6  ;;  %v2184_v32 = vrot.slane %v2182_v29, 7  ;;  %20440 = vst [vmem:[#allocation84_spill] sm:$0xff] %v16862_v27 }
 0x3eb   : > { %2360 = vst.msk [vmem:[#allocation2 + $0x64] sm:$0xf] %vm1812_vm12, %v2176_v11  ;;  %v2189_v42 = vshrl.u32 %v12109_v30, 16  ;;  %v2192_v6 = vshll.u32 %v12109_v30, 16  ;;  %v12110_v46 = vpack.c.bf16 %v1802_v59, %v1802_v59  ;;  %v1803_v33 = vmul.f32 %v16848_v49, %v1587_v23 }
 0x3ec   : > { %v14469_v2 = vpop.eup %14468  ;;  %v2185_v9 = vor.u32 %v2184_v32, %v2181_v14  ;;  %v1518_v18 = vadd.f32 1.0, %v14467_v57  ;;  %v16853_v53 = vadd.f32 %v16760_v52, %v1335_v25  ;;  %v2415_v25 = vld [vmem:[#allocation15 + $0x4] sm:$0xf]  ;;  %v2376_v57 = vld [vmem:[#allocation2] sm:$0xf]  ;;  %v3935_v8 = vshll.u32 %v17098_v51, 16 }
 0x3ed   : > { %v2191_v63 = vrot.slane %v2189_v42, 6  ;;  %v2194_v26 = vrot.slane %v2192_v6, 7  ;;  %v2199_v20 = vshrl.u32 %v12110_v46, 16  ;;  %v2202_v35 = vshll.u32 %v12110_v46, 16  ;;  %v2377_v32 = vld [vmem:[#allocation2 + $0x4] sm:$0xf]  ;;  %v16869_v46 = vpop.permute.xlu1 %1743  ;;  %13987 = vmatprep.subr.msk.bf16.mxu0 %vm2712_vm15, %v2415_v25 }
 0x3ee   : > { %v2186_v48 = vsel %vm16582_vm14, %v2177_v36, %v2185_v9  ;;  %v2187_v41 = vrot.slane %v2185_v9, 4  ;;  %v12111_v0 = vpack.c.bf16 %v1803_v33, %v1803_v33  ;;  %14476 = vrcp.f32 %v1518_v18  ;;  %v14471_v37 = vpop.eup %14470  ;;  %20441 = vst [vmem:[#allocation85_spill] sm:$0xff] %v16869_v46 }
 0x3ef   : > { %2361 = vst.msk [vmem:[#allocation2 + $0x68] sm:$0xf] %vm1812_vm12, %v2186_v48  ;;  %v2195_v61 = vor.u32 %v2194_v26, %v2191_v63  ;;  %v2201_v40 = vrot.slane %v2199_v20, 6  ;;  %v2204_v28 = vrot.slane %v2202_v35, 7  ;;  %v1519_v44 = vadd.f32 1.0, %v14469_v2  ;;  %v20442_v2 = vld [vmem:[#allocation57_spill] sm:$0xff] }
 0x3f0   : > { %v2209_v38 = vshrl.u32 %v12111_v0, 16  ;;  %v2212_v21 = vshll.u32 %v12111_v0, 16  ;;  %v1588_v12 = vmul.f32 %v14471_v37, %v16763_v19  ;;  %v1413_v34 = vsub.f32 0.0, %v16853_v53  ;;  %v16884_v37 = vld [vmem:[#allocation15] sm:$0xf] }
 0x3f1   : > { %v14473_v29 = vpop.eup %14472  ;;  %v2196_v30 = vsel %vm16582_vm14, %v2187_v41, %v2195_v61  ;;  %v2197_v59 = vrot.slane %v2195_v61, 4  ;;  %v2205_v23 = vor.u32 %v2204_v28, %v2201_v40  ;;  %14478 = vrcp.f32 %v1519_v44 }
 0x3f2   : > { %2362 = vst.msk [vmem:[#allocation2 + $0x6c] sm:$0xf] %vm1812_vm12, %v2196_v30  ;;  %v2211_v11 = vrot.slane %v2209_v38, 6  ;;  %v2214_v36 = vrot.slane %v2212_v21, 7  ;;  %v1804_v14 = vmul.f32 %v16862_v27, %v1588_v12  ;;  %v1589_v19 = vmul.f32 %v14473_v29, %v16776_v3  ;;  %v20444_v3 = vld [vmem:[#allocation58_spill] sm:$0xff]  ;;  %v17125_v22 = vld [vmem:[#allocation2 + $0x60] sm:$0xff]  }
 0x3f3   : > { %v2206_v42 = vsel %vm16582_vm14, %v2197_v59, %v2205_v23  ;;  %v2207_v6 = vrot.slane %v2205_v23, 4  ;;  %v1482_v33 = vmul.f32 1.442695, %v1413_v34  ;;  %v20443_v9 = vsub.f32 %v20442_v2, %v16252_v50  ;;  %v14475_v61 = vpop.eup %14474 }
 0x3f4   : > { %2363 = vst.msk [vmem:[#allocation2 + $0x70] sm:$0xf] %vm1812_vm12, %v2206_v42  ;;  %v2215_v63 = vor.u32 %v2214_v36, %v2211_v11  ;;  %v12112_v26 = vpack.c.bf16 %v1804_v14, %v1804_v14  ;;  %v1805_v20 = vmul.f32 %v16869_v46, %v1589_v19  ;;  %v20445_v35 = vsub.f32 %v20444_v3, %v16252_v50  ;;  %v16896_v36 = vld [vmem:[#allocation2 + $0x8] sm:$0xff]   ;;  %v16898_v19 = vpop.permute.xlu0 %1748  ;;  %v16913_v3 = vpop.permute.xlu1 %1753 }
 0x3f5   : > { %v1294_v18 = vmul.f32 %v16313_v1, %v20443_v9  ;;  %14480 = vpow2.f32 %v1482_v33  ;;  %v16882_v0 = vcombine.low %v2376_v57, %v2377_v32  ;;  %v1520_v50 = vadd.f32 1.0, %v14475_v61  ;;  %20446 = vst [vmem:[#allocation57_spill] sm:$0xff] %v16898_v19  ;;  %20447 = vst [vmem:[#allocation58_spill] sm:$0xff] %v16913_v3 }
 0x3f6   : > { %v1295_v48 = vmul.f32 %v16313_v1, %v20445_v35  ;;  %v2216_v40 = vsel %vm16582_vm14, %v2207_v6, %v2215_v63  ;;  %v2217_v28 = vrot.slane %v2215_v63, 4  ;;  %v2219_v44 = vshrl.u32 %v12112_v26, 16 }
 0x3f7   : > { %v1336_v41 = vmul.f32 %v16756_v31, %v1294_v18  ;;  %v2222_v38 = vshll.u32 %v12112_v26, 16  ;;  %2364 = vst.msk [vmem:[#allocation2 + $0x74] sm:$0xf] %vm1812_vm12, %v2216_v40  ;;  %v12113_v1 = vpack.c.bf16 %v1805_v20, %v1805_v20  ;;  %v2714_v59 = vsel %vm2712_vm15, %v2415_v25, 0 }
 0x3f8   : > { %v1337_v12 = vmul.f32 %v16756_v31, %v1295_v48  ;;  %v14477_v34 = vpop.eup %14476  ;;  %v2221_v29 = vrot.slane %v2219_v44, 6  ;;  %14482 = vrcp.f32 %v1520_v50  ;;  %12543 = vmatpush3.bf16.msra.mxu0 %v2714_v59  ;;  %v2511_v42 = vshrl.u32 %v16882_v0, 16 }
 0x3f9   : > { %v16891_v21 = vadd.f32 %v16760_v52, %v1336_v41  ;;  %v2224_v30 = vrot.slane %v2222_v38, 7  ;;  %v2229_v23 = vshrl.u32 %v12113_v1, 16  ;;  %v2232_v57 = vshll.u32 %v12113_v1, 16  ;;  %13988 = vmatprep.subr.msk.bf16.mxu0 %vm2712_vm15, %v16884_v37  ;;  %v16916_v41 = vld [vmem:[#allocation2 + $0x10] sm:$0xff]  }
 0x3fa   : > { %v1590_v11 = vmul.f32 %v14477_v34, %v16788_v13  ;;  %v16902_v31 = vadd.f32 %v16760_v52, %v1337_v12  ;;  %v2513_v2 = vshll.u32 %v16882_v0, 16  ;;  %v2518_v40 = vshll.u32 %v16896_v36, 16 }
 0x3fb   : > { %v2225_v14 = vor.u32 %v2224_v30, %v2221_v29  ;;  %v1414_v32 = vsub.f32 0.0, %v16891_v21  ;;  %v14479_v25 = vpop.eup %14478  ;;  %v2231_v6 = vrot.slane %v2229_v23, 6  ;;  %v2234_v13 = vrot.slane %v2232_v57, 7 }
 0x3fc   : > { %v1806_v33 = vmul.f32 %v16898_v19, %v1590_v11  ;;  %v1591_v63 = vmul.f32 %v14479_v25, %v16802_v7  ;;  %v1415_v35 = vsub.f32 0.0, %v16902_v31  ;;  %v2515_v48 = vrot.slane %v2513_v2, 1 }
 0x3fd   : > { %v2226_v9 = vsel %vm16582_vm14, %v2217_v28, %v2225_v14  ;;  %v2227_v18 = vrot.slane %v2225_v14, 4  ;;  %v1484_v52 = vmul.f32 1.442695, %v1414_v32  ;;  %v2235_v26 = vor.u32 %v2234_v13, %v2231_v6  ;;  %v16925_v14 = vld [vmem:[#allocation2 + $0x18] sm:$0xff]  }
 0x3fe   : > { %2365 = vst.msk [vmem:[#allocation2 + $0x78] sm:$0xf] %vm1812_vm12, %v2226_v9  ;;  %v12114_v20 = vpack.c.bf16 %v1806_v33, %v1806_v33  ;;  %v1807_v61 = vmul.f32 %v16913_v3, %v1591_v63  ;;  %v2522_v28 = vshrl.u32 %v16896_v36, 16  ;;  %v1486_v29 = vmul.f32 1.442695, %v1415_v35  ;;  %v17089_v3 = vld [vmem:[#allocation2 + $0x30] sm:$0xff]  }
 0x3ff   : > { %14484 = vpow2.f32 %v1484_v52  ;;  %v14481_v7 = vpop.eup %14480  ;;  %v2236_v44 = vsel %vm16582_vm14, %v2227_v18, %v2235_v26  ;;  %v2237_v38 = vrot.slane %v2235_v26, 4  ;;  %v2516_v30 = vor.u32 %v2515_v48, %v2511_v42  ;;  %v16930_v42 = vld [vmem:[#allocation2 + $0x20] sm:$0xff]  }
 0x400   : > { %v2239_v1 = vshrl.u32 %v12114_v20, 16  ;;  %v2242_v50 = vshll.u32 %v12114_v20, 16  ;;  %2366 = vst.msk [vmem:[#allocation2 + $0x7c] sm:$0xf] %vm1812_vm12, %v2236_v44  ;;  %v12115_v12 = vpack.c.bf16 %v1807_v61, %v1807_v61  ;;  %v1521_v34 = vadd.f32 1.0, %v14481_v7 }
 0x401   : > { %v2520_v57 = vrot.slane %v2518_v40, 1  ;;  %v2526_v11 = vshll.u32 %v16916_v41, 16  ;;  %v2930_v6 = vsel %vm2712_vm15, %v16884_v37, 0  ;;  %v16936_v37 = vpop.permute.xlu0 %1758  ;;  %v2530_v48 = vshrl.u32 %v16916_v41, 16  ;;  %v16940_v40 = vld [vmem:[#allocation2 + $0x28] sm:$0xff]  }
 0x402   : > { %v2241_v59 = vrot.slane %v2239_v1, 6  ;;  %v2244_v23 = vrot.slane %v2242_v50, 7  ;;  %v2249_v32 = vshrl.u32 %v12115_v12, 16  ;;  %v2252_v25 = vshll.u32 %v12115_v12, 16  ;;  %v14483_v13 = vpop.eup %14482  ;;  %20448 = vst [vmem:[#allocation86_spill] sm:$0xff] %v16936_v37  ;;  %v16949_v12 = vld [vmem:[#allocation2 + $0x30] sm:$0xff]  }
 0x403   : > { %14486 = vrcp.f32 %v1521_v34  ;;  %v2521_v2 = vsel %vm2509_vm2, %v2516_v30, %v2520_v57  ;;  %v2524_v9 = vor.u32 %v2522_v28, %v2520_v57  ;;  %v1592_v52 = vmul.f32 %v14483_v13, %v16826_v55  ;;  %v16945_v44 = vld [vmem:[#allocation15 + $0x8] sm:$0xf] }
 0x404   : > { %v2245_v33 = vor.u32 %v2244_v23, %v2241_v59  ;;  %14488 = vpow2.f32 %v1486_v29  ;;  %v2251_v18 = vrot.slane %v2249_v32, 6  ;;  %v2254_v63 = vrot.slane %v2252_v25, 7  ;;  %12544 = vmatprep.mubr.msk.bf16.mxu0 %vm873_vm1, %v2521_v2 }
 0x405   : > { %v2528_v26 = vrot.slane %v2526_v11, 1  ;;  %v2534_v61 = vshll.u32 %v16925_v14, 16  ;;  %v1808_v55 = vmul.f32 %v16936_v37, %v1592_v52  ;;  %v2542_v50 = vshll.u32 %v16930_v42, 16 }
 0x406   : > { %v2246_v20 = vsel %vm16582_vm14, %v2237_v38, %v2245_v33  ;;  %v2247_v35 = vrot.slane %v2245_v33, 4  ;;  %v2255_v28 = vor.u32 %v2254_v63, %v2251_v18  ;;  %v2538_v59 = vshrl.u32 %v16925_v14, 16 }
 0x407   : > { %2367 = vst.msk [vmem:[#allocation2 + $0x80] sm:$0xf] %vm1812_vm12, %v2246_v20  ;;  %v2529_v7 = vsel %vm2509_vm2, %v2524_v9, %v2528_v26  ;;  %v2532_v38 = vor.u32 %v2530_v48, %v2528_v26  ;;  %v2536_v1 = vrot.slane %v2534_v61, 1  ;;  %v12116_v30 = vpack.c.bf16 %v1808_v55, %v1808_v55  ;;  %v16963_v61 = vld [vmem:[#allocation2 + $0x38] sm:$0xff]  }
 0x408   : > { %12545 = vmatmul.mubr.msk.bf16.vlgmr.msra.gmra.mrb[4].mxu0 %vm873_vm1, %v2529_v7  ;;  %v2256_v29 = vsel %vm16582_vm14, %v2247_v35, %v2255_v28  ;;  %v2546_v23 = vshrl.u32 %v16930_v42, 16  ;;  %v2544_v32 = vrot.slane %v2542_v50, 1  ;;  %v2550_v25 = vshll.u32 %v16940_v40, 16  ;;  %v16965_v7 = vpop.permute.xlu1 %1763 }
 0x409   : > { %v14485_v34 = vpop.eup %14484  ;;  %12581 = vmatpush3.bf16.msra.mxu0 %v2930_v6  ;;  %2368 = vst.msk [vmem:[#allocation2 + $0x84] sm:$0xf] %vm1812_vm12, %v2256_v29  ;;  %v2537_v11 = vsel %vm2509_vm2, %v2532_v38, %v2536_v1  ;;  %v2259_v13 = vshrl.u32 %v12116_v30, 16  ;;  %v2262_v33 = vshll.u32 %v12116_v30, 16  ;;  %v2540_v6 = vor.u32 %v2538_v59, %v2536_v1  ;;  %20449 = vst [vmem:[#allocation87_spill] sm:$0xff] %v16965_v7  ;;  %v16971_v29 = vld [vmem:[#allocation2 + $0x40] sm:$0xff]  }
 0x40a   : > { %v1522_v57 = vadd.f32 1.0, %v14485_v34  ;;  %13989 = vmatprep.subr.msk.bf16.mxu0 %vm2712_vm15, %v16945_v44  ;;  %12548 = vmatprep.mubr.msk.bf16.mxu0 %vm873_vm1, %v2537_v11  ;;  %v2548_v2 = vor.u32 %v2546_v23, %v2544_v32  ;;  %v2558_v9 = vshll.u32 %v16949_v12, 16  ;;  %v2257_v63 = vrot.slane %v2255_v28, 4 }
 0x40b   : > { %v2261_v52 = vrot.slane %v2259_v13, 6  ;;  %v2264_v26 = vrot.slane %v2262_v33, 7  ;;  %v2552_v48 = vrot.slane %v2550_v25, 1  ;;  %v2545_v1 = vsel %vm2509_vm2, %v2540_v6, %v2544_v32 }
 0x40c   : > { %14490 = vrcp.f32 %v1522_v57  ;;  %v2560_v34 = vrot.slane %v2558_v9, 1  ;;  %v2554_v30 = vshrl.u32 %v16940_v40, 16  ;;  %v2562_v23 = vshrl.u32 %v16949_v12, 16 }
 0x40d   : > { %v14487_v18 = vpop.eup %14486  ;;  %v2265_v55 = vor.u32 %v2264_v26, %v2261_v52  ;;  %v2553_v28 = vsel %vm2509_vm2, %v2548_v2, %v2552_v48  ;;  %v2566_v57 = vshll.u32 %v16963_v61, 16  ;;  %v2574_v33 = vshll.u32 %v16971_v29, 16  ;;  %v16981_v52 = vld [vmem:[#allocation2 + $0x48] sm:$0xff]  }
 0x40e   : > { %v14489_v20 = vpop.eup %14488  ;;  %v1593_v35 = vmul.f32 %v14487_v18, %v16853_v53  ;;  %v2556_v11 = vor.u32 %v2554_v30, %v2552_v48  ;;  %v2564_v13 = vor.u32 %v2562_v23, %v2560_v34  ;;  %v16999_v23 = vpop.permute.xlu1 %1773  ;;  %v3968_v10 = vshrl.u32 %v17125_v22, 16 }
 0x40f   : > { %v1523_v38 = vadd.f32 1.0, %v14489_v20  ;;  %v2266_v53 = vsel %vm16582_vm14, %v2257_v63, %v2265_v55  ;;  %v2267_v2 = vrot.slane %v2265_v55, 4  ;;  %v2568_v63 = vrot.slane %v2566_v57, 1  ;;  %20451 = vst [vmem:[#allocation89_spill] sm:$0xff] %v16999_v23 }
 0x410   : > { %v1809_v50 = vmul.f32 %v16965_v7, %v1593_v35  ;;  %12549 = vmatmul.mubr.msk.bf16.gmra.mrb[8].mxu0 %vm873_vm1, %v2545_v1  ;;  %2369 = vst.msk [vmem:[#allocation2 + $0x88] sm:$0xf] %vm1812_vm12, %v2266_v53  ;;  %v2561_v20 = vsel %vm2509_vm2, %v2556_v11, %v2560_v34  ;;  %v2576_v1 = vrot.slane %v2574_v33, 1  ;;  %v2578_v34 = vshrl.u32 %v16971_v29, 16 }
 0x411   : > { %14492 = vrcp.f32 %v1523_v38  ;;  %12552 = vmatprep.mubr.msk.bf16.mxu0 %vm873_vm1, %v2553_v28  ;;  %v16985_v38 = vpop.permute.xlu0 %1768  ;;  %v2569_v48 = vsel %vm2509_vm2, %v2564_v13, %v2568_v63  ;;  %v2570_v28 = vshrl.u32 %v16963_v61, 16  ;;  %v2582_v53 = vshll.u32 %v16981_v52, 16 }
 0x412   : > { %v12117_v59 = vpack.c.bf16 %v1809_v50, %v1809_v50  ;;  %20450 = vst [vmem:[#allocation88_spill] sm:$0xff] %v16985_v38  ;;  %v16989_v50 = vld [vmem:[#allocation2 + $0x50] sm:$0xff]   ;;  %v3970_v58 = vrot.slane %v3968_v10, 1  ;;  %vm5878_vm8 = vcmask 261120  }
 0x413   : > { %v2572_v57 = vor.u32 %v2570_v28, %v2568_v63 }
 0x414   : > { %v2269_v32 = vshrl.u32 %v12117_v59, 16  ;;  %v2272_v25 = vshll.u32 %v12117_v59, 16 }
 0x416   : > { %v14491_v6 = vpop.eup %14490  ;;  %v2271_v9 = vrot.slane %v2269_v32, 6  ;;  %v2274_v18 = vrot.slane %v2272_v25, 7  ;;  %v2580_v32 = vor.u32 %v2578_v34, %v2576_v1  ;;  %v2590_v25 = vshll.u32 %v16989_v50, 16 }
 0x417   : > { %v1594_v26 = vmul.f32 %v14491_v6, %v16891_v21  ;;  %v2586_v34 = vshrl.u32 %v16981_v52, 16 }
 0x418   : > { %v2275_v35 = vor.u32 %v2274_v18, %v2271_v9  ;;  %12553 = vmatmul.mubr.msk.bf16.gmra.mrb[12].mxu0 %vm873_vm1, %v2561_v20  ;;  %v17004_v9 = vld [vmem:[#allocation2 + $0x58] sm:$0xff]   ;;  %v2592_v28 = vrot.slane %v2590_v25, 1 }
 0x419   : > { %v1810_v55 = vmul.f32 %v16985_v38, %v1594_v26  ;;  %12556 = vmatprep.mubr.msk.bf16.mxu0 %vm873_vm1, %v2569_v48  ;;  %v2577_v48 = vsel %vm2509_vm2, %v2572_v57, %v2576_v1 }
 0x41a   : > { %v2276_v21 = vsel %vm16582_vm14, %v2267_v2, %v2275_v35  ;;  %v2584_v2 = vrot.slane %v2582_v53, 1  ;;  %v2277_v18 = vrot.slane %v2275_v35, 4  ;;  %v2594_v35 = vshrl.u32 %v16989_v50, 16 }
 0x41b   : > { %v14493_v30 = vpop.eup %14492  ;;  %2370 = vst.msk [vmem:[#allocation2 + $0x8c] sm:$0xf] %vm1812_vm12, %v2276_v21  ;;  %v12118_v59 = vpack.c.bf16 %v1810_v55, %v1810_v55  ;;  %v17007_v55 = vld [vmem:[#allocation2 + $0x60] sm:$0xff]  }
 0x41c   : > { %v1595_v11 = vmul.f32 %v14493_v30, %v16902_v31  ;;  %v2585_v31 = vsel %vm2509_vm2, %v2580_v32, %v2584_v2  ;;  %v2588_v57 = vor.u32 %v2586_v34, %v2584_v2  ;;  %v17026_v34 = vld [vmem:[#allocation2 + $0x70] sm:$0xff]  }
 0x41d   : > { %v2279_v13 = vshrl.u32 %v12118_v59, 16  ;;  %v2282_v33 = vshll.u32 %v12118_v59, 16  ;;  %v2598_v59 = vshll.u32 %v17004_v9, 16 }
 0x41e   : > { %v1811_v6 = vmul.f32 %v16999_v23, %v1595_v11  ;;  %v2606_v11 = vshll.u32 %v17007_v55, 16  ;;  %v3423_v23 = vld [vmem:[#allocation2 + $0x8] sm:$0xe] }
 0x41f   : > { %v2281_v26 = vrot.slane %v2279_v13, 6  ;;  %v2284_v20 = vrot.slane %v2282_v33, 7  ;;  %v2596_v33 = vor.u32 %v2594_v35, %v2592_v28  ;;  %v2610_v35 = vshrl.u32 %v17007_v55, 16 }
 0x420   : > { %v12119_v63 = vpack.c.bf16 %v1811_v6, %v1811_v6  ;;  %12557 = vmatmul.mubr.msk.bf16.gmra.mrb[16].mxu0 %vm873_vm1, %v2577_v48  ;;  %v2373_v48 = vld [vmem:[#allocation2 + $0x98] sm:$0x3] }
 0x421   : > { %v2285_v21 = vor.u32 %v2284_v20, %v2281_v26  ;;  %12560 = vmatprep.mubr.msk.bf16.mxu0 %vm873_vm1, %v2585_v31  ;;  %v2600_v26 = vrot.slane %v2598_v59, 1  ;;  %v17019_v20 = vld [vmem:[#allocation2 + $0x68] sm:$0xff]  }
 0x422   : > { %v2289_v53 = vshrl.u32 %v12119_v63, 16  ;;  %v2292_v30 = vshll.u32 %v12119_v63, 16  ;;  %v2593_v63 = vsel %vm2509_vm2, %v2588_v57, %v2592_v28  ;;  %v2614_v59 = vshll.u32 %v17019_v20, 16  ;;  %v17037_v57 = vld [vmem:[#allocation2 + $0x80] sm:$0xff]  }
 0x423   : > { %v2286_v1 = vsel %vm16582_vm14, %v2277_v18, %v2285_v21  ;;  %v2287_v13 = vrot.slane %v2285_v21, 4  ;;  %v2601_v2 = vsel %vm2509_vm2, %v2596_v33, %v2600_v26  ;;  %v2608_v21 = vrot.slane %v2606_v11, 1 }
 0x424   : > { %2371 = vst.msk [vmem:[#allocation2 + $0x90] sm:$0xf] %vm1812_vm12, %v2286_v1  ;;  %v2291_v32 = vrot.slane %v2289_v53, 6  ;;  %v2294_v25 = vrot.slane %v2292_v30, 7  ;;  %v2602_v53 = vshrl.u32 %v17004_v9, 16  ;;  %v17035_v1 = vld [vmem:[#allocation2 + $0x78] sm:$0xff]  }
 0x425   : > { %v2616_v33 = vrot.slane %v2614_v59, 1  ;;  %v2626_v30 = vshrl.u32 %v17026_v34, 16 }
 0x426   : > { %v2295_v6 = vor.u32 %v2294_v25, %v2291_v32  ;;  %v2604_v11 = vor.u32 %v2602_v53, %v2600_v26  ;;  %v2612_v32 = vor.u32 %v2610_v35, %v2608_v21  ;;  %v2622_v25 = vshll.u32 %v17026_v34, 16 }
 0x427   : > { %v2618_v26 = vshrl.u32 %v17019_v20, 16 }
 0x428   : > { %v2296_v31 = vsel %vm16582_vm14, %v2287_v13, %v2295_v6  ;;  %v2297_v18 = vrot.slane %v2295_v6, 4  ;;  %12561 = vmatmul.mubr.msk.bf16.gmra.mrb[20].mxu0 %vm873_vm1, %v2593_v63  ;;  %v17039_v13 = vld [vmem:[#allocation2 + $0x88] sm:$0xff]   ;;  %v2630_v6 = vshll.u32 %v17035_v1, 16  ;;  %v2609_v63 = vsel %vm2509_vm2, %v2604_v11, %v2608_v21 }
 0x429   : > { %2372 = vst.msk [vmem:[#allocation2 + $0x94] sm:$0xf] %vm1812_vm12, %v2296_v31  ;;  %12564 = vmatprep.mubr.msk.bf16.mxu0 %vm873_vm1, %v2601_v2  ;;  %v2646_v31 = vshll.u32 %v17039_v13, 16  ;;  %v2624_v2 = vrot.slane %v2622_v25, 1  ;;  %v2620_v59 = vor.u32 %v2618_v26, %v2616_v33  ;;  %v17053_v21 = vld [vmem:[#allocation2 + $0xc] sm:$0xf] }
 0x42a   : > { %v2374_v28 = vsel %vm16030_vm7, %v2297_v18, %v2373_v48  ;;  %v2638_v48 = vshll.u32 %v17037_v57, 16  ;;  %v2617_v18 = vsel %vm2509_vm2, %v2612_v32, %v2616_v33  ;;  %v2642_v32 = vshrl.u32 %v17037_v57, 16  ;;  %v17067_v26 = vld [vmem:[#allocation2 + $0x18] sm:$0xff]  }
 0x42b   : > { %2375 = vst [vmem:[#allocation2 + $0x98] sm:$0x3] %v2374_v28  ;;  %v17050_v53 = vld [vmem:[#allocation2 + $0x90] ss:$0 sps:$4 sm:$0x11]   ;;  %v2632_v28 = vrot.slane %v2630_v6, 1  ;;  %v2628_v11 = vor.u32 %v2626_v30, %v2624_v2  ;;  %v17060_v37 = vcombine.low %v3423_v23, %v17053_v21  ;;  %v2625_v33 = vsel %vm2509_vm2, %v2620_v59, %v2624_v2 }
 0x42c   : > { %v2640_v35 = vrot.slane %v2638_v48, 1  ;;  %v2648_v39 = vrot.slane %v2646_v31, 1  ;;  %v2650_v25 = vshrl.u32 %v17039_v13, 16  ;;  %v17063_v48 = vld [vmem:[#allocation2 + $0x10] sm:$0xff]   ;;  %v17074_v23 = vld [vmem:[#allocation2 + $0x20] sm:$0xff]   ;;  %vm3115_vm7 = vcmask 1046528  }
 0x42d   : > { %v2633_v31 = vsel %vm2509_vm2, %v2628_v11, %v2632_v28  ;;  %v3899_v49 = vshll.u32 %v17074_v23, 16  ;;  %vm6030_vm12 = vcmask 130048  }
 0x42e   : > { %v2644_v7 = vor.u32 %v2642_v32, %v2640_v35  ;;  %v2652_v6 = vor.u32 %v2650_v25, %v2648_v39  ;;  %v17076_v32 = vld [vmem:[#allocation2 + $0x8] sm:$0xc] }
 0x42f   : > { %v17080_v25 = vld [vmem:[#allocation2 + $0x28] sm:$0xff]  }
 0x430   : > { %12565 = vmatmul.mubr.msk.bf16.gmra.mrb[24].mxu0 %vm873_vm1, %v2609_v63  ;;  %v2634_v63 = vshrl.u32 %v17035_v1, 16  ;;  %v2649_v59 = vsel %vm2509_vm2, %v2644_v7, %v2648_v39  ;;  %v3887_v39 = vshrl.u32 %v17067_v26, 16  ;;  %v3890_v7 = vshll.u32 %v17067_v26, 16 }
 0x431   : > { %12568 = vmatprep.mubr.msk.bf16.mxu0 %vm873_vm1, %v2617_v18  ;;  %v2654_v18 = vshll.u32 %v17050_v53, 16  ;;  %v3905_v16 = vshrl.u32 %v17080_v25, 16  ;;  %v3908_v5 = vshll.u32 %v17080_v25, 16 }
 0x432   : > { %v2636_v38 = vor.u32 %v2634_v63, %v2632_v28  ;;  %v17072_v63 = vsel %vm2712_vm15, %v16945_v44, 0  ;;  %v3870_v28 = vshrl.u32 %v17060_v37, 16  ;;  %v3873_v44 = vshll.u32 %v17060_v37, 16 }
 0x433   : > { %v2656_v30 = vrot.slane %v2654_v18, 1  ;;  %v3892_v27 = vrot.slane %v3890_v7, 2  ;;  %v3907_v47 = vrot.slane %v3905_v16, 1  ;;  %v3910_v45 = vrot.slane %v3908_v5, 2 }
 0x434   : > { %v2641_v2 = vsel %vm2509_vm2, %v2636_v38, %v2640_v35  ;;  %v3872_v38 = vrot.slane %v3870_v28, 1  ;;  %v17093_v35 = vld [vmem:[#allocation2 + $0x38] sm:$0xff]   ;;  %v3875_v19 = vrot.slane %v3873_v44, 2  ;;  %v17102_v44 = vld [vmem:[#allocation2 + $0x48] sm:$0xff]   ;;  %v3932_v5 = vshrl.u32 %v17098_v51, 16 }
 0x435   : > { %v2657_v18 = vsel %vm2509_vm2, %v2652_v6, %v2656_v30  ;;  %v3896_v6 = vshrl.u32 %v17074_v23, 16  ;;  %v3889_v30 = vrot.slane %v3887_v39, 1  ;;  %v3914_v39 = vshrl.u32 %v17089_v3, 16 }
 0x436   : > { %v3876_v28 = vor.u32 %v3875_v19, %v3872_v38  ;;  %v3923_v19 = vshrl.u32 %v17093_v35, 16  ;;  %v3926_v16 = vshll.u32 %v17093_v35, 16  ;;  %v17117_v38 = vld [vmem:[#allocation2 + $0x58] sm:$0xff]  }
 0x437   : > { %v3898_v60 = vrot.slane %v3896_v6, 1 }
 0x438   : > { %12569 = vmatmul.mubr.msk.bf16.gmra.mrb[28].mxu0 %vm873_vm1, %v2625_v33  ;;  %v3878_v33 = vshrl.u32 %v17063_v48, 16  ;;  %v3928_v17 = vrot.slane %v3926_v16, 2 }
 0x439   : > { %12572 = vmatprep.mubr.msk.bf16.mxu0 %vm873_vm1, %v2633_v31  ;;  %v3881_v31 = vshll.u32 %v17063_v48, 16 }
 0x43a   : > { %v3880_v11 = vrot.slane %v3878_v33, 1  ;;  %v3893_v33 = vor.u32 %v3892_v27, %v3889_v30  ;;  %v3925_v30 = vrot.slane %v3923_v19, 1  ;;  %v3937_v19 = vrot.slane %v3935_v8, 2 }
 0x43b   : > { %v3883_v46 = vrot.slane %v3881_v31, 2  ;;  %v3901_v31 = vrot.slane %v3899_v49, 2  ;;  %v3916_v49 = vrot.slane %v3914_v39, 1  ;;  %v3934_v39 = vrot.slane %v3932_v5, 1 }
 0x43d   : > { %v3884_v24 = vor.u32 %v3883_v46, %v3880_v11  ;;  %v3917_v46 = vshll.u32 %v17089_v3, 16  ;;  %v17111_v11 = vld [vmem:[#allocation2 + $0x50] sm:$0xff]   ;;  %v3902_v27 = vor.u32 %v3901_v31, %v3898_v60 }
 0x43e   : > { %v3950_v16 = vshrl.u32 %v17111_v11, 16  ;;  %v3953_v4 = vshll.u32 %v17111_v11, 16 }
 0x43f   : > { %v17107_v7 = vsel %vm3868_vm3, %v3876_v28, %v3884_v24  ;;  %v3919_v6 = vrot.slane %v3917_v46, 2  ;;  %v17121_v28 = vsel %vm3868_vm3, %v3893_v33, %v3902_v27  ;;  %v3929_v46 = vor.u32 %v3928_v17, %v3925_v30 }
 0x440   : > { %12573 = vmatmul.mubr.msk.bf16.gmra.mrb[32].mxu0 %vm873_vm1, %v2641_v2  ;;  %20453 = vst [vmem:[#allocation49_spill] sm:$0xff] %v17107_v7  ;;  %v17114_v2 = vsel %vm3868_vm3, %v3884_v24, %v3893_v33  ;;  %20455 = vst [vmem:[#allocation91_spill] sm:$0xff] %v17121_v28  ;;  %v3941_v24 = vshrl.u32 %v17102_v44, 16  ;;  %v3938_v17 = vor.u32 %v3937_v19, %v3934_v39  ;;  %v3952_v8 = vrot.slane %v3950_v16, 1  ;;  %v17156_v19 = vld [vmem:[#allocation2 + $0x80] sm:$0xff]  }
 0x441   : > { %12576 = vmatprep.mubr.msk.bf16.mxu0 %vm873_vm1, %v2649_v59  ;;  %20454 = vst [vmem:[#allocation90_spill] sm:$0xff] %v17114_v2  ;;  %v3911_v59 = vor.u32 %v3910_v45, %v3907_v47  ;;  %v3920_v31 = vor.u32 %v3919_v6, %v3916_v49  ;;  %v3944_v45 = vshll.u32 %v17102_v44, 16  ;;  %v17131_v47 = vld [vmem:[#allocation2 + $0x68] sm:$0xff]   ;;  %v17140_v49 = vld [vmem:[#allocation2 + $0x70] sm:$0xff]   ;;  %v3962_v30 = vshll.u32 %v17117_v38, 16  ;;  %20463 = vst [vmem:[#allocation99_spill] sm:$0xff] %v17156_v19 }
 0x442   : > { %20457 = vst [vmem:[#allocation93_spill] sm:$0xff] %v17131_v47  ;;  %v3943_v33 = vrot.slane %v3941_v24, 1  ;;  %20459 = vst [vmem:[#allocation95_spill] sm:$0xff] %v17140_v49  ;;  %v3955_v24 = vrot.slane %v3953_v4, 2  ;;  %v3977_v39 = vshrl.u32 %v17131_v47, 16  ;;  %v3980_v4 = vshll.u32 %v17131_v47, 16 }
 0x443   : > { %v17128_v60 = vsel %vm3868_vm3, %v3902_v27, %v3911_v59  ;;  %v17135_v56 = vsel %vm3868_vm3, %v3911_v59, %v3920_v31  ;;  %v3946_v62 = vrot.slane %v3944_v45, 2  ;;  %v3959_v27 = vshrl.u32 %v17117_v38, 16  ;;  %v17148_v59 = vld [vmem:[#allocation2 + $0x78] sm:$0xff]  }
 0x444   : > { %20456 = vst [vmem:[#allocation92_spill] sm:$0xff] %v17128_v60  ;;  %20458 = vst [vmem:[#allocation94_spill] sm:$0xff] %v17135_v56  ;;  %v17143_v6 = vsel %vm3868_vm3, %v3920_v31, %v3929_v46  ;;  %v3964_v54 = vrot.slane %v3962_v30, 2  ;;  %v3971_v31 = vshll.u32 %v17125_v22, 16  ;;  %v3986_v30 = vshrl.u32 %v17140_v49, 16 }
 0x445   : > { %20460 = vst [vmem:[#allocation96_spill] sm:$0xff] %v17143_v6  ;;  %20461 = vst [vmem:[#allocation97_spill] sm:$0xff] %v17148_v59  ;;  %v3947_v5 = vor.u32 %v3946_v62, %v3943_v33  ;;  %v3961_v45 = vrot.slane %v3959_v27, 1  ;;  %v17162_v62 = vld [vmem:[#allocation2 + $0x88] sm:$0xff]   ;;  %v3982_v15 = vrot.slane %v3980_v4, 2  ;;  %v4004_v4 = vshrl.u32 %v17156_v19, 16 }
 0x446   : > { %20465 = vst [vmem:[#allocation101_spill] sm:$0xff] %v17162_v62  ;;  %v3973_v27 = vrot.slane %v3971_v31, 2 }
 0x447   : > { %v17159_v16 = vsel %vm3868_vm3, %v3938_v17, %v3947_v5  ;;  %v3965_v33 = vor.u32 %v3964_v54, %v3961_v45  ;;  %v3998_v54 = vshll.u32 %v17148_v59, 16  ;;  %v17176_v45 = vld [vmem:[#allocation15 + $0xc] sm:$0xf] }
 0x448   : > { %12577 = vmatmul.mubr.msk.bf16.gmra.mrb[36].mxu0 %vm873_vm1, %v2657_v18  ;;  %v17152_v18 = vsel %vm3868_vm3, %v3929_v46, %v3938_v17  ;;  %20464 = vst [vmem:[#allocation100_spill] sm:$0xff] %v17159_v16  ;;  %v3979_v46 = vrot.slane %v3977_v39, 1  ;;  %v3995_v17 = vshrl.u32 %v17148_v59, 16  ;;  %v17170_v16 = vld [vmem:[#allocation2 + $0x90] sm:$0xff]  }
 0x449   : > { %12582 = vmatprep.mubr.msk.bf16.mxu0 %vm873_vm1, %v16882_v0  ;;  %20462 = vst [vmem:[#allocation98_spill] sm:$0xff] %v17152_v18  ;;  %v3956_v0 = vor.u32 %v3955_v24, %v3952_v8  ;;  %v3989_v18 = vshll.u32 %v17140_v49, 16  ;;  %20467 = vst [vmem:[#allocation103_spill] sm:$0xff] %v17170_v16  ;;  %v3974_v8 = vor.u32 %v3973_v27, %v3970_v58  ;;  %v3988_v24 = vrot.slane %v3986_v30, 1 }
 0x44a   : > { %v3983_v31 = vor.u32 %v3982_v15, %v3979_v46  ;;  %v4000_v6 = vrot.slane %v3998_v54, 2  ;;  %v4013_v58 = vshrl.u32 %v17162_v62, 16  ;;  %v4006_v27 = vrot.slane %v4004_v4, 1 }
 0x44b   : > { %v17166_v43 = vsel %vm3868_vm3, %v3947_v5, %v3956_v0  ;;  %v17173_v10 = vsel %vm3868_vm3, %v3956_v0, %v3965_v33  ;;  %v3991_v39 = vrot.slane %v3989_v18, 2  ;;  %v3997_v5 = vrot.slane %v3995_v17, 1 }
 0x44c   : > { %20466 = vst [vmem:[#allocation102_spill] sm:$0xff] %v17166_v43  ;;  %20468 = vst [vmem:[#allocation104_spill] sm:$0xff] %v17173_v10  ;;  %v17182_v43 = vsel %vm3868_vm3, %v3965_v33, %v3974_v8  ;;  %v4007_v0 = vshll.u32 %v17156_v19, 16  ;;  %v17190_v15 = vsel %vm3868_vm3, %v3974_v8, %v3983_v31  ;;  %v4015_v30 = vrot.slane %v4013_v58, 1 }
 0x44d   : > { %20469 = vst [vmem:[#allocation105_spill] sm:$0xff] %v17182_v43  ;;  %20470 = vst [vmem:[#allocation106_spill] sm:$0xff] %v17190_v15  ;;  %v3992_v18 = vor.u32 %v3991_v39, %v3988_v24  ;;  %v4001_v33 = vor.u32 %v4000_v6, %v3997_v5  ;;  %v4022_v17 = vshrl.u32 %v17170_v16, 16  ;;  %v20474_v5 = vcombine.low %v17076_v32, %v17053_v21  ;;  %v17355_v43 = vld [vmem:[#allocation2 + $0x60] sm:$0xff]  }
 0x44e   : > { %v4009_v46 = vrot.slane %v4007_v0, 2  ;;  %v4323_v21 = vrot.slane %v17080_v25, 2  ;;  %v4325_v32 = vrot.slane %v17089_v3, 2 }
 0x44f   : > { %v17201_v8 = vsel %vm3868_vm3, %v3992_v18, %v4001_v33  ;;  %v4024_v39 = vrot.slane %v4022_v17, 1  ;;  %v4316_v0 = vrot.slane %v20474_v5, 2  ;;  %v4335_v5 = vrot.slane %v17117_v38, 2 }
 0x450   : > { %12583 = vmatmul.mubr.msk.bf16.vlgmr.msra.gmra.mrb[4].mxu0 %vm873_vm1, %v16896_v36  ;;  %v4016_v36 = vshll.u32 %v17162_v62, 16  ;;  %20472 = vst [vmem:[#allocation108_spill] sm:$0xff] %v17201_v8  ;;  %v4010_v24 = vor.u32 %v4009_v46, %v4006_v27  ;;  %v4321_v27 = vrot.slane %v17074_v23, 2 }
 0x451   : > { %12619 = vmatpush3.bf16.msra.mxu0 %v17072_v63  ;;  %12586 = vmatprep.mubr.msk.bf16.mxu0 %vm873_vm1, %v16916_v41  ;;  %v17197_v63 = vsel %vm3868_vm3, %v3983_v31, %v3992_v18  ;;  %v4025_v41 = vshll.u32 %v17170_v16, 16  ;;  %v4317_v31 = vrot.slane %v17063_v48, 2  ;;  %v4319_v18 = vrot.slane %v17067_v26, 2 }
 0x452   : > { %13990 = vmatprep.subr.msk.bf16.mxu0 %vm2712_vm15, %v17176_v45  ;;  %20471 = vst [vmem:[#allocation107_spill] sm:$0xff] %v17197_v63  ;;  %v4018_v54 = vrot.slane %v4016_v36, 2  ;;  %v17204_v6 = vsel %vm3868_vm3, %v4001_v33, %v4010_v24  ;;  %v17238_v17 = vsel %vm4315_vm4, %v4321_v27, %v4323_v21 }
 0x453   : > { %v4027_v15 = vrot.slane %v4025_v41, 2  ;;  %20473 = vst [vmem:[#allocation109_spill] sm:$0xff] %v17204_v6  ;;  %v17220_v33 = vsel %vm4315_vm4, %v4316_v0, %v4317_v31  ;;  %v17231_v46 = vsel %vm4315_vm4, %v4317_v31, %v4319_v18  ;;  %20481 = vst [vmem:[#allocation116_spill] sm:$0xff] %v17238_v17  ;;  %v17244_v41 = vld [vmem:[#allocation2 + $0x98] ss:$0 sps:$4 sm:$0x33]  }
 0x454   : > { %v4019_v4 = vor.u32 %v4018_v54, %v4015_v30  ;;  %20477 = vst [vmem:[#allocation112_spill] sm:$0xff] %v17220_v33  ;;  %20479 = vst [vmem:[#allocation114_spill] sm:$0xff] %v17231_v46  ;;  %v17234_v30 = vsel %vm4315_vm4, %v4319_v18, %v4321_v27  ;;  %v17241_v54 = vsel %vm4315_vm4, %v4323_v21, %v4325_v32  ;;  %v4337_v31 = vrot.slane %v17125_v22, 2  ;;  %v17334_v6 = vld [vmem:[#allocation2 + $0x48] sm:$0xff]  }
 0x455   : > { %v17213_v36 = vor.u32 %v4027_v15, %v4024_v39  ;;  %20480 = vst [vmem:[#allocation115_spill] sm:$0xff] %v17234_v30  ;;  %20482 = vst [vmem:[#allocation117_spill] sm:$0xff] %v17241_v54  ;;  %v4331_v39 = vrot.slane %v17102_v44, 2  ;;  %v4339_v18 = vrot.slane %v17131_v47, 2  ;;  %v4341_v27 = vrot.slane %v17140_v49, 2 }
 0x456   : > { %v17211_v58 = vsel %vm3868_vm3, %v4010_v24, %v4019_v4  ;;  %20483 = vst [vmem:[#allocation118_spill] sm:$0xff] %v17244_v41  ;;  %v4343_v54 = vrot.slane %v17148_v59, 2  ;;  %v5132_v56 = vshrl.u32 %v17334_v6, 16 }
 0x457   : > { %20475 = vst [vmem:[#allocation110_spill] sm:$0xff] %v17211_v58  ;;  %20476 = vst [vmem:[#allocation111_spill] sm:$0xff] %v17213_v36  ;;  %v17228_v15 = vsel %vm3868_vm3, %v4019_v4, %v17213_v36  ;;  %v4333_v4 = vrot.slane %v17111_v11, 2  ;;  %v17275_v17 = vsel %vm4315_vm4, %v4339_v18, %v4341_v27 }
 0x458   : > { %12587 = vmatmul.mubr.msk.bf16.gmra.mrb[8].mxu0 %vm873_vm1, %v16925_v14  ;;  %20478 = vst [vmem:[#allocation113_spill] sm:$0xff] %v17228_v15  ;;  %v4327_v14 = vrot.slane %v17093_v35, 2  ;;  %20491 = vst [vmem:[#allocation126_spill] sm:$0xff] %v17275_v17  ;;  %v17300_v17 = vld [vmem:[#allocation2 + $0x14] sm:$0xf] }
 0x459   : > { %12590 = vmatprep.mubr.msk.bf16.mxu0 %vm873_vm1, %v16930_v42  ;;  %v4329_v42 = vrot.slane %v17098_v51, 2 }
 0x45a   : > { %v17247_v24 = vsel %vm4315_vm4, %v4325_v32, %v4327_v14  ;;  %v17262_v32 = vsel %vm4315_vm4, %v4331_v39, %v4333_v4 }
 0x45b   : > { %20484 = vst [vmem:[#allocation119_spill] sm:$0xff] %v17247_v24  ;;  %v17253_v0 = vsel %vm4315_vm4, %v4327_v14, %v4329_v42  ;;  %v17259_v21 = vsel %vm4315_vm4, %v4329_v42, %v4331_v39  ;;  %20487 = vst [vmem:[#allocation122_spill] sm:$0xff] %v17262_v32  ;;  %v17265_v24 = vsel %vm4315_vm4, %v4333_v4, %v4335_v5  ;;  %v4345_v42 = vrot.slane %v17156_v19, 2 }
 0x45c   : > { %20485 = vst [vmem:[#allocation120_spill] sm:$0xff] %v17253_v0  ;;  %20486 = vst [vmem:[#allocation121_spill] sm:$0xff] %v17259_v21  ;;  %v17269_v14 = vsel %vm4315_vm4, %v4335_v5, %v4337_v31  ;;  %v17272_v0 = vsel %vm4315_vm4, %v4337_v31, %v4339_v18  ;;  %v17279_v21 = vsel %vm4315_vm4, %v4341_v27, %v4343_v54  ;;  %v4347_v39 = vrot.slane %v17162_v62, 2 }
 0x45d   : > { %20488 = vst [vmem:[#allocation123_spill] sm:$0xff] %v17265_v24  ;;  %20489 = vst [vmem:[#allocation124_spill] sm:$0xff] %v17269_v14  ;;  %v4349_v4 = vrot.slane %v17170_v16, 2  ;;  %v4351_v24 = vrot.slane %v17244_v41, 2  ;;  %v17287_v5 = vsel %vm4315_vm4, %v4343_v54, %v4345_v42  ;;  %v17305_v54 = vld [vmem:[#allocation2 + $0x18] sm:$0xff]  }
 0x45e   : > { %20490 = vst [vmem:[#allocation125_spill] sm:$0xff] %v17272_v0  ;;  %20492 = vst [vmem:[#allocation127_spill] sm:$0xff] %v17279_v21  ;;  %v17292_v31 = vsel %vm4315_vm4, %v4345_v42, %v4347_v39  ;;  %v4623_v21 = vld [vmem:[#allocation2 + $0x10] sm:$0xc]  ;;  %v17313_v42 = vld [vmem:[#allocation2 + $0x28] sm:$0xff]  }
 0x45f   : > { %20493 = vst [vmem:[#allocation128_spill] sm:$0xff] %v17287_v5  ;;  %20494 = vst [vmem:[#allocation129_spill] sm:$0xff] %v17292_v31  ;;  %v17295_v18 = vsel %vm4315_vm4, %v4347_v39, %v4349_v4  ;;  %v17298_v27 = vsel %vm4315_vm4, %v4349_v4, %v4351_v24  ;;  %v17307_v5 = vld [vmem:[#allocation2 + $0x20] sm:$0xff]   ;;  %v17317_v24 = vld [vmem:[#allocation2 + $0x30] sm:$0xff]   ;;  %v5099_v33 = vshll.u32 %v17313_v42, 16 }
 0x460   : > { %12591 = vmatmul.mubr.msk.bf16.gmra.mrb[12].mxu0 %vm873_vm1, %v16940_v40  ;;  %20495 = vst [vmem:[#allocation130_spill] sm:$0xff] %v17295_v18  ;;  %20496 = vst [vmem:[#allocation131_spill] sm:$0xff] %v17298_v27  ;;  %v17303_v40 = vcombine.low %v4623_v21, %v17300_v17  ;;  %v17323_v27 = vld [vmem:[#allocation2 + $0x38] sm:$0xff]   ;;  %v5078_v18 = vshrl.u32 %v17305_v54, 16  ;;  %v5087_v31 = vshrl.u32 %v17307_v5, 16  ;;  %v17328_v0 = vld [vmem:[#allocation2 + $0x40] sm:$0xff]  }
 0x461   : > { %12594 = vmatprep.mubr.msk.bf16.mxu0 %vm873_vm1, %v16949_v12  ;;  %v17309_v12 = vld [vmem:[#allocation2 + $0x10] sm:$0x8]  ;;  %v5090_v32 = vshll.u32 %v17307_v5, 16  ;;  %v5105_v41 = vshrl.u32 %v17317_v24, 16  ;;  %v5101_v63 = vrot.slane %v5099_v33, 3 }
 0x462   : > { %20497 = vst [vmem:[#allocation132_spill] sm:$0xff] %v17303_v40  ;;  %v5070_v39 = vshrl.u32 %v17303_v40, 16  ;;  %v5073_v21 = vshll.u32 %v17303_v40, 16  ;;  %v5096_v40 = vshrl.u32 %v17313_v42, 16  ;;  %v5080_v30 = vrot.slane %v5078_v18, 2  ;;  %v17340_v18 = vld [vmem:[#allocation2 + $0x50] sm:$0xff]  }
 0x463   : > { %v5089_v4 = vrot.slane %v5087_v31, 2  ;;  %v5092_v15 = vrot.slane %v5090_v32, 3  ;;  %v5117_v32 = vshll.u32 %v17323_v27, 16 }
 0x464   : > { %v5075_v14 = vrot.slane %v5073_v21, 3  ;;  %v5098_v58 = vrot.slane %v5096_v40, 2  ;;  %v5114_v21 = vshrl.u32 %v17323_v27, 16 }
 0x465   : > { %v5093_v31 = vor.u32 %v5092_v15, %v5089_v4  ;;  %v5119_v15 = vrot.slane %v5117_v32, 3  ;;  %v5126_v4 = vshll.u32 %v17328_v0, 16 }
 0x468   : > { %12595 = vmatmul.mubr.msk.bf16.gmra.mrb[16].mxu0 %vm873_vm1, %v16963_v61  ;;  %v5081_v61 = vshll.u32 %v17305_v54, 16 }
 0x469   : > { %12598 = vmatprep.mubr.msk.bf16.mxu0 %vm873_vm1, %v16971_v29  ;;  %v5072_v29 = vrot.slane %v5070_v39, 2  ;;  %v5108_v39 = vshll.u32 %v17317_v24, 16 }
 0x46a   : > { %v5083_v46 = vrot.slane %v5081_v61, 3  ;;  %v5107_v61 = vrot.slane %v5105_v41, 2 }
 0x46b   : > { %v5076_v36 = vor.u32 %v5075_v14, %v5072_v29  ;;  %v5123_v14 = vshrl.u32 %v17328_v0, 16  ;;  %v5110_v40 = vrot.slane %v5108_v39, 3  ;;  %v5116_v29 = vrot.slane %v5114_v21, 2 }
 0x46c   : > { %v5084_v8 = vor.u32 %v5083_v46, %v5080_v30  ;;  %v17346_v46 = vld [vmem:[#allocation2 + $0x58] sm:$0xff]   ;;  %v5102_v30 = vor.u32 %v5101_v63, %v5098_v58  ;;  %v17362_v63 = vld [vmem:[#allocation2 + $0x68] sm:$0xff]   ;;  %v5128_v39 = vrot.slane %v5126_v4, 3  ;;  %v5144_v21 = vshll.u32 %v17340_v18, 16 }
 0x46d   : > { %v5125_v41 = vrot.slane %v5123_v14, 2  ;;  %v5120_v58 = vor.u32 %v5119_v15, %v5116_v29  ;;  %v5134_v14 = vrot.slane %v5132_v56, 2  ;;  %v17375_v15 = vld [vmem:[#allocation2 + $0x78] sm:$0xff]   ;;  %v5153_v28 = vshll.u32 %v17346_v46, 16  ;;  %v17381_v56 = vld [vmem:[#allocation2 + $0x80] sm:$0xff]  }
 0x46e   : > { %v17349_v33 = vsel %vm5068_vm5, %v5076_v36, %v5084_v8  ;;  %v17358_v10 = vsel %vm5068_vm5, %v5093_v31, %v5102_v30  ;;  %v5135_v36 = vshll.u32 %v17334_v6, 16  ;;  %v5146_v29 = vrot.slane %v5144_v21, 3 }
 0x46f   : > { %20498 = vst [vmem:[#allocation133_spill] sm:$0xff] %v17349_v33  ;;  %20500 = vst [vmem:[#allocation135_spill] sm:$0xff] %v17358_v10  ;;  %v5129_v10 = vor.u32 %v5128_v39, %v5125_v41  ;;  %v5162_v41 = vshll.u32 %v17355_v43, 16  ;;  %v5168_v39 = vshrl.u32 %v17362_v63, 16  ;;  %v5189_v7 = vshll.u32 %v17375_v15, 16 }
 0x470   : > { %12599 = vmatmul.mubr.msk.bf16.gmra.mrb[20].mxu0 %vm873_vm1, %v16981_v52  ;;  %v17352_v52 = vsel %vm5068_vm5, %v5084_v8, %v5093_v31  ;;  %v5141_v8 = vshrl.u32 %v17340_v18, 16  ;;  %v5150_v31 = vshrl.u32 %v17346_v46, 16 }
 0x471   : > { %12602 = vmatprep.mubr.msk.bf16.mxu0 %vm873_vm1, %v16989_v50  ;;  %20499 = vst [vmem:[#allocation134_spill] sm:$0xff] %v17352_v52  ;;  %v5111_v50 = vor.u32 %v5110_v40, %v5107_v61  ;;  %v5137_v52 = vrot.slane %v5135_v36, 3  ;;  %v17370_v61 = vld [vmem:[#allocation2 + $0x70] sm:$0xff]   ;;  %v17384_v36 = vsel %vm5068_vm5, %v5120_v58, %v5129_v10  ;;  %v5191_v16 = vrot.slane %v5189_v7, 3 }
 0x472   : > { %v5143_v33 = vrot.slane %v5141_v8, 2  ;;  %v5152_v60 = vrot.slane %v5150_v31, 2  ;;  %20503 = vst [vmem:[#allocation138_spill] sm:$0xff] %v17384_v36  ;;  %v5155_v8 = vrot.slane %v5153_v28, 3  ;;  %v5170_v36 = vrot.slane %v5168_v39, 2 }
 0x473   : > { %v17367_v32 = vsel %vm5068_vm5, %v5102_v30, %v5111_v50  ;;  %v17373_v40 = vsel %vm5068_vm5, %v5111_v50, %v5120_v58  ;;  %v5138_v4 = vor.u32 %v5137_v52, %v5134_v14  ;;  %v5159_v30 = vshrl.u32 %v17355_v43, 16 }
 0x474   : > { %20501 = vst [vmem:[#allocation136_spill] sm:$0xff] %v17367_v32  ;;  %20502 = vst [vmem:[#allocation137_spill] sm:$0xff] %v17373_v40  ;;  %v5147_v50 = vor.u32 %v5146_v29, %v5143_v33  ;;  %v5171_v14 = vshll.u32 %v17362_v63, 16  ;;  %v5164_v58 = vrot.slane %v5162_v41, 3  ;;  %v5177_v33 = vshrl.u32 %v17370_v61, 16  ;;  %v17398_v29 = vld [vmem:[#allocation2 + $0x88] sm:$0xff]  }
 0x475   : > { %v17391_v52 = vsel %vm5068_vm5, %v5129_v10, %v5138_v4  ;;  %v5161_v21 = vrot.slane %v5159_v30, 2  ;;  %v5156_v40 = vor.u32 %v5155_v8, %v5152_v60  ;;  %v5180_v2 = vshll.u32 %v17370_v61, 16  ;;  %v17406_v41 = vld [vmem:[#allocation2 + $0x98] sm:$0xff]  }
 0x476   : > { %20504 = vst [vmem:[#allocation139_spill] sm:$0xff] %v17391_v52  ;;  %v17395_v31 = vsel %vm5068_vm5, %v5138_v4, %v5147_v50  ;;  %v5173_v32 = vrot.slane %v5171_v14, 3  ;;  %v5186_v10 = vshrl.u32 %v17375_v15, 16  ;;  %v17402_v52 = vld [vmem:[#allocation2 + $0x90] sm:$0xff]   ;;  %v5179_v30 = vrot.slane %v5177_v33, 2 }
 0x477   : > { %20505 = vst [vmem:[#allocation140_spill] sm:$0xff] %v17395_v31  ;;  %v5165_v28 = vor.u32 %v5164_v58, %v5161_v21  ;;  %v5195_v4 = vshrl.u32 %v17381_v56, 16  ;;  %v17409_v39 = vsel %vm5068_vm5, %v5147_v50, %v5156_v40  ;;  %v5182_v60 = vrot.slane %v5180_v2, 3 }
 0x478   : > { %12603 = vmatmul.mubr.msk.bf16.gmra.mrb[24].mxu0 %vm873_vm1, %v17004_v9  ;;  %20506 = vst [vmem:[#allocation141_spill] sm:$0xff] %v17409_v39  ;;  %v5174_v31 = vor.u32 %v5173_v32, %v5170_v36  ;;  %v5188_v8 = vrot.slane %v5186_v10, 2  ;;  %v5198_v21 = vshll.u32 %v17381_v56, 16  ;;  %v5204_v19 = vshrl.u32 %v17398_v29, 16  ;;  %v3109_v36 = vld [vmem:[#allocation2] sm:$0xe] }
 0x479   : > { %12606 = vmatprep.mubr.msk.bf16.mxu0 %vm873_vm1, %v17007_v55  ;;  %v17412_v14 = vsel %vm5068_vm5, %v5156_v40, %v5165_v28  ;;  %v5197_v62 = vrot.slane %v5195_v4, 2  ;;  %v5183_v33 = vor.u32 %v5182_v60, %v5179_v30  ;;  %v5207_v59 = vshll.u32 %v17398_v29, 16  ;;  %v14646_v39 = vld [vmem:[#allocation2 + $0x4] sm:$0xf] }
 0x47a   : > { %20507 = vst [vmem:[#allocation142_spill] sm:$0xff] %v17412_v14  ;;  %v17416_v58 = vsel %vm5068_vm5, %v5165_v28, %v5174_v31  ;;  %v5192_v2 = vor.u32 %v5191_v16, %v5188_v8  ;;  %v5200_v32 = vrot.slane %v5198_v21, 3  ;;  %v5213_v40 = vshrl.u32 %v17402_v52, 16 }
 0x47b   : > { %20508 = vst [vmem:[#allocation143_spill] sm:$0xff] %v17416_v58  ;;  %v5216_v7 = vshll.u32 %v17402_v52, 16  ;;  %v17427_v50 = vsel %vm5068_vm5, %v5174_v31, %v5183_v33  ;;  %v5206_v10 = vrot.slane %v5204_v19, 2  ;;  %v5209_v28 = vrot.slane %v5207_v59, 3 }
 0x47c   : > { %v5222_v30 = vshrl.u32 %v17406_v41, 16  ;;  %v17431_v4 = vsel %vm5068_vm5, %v5183_v33, %v5192_v2  ;;  %v5201_v16 = vor.u32 %v5200_v32, %v5197_v62  ;;  %v5215_v60 = vrot.slane %v5213_v40, 2 }
 0x47d   : > { %v5218_v8 = vrot.slane %v5216_v7, 3  ;;  %v5210_v21 = vor.u32 %v5209_v28, %v5206_v10  ;;  %v5225_v14 = vshll.u32 %v17406_v41, 16  ;;  %v11617_v49 = vcombine.low %v3109_v36, %v14646_v39 }
 0x47e   : > { %v5224_v58 = vrot.slane %v5222_v30, 2  ;;  %v17435_v47 = vsel %vm5068_vm5, %v5192_v2, %v5201_v16  ;;  %v20509_v62 = vcombine.low %v17309_v12, %v17300_v17  ;;  %v5517_v40 = vrot.slane %v17305_v54, 3 }
 0x47f   : > { %v5219_v31 = vor.u32 %v5218_v8, %v5215_v60  ;;  %v17438_v59 = vsel %vm5068_vm5, %v5201_v16, %v5210_v21  ;;  %v5227_v19 = vrot.slane %v5225_v14, 3  ;;  %v5519_v39 = vrot.slane %v17307_v5, 3  ;;  %v14647_v60 = vld [vmem:[#allocation2 + $0x8] sm:$0xff]  }
 0x480   : > { %12607 = vmatmul.mubr.msk.bf16.gmra.mrb[28].mxu0 %vm873_vm1, %v17019_v20  ;;  %v5516_v33 = vrot.slane %v20509_v62, 3  ;;  %v5521_v7 = vrot.slane %v17313_v42, 3  ;;  %v5523_v36 = vrot.slane %v17317_v24, 3  ;;  %v5525_v14 = vrot.slane %v17323_v27, 3 }
 0x481   : > { %12610 = vmatprep.mubr.msk.bf16.mxu0 %vm873_vm1, %v17026_v34  ;;  %v17444_v32 = vsel %vm5068_vm5, %v5210_v21, %v5219_v31  ;;  %v17448_v2 = vor.u32 %v5227_v19, %v5224_v58  ;;  %v3116_v17 = vrot.slane %v11617_v49, 1  ;;  %v17459_v10 = vsel %vm5515_vm6, %v5517_v40, %v5519_v39  ;;  %v17477_v21 = vld [vmem:[#allocation2 + $0xa0] ss:$0 sps:$4 sm:$0x77]  }
 0x482   : > { %v17456_v12 = vsel %vm5515_vm6, %v5516_v33, %v5517_v40  ;;  %20510 = vst [vmem:[#allocation144_spill] sm:$0xff] %v17459_v10  ;;  %v5527_v28 = vrot.slane %v17328_v0, 3  ;;  %v17469_v30 = vsel %vm5515_vm6, %v5519_v39, %v5521_v7  ;;  %v17472_v49 = vsel %vm5515_vm6, %v5521_v7, %v5523_v36 }
 0x483   : > { %v17466_v58 = vsel %vm5068_vm5, %v5219_v31, %v17448_v2  ;;  %20511 = vst [vmem:[#allocation145_spill] sm:$0xff] %v17469_v30  ;;  %20512 = vst [vmem:[#allocation146_spill] sm:$0xff] %v17472_v49  ;;  %v17475_v16 = vsel %vm5515_vm6, %v5523_v36, %v5525_v14  ;;  %v3117_v8 = vrot.slane %v14647_v60, 1  ;;  %v5529_v62 = vrot.slane %v17334_v6, 3 }
 0x484   : > { %20513 = vst [vmem:[#allocation147_spill] sm:$0xff] %v17475_v16  ;;  %v17480_v19 = vsel %vm5515_vm6, %v5525_v14, %v5527_v28  ;;  %v5531_v31 = vrot.slane %v17340_v18, 3  ;;  %v5533_v33 = vrot.slane %v17346_v46, 3  ;;  %v5535_v40 = vrot.slane %v17355_v43, 3 }
 0x485   : > { %20514 = vst [vmem:[#allocation148_spill] sm:$0xff] %v17480_v19  ;;  %v5537_v39 = vrot.slane %v17362_v63, 3  ;;  %v5539_v7 = vrot.slane %v17370_v61, 3  ;;  %v17489_v36 = vsel %vm5515_vm6, %v5527_v28, %v5529_v62  ;;  %v5541_v14 = vrot.slane %v17375_v15, 3 }
 0x486   : > { %v17492_v60 = vsel %vm5515_vm6, %v5529_v62, %v5531_v31  ;;  %v5543_v19 = vrot.slane %v17381_v56, 3  ;;  %v17497_v16 = vsel %vm5515_vm6, %v5531_v31, %v5533_v33  ;;  %v17500_v49 = vsel %vm5515_vm6, %v5533_v33, %v5535_v40 }
 0x487   : > { %20515 = vst [vmem:[#allocation149_spill] sm:$0xff] %v17492_v60  ;;  %20516 = vst [vmem:[#allocation150_spill] sm:$0xff] %v17497_v16  ;;  %v17503_v30 = vsel %vm5515_vm6, %v5535_v40, %v5537_v39  ;;  %v17506_v10 = vsel %vm5515_vm6, %v5537_v39, %v5539_v7  ;;  %v17509_v28 = vsel %vm5515_vm6, %v5539_v7, %v5541_v14  ;;  %v5545_v60 = vrot.slane %v17398_v29, 3 }
 0x488   : > { %12611 = vmatmul.mubr.msk.bf16.gmra.mrb[32].mxu0 %vm873_vm1, %v17035_v1  ;;  %20517 = vst [vmem:[#allocation151_spill] sm:$0xff] %v17500_v49  ;;  %20518 = vst [vmem:[#allocation152_spill] sm:$0xff] %v17503_v30  ;;  %v17512_v62 = vsel %vm5515_vm6, %v5541_v14, %v5543_v19  ;;  %v5547_v31 = vrot.slane %v17402_v52, 3  ;;  %v5549_v16 = vrot.slane %v17406_v41, 3  ;;  %v5551_v33 = vrot.slane %v17477_v21, 3  ;;  %v14649_v30 = vld [vmem:[#allocation2 + $0x18] sm:$0xff]  }
 0x489   : > { %12614 = vmatprep.mubr.msk.bf16.mxu0 %vm873_vm1, %v17037_v57  ;;  %20519 = vst [vmem:[#allocation153_spill] sm:$0xff] %v17506_v10  ;;  %20520 = vst [vmem:[#allocation154_spill] sm:$0xff] %v17509_v28  ;;  %v3118_v40 = vsel %vm3115_vm7, %v3116_v17, %v3117_v8  ;;  %v17522_v39 = vsel %vm5515_vm6, %v5543_v19, %v5545_v60  ;;  %v14648_v28 = vld [vmem:[#allocation2 + $0x10] sm:$0xff]   ;;  %v3121_v49 = vrot.slane %v14649_v30, 1  ;;  %v3647_v17 = vsel %vm2712_vm15, %v17176_v45, 0  ;;  %v14651_v30 = vld [vmem:[#allocation2 + $0x28] sm:$0xff]  }
 0x48a   : > { %20521 = vst [vmem:[#allocation155_spill] sm:$0xff] %v17512_v62  ;;  %20522 = vst [vmem:[#allocation156_spill] sm:$0xff] %v17522_v39  ;;  %v17525_v7 = vsel %vm5515_vm6, %v5545_v60, %v5547_v31  ;;  %v17529_v14 = vsel %vm5515_vm6, %v5547_v31, %v5549_v16  ;;  %v17532_v62 = vsel %vm5515_vm6, %v5549_v16, %v5551_v33  ;;  %v3119_v10 = vrot.slane %v14648_v28, 1  ;;  %v17537_v39 = vld [vmem:[#allocation15 + $0x10] sm:$0xf]  ;;  %v14652_v33 = vld [vmem:[#allocation2 + $0x30] sm:$0xff]  }
 0x48b   : > { %v14650_v16 = vld [vmem:[#allocation2 + $0x20] sm:$0xff]   ;;  %v3125_v31 = vrot.slane %v14651_v30, 1  ;;  %v14655_v30 = vld [vmem:[#allocation2 + $0x48] sm:$0xff]  }
 0x48c   : > { %v3120_v19 = vsel %vm3115_vm7, %v3117_v8, %v3119_v10  ;;  %v3122_v60 = vsel %vm3115_vm7, %v3119_v10, %v3121_v49  ;;  %v3123_v28 = vrot.slane %v14650_v16, 1  ;;  %v3127_v10 = vrot.slane %v14652_v33, 1  ;;  %v14654_v16 = vld [vmem:[#allocation2 + $0x40] sm:$0xff]   ;;  %v14656_v33 = vld [vmem:[#allocation2 + $0x50] sm:$0xff]  }
 0x48e   : > { %v3124_v45 = vsel %vm3115_vm7, %v3121_v49, %v3123_v28  ;;  %v3126_v8 = vsel %vm3115_vm7, %v3123_v28, %v3125_v31  ;;  %v3131_v49 = vrot.slane %v14654_v16, 1 }
 0x490   : > { %12615 = vmatmul.mubr.msk.bf16.gmra.mrb[36].mxu0 %vm873_vm1, %v17039_v13 }
 0x491   : > { %12620 = vmatprep.mubr.msk.bf16.mxu0 %vm873_vm1, %v3118_v40  ;;  %v14653_v40 = vld [vmem:[#allocation2 + $0x38] sm:$0xff]  }
 0x498   : > { %12621 = vmatmul.mubr.msk.bf16.vlgmr.msra.gmra.mrb[4].mxu0 %vm873_vm1, %v3120_v19  ;;  %v3128_v19 = vsel %vm3115_vm7, %v3125_v31, %v3127_v10  ;;  %v3135_v31 = vrot.slane %v14656_v33, 1  ;;  %v3555_v33 = vrot.slane %v17060_v37, 1  ;;  %v4311_v37 = vld [vmem:[#allocation15 + $0x14] sm:$0xf] }
 0x499   : > { %12657 = vmatpush3.bf16.msra.mxu0 %v3647_v17  ;;  %12624 = vmatprep.mubr.msk.bf16.mxu0 %vm873_vm1, %v3122_v60  ;;  %v3129_v17 = vrot.slane %v14653_v40, 1  ;;  %v3137_v40 = vrot.slane %v17004_v9, 1  ;;  %v3143_v9 = vrot.slane %v17026_v34, 1 }
 0x49a   : > { %13991 = vmatprep.subr.msk.bf16.mxu0 %vm2712_vm15, %v17537_v39 }
 0x49b   : > { %v3130_v60 = vsel %vm3115_vm7, %v3127_v10, %v3129_v17  ;;  %v3132_v28 = vsel %vm3115_vm7, %v3129_v17, %v3131_v49  ;;  %v3139_v17 = vrot.slane %v17007_v55, 1 }
 0x49d   : > { %v3140_v16 = vsel %vm3115_vm7, %v3137_v40, %v3139_v17 }
 0x4a0   : > { %12625 = vmatmul.mubr.msk.bf16.gmra.mrb[8].mxu0 %vm873_vm1, %v3124_v45  ;;  %v3133_v45 = vrot.slane %v14655_v30, 1  ;;  %v3145_v30 = vrot.slane %v17035_v1, 1  ;;  %v3151_v1 = vrot.slane %v17050_v53, 1 }
 0x4a1   : > { %12628 = vmatprep.mubr.msk.bf16.mxu0 %vm873_vm1, %v3126_v8 }
 0x4a2   : > { %v3134_v8 = vsel %vm3115_vm7, %v3131_v49, %v3133_v45  ;;  %v3136_v10 = vsel %vm3115_vm7, %v3133_v45, %v3135_v31  ;;  %v3146_v55 = vsel %vm3115_vm7, %v3143_v9, %v3145_v30 }
 0x4a8   : > { %12629 = vmatmul.mubr.msk.bf16.gmra.mrb[12].mxu0 %vm873_vm1, %v3128_v19  ;;  %v3138_v19 = vsel %vm3115_vm7, %v3135_v31, %v3137_v40  ;;  %v3556_v31 = vrot.slane %v17063_v48, 1 }
 0x4a9   : > { %12632 = vmatprep.mubr.msk.bf16.mxu0 %vm873_vm1, %v3130_v60  ;;  %v3141_v60 = vrot.slane %v17019_v20, 1  ;;  %v3147_v20 = vrot.slane %v17037_v57, 1 }
 0x4aa   : > { %v3557_v57 = vsel %vm3115_vm7, %v3555_v33, %v3556_v31  ;;  %v20526_v33 = vld [vmem:[#allocation99_spill] sm:$0xff] }
 0x4ab   : > { %v3142_v49 = vsel %vm3115_vm7, %v3139_v17, %v3141_v60  ;;  %v3144_v45 = vsel %vm3115_vm7, %v3141_v60, %v3143_v9  ;;  %v3562_v17 = vrot.slane %v17080_v25, 1  ;;  %v3566_v60 = vrot.slane %v17093_v35, 1 }
 0x4ac   : > { %v3572_v9 = vrot.slane %v17111_v11, 1  ;;  %v20523_v11 = vld [vmem:[#allocation93_spill] sm:$0xff] }
 0x4b0   : > { %12633 = vmatmul.mubr.msk.bf16.gmra.mrb[16].mxu0 %vm873_vm1, %v3132_v28  ;;  %v3149_v28 = vrot.slane %v17039_v13, 1  ;;  %v3558_v13 = vrot.slane %v17067_v26, 1  ;;  %v3564_v26 = vrot.slane %v17089_v3, 1  ;;  %v3570_v3 = vrot.slane %v17102_v44, 1 }
 0x4b1   : > { %12636 = vmatprep.mubr.msk.bf16.mxu0 %vm873_vm1, %v3134_v8  ;;  %v3148_v8 = vsel %vm3115_vm7, %v3145_v30, %v3147_v20 }
 0x4b2   : > { %v3150_v34 = vsel %vm3115_vm7, %v3147_v20, %v3149_v28  ;;  %v3152_v40 = vsel %vm3115_vm7, %v3149_v28, %v3151_v1  ;;  %v3559_v53 = vsel %vm3115_vm7, %v3556_v31, %v3558_v13  ;;  %v3573_v35 = vsel %vm3115_vm7, %v3570_v3, %v3572_v9  ;;  %v20524_v28 = vld [vmem:[#allocation95_spill] sm:$0xff] }
 0x4b3   : > { %v3578_v20 = vrot.slane %v20523_v11, 1  ;;  %v3584_v31 = vrot.slane %v20526_v33, 1  ;;  %v20540_v11 = vld [vmem:[#allocation106_spill] sm:$0xff] }
 0x4b8   : > { %12637 = vmatmul.mubr.msk.bf16.gmra.mrb[20].mxu0 %vm873_vm1, %v3136_v10  ;;  %v3560_v10 = vrot.slane %v17074_v23, 1 }
 0x4b9   : > { %12640 = vmatprep.mubr.msk.bf16.mxu0 %vm873_vm1, %v3138_v19  ;;  %v4094_v19 = vsel %vm2712_vm15, %v17537_v39, 0  ;;  %v3565_v39 = vsel %vm3115_vm7, %v3562_v17, %v3564_v26 }
 0x4ba   : > { %v3561_v48 = vsel %vm3115_vm7, %v3558_v13, %v3560_v10  ;;  %v3563_v23 = vsel %vm3115_vm7, %v3560_v10, %v3562_v17  ;;  %v20527_v13 = vld [vmem:[#allocation101_spill] sm:$0xff]  ;;  %v14253_v17 = vld [vmem:[#allocation2 + $0x98] ss:$0 sps:$4 sm:$0x11]  }
 0x4bb   : > { %v3586_v10 = vrot.slane %v20527_v13, 1  ;;  %v20547_v13 = vld [vmem:[#allocation111_spill] sm:$0xff] }
 0x4c0   : > { %12641 = vmatmul.mubr.msk.bf16.gmra.mrb[24].mxu0 %vm873_vm1, %v3140_v16  ;;  %v3568_v16 = vrot.slane %v17098_v51, 1  ;;  %v3574_v51 = vrot.slane %v17117_v38, 1 }
 0x4c1   : > { %12644 = vmatprep.mubr.msk.bf16.mxu0 %vm873_vm1, %v3142_v49  ;;  %v3567_v49 = vsel %vm3115_vm7, %v3564_v26, %v3566_v60 }
 0x4c2   : > { %v3569_v25 = vsel %vm3115_vm7, %v3566_v60, %v3568_v16  ;;  %v3571_v30 = vsel %vm3115_vm7, %v3568_v16, %v3570_v3  ;;  %v20529_v60 = vld [vmem:[#allocation49_spill] sm:$0xff]  ;;  %v4408_v16 = vsel %vm2712_vm15, %v4311_v37, 0  ;;  %v20531_v3 = vld [vmem:[#allocation91_spill] sm:$0xff] }
 0x4c8   : > { %12645 = vmatmul.mubr.msk.bf16.gmra.mrb[28].mxu0 %vm873_vm1, %v3144_v45  ;;  %v3576_v45 = vrot.slane %v17125_v22, 1  ;;  %v20525_v22 = vld [vmem:[#allocation97_spill] sm:$0xff] }
 0x4c9   : > { %12648 = vmatprep.mubr.msk.bf16.mxu0 %vm873_vm1, %v3146_v55  ;;  %v3575_v55 = vsel %vm3115_vm7, %v3572_v9, %v3574_v51  ;;  %v3582_v1 = vrot.slane %v20525_v22, 1  ;;  %v20532_v9 = vld [vmem:[#allocation92_spill] sm:$0xff] }
 0x4ca   : > { %v3577_v44 = vsel %vm3115_vm7, %v3574_v51, %v3576_v45  ;;  %v20536_v51 = vld [vmem:[#allocation100_spill] sm:$0xff] }
 0x4d0   : > { %12649 = vmatmul.mubr.msk.bf16.gmra.mrb[32].mxu0 %vm873_vm1, %v3148_v8  ;;  %v3580_v8 = vrot.slane %v20524_v28, 1  ;;  %v20542_v28 = vld [vmem:[#allocation108_spill] sm:$0xff] }
 0x4d1   : > { %12652 = vmatprep.mubr.msk.bf16.mxu0 %vm873_vm1, %v3150_v34  ;;  %v3579_v34 = vsel %vm3115_vm7, %v3576_v45, %v3578_v20  ;;  %v20537_v45 = vld [vmem:[#allocation102_spill] sm:$0xff] }
 0x4d2   : > { %v3581_v38 = vsel %vm3115_vm7, %v3578_v20, %v3580_v8  ;;  %v20541_v20 = vld [vmem:[#allocation107_spill] sm:$0xff] }
 0x4d8   : > { %12653 = vmatmul.mubr.msk.bf16.gmra.mrb[36].mxu0 %vm873_vm1, %v3152_v40  ;;  %v3583_v40 = vsel %vm3115_vm7, %v3580_v8, %v3582_v1  ;;  %v20543_v8 = vld [vmem:[#allocation109_spill] sm:$0xff] }
 0x4d9   : > { %12658 = vmatprep.mubr.msk.bf16.mxu0 %vm873_vm1, %v3557_v57  ;;  %v3585_v57 = vsel %vm3115_vm7, %v3582_v1, %v3584_v31 }
 0x4e0   : > { %12659 = vmatmul.mubr.msk.bf16.vlgmr.msra.gmra.mrb[4].mxu0 %vm873_vm1, %v3559_v53 }
 0x4e1   : > { %12695 = vmatpush3.bf16.msra.mxu0 %v4094_v19  ;;  %12662 = vmatprep.mubr.msk.bf16.mxu0 %vm873_vm1, %v3561_v48  ;;  %v20528_v19 = vld [vmem:[#allocation103_spill] sm:$0xff]  ;;  %v3587_v48 = vsel %vm3115_vm7, %v3584_v31, %v3586_v10  ;;  %v20545_v31 = vld [vmem:[#allocation110_spill] sm:$0xff] }
 0x4e2   : > { %13992 = vmatprep.subr.msk.bf16.mxu0 %vm2712_vm15, %v4311_v37  ;;  %v3588_v53 = vrot.slane %v20528_v19, 1  ;;  %v20535_v37 = vld [vmem:[#allocation98_spill] sm:$0xff]  ;;  %v20548_v19 = vld [vmem:[#allocation112_spill] sm:$0xff] }
 0x4e4   : > { %v3589_v26 = vsel %vm3115_vm7, %v3586_v10, %v3588_v53 }
 0x4e8   : > { %12663 = vmatmul.mubr.msk.bf16.gmra.mrb[8].mxu0 %vm873_vm1, %v3563_v23  ;;  %v3590_v23 = vrot.slane %v14253_v17, 1  ;;  %v20549_v17 = vld [vmem:[#allocation114_spill] sm:$0xff] }
 0x4e9   : > { %12666 = vmatprep.mubr.msk.bf16.mxu0 %vm873_vm1, %v3565_v39 }
 0x4ea   : > { %v3591_v39 = vsel %vm3115_vm7, %v3588_v53, %v3590_v23  ;;  %v20551_v23 = vld [vmem:[#allocation116_spill] sm:$0xff] }
 0x4f0   : > { %12667 = vmatmul.mubr.msk.bf16.gmra.mrb[12].mxu0 %vm873_vm1, %v3567_v49  ;;  %v4661_v49 = vld [vmem:[#allocation15 + $0x18] sm:$0xf] }
 0x4f1   : > { %12670 = vmatprep.mubr.msk.bf16.mxu0 %vm873_vm1, %v3569_v25  ;;  %v20530_v25 = vld [vmem:[#allocation90_spill] sm:$0xff]  ;;  %v4847_v53 = vsel %vm2712_vm15, %v4661_v49, 0 }
 0x4f8   : > { %12671 = vmatmul.mubr.msk.bf16.gmra.mrb[16].mxu0 %vm873_vm1, %v3571_v30  ;;  %v20533_v30 = vld [vmem:[#allocation94_spill] sm:$0xff] }
 0x4f9   : > { %12674 = vmatprep.mubr.msk.bf16.mxu0 %vm873_vm1, %v3573_v35  ;;  %v20534_v35 = vld [vmem:[#allocation96_spill] sm:$0xff] }
 0x500   : > { %12675 = vmatmul.mubr.msk.bf16.gmra.mrb[20].mxu0 %vm873_vm1, %v3575_v55  ;;  %v20538_v55 = vld [vmem:[#allocation104_spill] sm:$0xff] }
 0x501   : > { %12678 = vmatprep.mubr.msk.bf16.mxu0 %vm873_vm1, %v3577_v44  ;;  %v20539_v44 = vld [vmem:[#allocation105_spill] sm:$0xff] }
 0x508   : > { %12679 = vmatmul.mubr.msk.bf16.gmra.mrb[24].mxu0 %vm873_vm1, %v3579_v34  ;;  %v20544_v34 = vld [vmem:[#allocation118_spill] sm:$0xff] }
 0x509   : > { %12682 = vmatprep.mubr.msk.bf16.mxu0 %vm873_vm1, %v3581_v38  ;;  %v4031_v38 = vshrl.u32 %v20544_v34, 16  ;;  %v4034_v22 = vshll.u32 %v20544_v34, 16  ;;  %v4758_v34 = vrot.slane %v17307_v5, 2  ;;  %v4764_v5 = vrot.slane %v17323_v27, 2 }
 0x50b   : > { %v4033_v1 = vrot.slane %v4031_v38, 1  ;;  %v4036_v33 = vrot.slane %v4034_v22, 2  ;;  %v4760_v38 = vrot.slane %v17313_v42, 2 }
 0x510   : > { %12683 = vmatmul.mubr.msk.bf16.gmra.mrb[28].mxu0 %vm873_vm1, %v3583_v40  ;;  %v20546_v40 = vld [vmem:[#allocation113_spill] sm:$0xff] }
 0x511   : > { %12686 = vmatprep.mubr.msk.bf16.mxu0 %vm873_vm1, %v3585_v57  ;;  %v4037_v57 = vor.u32 %v4036_v33, %v4033_v1  ;;  %v5511_v33 = vld [vmem:[#allocation15 + $0x20] sm:$0xf] }
 0x513   : > { %v4038_v10 = vsel %vm3868_vm3, %v20547_v13, %v4037_v57  ;;  %v15274_v57 = vmov 0.0|0.0   ;;  %v4766_v13 = vrot.slane %v17328_v0, 2 }
 0x514   : > { %13295 = vmatprep.subr.bf16.mxu1 %v15274_v57 }
 0x518   : > { %12687 = vmatmul.mubr.msk.bf16.gmra.mrb[32].mxu0 %vm873_vm1, %v3587_v48  ;;  %v5064_v48 = vld [vmem:[#allocation15 + $0x1c] sm:$0xf] }
 0x519   : > { %12690 = vmatprep.mubr.msk.bf16.mxu0 %vm873_vm1, %v3589_v26  ;;  %v20550_v26 = vld [vmem:[#allocation115_spill] sm:$0xff]  ;;  %v5294_v22 = vsel %vm2712_vm15, %v5064_v48, 0 }
 0x520   : > { %12691 = vmatmul.mubr.msk.bf16.gmra.mrb[36].mxu0 %vm873_vm1, %v3591_v39  ;;  %v20552_v39 = vld [vmem:[#allocation117_spill] sm:$0xff] }
 0x521   : > { %12696 = vmatprep.mubr.msk.bf16.mxu0 %vm873_vm1, %v20529_v60  ;;  %v20553_v60 = vld [vmem:[#allocation119_spill] sm:$0xff] }
 0x528   : > { %12697 = vmatmul.mubr.msk.bf16.vlgmr.msra.gmra.mrb[4].mxu0 %vm873_vm1, %v20530_v25  ;;  %v20556_v25 = vld [vmem:[#allocation122_spill] sm:$0xff] }
 0x529   : > { %12733 = vmatpush3.bf16.msra.mxu0 %v4408_v16  ;;  %12700 = vmatprep.mubr.msk.bf16.mxu0 %vm873_vm1, %v20531_v3  ;;  %v20554_v16 = vld [vmem:[#allocation120_spill] sm:$0xff]  ;;  %v20557_v3 = vld [vmem:[#allocation123_spill] sm:$0xff] }
 0x52a   : > { %13993 = vmatprep.subr.msk.bf16.mxu0 %vm2712_vm15, %v4661_v49  ;;  %v20555_v49 = vld [vmem:[#allocation121_spill] sm:$0xff] }
 0x530   : > { %12701 = vmatmul.mubr.msk.bf16.gmra.mrb[8].mxu0 %vm873_vm1, %v20532_v9  ;;  %v20558_v9 = vld [vmem:[#allocation124_spill] sm:$0xff] }
 0x531   : > { %12704 = vmatprep.mubr.msk.bf16.mxu0 %vm873_vm1, %v20533_v30  ;;  %v20559_v30 = vld [vmem:[#allocation125_spill] sm:$0xff] }
 0x538   : > { %12705 = vmatmul.mubr.msk.bf16.gmra.mrb[12].mxu0 %vm873_vm1, %v20534_v35  ;;  %v20560_v35 = vld [vmem:[#allocation126_spill] sm:$0xff] }
 0x539   : > { %12708 = vmatprep.mubr.msk.bf16.mxu0 %vm873_vm1, %v20535_v37  ;;  %v20561_v37 = vld [vmem:[#allocation127_spill] sm:$0xff] }
 0x540   : > { %12709 = vmatmul.mubr.msk.bf16.gmra.mrb[16].mxu0 %vm873_vm1, %v20536_v51  ;;  %v20562_v51 = vld [vmem:[#allocation128_spill] sm:$0xff] }
 0x541   : > { %12712 = vmatprep.mubr.msk.bf16.mxu0 %vm873_vm1, %v20537_v45  ;;  %v20563_v45 = vld [vmem:[#allocation129_spill] sm:$0xff] }
 0x548   : > { %12713 = vmatmul.mubr.msk.bf16.gmra.mrb[20].mxu0 %vm873_vm1, %v20538_v55  ;;  %v20564_v55 = vld [vmem:[#allocation130_spill] sm:$0xff] }
 0x549   : > { %12716 = vmatprep.mubr.msk.bf16.mxu0 %vm873_vm1, %v20539_v44  ;;  %v20565_v44 = vld [vmem:[#allocation132_spill] sm:$0xff] }
 0x550   : > { %12717 = vmatmul.mubr.msk.bf16.gmra.mrb[24].mxu0 %vm873_vm1, %v20540_v11  ;;  %v4755_v11 = vrot.slane %v20565_v44, 2  ;;  %v20574_v44 = vld [vmem:[#allocation140_spill] sm:$0xff] }
 0x551   : > { %12720 = vmatprep.mubr.msk.bf16.mxu0 %vm873_vm1, %v20541_v20  ;;  %v4756_v20 = vrot.slane %v17305_v54, 2  ;;  %v4761_v54 = vsel %vm4315_vm4, %v4758_v34, %v4760_v38 }
 0x553   : > { %v4759_v1 = vsel %vm4315_vm4, %v4756_v20, %v4758_v34  ;;  %v5234_v34 = vshll.u32 %v17477_v21, 16 }
 0x558   : > { %12721 = vmatmul.mubr.msk.bf16.gmra.mrb[28].mxu0 %vm873_vm1, %v20542_v28  ;;  %v20566_v28 = vld [vmem:[#allocation131_spill] sm:$0xff] }
 0x559   : > { %12724 = vmatprep.mubr.msk.bf16.mxu0 %vm873_vm1, %v20543_v8  ;;  %v4757_v8 = vsel %vm4315_vm4, %v4755_v11, %v4756_v20  ;;  %v20575_v11 = vld [vmem:[#allocation141_spill] sm:$0xff]  ;;  %v20576_v20 = vld [vmem:[#allocation142_spill] sm:$0xff] }
 0x560   : > { %12725 = vmatmul.mubr.msk.bf16.gmra.mrb[32].mxu0 %vm873_vm1, %v20545_v31  ;;  %v4762_v31 = vrot.slane %v17317_v24, 2  ;;  %v4770_v24 = vrot.slane %v17340_v18, 2 }
 0x561   : > { %12728 = vmatprep.mubr.msk.bf16.mxu0 %vm873_vm1, %v20546_v40 }
 0x562   : > { %v4763_v42 = vsel %vm4315_vm4, %v4760_v38, %v4762_v31  ;;  %v4765_v40 = vsel %vm4315_vm4, %v4762_v31, %v4764_v5  ;;  %v20582_v31 = vld [vmem:[#allocation148_spill] sm:$0xff] }
 0x568   : > { %12729 = vmatmul.mubr.msk.bf16.gmra.mrb[36].mxu0 %vm873_vm1, %v4038_v10  ;;  %v4768_v10 = vrot.slane %v17334_v6, 2  ;;  %v4774_v6 = vrot.slane %v17355_v43, 2 }
 0x569   : > { %12734 = vmatprep.mubr.msk.bf16.mxu0 %vm873_vm1, %v20548_v19  ;;  %v4767_v19 = vsel %vm4315_vm4, %v4764_v5, %v4766_v13  ;;  %v20583_v5 = vld [vmem:[#allocation149_spill] sm:$0xff] }
 0x56a   : > { %v4769_v27 = vsel %vm4315_vm4, %v4766_v13, %v4768_v10 }
 0x570   : > { %12735 = vmatmul.mubr.msk.bf16.vlgmr.msra.gmra.mrb[4].mxu0 %vm873_vm1, %v20549_v17  ;;  %v4776_v17 = vrot.slane %v17362_v63, 2  ;;  %v4782_v63 = vrot.slane %v17381_v56, 2 }
 0x571   : > { %12771 = vmatpush3.bf16.msra.mxu0 %v4847_v53  ;;  %12738 = vmatprep.mubr.msk.bf16.mxu0 %vm873_vm1, %v20550_v26  ;;  %v4772_v53 = vrot.slane %v17346_v46, 2  ;;  %v4778_v46 = vrot.slane %v17370_v61, 2 }
 0x572   : > { %13994 = vmatprep.subr.msk.bf16.mxu0 %vm2712_vm15, %v5064_v48  ;;  %v4771_v48 = vsel %vm4315_vm4, %v4768_v10, %v4770_v24  ;;  %v4777_v18 = vsel %vm4315_vm4, %v4774_v6, %v4776_v17  ;;  %v20585_v10 = vld [vmem:[#allocation151_spill] sm:$0xff] }
 0x573   : > { %v4773_v0 = vsel %vm4315_vm4, %v4770_v24, %v4772_v53  ;;  %v4775_v26 = vsel %vm4315_vm4, %v4772_v53, %v4774_v6  ;;  %v20587_v24 = vld [vmem:[#allocation153_spill] sm:$0xff] }
 0x578   : > { %12739 = vmatmul.mubr.msk.bf16.gmra.mrb[8].mxu0 %vm873_vm1, %v20551_v23  ;;  %v4780_v23 = vrot.slane %v17375_v15, 2  ;;  %v4786_v15 = vrot.slane %v17402_v52, 2  ;;  %v5608_v52 = vsel %vm2712_vm15, %v5511_v33, 0 }
 0x579   : > { %12742 = vmatprep.mubr.msk.bf16.mxu0 %vm873_vm1, %v20552_v39  ;;  %v4779_v39 = vsel %vm4315_vm4, %v4776_v17, %v4778_v46 }
 0x57a   : > { %v4781_v43 = vsel %vm4315_vm4, %v4778_v46, %v4780_v23  ;;  %v20592_v46 = vmov 0  }
 0x57b   : > { %6791 = vst.msk [vmem:[#allocation3] sm:$0xf] %vm6790_vm9, %v20592_v46  ;;  %6792 = vst.msk [vmem:[#allocation3 + $0x4] sm:$0xf] %vm6790_vm9, %v20592_v46 }
 0x57c   : > { %6803 = vst.msk [vmem:[#allocation3 + $0x9c] sm:$0xf] %vm6790_vm9, %v20592_v46  ;;  %6804 = vst.msk [vmem:[#allocation3 + $0xa0] sm:$0xf] %vm6790_vm9, %v20592_v46 }
 0x580   : > { %12743 = vmatmul.mubr.msk.bf16.gmra.mrb[12].mxu0 %vm873_vm1, %v20553_v60  ;;  %v4784_v60 = vrot.slane %v17398_v29, 2 }
 0x581   : > { %12746 = vmatprep.mubr.msk.bf16.mxu0 %vm873_vm1, %v20554_v16  ;;  %v4783_v16 = vsel %vm4315_vm4, %v4780_v23, %v4782_v63 }
 0x582   : > { %v4785_v61 = vsel %vm4315_vm4, %v4782_v63, %v4784_v60 }
 0x588   : > { %12747 = vmatmul.mubr.msk.bf16.gmra.mrb[16].mxu0 %vm873_vm1, %v20555_v49  ;;  %v4788_v49 = vrot.slane %v17406_v41, 2  ;;  %v20568_v41 = vld [vmem:[#allocation134_spill] sm:$0xff] }
 0x589   : > { %12750 = vmatprep.mubr.msk.bf16.mxu0 %vm873_vm1, %v20556_v25  ;;  %v4787_v25 = vsel %vm4315_vm4, %v4784_v60, %v4786_v15 }
 0x58a   : > { %v4789_v56 = vsel %vm4315_vm4, %v4786_v15, %v4788_v49 }
 0x590   : > { %12751 = vmatmul.mubr.msk.bf16.gmra.mrb[20].mxu0 %vm873_vm1, %v20557_v3  ;;  %v14274_v3 = vld [vmem:[#allocation2 + $0xa0] ss:$0 sps:$4 sm:$0x33]  }
 0x591   : > { %12754 = vmatprep.mubr.msk.bf16.mxu0 %vm873_vm1, %v20558_v9  ;;  %v4790_v29 = vrot.slane %v14274_v3, 2 }
 0x593   : > { %v4791_v9 = vsel %vm4315_vm4, %v4788_v49, %v4790_v29 }
 0x598   : > { %12755 = vmatmul.mubr.msk.bf16.gmra.mrb[24].mxu0 %vm873_vm1, %v20559_v30  ;;  %v20567_v30 = vld [vmem:[#allocation133_spill] sm:$0xff] }
 0x599   : > { %12758 = vmatprep.mubr.msk.bf16.mxu0 %vm873_vm1, %v20560_v35  ;;  %v20569_v35 = vld [vmem:[#allocation135_spill] sm:$0xff] }
 0x5a0   : > { %12759 = vmatmul.mubr.msk.bf16.gmra.mrb[28].mxu0 %vm873_vm1, %v20561_v37  ;;  %v20570_v37 = vld [vmem:[#allocation136_spill] sm:$0xff] }
 0x5a1   : > { %12762 = vmatprep.mubr.msk.bf16.mxu0 %vm873_vm1, %v20562_v51  ;;  %v20571_v51 = vld [vmem:[#allocation137_spill] sm:$0xff] }
 0x5a8   : > { %12763 = vmatmul.mubr.msk.bf16.gmra.mrb[32].mxu0 %vm873_vm1, %v20563_v45  ;;  %v20572_v45 = vld [vmem:[#allocation138_spill] sm:$0xff] }
 0x5a9   : > { %12766 = vmatprep.mubr.msk.bf16.mxu0 %vm873_vm1, %v20564_v55  ;;  %v20573_v55 = vld [vmem:[#allocation139_spill] sm:$0xff] }
 0x5b0   : > { %12767 = vmatmul.mubr.msk.bf16.gmra.mrb[36].mxu0 %vm873_vm1, %v20566_v28  ;;  %v20577_v28 = vld [vmem:[#allocation143_spill] sm:$0xff] }
 0x5b1   : > { %12772 = vmatprep.mubr.msk.bf16.mxu0 %vm873_vm1, %v4757_v8  ;;  %v5231_v8 = vshrl.u32 %v17477_v21, 16 }
 0x5b3   : > { %v5233_v38 = vrot.slane %v5231_v8, 2 }
 0x5b8   : > { %12773 = vmatmul.mubr.msk.bf16.vlgmr.msra.gmra.mrb[4].mxu0 %vm873_vm1, %v4759_v1  ;;  %v5875_v1 = vld [vmem:[#allocation18 + $0x10] sm:$0xff] }
 0x5b9   : > { %12809 = vmatpush3.bf16.msra.mxu0 %v5294_v22  ;;  %12776 = vmatprep.mubr.msk.bf16.mxu0 %vm873_vm1, %v4761_v54  ;;  %v5236_v22 = vrot.slane %v5234_v34, 3  ;;  %v20578_v54 = vld [vmem:[#allocation144_spill] sm:$0xff] }
 0x5ba   : > { %13995 = vmatprep.subr.msk.bf16.mxu0 %vm2712_vm15, %v5511_v33  ;;  %v5876_v33 = vld [vmem:[#allocation18 + $0x18] sm:$0xff] }
 0x5c0   : > { %12777 = vmatmul.mubr.msk.bf16.gmra.mrb[8].mxu0 %vm873_vm1, %v4763_v42  ;;  %v20584_v42 = vld [vmem:[#allocation150_spill] sm:$0xff] }
 0x5c1   : > { %12780 = vmatprep.mubr.msk.bf16.mxu0 %vm873_vm1, %v4765_v40  ;;  %v5866_v40 = vld [vmem:[%s683_s30] sm:$0x1] }
 0x5c2   : > { %v5867_v13 = vsub.f32 0.0, %v5866_v40 }
 0x5c8   : > { %12781 = vmatmul.mubr.msk.bf16.gmra.mrb[12].mxu0 %vm873_vm1, %v4767_v19  ;;  %v20586_v19 = vld [vmem:[#allocation152_spill] sm:$0xff] }
 0x5c9   : > { %12784 = vmatprep.mubr.msk.bf16.mxu0 %vm873_vm1, %v4769_v27  ;;  %v5868_v27 = vmul.f32 1.442695, %v5867_v13 }
 0x5cb   : > { %14494 = vpow2.f32 %v5868_v27 }
 0x5d0   : > { %12785 = vmatmul.mubr.msk.bf16.gmra.mrb[16].mxu0 %vm873_vm1, %v4771_v48  ;;  %v20589_v48 = vld [vmem:[#allocation155_spill] sm:$0xff] }
 0x5d1   : > { %12788 = vmatprep.mubr.msk.bf16.mxu0 %vm873_vm1, %v4773_v0  ;;  %v20590_v0 = vld [vmem:[#allocation156_spill] sm:$0xff] }
 0x5d5   : > { %v14495_v53 = vpop.eup %14494 }
 0x5d6   : > { %v5870_v6 = vadd.f32 1.0, %v14495_v53 }
 0x5d8   : > { %12789 = vmatmul.mubr.msk.bf16.gmra.mrb[20].mxu0 %vm873_vm1, %v4775_v26  ;;  %14496 = vrcp.f32 %v5870_v6  ;;  %v20591_v26 = vmov 0.0  }
 0x5d9   : > { %12792 = vmatprep.mubr.msk.bf16.mxu0 %vm873_vm1, %v4777_v18 }
 0x5e0   : > { %12793 = vmatmul.mubr.msk.bf16.gmra.mrb[24].mxu0 %vm873_vm1, %v4779_v39 }
 0x5e1   : > { %12796 = vmatprep.mubr.msk.bf16.mxu0 %vm873_vm1, %v4781_v43 }
 0x5e2   : > { %v14497_v17 = vpop.eup %14496 }
 0x5e3   : > { %v5872_v18 = vmul.f32 %v14497_v17, %v5866_v40 }
 0x5e8   : > { %12797 = vmatmul.mubr.msk.bf16.gmra.mrb[28].mxu0 %vm873_vm1, %v4783_v16 }
 0x5e9   : > { %12800 = vmatprep.mubr.msk.bf16.mxu0 %vm873_vm1, %v4785_v61 }
 0x5f0   : > { %12801 = vmatmul.mubr.msk.bf16.gmra.mrb[32].mxu0 %vm873_vm1, %v4787_v25 }
 0x5f1   : > { %12804 = vmatprep.mubr.msk.bf16.mxu0 %vm873_vm1, %v4789_v56 }
 0x5f8   : > { %12805 = vmatmul.mubr.msk.bf16.gmra.mrb[36].mxu0 %vm873_vm1, %v4791_v9 }
 0x5f9   : > { %12810 = vmatprep.mubr.msk.bf16.mxu0 %vm873_vm1, %v20567_v30 }
 0x600   : > { %12811 = vmatmul.mubr.msk.bf16.vlgmr.msra.gmra.mrb[4].mxu0 %vm873_vm1, %v20568_v41 }
 0x601   : > { %12847 = vmatpush3.bf16.msra.mxu0 %v5608_v52  ;;  %12814 = vmatprep.mubr.msk.bf16.mxu0 %vm873_vm1, %v20569_v35  ;;  %v6108_v35 = vld [vmem:[#allocation21] sm:$0xff] }
 0x602   : > { %13289 = vmatprep.subr.bf16.mxu0 %v15274_v57 }
 0x608   : > { %12815 = vmatmul.mubr.msk.bf16.gmra.mrb[8].mxu0 %vm873_vm1, %v20570_v37  ;;  %v6109_v37 = vld [vmem:[#allocation21 + $0x8] sm:$0xff] }
 0x609   : > { %12818 = vmatprep.mubr.msk.bf16.mxu0 %vm873_vm1, %v20571_v51  ;;  %v17865_v51 = vpack.c.bf16 %v6109_v37, %v6108_v35 }
 0x60b   : > { %13297 = vmatpush3.bf16.msra.mxu1 %v17865_v51 }
 0x60c   : > { %13298 = vmatprep.subr.bf16.mxu1 %v15274_v57 }
 0x610   : > { %12819 = vmatmul.mubr.msk.bf16.gmra.mrb[12].mxu0 %vm873_vm1, %v20572_v45 }
 0x611   : > { %12822 = vmatprep.mubr.msk.bf16.mxu0 %vm873_vm1, %v20573_v55 }
 0x618   : > { %12823 = vmatmul.mubr.msk.bf16.gmra.mrb[16].mxu0 %vm873_vm1, %v20574_v44 }
 0x619   : > { %12826 = vmatprep.mubr.msk.bf16.mxu0 %vm873_vm1, %v20575_v11 }
 0x620   : > { %12827 = vmatmul.mubr.msk.bf16.gmra.mrb[20].mxu0 %vm873_vm1, %v20576_v20 }
 0x621   : > { %12830 = vmatprep.mubr.msk.bf16.mxu0 %vm873_vm1, %v20577_v28 }
 0x628   : > { %12831 = vmatmul.mubr.msk.bf16.gmra.mrb[24].mxu0 %vm873_vm1, %v17427_v50  ;;  %v5237_v50 = vor.u32 %v5236_v22, %v5233_v38 }
 0x629   : > { %12834 = vmatprep.mubr.msk.bf16.mxu0 %vm873_vm1, %v17431_v4 }
 0x62a   : > { %v5238_v4 = vsel %vm5068_vm5, %v17448_v2, %v5237_v50  ;;  %v20580_v2 = vld [vmem:[#allocation146_spill] sm:$0xff] }
 0x630   : > { %12835 = vmatmul.mubr.msk.bf16.gmra.mrb[28].mxu0 %vm873_vm1, %v17435_v47  ;;  %v5873_v47 = vld [vmem:[#allocation18] sm:$0xff] }
 0x631   : > { %12838 = vmatprep.mubr.msk.bf16.mxu0 %vm873_vm1, %v17438_v59  ;;  %v5874_v59 = vld [vmem:[#allocation18 + $0x8] sm:$0xff] }
 0x632   : > { %v13290_v21 = vpack.c.bf16 %v5874_v59, %v5873_v47  ;;  %v11786_v47 = vld [vmem:[#allocation16] ss:$0 sm:$0xff] }
 0x638   : > { %12839 = vmatmul.mubr.msk.bf16.gmra.mrb[32].mxu0 %vm873_vm1, %v17444_v32  ;;  %v20579_v32 = vld [vmem:[#allocation145_spill] sm:$0xff] }
 0x639   : > { %12842 = vmatprep.mubr.msk.bf16.mxu0 %vm873_vm1, %v17466_v58  ;;  %v13293_v58 = vpack.c.bf16 %v5876_v33, %v5875_v1 }
 0x640   : > { %12843 = vmatmul.mubr.msk.bf16.gmra.mrb[36].mxu0 %vm873_vm1, %v5238_v4 }
 0x641   : > { %12848 = vmatprep.mubr.msk.bf16.mxu0 %vm873_vm1, %v17456_v12  ;;  %v20581_v12 = vld [vmem:[#allocation147_spill] sm:$0xff] }
 0x648   : > { %12849 = vmatmul.mubr.msk.bf16.vlgmr.msra.gmra.mrb[4].mxu0 %vm873_vm1, %v20578_v54 }
 0x649   : > { %13291 = vmatpush3.bf16.msra.mxu0 %v13290_v21  ;;  %12852 = vmatprep.mubr.msk.bf16.mxu0 %vm873_vm1, %v20579_v32 }
 0x64a   : > { %13292 = vmatprep.subr.bf16.mxu0 %v15274_v57 }
 0x64d   : > { %13294 = vmatpush3.bf16.msra.mxu0 %v13293_v58 }
 0x650   : > { %12853 = vmatmul.mubr.msk.bf16.gmra.mrb[8].mxu0 %vm873_vm1, %v20580_v2 }
 0x651   : > { %12856 = vmatprep.mubr.msk.bf16.mxu0 %vm873_vm1, %v20581_v12 }
 0x658   : > { %12857 = vmatmul.mubr.msk.bf16.gmra.mrb[12].mxu0 %vm873_vm1, %v20582_v31 }
 0x659   : > { %12860 = vmatprep.mubr.msk.bf16.mxu0 %vm873_vm1, %v17489_v36  ;;  %v20588_v36 = vld [vmem:[#allocation154_spill] sm:$0xff] }
 0x660   : > { %12861 = vmatmul.mubr.msk.bf16.gmra.mrb[16].mxu0 %vm873_vm1, %v20583_v5 }
 0x661   : > { %12864 = vmatprep.mubr.msk.bf16.mxu0 %vm873_vm1, %v20584_v42 }
 0x668   : > { %12865 = vmatmul.mubr.msk.bf16.gmra.mrb[20].mxu0 %vm873_vm1, %v20585_v10 }
 0x669   : > { %12868 = vmatprep.mubr.msk.bf16.mxu0 %vm873_vm1, %v20586_v19 }
 0x670   : > { %12869 = vmatmul.mubr.msk.bf16.gmra.mrb[24].mxu0 %vm873_vm1, %v20587_v24  ;;  %v5877_v24 = vld [vmem:[#allocation19] sm:$0x1] }
 0x671   : > { %12872 = vmatprep.mubr.msk.bf16.mxu0 %vm873_vm1, %v20588_v36 }
 0x678   : > { %12873 = vmatmul.mubr.msk.bf16.gmra.mrb[28].mxu0 %vm873_vm1, %v20589_v48 }
 0x679   : > { %12876 = vmatprep.mubr.msk.bf16.mxu0 %vm873_vm1, %v20590_v0 }
 0x680   : > { %12877 = vmatmul.mubr.msk.bf16.gmra.mrb[32].mxu0 %vm873_vm1, %v17525_v7 }
 0x681   : > { %12880 = vmatprep.mubr.msk.bf16.mxu0 %vm873_vm1, %v17529_v14 }
 0x688   : > { %12881 = vmatmul.mubr.msk.bf16.gmra.mrb[36].mxu0 %vm873_vm1, %v17532_v62 }
 0x689   : > { %12892 = vmatprep.mubr.msk.f32.mxu0 %vm15272_vm0, %v20591_v26 }
 0x690   : > { %12893 = vmatmul.mubr.msk.f32.vlgmr.msra.gmra.mrb[2].mxu0 %vm5878_vm8, %v5872_v18 }
 0x71b   : > { %v12850_v62 = vpop.f32.mrb[4].mxu0 }
 0x71c   : > { %v5644_v7 = vpop.f32.mrb[5].mxu0  ;;  %v5832_v33 = vadd.f32 %v12850_v62, %v11786_v47 }
 0x71d   : > { %v12851_v14 = vpop.f32.mrb[6].mxu0  ;;  %v5830_v54 = vadd.f32 %v11786_v47, %v5644_v7 }
 0x71e   : > { %v5647_v23 = vpop.f32.mrb[7].mxu0  ;;  %v5833_v58 = vadd.f32 %v12851_v14, %v11786_v47 }
 0x71f   : > { %v5831_v2 = vadd.f32 %v11786_v47, %v5647_v23 }
 0x723   : > { %v12854_v39 = vpop.f32.mrb[8].mxu0 }
 0x724   : > { %v5660_v43 = vpop.f32.mrb[9].mxu0  ;;  %v5836_v12 = vadd.f32 %v12854_v39, %v11786_v47 }
 0x725   : > { %v12855_v63 = vpop.f32.mrb[10].mxu0  ;;  %v5834_v57 = vadd.f32 %v11786_v47, %v5660_v43 }
 0x726   : > { %v5663_v60 = vpop.f32.mrb[11].mxu0  ;;  %v5837_v31 = vadd.f32 %v12855_v63, %v11786_v47 }
 0x727   : > { %v5835_v5 = vadd.f32 %v11786_v47, %v5663_v60 }
 0x72b   : > { %v12858_v16 = vpop.f32.mrb[12].mxu0 }
 0x72c   : > { %v5676_v61 = vpop.f32.mrb[13].mxu0  ;;  %v5840_v42 = vadd.f32 %v12858_v16, %v11786_v47 }
 0x72d   : > { %v12859_v15 = vpop.f32.mrb[14].mxu0  ;;  %v5838_v40 = vadd.f32 %v11786_v47, %v5676_v61 }
 0x72e   : > { %v5679_v49 = vpop.f32.mrb[15].mxu0  ;;  %v5841_v13 = vadd.f32 %v12859_v15, %v11786_v47 }
 0x72f   : > { %v5839_v10 = vadd.f32 %v11786_v47, %v5679_v49 }
 0x733   : > { %v12862_v25 = vpop.f32.mrb[16].mxu0 }
 0x734   : > { %v5692_v3 = vpop.f32.mrb[17].mxu0  ;;  %v5844_v19 = vadd.f32 %v12862_v25, %v11786_v47 }
 0x735   : > { %v12863_v56 = vpop.f32.mrb[18].mxu0  ;;  %v5842_v27 = vadd.f32 %v11786_v47, %v5692_v3  ;;  %v20593_v3 = vld [vmem:[#allocation59_spill] sm:$0xff] }
 0x736   : > { %v5695_v29 = vpop.f32.mrb[19].mxu0  ;;  %v5845_v36 = vadd.f32 %v12863_v56, %v11786_v47 }
 0x737   : > { %v5843_v53 = vadd.f32 %v11786_v47, %v5695_v29 }
 0x73b   : > { %v12866_v9 = vpop.f32.mrb[20].mxu0 }
 0x73c   : > { %v5708_v30 = vpop.f32.mrb[21].mxu0  ;;  %v5848_v48 = vadd.f32 %v12866_v9, %v11786_v47 }
 0x73d   : > { %v12867_v52 = vpop.f32.mrb[22].mxu0  ;;  %v5846_v0 = vadd.f32 %v11786_v47, %v5708_v30 }
 0x73e   : > { %v5711_v41 = vpop.f32.mrb[23].mxu0  ;;  %v5849_v6 = vadd.f32 %v12867_v52, %v11786_v47 }
 0x73f   : > { %v5847_v17 = vadd.f32 %v11786_v47, %v5711_v41 }
 0x743   : > { %v12870_v45 = vpop.f32.mrb[24].mxu0 }
 0x744   : > { %v5724_v55 = vpop.f32.mrb[25].mxu0  ;;  %v5852_v18 = vadd.f32 %v12870_v45, %v11786_v47 }
 0x745   : > { %v12871_v44 = vpop.f32.mrb[26].mxu0  ;;  %v5850_v46 = vadd.f32 %v11786_v47, %v5724_v55 }
 0x746   : > { %v5727_v11 = vpop.f32.mrb[27].mxu0  ;;  %v5853_v7 = vadd.f32 %v12871_v44, %v11786_v47 }
 0x747   : > { %v5851_v14 = vadd.f32 %v11786_v47, %v5727_v11 }
 0x74b   : > { %v12874_v20 = vpop.f32.mrb[28].mxu0 }
 0x74c   : > { %v5740_v28 = vpop.f32.mrb[29].mxu0  ;;  %v5856_v23 = vadd.f32 %v12874_v20, %v11786_v47 }
 0x74d   : > { %v12875_v8 = vpop.f32.mrb[30].mxu0  ;;  %v5854_v63 = vadd.f32 %v11786_v47, %v5740_v28 }
 0x74e   : > { %v5743_v34 = vpop.f32.mrb[31].mxu0  ;;  %v5857_v60 = vadd.f32 %v12875_v8, %v11786_v47 }
 0x74f   : > { %v5855_v16 = vadd.f32 %v11786_v47, %v5743_v34 }
 0x753   : > { %v12878_v38 = vpop.f32.mrb[32].mxu0 }
 0x754   : > { %v5756_v22 = vpop.f32.mrb[33].mxu0  ;;  %v5860_v61 = vadd.f32 %v12878_v38, %v11786_v47 }
 0x755   : > { %v12879_v50 = vpop.f32.mrb[34].mxu0  ;;  %v5858_v15 = vadd.f32 %v11786_v47, %v5756_v22 }
 0x756   : > { %v5759_v4 = vpop.f32.mrb[35].mxu0  ;;  %v5861_v49 = vadd.f32 %v12879_v50, %v11786_v47 }
 0x757   : > { %v5859_v25 = vadd.f32 %v11786_v47, %v5759_v4 }
 0x75b   : > { %v12882_v59 = vpop.f32.mrb[36].mxu0 }
 0x75c   : > { %v5772_v21 = vpop.f32.mrb[37].mxu0  ;;  %v5864_v29 = vadd.f32 %v12882_v59, %v11786_v47 }
 0x75d   : > { %v12883_v1 = vpop.f32.mrb[38].mxu0  ;;  %v5862_v9 = vadd.f32 %v11786_v47, %v5772_v21 }
 0x75e   : > { %v5775_v32 = vpop.f32.mrb[39].mxu0  ;;  %v5865_v30 = vadd.f32 %v12883_v1, %v11786_v47 }
 0x75f   : > { %v5863_v52 = vadd.f32 %v11786_v47, %v5775_v32 }
 0x763   : > { %v5948_v62 = vpop.f32.mrb[2].mxu0 }
 0x764   : > { %v5949_v39 = vadd.f32 %v5948_v62, %v5877_v24  ;;  %v12894_v43 = vpop.f32.mrb[3].mxu0 }
 0x766   : > { %v5955_v56 = vrot.slane %v5949_v39, %v20593_v3  ;;  %v20598_v39 = vld [vmem:[#allocation64_spill] sm:$0xff] }
 0x768   : > { %v5956_v41 = vadd.f32 %v5955_v56, %v5830_v54  ;;  %v5957_v35 = vadd.f32 %v5955_v56, %v5831_v2  ;;  %v5958_v37 = vadd.f32 %v5955_v56, %v5832_v33  ;;  %v5959_v45 = vadd.f32 %v5955_v56, %v5833_v58 }
 0x769   : > { %v5960_v55 = vadd.f32 %v5955_v56, %v5834_v57  ;;  %v5961_v44 = vadd.f32 %v5955_v56, %v5835_v5  ;;  %v5962_v11 = vadd.f32 %v5955_v56, %v5836_v12  ;;  %v5963_v20 = vadd.f32 %v5955_v56, %v5837_v31 }
 0x76a   : > { %v5964_v28 = vadd.f32 %v5955_v56, %v5838_v40  ;;  %v5965_v8 = vadd.f32 %v5955_v56, %v5839_v10  ;;  %v5966_v34 = vadd.f32 %v5955_v56, %v5840_v42  ;;  %v5967_v38 = vadd.f32 %v5955_v56, %v5841_v13 }
 0x76b   : > { %v5968_v22 = vadd.f32 %v5955_v56, %v5842_v27  ;;  %v5969_v50 = vadd.f32 %v5955_v56, %v5843_v53  ;;  %v5970_v4 = vadd.f32 %v5955_v56, %v5844_v19  ;;  %v17870_v24 = vadd.f32 %v5955_v56, %v5845_v36  ;;  %v20594_v53 = vld [vmem:[#allocation60_spill] sm:$0xff] }
 0x76c   : > { %v17872_v59 = vadd.f32 %v5955_v56, %v5846_v0  ;;  %v17874_v47 = vadd.f32 %v5955_v56, %v5847_v17  ;;  %v17876_v21 = vadd.f32 %v5955_v56, %v5848_v48  ;;  %v17878_v1 = vadd.f32 %v5955_v56, %v5849_v6  ;;  %v20595_v0 = vld [vmem:[#allocation62_spill] sm:$0xff]  ;;  %v20596_v17 = vld [vmem:[#allocation61_spill] sm:$0xff] }
 0x76d   : > { %v17880_v33 = vadd.f32 %v5955_v56, %v5850_v46  ;;  %v17882_v54 = vadd.f32 %v5955_v56, %v5851_v14  ;;  %v17884_v32 = vadd.f32 %v5955_v56, %v5852_v18  ;;  %v17886_v58 = vadd.f32 %v5955_v56, %v5853_v7  ;;  %v20597_v46 = vld [vmem:[#allocation63_spill] sm:$0xff] }
 0x76e   : > { %v17888_v2 = vadd.f32 %v5955_v56, %v5854_v63  ;;  %v17890_v12 = vadd.f32 %v5955_v56, %v5855_v16  ;;  %v17892_v57 = vadd.f32 %v5955_v56, %v5856_v23  ;;  %v17894_v31 = vadd.f32 %v5955_v56, %v5857_v60  ;;  %v20599_v16 = vld [vmem:[#allocation65_spill] sm:$0xff] }
 0x76f   : > { %v17896_v5 = vadd.f32 %v5955_v56, %v5858_v15  ;;  %v17898_v42 = vadd.f32 %v5955_v56, %v5859_v25  ;;  %v17900_v40 = vadd.f32 %v5955_v56, %v5860_v61  ;;  %v17902_v13 = vadd.f32 %v5955_v56, %v5861_v49  ;;  %v20600_v25 = vld [vmem:[#allocation66_spill] sm:$0xff] }
 0x770   : > { %v17904_v10 = vadd.f32 %v5955_v56, %v5862_v9  ;;  %v17906_v19 = vadd.f32 %v5955_v56, %v5863_v52  ;;  %v17908_v27 = vadd.f32 %v5955_v56, %v5864_v29  ;;  %v17910_v36 = vadd.f32 %v5955_v56, %v5865_v30  ;;  %v20601_v30 = vld [vmem:[#allocation67_spill] sm:$0xff] }
 0x771   : > { %v17913_v48 = vmul.f32 %v5956_v41, %v20594_v53  ;;  %v17916_v6 = vmul.f32 %v5957_v35, %v20595_v0  ;;  %v17919_v18 = vmul.f32 %v5958_v37, %v20596_v17  ;;  %v17922_v62 = vmul.f32 %v5959_v45, %v20597_v46  ;;  %v20602_v37 = vld [vmem:[#allocation69_spill] sm:$0xff] }
 0x772   : > { %v17929_v43 = vmul.f32 %v5960_v55, %v20598_v39  ;;  %v17934_v61 = vmul.f32 %v5961_v44, %v20599_v16  ;;  %v17939_v56 = vmul.f32 %v5962_v11, %v20600_v25  ;;  %v17944_v52 = vmul.f32 %v5963_v20, %v20601_v30  ;;  %v20603_v11 = vld [vmem:[#allocation70_spill] sm:$0xff]  ;;  %v20604_v20 = vld [vmem:[#allocation71_spill] sm:$0xff] }
 0x773   : > { %v6031_v7 = vsel %vm6030_vm12, %v17913_v48, 0.0  ;;  %v6032_v14 = vsel %vm6030_vm12, %v17916_v6, 0.0  ;;  %v6034_v63 = vsel %vm6030_vm12, %v17919_v18, 0.0  ;;  %v6036_v15 = vsel %vm6030_vm12, %v17922_v62, 0.0 }
 0x774   : > { %v6033_v23 = vadd.f32 %v6032_v14, %v6031_v7  ;;  %v6038_v29 = vsel %vm6030_vm12, %v17929_v43, 0.0  ;;  %v6040_v41 = vsel %vm6030_vm12, %v17934_v61, 0.0  ;;  %v17949_v45 = vmul.f32 %v5964_v28, %v20602_v37  ;;  %v20605_v28 = vld [vmem:[#allocation72_spill] sm:$0xff] }
 0x775   : > { %v6042_v55 = vsel %vm6030_vm12, %v17939_v56, 0.0  ;;  %v17954_v7 = vmul.f32 %v5965_v8, %v20603_v11  ;;  %v6044_v14 = vsel %vm6030_vm12, %v17944_v52, 0.0  ;;  %v20606_v8 = vld [vmem:[#allocation74_spill] sm:$0xff] }
 0x776   : > { %v6035_v60 = vadd.f32 %v6034_v63, %v6033_v23  ;;  %v17959_v63 = vmul.f32 %v5966_v34, %v20604_v20  ;;  %v20607_v34 = vld [vmem:[#allocation75_spill] sm:$0xff]  ;;  %v20613_v20 = vld [vmem:[#allocation52_spill] sm:$0xff] }
 0x778   : > { %v6037_v49 = vadd.f32 %v6036_v15, %v6035_v60  ;;  %v6046_v60 = vsel %vm6030_vm12, %v17949_v45, 0.0 }
 0x77a   : > { %v6039_v9 = vadd.f32 %v6038_v29, %v6037_v49  ;;  %v17964_v49 = vmul.f32 %v5967_v38, %v20605_v28  ;;  %v6048_v29 = vsel %vm6030_vm12, %v17954_v7, 0.0  ;;  %v20608_v38 = vld [vmem:[#allocation76_spill] sm:$0xff] }
 0x77c   : > { %v6041_v35 = vadd.f32 %v6040_v41, %v6039_v9  ;;  %v17969_v41 = vmul.f32 %v5968_v22, %v20606_v8  ;;  %v6183_v22 = vmul.f32 %v17913_v48, %v17913_v48 }
 0x77e   : > { %v6043_v44 = vadd.f32 %v6042_v55, %v6041_v35  ;;  %v6050_v35 = vsel %vm6030_vm12, %v17959_v63, 0.0  ;;  %v6219_v8 = vsel %vm6030_vm12, %v6183_v22, 0.0 }
 0x780   : > { %v6045_v23 = vadd.f32 %v6044_v14, %v6043_v44  ;;  %v17974_v44 = vmul.f32 %v5969_v50, %v20607_v34  ;;  %v6052_v14 = vsel %vm6030_vm12, %v17964_v49, 0.0  ;;  %v6185_v34 = vmul.f32 %v17919_v18, %v17919_v18 }
 0x782   : > { %v6047_v15 = vadd.f32 %v6046_v60, %v6045_v23  ;;  %v17979_v60 = vmul.f32 %v5970_v4, %v20608_v38  ;;  %v20610_v4 = vld [vmem:[#allocation78_spill] sm:$0xff] }
 0x783   : > { %v17995_v38 = vmul.f32 %v17872_v59, %v20610_v4  ;;  %v20612_v4 = vld [vmem:[#allocation80_spill] sm:$0xff] }
 0x784   : > { %v6049_v9 = vadd.f32 %v6048_v29, %v6047_v15  ;;  %v6054_v15 = vsel %vm6030_vm12, %v17969_v41, 0.0 }
 0x785   : > { %v6062_v22 = vsel %vm6030_vm12, %v17995_v38, 0.0 }
 0x786   : > { %v6051_v55 = vadd.f32 %v6050_v35, %v6049_v9  ;;  %v6184_v9 = vmul.f32 %v17916_v6, %v17916_v6  ;;  %v20609_v35 = vld [vmem:[#allocation77_spill] sm:$0xff] }
 0x787   : > { %v17989_v50 = vmul.f32 %v17870_v24, %v20609_v35  ;;  %v20611_v35 = vld [vmem:[#allocation79_spill] sm:$0xff] }
 0x788   : > { %v6053_v23 = vadd.f32 %v6052_v14, %v6051_v55  ;;  %v6056_v55 = vsel %vm6030_vm12, %v17974_v44, 0.0  ;;  %v6220_v24 = vsel %vm6030_vm12, %v6184_v9, 0.0  ;;  %v18005_v28 = vmul.f32 %v17874_v47, %v20611_v35 }
 0x789   : > { %v6187_v47 = vmul.f32 %v17929_v43, %v17929_v43  ;;  %v6222_v35 = vsel %vm6030_vm12, %v6185_v34, 0.0 }
 0x78a   : > { %v6055_v29 = vadd.f32 %v6054_v15, %v6053_v23  ;;  %v6058_v23 = vsel %vm6030_vm12, %v17979_v60, 0.0 }
 0x78c   : > { %v6057_v14 = vadd.f32 %v6056_v55, %v6055_v29  ;;  %v6060_v29 = vsel %vm6030_vm12, %v17989_v50, 0.0  ;;  %v6186_v55 = vmul.f32 %v17922_v62, %v17922_v62 }
 0x78e   : > { %v6059_v15 = vadd.f32 %v6058_v23, %v6057_v14  ;;  %v18013_v14 = vmul.f32 %v17876_v21, %v20612_v4  ;;  %v6221_v23 = vadd.f32 %v6220_v24, %v6219_v8  ;;  %v6188_v4 = vmul.f32 %v17934_v61, %v17934_v61  ;;  %v20614_v24 = vld [vmem:[#allocation53_spill] sm:$0xff] }
 0x78f   : > { %v6224_v8 = vsel %vm6030_vm12, %v6186_v55, 0.0 }
 0x790   : > { %v6061_v59 = vadd.f32 %v6060_v29, %v6059_v15  ;;  %v18022_v15 = vmul.f32 %v17878_v1, %v20613_v20  ;;  %v6064_v29 = vsel %vm6030_vm12, %v18005_v28, 0.0  ;;  %v6223_v11 = vadd.f32 %v6222_v35, %v6221_v23  ;;  %v20615_v23 = vld [vmem:[#allocation68_spill] sm:$0xff] }
 0x791   : > { %v6066_v34 = vsel %vm6030_vm12, %v18013_v14, 0.0  ;;  %v6189_v20 = vmul.f32 %v17939_v56, %v17939_v56  ;;  %v6226_v35 = vsel %vm6030_vm12, %v6187_v47, 0.0 }
 0x792   : > { %v6063_v9 = vadd.f32 %v6062_v22, %v6061_v59  ;;  %v18031_v59 = vmul.f32 %v17880_v33, %v20614_v24  ;;  %v6225_v22 = vadd.f32 %v6224_v8, %v6223_v11  ;;  %v6068_v55 = vsel %vm6030_vm12, %v18022_v15, 0.0 }
 0x793   : > { %v6190_v24 = vmul.f32 %v17944_v52, %v17944_v52  ;;  %v6228_v11 = vsel %vm6030_vm12, %v6188_v4, 0.0 }
 0x794   : > { %v6065_v21 = vadd.f32 %v6064_v29, %v6063_v9  ;;  %v18040_v9 = vmul.f32 %v17882_v54, %v20615_v23  ;;  %v6227_v29 = vadd.f32 %v6226_v35, %v6225_v22  ;;  %v6070_v47 = vsel %vm6030_vm12, %v18031_v59, 0.0 }
 0x795   : > { %v6191_v23 = vmul.f32 %v17949_v45, %v17949_v45  ;;  %v6230_v22 = vsel %vm6030_vm12, %v6189_v20, 0.0 }
 0x796   : > { %v6067_v1 = vadd.f32 %v6066_v34, %v6065_v21  ;;  %v20616_v21 = vld [vmem:[#allocation54_spill] sm:$0xff]  ;;  %v6229_v34 = vadd.f32 %v6228_v11, %v6227_v29  ;;  %v6072_v4 = vsel %vm6030_vm12, %v18040_v9, 0.0  ;;  %v6232_v29 = vsel %vm6030_vm12, %v6190_v24, 0.0 }
 0x797   : > { %v18049_v8 = vmul.f32 %v17884_v32, %v20616_v21  ;;  %v6192_v21 = vmul.f32 %v17954_v7, %v17954_v7 }
 0x798   : > { %v6069_v33 = vadd.f32 %v6068_v55, %v6067_v1  ;;  %v20617_v1 = vld [vmem:[#allocation55_spill] sm:$0xff]  ;;  %v6231_v55 = vadd.f32 %v6230_v22, %v6229_v34  ;;  %v6234_v34 = vsel %vm6030_vm12, %v6191_v23, 0.0 }
 0x799   : > { %v18058_v35 = vmul.f32 %v17886_v58, %v20617_v1  ;;  %v6074_v20 = vsel %vm6030_vm12, %v18049_v8, 0.0  ;;  %v6193_v1 = vmul.f32 %v17959_v63, %v17959_v63 }
 0x79a   : > { %v6071_v54 = vadd.f32 %v6070_v47, %v6069_v33  ;;  %v20618_v33 = vld [vmem:[#allocation56_spill] sm:$0xff]  ;;  %v6233_v47 = vadd.f32 %v6232_v29, %v6231_v55  ;;  %v6236_v55 = vsel %vm6030_vm12, %v6192_v21, 0.0 }
 0x79b   : > { %v18067_v11 = vmul.f32 %v17888_v2, %v20618_v33  ;;  %v6076_v24 = vsel %vm6030_vm12, %v18058_v35, 0.0  ;;  %v6194_v33 = vmul.f32 %v17964_v49, %v17964_v49 }
 0x79c   : > { %v6073_v32 = vadd.f32 %v6072_v4, %v6071_v54  ;;  %v20619_v54 = vld [vmem:[#allocation81_spill] sm:$0xff]  ;;  %v6235_v4 = vadd.f32 %v6234_v34, %v6233_v47  ;;  %v6238_v47 = vsel %vm6030_vm12, %v6193_v1, 0.0 }
 0x79d   : > { %v18076_v22 = vmul.f32 %v17890_v12, %v20619_v54  ;;  %v6078_v23 = vsel %vm6030_vm12, %v18067_v11, 0.0  ;;  %v6195_v54 = vmul.f32 %v17969_v41, %v17969_v41 }
 0x79e   : > { %v6075_v58 = vadd.f32 %v6074_v20, %v6073_v32  ;;  %v20620_v32 = vld [vmem:[#allocation82_spill] sm:$0xff]  ;;  %v6237_v20 = vadd.f32 %v6236_v55, %v6235_v4  ;;  %v6240_v4 = vsel %vm6030_vm12, %v6194_v33, 0.0 }
 0x79f   : > { %v18085_v29 = vmul.f32 %v17892_v57, %v20620_v32  ;;  %v6080_v21 = vsel %vm6030_vm12, %v18076_v22, 0.0  ;;  %v6196_v32 = vmul.f32 %v17974_v44, %v17974_v44 }
 0x7a0   : > { %v6077_v2 = vadd.f32 %v6076_v24, %v6075_v58  ;;  %v20621_v58 = vld [vmem:[#allocation83_spill] sm:$0xff]  ;;  %v6239_v24 = vadd.f32 %v6238_v47, %v6237_v20  ;;  %v6242_v20 = vsel %vm6030_vm12, %v6195_v54, 0.0 }
 0x7a1   : > { %v18094_v34 = vmul.f32 %v17894_v31, %v20621_v58  ;;  %v6082_v1 = vsel %vm6030_vm12, %v18085_v29, 0.0  ;;  %v6197_v58 = vmul.f32 %v17979_v60, %v17979_v60 }
 0x7a2   : > { %v6079_v12 = vadd.f32 %v6078_v23, %v6077_v2  ;;  %v20622_v2 = vld [vmem:[#allocation84_spill] sm:$0xff]  ;;  %v6241_v23 = vadd.f32 %v6240_v4, %v6239_v24  ;;  %v6244_v24 = vsel %vm6030_vm12, %v6196_v32, 0.0 }
 0x7a3   : > { %v18103_v55 = vmul.f32 %v17896_v5, %v20622_v2  ;;  %v6084_v33 = vsel %vm6030_vm12, %v18094_v34, 0.0  ;;  %v6198_v2 = vmul.f32 %v17989_v50, %v17989_v50 }
 0x7a4   : > { %v6081_v57 = vadd.f32 %v6080_v21, %v6079_v12  ;;  %v20623_v12 = vld [vmem:[#allocation85_spill] sm:$0xff]  ;;  %v6243_v21 = vadd.f32 %v6242_v20, %v6241_v23  ;;  %v6246_v23 = vsel %vm6030_vm12, %v6197_v58, 0.0 }
 0x7a5   : > { %v18112_v47 = vmul.f32 %v17898_v42, %v20623_v12  ;;  %v6086_v54 = vsel %vm6030_vm12, %v18103_v55, 0.0  ;;  %v6199_v12 = vmul.f32 %v17995_v38, %v17995_v38  ;;  %v6211_v30 = vmul.f32 %v18103_v55, %v18103_v55 }
 0x7a6   : > { %v6083_v31 = vadd.f32 %v6082_v1, %v6081_v57  ;;  %v20624_v57 = vld [vmem:[#allocation57_spill] sm:$0xff]  ;;  %v6245_v1 = vadd.f32 %v6244_v24, %v6243_v21  ;;  %v6248_v21 = vsel %vm6030_vm12, %v6198_v2, 0.0 }
 0x7a7   : > { %v18121_v4 = vmul.f32 %v17900_v40, %v20624_v57  ;;  %v6088_v32 = vsel %vm6030_vm12, %v18112_v47, 0.0  ;;  %v6200_v57 = vmul.f32 %v18005_v28, %v18005_v28 }
 0x7a8   : > { %v6085_v5 = vadd.f32 %v6084_v33, %v6083_v31  ;;  %v20625_v31 = vld [vmem:[#allocation58_spill] sm:$0xff]  ;;  %v6247_v33 = vadd.f32 %v6246_v23, %v6245_v1  ;;  %v6250_v1 = vsel %vm6030_vm12, %v6199_v12, 0.0 }
 0x7a9   : > { %v18130_v20 = vmul.f32 %v17902_v13, %v20625_v31  ;;  %v6090_v58 = vsel %vm6030_vm12, %v18121_v4, 0.0  ;;  %v6201_v31 = vmul.f32 %v18013_v14, %v18013_v14 }
 0x7aa   : > { %v6087_v42 = vadd.f32 %v6086_v54, %v6085_v5  ;;  %v20626_v5 = vld [vmem:[#allocation86_spill] sm:$0xff]  ;;  %v6249_v54 = vadd.f32 %v6248_v21, %v6247_v33  ;;  %v6252_v33 = vsel %vm6030_vm12, %v6200_v57, 0.0 }
 0x7ab   : > { %v18139_v24 = vmul.f32 %v17904_v10, %v20626_v5  ;;  %v6092_v2 = vsel %vm6030_vm12, %v18130_v20, 0.0  ;;  %v6202_v5 = vmul.f32 %v18022_v15, %v18022_v15 }
 0x7ac   : > { %v6089_v40 = vadd.f32 %v6088_v32, %v6087_v42  ;;  %v20627_v42 = vld [vmem:[#allocation87_spill] sm:$0xff]  ;;  %v6251_v32 = vadd.f32 %v6250_v1, %v6249_v54  ;;  %v6254_v54 = vsel %vm6030_vm12, %v6201_v31, 0.0  ;;  %v6205_v31 = vmul.f32 %v18049_v8, %v18049_v8 }
 0x7ad   : > { %v18148_v23 = vmul.f32 %v17906_v19, %v20627_v42  ;;  %v6094_v12 = vsel %vm6030_vm12, %v18139_v24, 0.0  ;;  %v6203_v42 = vmul.f32 %v18031_v59, %v18031_v59 }
 0x7ae   : > { %v6091_v13 = vadd.f32 %v6090_v58, %v6089_v40  ;;  %v20628_v40 = vld [vmem:[#allocation88_spill] sm:$0xff]  ;;  %v6253_v58 = vadd.f32 %v6252_v33, %v6251_v32  ;;  %v6256_v32 = vsel %vm6030_vm12, %v6202_v5, 0.0 }
 0x7af   : > { %v18157_v21 = vmul.f32 %v17908_v27, %v20628_v40  ;;  %v6096_v57 = vsel %vm6030_vm12, %v18148_v23, 0.0  ;;  %v6204_v40 = vmul.f32 %v18040_v9, %v18040_v9 }
 0x7b0   : > { %v6093_v10 = vadd.f32 %v6092_v2, %v6091_v13  ;;  %v20629_v13 = vld [vmem:[#allocation89_spill] sm:$0xff]  ;;  %v6255_v2 = vadd.f32 %v6254_v54, %v6253_v58  ;;  %v6206_v54 = vmul.f32 %v18058_v35, %v18058_v35 }
 0x7b1   : > { %v18166_v1 = vmul.f32 %v17910_v36, %v20629_v13  ;;  %v6258_v36 = vsel %vm6030_vm12, %v6203_v42, 0.0  ;;  %v6260_v5 = vsel %vm6030_vm12, %v6204_v40, 0.0  ;;  %v6208_v42 = vmul.f32 %v18076_v22, %v18076_v22 }
 0x7b2   : > { %v6095_v19 = vadd.f32 %v6094_v12, %v6093_v10  ;;  %v6098_v10 = vsel %vm6030_vm12, %v18157_v21, 0.0  ;;  %v6257_v33 = vadd.f32 %v6256_v32, %v6255_v2  ;;  %v6207_v2 = vmul.f32 %v18067_v11, %v18067_v11 }
 0x7b3   : > { %v6100_v13 = vsel %vm6030_vm12, %v18166_v1, 0.0 }
 0x7b4   : > { %v6097_v27 = vadd.f32 %v6096_v57, %v6095_v19  ;;  %v6259_v58 = vadd.f32 %v6258_v36, %v6257_v33  ;;  %v6266_v40 = vsel %vm6030_vm12, %v6207_v2, 0.0 }
 0x7b6   : > { %v6099_v12 = vadd.f32 %v6098_v10, %v6097_v27  ;;  %v6261_v57 = vadd.f32 %v6260_v5, %v6259_v58  ;;  %v6262_v27 = vsel %vm6030_vm12, %v6205_v31, 0.0  ;;  %v6264_v10 = vsel %vm6030_vm12, %v6206_v54, 0.0 }
 0x7b7   : > { %v6210_v5 = vmul.f32 %v18094_v34, %v18094_v34  ;;  %v6268_v31 = vsel %vm6030_vm12, %v6208_v42, 0.0  ;;  %v6274_v42 = vsel %vm6030_vm12, %v6211_v30, 0.0 }
 0x7b8   : > { %v6101_v19 = vadd.f32 %v6100_v13, %v6099_v12  ;;  %v6263_v32 = vadd.f32 %v6262_v27, %v6261_v57  ;;  %v6209_v12 = vmul.f32 %v18085_v29, %v18085_v29 }
 0x7b9   : > { %v6272_v2 = vsel %vm6030_vm12, %v6210_v5, 0.0  ;;  %v6215_v5 = vmul.f32 %v18139_v24, %v18139_v24 }
 0x7ba   : > { %v6102_v37 = vrot.slane %v6101_v19, 4  ;;  %v6265_v13 = vadd.f32 %v6264_v10, %v6263_v32  ;;  %v6212_v32 = vmul.f32 %v18112_v47, %v18112_v47 }
 0x7bc   : > { %v6103_v33 = vadd.f32 %v6102_v37, %v6101_v19  ;;  %v6267_v58 = vadd.f32 %v6266_v40, %v6265_v13  ;;  %v6270_v37 = vsel %vm6030_vm12, %v6209_v12, 0.0  ;;  %v6213_v40 = vmul.f32 %v18121_v4, %v18121_v4 }
 0x7bd   : > { %v6214_v12 = vmul.f32 %v18130_v20, %v18130_v20 }
 0x7be   : > { %v6104_v36 = vrot.slane %v6103_v33, 2  ;;  %v6269_v27 = vadd.f32 %v6268_v31, %v6267_v58  ;;  %v6278_v31 = vsel %vm6030_vm12, %v6213_v40, 0.0 }
 0x7c0   : > { %v6105_v57 = vadd.f32 %v6104_v36, %v6103_v33  ;;  %v6271_v54 = vadd.f32 %v6270_v37, %v6269_v27  ;;  %v6276_v36 = vsel %vm6030_vm12, %v6212_v32, 0.0  ;;  %v6282_v37 = vsel %vm6030_vm12, %v6215_v5, 0.0 }
 0x7c2   : > { %v6106_v19 = vrot.slane %v6105_v57, 1  ;;  %v6273_v13 = vadd.f32 %v6272_v2, %v6271_v54  ;;  %v6218_v54 = vmul.f32 %v18166_v1, %v18166_v1 }
 0x7c4   : > { %v6107_v10 = vadd.f32 %v6106_v19, %v6105_v57  ;;  %v6275_v33 = vadd.f32 %v6274_v42, %v6273_v13  ;;  %v6216_v57 = vmul.f32 %v18148_v23, %v18148_v23  ;;  %v6288_v40 = vsel %vm6030_vm12, %v6218_v54, 0.0 }
 0x7c6   : > { %12900 = vmatmul.mubr.msk.f32.vlgmr.msra.gmra.mrb[2].mxu1 %vm6030_vm12, %v6107_v10  ;;  %v6277_v58 = vadd.f32 %v6276_v36, %v6275_v33  ;;  %v6284_v32 = vsel %vm6030_vm12, %v6216_v57, 0.0 }
 0x7c7   : > { %13300 = vmatpush3.bf16.msra.mxu1 %v17865_v51  ;;  %12906 = vmatprep.mubr.msk.f32.mxu1 %vm15272_vm0, %v20591_v26  ;;  %v6280_v51 = vsel %vm6030_vm12, %v6214_v12, 0.0  ;;  %v6217_v26 = vmul.f32 %v18157_v21, %v18157_v21 }
 0x7c8   : > { %v6279_v30 = vadd.f32 %v6278_v31, %v6277_v58 }
 0x7c9   : > { %v6286_v10 = vsel %vm6030_vm12, %v6217_v26, 0.0 }
 0x7ca   : > { %v6281_v27 = vadd.f32 %v6280_v51, %v6279_v30 }
 0x7cc   : > { %v6283_v19 = vadd.f32 %v6282_v37, %v6281_v27 }
 0x7ce   : > { %v6285_v2 = vadd.f32 %v6284_v32, %v6283_v19 }
 0x7d0   : > { %v6287_v13 = vadd.f32 %v6286_v10, %v6285_v2 }
 0x7d2   : > { %v6289_v42 = vadd.f32 %v6288_v40, %v6287_v13 }
 0x7d4   : > { %v6290_v33 = vrot.slane %v6289_v42, 4 }
 0x7d6   : > { %v6291_v12 = vadd.f32 %v6290_v33, %v6289_v42 }
 0x7d8   : > { %v6292_v36 = vrot.slane %v6291_v12, 2 }
 0x7da   : > { %v6293_v58 = vadd.f32 %v6292_v36, %v6291_v12 }
 0x7dc   : > { %v6294_v31 = vrot.slane %v6293_v58, 1 }
 0x7de   : > { %v6295_v30 = vadd.f32 %v6294_v31, %v6293_v58 }
 0x7e0   : > { %12907 = vmatmul.mubr.msk.f32.vlgmr.msra.gmra.mrb[4].mxu1 %vm6030_vm12, %v6295_v30 }
 0x899   : > { %v6179_v5 = vpop.f32.mrb[2].mxu1 }
 0x89a   : > { %v12901_v51 = vpop.f32.mrb[3].mxu1  ;;  %v6369_v27 = vmul.f32 %v6179_v5, %v6179_v5  ;;  %v18227_v2 = vrot.slane %v6179_v5, %v20593_v3 }
 0x89c   : > { %v6376_v54 = vsub.f32 %v17913_v48, %v18227_v2  ;;  %v6377_v10 = vsub.f32 %v17916_v6, %v18227_v2  ;;  %v6378_v13 = vsub.f32 %v17919_v18, %v18227_v2  ;;  %v6379_v40 = vsub.f32 %v17922_v62, %v18227_v2 }
 0x89d   : > { %v6380_v42 = vsub.f32 %v17929_v43, %v18227_v2  ;;  %v6381_v33 = vsub.f32 %v17934_v61, %v18227_v2  ;;  %v6382_v12 = vsub.f32 %v17939_v56, %v18227_v2  ;;  %v6383_v48 = vsub.f32 %v17944_v52, %v18227_v2 }
 0x89e   : > { %v6384_v6 = vsub.f32 %v17949_v45, %v18227_v2  ;;  %v6385_v18 = vsub.f32 %v17954_v7, %v18227_v2  ;;  %v6386_v62 = vsub.f32 %v17959_v63, %v18227_v2  ;;  %v6387_v43 = vsub.f32 %v17964_v49, %v18227_v2 }
 0x89f   : > { %v6388_v61 = vsub.f32 %v17969_v41, %v18227_v2  ;;  %v6389_v56 = vsub.f32 %v17974_v44, %v18227_v2  ;;  %v6390_v52 = vsub.f32 %v17979_v60, %v18227_v2  ;;  %v6391_v45 = vsub.f32 %v17989_v50, %v18227_v2 }
 0x8a0   : > { %v6392_v7 = vsub.f32 %v17995_v38, %v18227_v2  ;;  %v6393_v63 = vsub.f32 %v18005_v28, %v18227_v2  ;;  %v6394_v49 = vsub.f32 %v18013_v14, %v18227_v2  ;;  %v6395_v41 = vsub.f32 %v18022_v15, %v18227_v2 }
 0x8a1   : > { %v6396_v44 = vsub.f32 %v18031_v59, %v18227_v2  ;;  %v6397_v60 = vsub.f32 %v18040_v9, %v18227_v2  ;;  %v6398_v50 = vsub.f32 %v18049_v8, %v18227_v2  ;;  %v6399_v38 = vsub.f32 %v18058_v35, %v18227_v2 }
 0x8a2   : > { %v6400_v28 = vsub.f32 %v18067_v11, %v18227_v2  ;;  %v6401_v14 = vsub.f32 %v18076_v22, %v18227_v2  ;;  %v6402_v15 = vsub.f32 %v18085_v29, %v18227_v2  ;;  %v6403_v59 = vsub.f32 %v18094_v34, %v18227_v2 }
 0x8a3   : > { %v6404_v9 = vsub.f32 %v18103_v55, %v18227_v2  ;;  %v6405_v8 = vsub.f32 %v18112_v47, %v18227_v2  ;;  %v6406_v35 = vsub.f32 %v18121_v4, %v18227_v2  ;;  %v6407_v11 = vsub.f32 %v18130_v20, %v18227_v2 }
 0x8a4   : > { %v6408_v29 = vsub.f32 %v18139_v24, %v18227_v2  ;;  %v6409_v34 = vsub.f32 %v18148_v23, %v18227_v2  ;;  %v6410_v55 = vsub.f32 %v18157_v21, %v18227_v2  ;;  %v6411_v47 = vsub.f32 %v18166_v1, %v18227_v2 }
 0x8b3   : > { %v6365_v37 = vpop.f32.mrb[4].mxu1 }
 0x8b4   : > { %v6370_v57 = vsub.f32 %v6365_v37, %v6369_v27  ;;  %v12908_v19 = vpop.f32.mrb[5].mxu1 }
 0x8b6   : > { %v6371_v32 = vmax.f32 %v6370_v57, 0.0 }
 0x8b8   : > { %v6412_v26 = vadd.f32 1e-05, %v6371_v32 }
 0x8ba   : > { %14498 = vrsqrt.f32 %v6412_v26 }
 0x8c4   : > { %v14499_v36 = vpop.eup %14498 }
 0x8c5   : > { %v6417_v22 = vrot.slane %v14499_v36, %v20593_v3 }
 0x8c7   : > { %v6418_v58 = vmul.f32 %v6417_v22, %v6376_v54  ;;  %v6419_v31 = vmul.f32 %v6417_v22, %v6377_v10  ;;  %v6420_v4 = vmul.f32 %v6417_v22, %v6378_v13  ;;  %v6421_v30 = vmul.f32 %v6417_v22, %v6379_v40 }
 0x8c8   : > { %v6422_v5 = vmul.f32 %v6417_v22, %v6380_v42  ;;  %v6423_v20 = vmul.f32 %v6417_v22, %v6381_v33  ;;  %v6424_v51 = vmul.f32 %v6417_v22, %v6382_v12  ;;  %v6425_v3 = vmul.f32 %v6417_v22, %v6383_v48 }
 0x8c9   : > { %v6426_v27 = vmul.f32 %v6417_v22, %v6384_v6  ;;  %v6427_v37 = vmul.f32 %v6417_v22, %v6385_v18  ;;  %v6428_v24 = vmul.f32 %v6417_v22, %v6386_v62  ;;  %v6429_v57 = vmul.f32 %v6417_v22, %v6387_v43 }
 0x8ca   : > { %v6430_v19 = vmul.f32 %v6417_v22, %v6388_v61  ;;  %v6431_v23 = vmul.f32 %v6417_v22, %v6389_v56  ;;  %v6432_v32 = vmul.f32 %v6417_v22, %v6390_v52  ;;  %v6433_v26 = vmul.f32 %v6417_v22, %v6391_v45  ;;  %v11790_v45 = vld [vmem:[#allocation22] ss:$0 sm:$0xff] }
 0x8cb   : > { %v6434_v21 = vmul.f32 %v6417_v22, %v6392_v7  ;;  %v6435_v36 = vmul.f32 %v6417_v22, %v6393_v63  ;;  %v6436_v25 = vmul.f32 %v6417_v22, %v6394_v49  ;;  %v6437_v1 = vmul.f32 %v6417_v22, %v6395_v41 }
 0x8cc   : > { %v6438_v2 = vmul.f32 %v6417_v22, %v6396_v44  ;;  %v6439_v54 = vmul.f32 %v6417_v22, %v6397_v60  ;;  %v6440_v10 = vmul.f32 %v6417_v22, %v6398_v50  ;;  %v6441_v13 = vmul.f32 %v6417_v22, %v6399_v38 }
 0x8cd   : > { %v6442_v40 = vmul.f32 %v6417_v22, %v6400_v28  ;;  %v6443_v42 = vmul.f32 %v6417_v22, %v6401_v14  ;;  %v6444_v33 = vmul.f32 %v6417_v22, %v6402_v15  ;;  %v6445_v12 = vmul.f32 %v6417_v22, %v6403_v59  ;;  %v18302_v28 = vld [vmem:[#allocation24] ss:$0 sm:$0xff] }
 0x8ce   : > { %v6446_v48 = vmul.f32 %v6417_v22, %v6404_v9  ;;  %v6447_v6 = vmul.f32 %v6417_v22, %v6405_v8  ;;  %v6448_v18 = vmul.f32 %v6417_v22, %v6406_v35  ;;  %v6449_v62 = vmul.f32 %v6417_v22, %v6407_v11 }
 0x8cf   : > { %v6450_v43 = vmul.f32 %v6417_v22, %v6408_v29  ;;  %v6451_v61 = vmul.f32 %v6417_v22, %v6409_v34  ;;  %v6452_v56 = vmul.f32 %v6417_v22, %v6410_v55  ;;  %v6453_v52 = vmul.f32 %v6417_v22, %v6411_v47 }
 0x8d0   : > { %v6460_v7 = vmul.f32 %v11790_v45, %v6418_v58  ;;  %v6461_v63 = vmul.f32 %v11790_v45, %v6419_v31  ;;  %v6462_v49 = vmul.f32 %v11790_v45, %v6420_v4  ;;  %v6463_v41 = vmul.f32 %v11790_v45, %v6421_v30 }
 0x8d1   : > { %v6464_v44 = vmul.f32 %v11790_v45, %v6422_v5  ;;  %v6465_v60 = vmul.f32 %v11790_v45, %v6423_v20  ;;  %v6466_v50 = vmul.f32 %v11790_v45, %v6424_v51  ;;  %v6467_v38 = vmul.f32 %v11790_v45, %v6425_v3 }
 0x8d2   : > { %v6468_v14 = vmul.f32 %v11790_v45, %v6426_v27  ;;  %v6469_v15 = vmul.f32 %v11790_v45, %v6427_v37  ;;  %v6470_v59 = vmul.f32 %v11790_v45, %v6428_v24  ;;  %v6471_v9 = vmul.f32 %v11790_v45, %v6429_v57 }
 0x8d3   : > { %v6472_v8 = vmul.f32 %v11790_v45, %v6430_v19  ;;  %v6473_v35 = vmul.f32 %v11790_v45, %v6431_v23  ;;  %v6474_v11 = vmul.f32 %v11790_v45, %v6432_v32  ;;  %v6475_v29 = vmul.f32 %v11790_v45, %v6433_v26 }
 0x8d4   : > { %v6476_v22 = vmul.f32 %v11790_v45, %v6434_v21  ;;  %v18304_v34 = vmul.f32 %v11790_v45, %v6435_v36  ;;  %v18306_v55 = vmul.f32 %v11790_v45, %v6436_v25  ;;  %v18308_v47 = vmul.f32 %v11790_v45, %v6437_v1 }
 0x8d5   : > { %v18310_v58 = vmul.f32 %v11790_v45, %v6438_v2  ;;  %v18313_v31 = vadd.f32 %v18302_v28, %v6460_v7  ;;  %v18316_v4 = vadd.f32 %v18302_v28, %v6461_v63  ;;  %v18319_v30 = vadd.f32 %v18302_v28, %v6462_v49 }
 0x8d6   : > { %v18321_v5 = vmul.f32 %v11790_v45, %v6439_v54  ;;  %v18323_v20 = vmul.f32 %v11790_v45, %v6440_v10  ;;  %v18325_v51 = vmul.f32 %v11790_v45, %v6441_v13  ;;  %v18328_v25 = vadd.f32 %v18302_v28, %v6463_v41 }
 0x8d7   : > { %v18330_v3 = vmul.f32 %v11790_v45, %v6442_v40  ;;  %v18332_v27 = vmul.f32 %v11790_v45, %v6443_v42  ;;  %v18334_v37 = vmul.f32 %v11790_v45, %v6444_v33  ;;  %v18337_v24 = vadd.f32 %v18302_v28, %v6464_v44 }
 0x8d8   : > { %v18339_v57 = vmul.f32 %v11790_v45, %v6445_v12  ;;  %v18341_v19 = vmul.f32 %v11790_v45, %v6446_v48  ;;  %v18344_v23 = vadd.f32 %v18302_v28, %v6465_v60  ;;  %v18347_v32 = vadd.f32 %v18302_v28, %v6466_v50 }
 0x8d9   : > { %v18349_v26 = vmul.f32 %v11790_v45, %v6447_v6  ;;  %v6538_v21 = vsub.f32 0.0, %v18313_v31  ;;  %v6539_v36 = vsub.f32 0.0, %v18316_v4  ;;  %v6540_v1 = vsub.f32 0.0, %v18319_v30 }
 0x8da   : > { %v18354_v2 = vmul.f32 %v11790_v45, %v6448_v18  ;;  %v18356_v54 = vmul.f32 %v11790_v45, %v6449_v62  ;;  %v18359_v10 = vadd.f32 %v18302_v28, %v6467_v38  ;;  %v6541_v13 = vsub.f32 0.0, %v18328_v25 }
 0x8db   : > { %v18362_v40 = vmul.f32 %v11790_v45, %v6450_v43  ;;  %v18364_v42 = vmul.f32 %v11790_v45, %v6451_v61  ;;  %v18367_v33 = vadd.f32 %v18302_v28, %v6468_v14  ;;  %v6542_v12 = vsub.f32 0.0, %v18337_v24 }
 0x8dc   : > { %v18370_v48 = vmul.f32 %v11790_v45, %v6452_v56  ;;  %v18373_v6 = vadd.f32 %v18302_v28, %v6469_v15  ;;  %v6543_v18 = vsub.f32 0.0, %v18344_v23  ;;  %v6544_v62 = vsub.f32 0.0, %v18347_v32 }
 0x8dd   : > { %v18378_v7 = vadd.f32 %v18302_v28, %v6470_v59  ;;  %v6574_v43 = vmul.f32 1.442695, %v6538_v21  ;;  %v6576_v61 = vmul.f32 1.442695, %v6539_v36  ;;  %v6578_v63 = vmul.f32 1.442695, %v6540_v1 }
 0x8de   : > { %v18380_v49 = vmul.f32 %v11790_v45, %v6453_v52  ;;  %v18383_v41 = vadd.f32 %v18302_v28, %v6471_v9  ;;  %v6545_v56 = vsub.f32 0.0, %v18359_v10  ;;  %v6580_v44 = vmul.f32 1.442695, %v6541_v13 }
 0x8df   : > { %v18387_v60 = vadd.f32 %v18302_v28, %v6472_v8  ;;  %v6546_v50 = vsub.f32 0.0, %v18367_v33  ;;  %14500 = vpow2.f32 %v6574_v43  ;;  %v6582_v38 = vmul.f32 1.442695, %v6542_v12 }
 0x8e0   : > { %v18391_v14 = vadd.f32 %v18302_v28, %v6473_v35  ;;  %v6547_v15 = vsub.f32 0.0, %v18373_v6  ;;  %14502 = vpow2.f32 %v6576_v61  ;;  %v6584_v52 = vmul.f32 1.442695, %v6543_v18 }
 0x8e1   : > { %v18395_v45 = vadd.f32 %v18302_v28, %v6474_v11  ;;  %v6548_v59 = vsub.f32 0.0, %v18378_v7  ;;  %14504 = vpow2.f32 %v6578_v63  ;;  %v6586_v9 = vmul.f32 1.442695, %v6544_v62 }
 0x8e2   : > { %v18399_v8 = vadd.f32 %v18302_v28, %v6475_v29  ;;  %v6549_v21 = vsub.f32 0.0, %v18383_v41  ;;  %14506 = vpow2.f32 %v6580_v44  ;;  %v6588_v36 = vmul.f32 1.442695, %v6545_v56 }
 0x8e3   : > { %v18403_v35 = vadd.f32 %v18302_v28, %v6476_v22  ;;  %v6550_v1 = vsub.f32 0.0, %v18387_v60  ;;  %14508 = vpow2.f32 %v6582_v38  ;;  %v6590_v13 = vmul.f32 1.442695, %v6546_v50 }
 0x8e4   : > { %v18408_v11 = vadd.f32 %v18302_v28, %v18304_v34  ;;  %v6551_v12 = vsub.f32 0.0, %v18391_v14  ;;  %14510 = vpow2.f32 %v6584_v52  ;;  %v6592_v29 = vmul.f32 1.442695, %v6547_v15 }
 0x8e5   : > { %v18413_v18 = vadd.f32 %v18302_v28, %v18306_v55  ;;  %v6552_v62 = vsub.f32 0.0, %v18395_v45  ;;  %14512 = vpow2.f32 %v6586_v9  ;;  %v6594_v22 = vmul.f32 1.442695, %v6548_v59 }
 0x8e6   : > { %20630 = vst [vmem:[#allocation93_spill] sm:$0xff] %v18408_v11  ;;  %v18418_v43 = vadd.f32 %v18302_v28, %v18308_v47  ;;  %v6553_v61 = vsub.f32 0.0, %v18399_v8  ;;  %14514 = vpow2.f32 %v6588_v36  ;;  %v6596_v34 = vmul.f32 1.442695, %v6549_v21 }
 0x8e7   : > { %20631 = vst [vmem:[#allocation95_spill] sm:$0xff] %v18413_v18  ;;  %v18423_v63 = vadd.f32 %v18302_v28, %v18310_v58  ;;  %v6554_v56 = vsub.f32 0.0, %v18403_v35  ;;  %14516 = vpow2.f32 %v6590_v13  ;;  %v6598_v55 = vmul.f32 1.442695, %v6550_v1 }
 0x8e8   : > { %20632 = vst [vmem:[#allocation97_spill] sm:$0xff] %v18418_v43  ;;  %v18428_v44 = vadd.f32 %v18302_v28, %v18321_v5  ;;  %v6555_v50 = vsub.f32 0.0, %v18408_v11  ;;  %14518 = vpow2.f32 %v6592_v29  ;;  %v6600_v47 = vmul.f32 1.442695, %v6551_v12 }
 0x8e9   : > { %20633 = vst [vmem:[#allocation99_spill] sm:$0xff] %v18423_v63  ;;  %v18431_v38 = vpop.eup %14500  ;;  %v18435_v15 = vadd.f32 %v18302_v28, %v18323_v20  ;;  %v6556_v58 = vsub.f32 0.0, %v18413_v18  ;;  %14520 = vpow2.f32 %v6594_v22  ;;  %v6602_v52 = vmul.f32 1.442695, %v6552_v62 }
 0x8ea   : > { %20634 = vst [vmem:[#allocation101_spill] sm:$0xff] %v18428_v44  ;;  %v18438_v59 = vpop.eup %14502  ;;  %v18442_v5 = vadd.f32 %v18302_v28, %v18325_v51  ;;  %v6557_v9 = vsub.f32 0.0, %v18418_v43  ;;  %14522 = vpow2.f32 %v6596_v34  ;;  %v6604_v21 = vmul.f32 1.442695, %v6553_v61 }
 0x8eb   : > { %20635 = vst [vmem:[#allocation103_spill] sm:$0xff] %v18435_v15  ;;  %v18445_v36 = vpop.eup %14504  ;;  %v18449_v20 = vadd.f32 %v18302_v28, %v18330_v3  ;;  %v6558_v1 = vsub.f32 0.0, %v18423_v63  ;;  %14524 = vpow2.f32 %v6598_v55  ;;  %v6606_v13 = vmul.f32 1.442695, %v6554_v56 }
 0x8ec   : > { %20636 = vst [vmem:[#allocation49_spill] sm:$0xff] %v18442_v5  ;;  %v18452_v12 = vpop.eup %14506  ;;  %v18456_v51 = vadd.f32 %v18302_v28, %v18332_v27  ;;  %v6559_v29 = vsub.f32 0.0, %v18428_v44  ;;  %14526 = vpow2.f32 %v6600_v47  ;;  %v6608_v62 = vmul.f32 1.442695, %v6555_v50 }
 0x8ed   : > { %20637 = vst [vmem:[#allocation90_spill] sm:$0xff] %v18449_v20  ;;  %v18459_v22 = vpop.eup %14508  ;;  %v18463_v3 = vadd.f32 %v18302_v28, %v18334_v37  ;;  %v6560_v61 = vsub.f32 0.0, %v18435_v15  ;;  %14528 = vpow2.f32 %v6602_v52  ;;  %v6610_v34 = vmul.f32 1.442695, %v6556_v58 }
 0x8ee   : > { %20638 = vst [vmem:[#allocation91_spill] sm:$0xff] %v18456_v51  ;;  %v18466_v56 = vpop.eup %14510  ;;  %v18470_v27 = vadd.f32 %v18302_v28, %v18339_v57  ;;  %v6561_v55 = vsub.f32 0.0, %v18442_v5  ;;  %14530 = vpow2.f32 %v6604_v21  ;;  %v6612_v50 = vmul.f32 1.442695, %v6557_v9 }
 0x8ef   : > { %20639 = vst [vmem:[#allocation92_spill] sm:$0xff] %v18463_v3  ;;  %v18473_v47 = vpop.eup %14512  ;;  %v18477_v37 = vadd.f32 %v18302_v28, %v18341_v19  ;;  %v6562_v15 = vsub.f32 0.0, %v18449_v20  ;;  %14532 = vpow2.f32 %v6606_v13  ;;  %v6614_v58 = vmul.f32 1.442695, %v6558_v1 }
 0x8f0   : > { %20640 = vst [vmem:[#allocation94_spill] sm:$0xff] %v18470_v27  ;;  %v18480_v52 = vpop.eup %14514  ;;  %v18484_v57 = vadd.f32 %v18302_v28, %v18349_v26  ;;  %v6563_v5 = vsub.f32 0.0, %v18456_v51  ;;  %14534 = vpow2.f32 %v6608_v62  ;;  %v6616_v9 = vmul.f32 1.442695, %v6559_v29 }
 0x8f1   : > { %20641 = vst [vmem:[#allocation96_spill] sm:$0xff] %v18477_v37  ;;  %v18487_v21 = vpop.eup %14516  ;;  %v18491_v19 = vadd.f32 %v18302_v28, %v18354_v2  ;;  %v6564_v20 = vsub.f32 0.0, %v18463_v3  ;;  %14536 = vpow2.f32 %v6610_v34  ;;  %v6618_v1 = vmul.f32 1.442695, %v6560_v61 }
 0x8f2   : > { %20642 = vst [vmem:[#allocation98_spill] sm:$0xff] %v18484_v57  ;;  %v18494_v13 = vpop.eup %14518  ;;  %v18498_v26 = vadd.f32 %v18302_v28, %v18356_v54  ;;  %v6565_v51 = vsub.f32 0.0, %v18470_v27  ;;  %14538 = vpow2.f32 %v6612_v50  ;;  %v6620_v29 = vmul.f32 1.442695, %v6561_v55  ;;  %v14277_v50 = vld [vmem:[#allocation25 + $0x8] sm:$0xff]  }
 0x8f3   : > { %20643 = vst [vmem:[#allocation100_spill] sm:$0xff] %v18491_v19  ;;  %v18501_v62 = vpop.eup %14520  ;;  %v18505_v2 = vadd.f32 %v18302_v28, %v18362_v40  ;;  %v6566_v3 = vsub.f32 0.0, %v18477_v37  ;;  %14540 = vpow2.f32 %v6614_v58  ;;  %v6622_v61 = vmul.f32 1.442695, %v6562_v15  ;;  %12909 = vmatprep.subr.bf16.mxu0 %v14277_v50  ;;  %13301 = vmatprep.subr.bf16.mxu1 %v14277_v50 }
 0x8f4   : > { %20644 = vst [vmem:[#allocation102_spill] sm:$0xff] %v18498_v26  ;;  %v18508_v34 = vpop.eup %14522  ;;  %v18512_v54 = vadd.f32 %v18302_v28, %v18364_v42  ;;  %v6567_v27 = vsub.f32 0.0, %v18484_v57  ;;  %14542 = vpow2.f32 %v6616_v9  ;;  %v6624_v55 = vmul.f32 1.442695, %v6563_v5  ;;  %12910 = vmatpush3.bf16.msra.mxu0 %v14277_v50  ;;  %13302 = vmatpush3.bf16.msra.mxu1 %v14277_v50 }
 0x8f5   : > { %20645 = vst [vmem:[#allocation104_spill] sm:$0xff] %v18505_v2  ;;  %v18515_v44 = vpop.eup %14524  ;;  %v18519_v40 = vadd.f32 %v18302_v28, %v18370_v48  ;;  %v6568_v58 = vsub.f32 0.0, %v18491_v19  ;;  %14544 = vpow2.f32 %v6618_v1  ;;  %v6626_v15 = vmul.f32 1.442695, %v6564_v20 }
 0x8f6   : > { %20646 = vst [vmem:[#allocation105_spill] sm:$0xff] %v18512_v54  ;;  %v18522_v37 = vpop.eup %14526  ;;  %v18526_v42 = vadd.f32 %v18302_v28, %v18380_v49  ;;  %v6569_v9 = vsub.f32 0.0, %v18498_v26  ;;  %14546 = vpow2.f32 %v6620_v29  ;;  %v6628_v5 = vmul.f32 1.442695, %v6565_v51 }
 0x8f7   : > { %20647 = vst [vmem:[#allocation106_spill] sm:$0xff] %v18519_v40  ;;  %v18529_v57 = vpop.eup %14528  ;;  %v6570_v48 = vsub.f32 0.0, %v18505_v2  ;;  %14548 = vpow2.f32 %v6622_v61  ;;  %v6630_v19 = vmul.f32 1.442695, %v6566_v3  ;;  %v6571_v1 = vsub.f32 0.0, %v18512_v54 }
 0x8f8   : > { %20648 = vst [vmem:[#allocation107_spill] sm:$0xff] %v18526_v42  ;;  %v18532_v20 = vpop.eup %14530  ;;  %14550 = vpow2.f32 %v6624_v55  ;;  %v6632_v28 = vmul.f32 1.442695, %v6567_v27  ;;  %v6572_v29 = vsub.f32 0.0, %v18519_v40  ;;  %v6634_v51 = vmul.f32 1.442695, %v6568_v58 }
 0x8f9   : > { %v14533_v49 = vpop.eup %14532  ;;  %14552 = vpow2.f32 %v6626_v15  ;;  %v6573_v63 = vsub.f32 0.0, %v18526_v42  ;;  %v6636_v2 = vmul.f32 1.442695, %v6569_v9  ;;  %v6638_v3 = vmul.f32 1.442695, %v6570_v48  ;;  %v14283_v40 = vld [vmem:[#allocation25] sm:$0xff]  }
 0x8fa   : > { %v14535_v26 = vpop.eup %14534  ;;  %14554 = vpow2.f32 %v6628_v5  ;;  %v6640_v43 = vmul.f32 1.442695, %v6571_v1  ;;  %v6642_v55 = vmul.f32 1.442695, %v6572_v29  ;;  %v6646_v58 = vadd.f32 1.0, %v18431_v38  ;;  %12947 = vmatprep.subr.bf16.mxu1 %v14283_v40 }
 0x8fb   : > { %v14537_v61 = vpop.eup %14536  ;;  %14556 = vpow2.f32 %v6630_v19  ;;  %v6644_v54 = vmul.f32 1.442695, %v6573_v63  ;;  %v6647_v9 = vadd.f32 1.0, %v18438_v59  ;;  %v6648_v5 = vadd.f32 1.0, %v18445_v36  ;;  %v7351_v29 = vld [vmem:[#allocation3 + $0x4] sm:$0xf] }
 0x8fc   : > { %v14539_v50 = vpop.eup %14538  ;;  %14558 = vpow2.f32 %v6632_v28  ;;  %v6649_v1 = vadd.f32 1.0, %v18452_v12  ;;  %v6650_v63 = vadd.f32 1.0, %v18459_v22  ;;  %v6651_v38 = vadd.f32 1.0, %v18466_v56 }
 0x8fd   : > { %v14541_v18 = vpop.eup %14540  ;;  %14560 = vpow2.f32 %v6634_v51  ;;  %v6652_v40 = vadd.f32 1.0, %v18473_v47  ;;  %v6653_v36 = vadd.f32 1.0, %v18480_v52  ;;  %v6655_v12 = vadd.f32 1.0, %v18494_v13 }
 0x8fe   : > { %v14543_v27 = vpop.eup %14542  ;;  %14562 = vpow2.f32 %v6636_v2  ;;  %v6657_v56 = vadd.f32 1.0, %v18508_v34  ;;  %v6658_v47 = vadd.f32 1.0, %v18515_v44  ;;  %v6660_v52 = vadd.f32 1.0, %v18529_v57 }
 0x8ff   : > { %v14545_v15 = vpop.eup %14544  ;;  %14564 = vpow2.f32 %v6638_v3  ;;  %v6656_v3 = vadd.f32 1.0, %v18501_v62  ;;  %v6661_v13 = vadd.f32 1.0, %v18532_v20  ;;  %v6664_v11 = vadd.f32 1.0, %v14537_v61 }
 0x900   : > { %v14547_v42 = vpop.eup %14546  ;;  %14566 = vpow2.f32 %v6640_v43  ;;  %v7350_v43 = vld [vmem:[#allocation3] sm:$0xf]  ;;  %v6665_v34 = vadd.f32 1.0, %v14539_v50  ;;  %v18557_v44 = vadd.f32 1.0, %v14545_v15 }
 0x901   : > { %v14549_v19 = vpop.eup %14548  ;;  %14568 = vpow2.f32 %v6642_v55  ;;  %v18549_v55 = vcombine.low %v7350_v43, %v7351_v29  ;;  %v18555_v29 = vadd.f32 1.0, %v14543_v27 }
 0x902   : > { %v14551_v48 = vpop.eup %14550  ;;  %14570 = vpow2.f32 %v6644_v54  ;;  %v6654_v54 = vadd.f32 1.0, %v18487_v21 }
 0x903   : > { %v14553_v2 = vpop.eup %14552  ;;  %14572 = vrcp.f32 %v6646_v58  ;;  %v18563_v20 = vadd.f32 1.0, %v14551_v48 }
 0x904   : > { %v14555_v28 = vpop.eup %14554  ;;  %14574 = vrcp.f32 %v6647_v9  ;;  %v6659_v9 = vadd.f32 1.0, %v18522_v37  ;;  %v18559_v37 = vadd.f32 1.0, %v14547_v42 }
 0x905   : > { %v14557_v59 = vpop.eup %14556  ;;  %14576 = vrcp.f32 %v6648_v5  ;;  %v6662_v5 = vadd.f32 1.0, %v14533_v49  ;;  %v18567_v61 = vadd.f32 1.0, %v14555_v28 }
 0x906   : > { %v14559_v51 = vpop.eup %14558  ;;  %14578 = vrcp.f32 %v6649_v1  ;;  %v6663_v1 = vadd.f32 1.0, %v14535_v26  ;;  %v18565_v26 = vadd.f32 1.0, %v14553_v2 }
 0x907   : > { %v14561_v22 = vpop.eup %14560  ;;  %14580 = vrcp.f32 %v6650_v63  ;;  %v6666_v63 = vadd.f32 1.0, %v14541_v18  ;;  %v18569_v18 = vadd.f32 1.0, %v14557_v59  ;;  %v18571_v50 = vadd.f32 1.0, %v14559_v51 }
 0x908   : > { %v14563_v58 = vpop.eup %14562  ;;  %14582 = vrcp.f32 %v6651_v38  ;;  %v18561_v38 = vadd.f32 1.0, %v14549_v19  ;;  %v18573_v42 = vadd.f32 1.0, %v14561_v22 }
 0x909   : > { %v14565_v21 = vpop.eup %14564  ;;  %14584 = vrcp.f32 %v6652_v40  ;;  %v18575_v15 = vadd.f32 1.0, %v14563_v58 }
 0x90a   : > { %v14567_v62 = vpop.eup %14566  ;;  %14586 = vrcp.f32 %v6653_v36  ;;  %v18578_v2 = vadd.f32 1.0, %v14565_v21 }
 0x90b   : > { %v14569_v43 = vpop.eup %14568  ;;  %14588 = vrcp.f32 %v6654_v54  ;;  %v18580_v40 = vadd.f32 1.0, %v14567_v62 }
 0x90c   : > { %v14571_v57 = vpop.eup %14570  ;;  %14590 = vrcp.f32 %v6655_v12  ;;  %v18583_v51 = vadd.f32 1.0, %v14569_v43  ;;  %v20649_v43 = vld [vmem:[#allocation66_spill] sm:$0xff] }
 0x90d   : > { %v14573_v49 = vpop.eup %14572  ;;  %14592 = vrcp.f32 %v6656_v3  ;;  %v18587_v22 = vadd.f32 1.0, %v14571_v57 }
 0x90e   : > { %v14575_v27 = vpop.eup %14574  ;;  %14594 = vrcp.f32 %v6657_v56  ;;  %v6718_v19 = vmul.f32 %v14573_v49, %v18313_v31  ;;  %v20650_v49 = vld [vmem:[#allocation67_spill] sm:$0xff] }
 0x90f   : > { %v14577_v48 = vpop.eup %14576  ;;  %14596 = vrcp.f32 %v6658_v47  ;;  %v6719_v28 = vmul.f32 %v14575_v27, %v18316_v4 }
 0x910   : > { %v14579_v59 = vpop.eup %14578  ;;  %14598 = vrcp.f32 %v6659_v9  ;;  %v6720_v36 = vmul.f32 %v14577_v48, %v18319_v30  ;;  %v6754_v54 = vmul.f32 %v6718_v19, %v20594_v53 }
 0x911   : > { %v14581_v12 = vpop.eup %14580  ;;  %14600 = vrcp.f32 %v6660_v52  ;;  %v6721_v31 = vmul.f32 %v14579_v59, %v18328_v25  ;;  %v6755_v3 = vmul.f32 %v6719_v28, %v20595_v0  ;;  %v20652_v28 = vld [vmem:[#allocation70_spill] sm:$0xff] }
 0x912   : > { %v14583_v56 = vpop.eup %14582  ;;  %14602 = vrcp.f32 %v6661_v13  ;;  %v6722_v4 = vmul.f32 %v14581_v12, %v18337_v24  ;;  %v6756_v58 = vmul.f32 %v6720_v36, %v20596_v17  ;;  %v18593_v47 = vpack.c.bf16 %v6754_v54, %v6754_v54  ;;  %v20653_v54 = vld [vmem:[#allocation71_spill] sm:$0xff] }
 0x913   : > { %v14585_v9 = vpop.eup %14584  ;;  %14604 = vrcp.f32 %v6662_v5  ;;  %v6723_v53 = vmul.f32 %v14583_v56, %v18344_v23  ;;  %v6757_v30 = vmul.f32 %v6721_v31, %v20597_v46  ;;  %v18597_v21 = vpack.c.bf16 %v6755_v3, %v6755_v3  ;;  %v20654_v3 = vld [vmem:[#allocation72_spill] sm:$0xff] }
 0x914   : > { %v14587_v52 = vpop.eup %14586  ;;  %14606 = vrcp.f32 %v6663_v1  ;;  %v6724_v0 = vmul.f32 %v14585_v9, %v18347_v32  ;;  %v6758_v25 = vmul.f32 %v6722_v4, %v20598_v39  ;;  %v18601_v13 = vpack.c.bf16 %v6756_v58, %v6756_v58  ;;  %v20655_v58 = vld [vmem:[#allocation74_spill] sm:$0xff] }
 0x915   : > { %v14589_v24 = vpop.eup %14588  ;;  %14608 = vrcp.f32 %v6664_v11  ;;  %v6725_v17 = vmul.f32 %v14587_v52, %v18359_v10  ;;  %v6759_v5 = vmul.f32 %v6723_v53, %v20599_v16  ;;  %v18605_v62 = vpack.c.bf16 %v6757_v30, %v6757_v30  ;;  %v20656_v30 = vld [vmem:[#allocation75_spill] sm:$0xff] }
 0x916   : > { %v14591_v23 = vpop.eup %14590  ;;  %14610 = vrcp.f32 %v6665_v34  ;;  %v6726_v46 = vmul.f32 %v14589_v24, %v18367_v33  ;;  %v6760_v1 = vmul.f32 %v6724_v0, %v20649_v43  ;;  %v18609_v57 = vpack.c.bf16 %v6758_v25, %v6758_v25  ;;  %v20651_v34 = vld [vmem:[#allocation69_spill] sm:$0xff]  ;;  %v20657_v25 = vld [vmem:[#allocation76_spill] sm:$0xff] }
 0x917   : > { %v14593_v32 = vpop.eup %14592  ;;  %14612 = vrcp.f32 %v6666_v63  ;;  %v6727_v39 = vmul.f32 %v14591_v23, %v18373_v6  ;;  %v6761_v11 = vmul.f32 %v6725_v17, %v20650_v49  ;;  %v18613_v27 = vpack.c.bf16 %v6759_v5, %v6759_v5  ;;  %v20658_v5 = vld [vmem:[#allocation93_spill] sm:$0xff] }
 0x918   : > { %v14595_v10 = vpop.eup %14594  ;;  %14614 = vrcp.f32 %v18555_v29  ;;  %v6728_v16 = vmul.f32 %v14593_v32, %v18378_v7  ;;  %v6762_v19 = vmul.f32 %v6726_v46, %v20651_v34  ;;  %v18618_v33 = vpack.c.bf16 %v6760_v1, %v6760_v1  ;;  %v20659_v23 = vld [vmem:[#allocation77_spill] sm:$0xff]  ;;  %v20660_v1 = vld [vmem:[#allocation95_spill] sm:$0xff]  ;;  %v20661_v32 = vld [vmem:[#allocation78_spill] sm:$0xff] }
 0x919   : > { %v14597_v48 = vpop.eup %14596  ;;  %14616 = vrcp.f32 %v18557_v44  ;;  %v6729_v63 = vmul.f32 %v14595_v10, %v18383_v41  ;;  %v6763_v6 = vmul.f32 %v6727_v39, %v20652_v28  ;;  %v18623_v59 = vpack.c.bf16 %v6761_v11, %v6761_v11  ;;  %v20662_v11 = vld [vmem:[#allocation97_spill] sm:$0xff]  ;;  %v20663_v10 = vld [vmem:[#allocation79_spill] sm:$0xff] }
 0x91a   : > { %v14599_v36 = vpop.eup %14598  ;;  %14618 = vrcp.f32 %v18559_v37  ;;  %v6730_v29 = vmul.f32 %v14597_v48, %v18387_v60  ;;  %v6764_v7 = vmul.f32 %v6728_v16, %v20653_v54  ;;  %v18628_v12 = vpack.c.bf16 %v6762_v19, %v6762_v19  ;;  %v20664_v48 = vld [vmem:[#allocation99_spill] sm:$0xff]  ;;  %v20667_v54 = vld [vmem:[#allocation52_spill] sm:$0xff] }
 0x91b   : > { %v14601_v31 = vpop.eup %14600  ;;  %14620 = vrcp.f32 %v18561_v38  ;;  %v6731_v44 = vmul.f32 %v14599_v36, %v18391_v14  ;;  %v6765_v41 = vmul.f32 %v6729_v63, %v20654_v3  ;;  %v18633_v56 = vpack.c.bf16 %v6763_v6, %v6763_v6  ;;  %v20665_v63 = vld [vmem:[#allocation80_spill] sm:$0xff]  ;;  %v20668_v3 = vld [vmem:[#allocation103_spill] sm:$0xff] }
 0x91c   : > { %v14603_v4 = vpop.eup %14602  ;;  %14622 = vrcp.f32 %v18563_v20  ;;  %v6732_v37 = vmul.f32 %v14601_v31, %v18395_v45  ;;  %v6766_v60 = vmul.f32 %v6730_v29, %v20655_v58  ;;  %v18638_v9 = vpack.c.bf16 %v6764_v7, %v6764_v7  ;;  %v20666_v29 = vld [vmem:[#allocation101_spill] sm:$0xff] }
 0x91d   : > { %v14605_v53 = vpop.eup %14604  ;;  %14624 = vrcp.f32 %v18565_v26  ;;  %v6733_v38 = vmul.f32 %v14603_v4, %v18399_v8  ;;  %v6767_v14 = vmul.f32 %v6731_v44, %v20656_v30  ;;  %v18643_v52 = vpack.c.bf16 %v6765_v41, %v6765_v41  ;;  %v20669_v41 = vld [vmem:[#allocation53_spill] sm:$0xff] }
 0x91e   : > { %v14607_v0 = vpop.eup %14606  ;;  %14626 = vrcp.f32 %v18567_v61  ;;  %v6734_v20 = vmul.f32 %v14605_v53, %v18403_v35  ;;  %v6768_v45 = vmul.f32 %v6732_v37, %v20657_v25  ;;  %v18648_v24 = vpack.c.bf16 %v6766_v60, %v6766_v60  ;;  %v20670_v60 = vld [vmem:[#allocation49_spill] sm:$0xff]  ;;  %v20671_v53 = vld [vmem:[#allocation68_spill] sm:$0xff] }
 0x91f   : > { %v14609_v17 = vpop.eup %14608  ;;  %14628 = vrcp.f32 %v18569_v18  ;;  %v6735_v26 = vmul.f32 %v14607_v0, %v20658_v5  ;;  %v6769_v8 = vmul.f32 %v6733_v38, %v20659_v23  ;;  %v18653_v46 = vpack.c.bf16 %v6767_v14, %v6767_v14  ;;  %v20672_v0 = vld [vmem:[#allocation90_spill] sm:$0xff]  ;;  %v20674_v5 = vld [vmem:[#allocation91_spill] sm:$0xff] }
 0x920   : > { %v14611_v43 = vpop.eup %14610  ;;  %14630 = vrcp.f32 %v18571_v50  ;;  %v6736_v61 = vmul.f32 %v14609_v17, %v20660_v1  ;;  %v6770_v35 = vmul.f32 %v6734_v20, %v20661_v32  ;;  %v18658_v39 = vpack.c.bf16 %v6768_v45, %v6768_v45  ;;  %v20673_v20 = vld [vmem:[#allocation54_spill] sm:$0xff]  ;;  %v20675_v23 = vld [vmem:[#allocation55_spill] sm:$0xff] }
 0x921   : > { %v14613_v49 = vpop.eup %14612  ;;  %14632 = vrcp.f32 %v18573_v42  ;;  %v6737_v18 = vmul.f32 %v14611_v43, %v20662_v11  ;;  %v6771_v16 = vmul.f32 %v6735_v26, %v20663_v10  ;;  %v18663_v34 = vpack.c.bf16 %v6769_v8, %v6769_v8  ;;  %v20678_v10 = vld [vmem:[#allocation94_spill] sm:$0xff] }
 0x922   : > { %v14615_v19 = vpop.eup %14614  ;;  %14634 = vrcp.f32 %v18575_v15  ;;  %v6738_v50 = vmul.f32 %v14613_v49, %v20664_v48  ;;  %v6772_v28 = vmul.f32 %v6736_v61, %v20665_v63  ;;  %v18668_v6 = vpack.c.bf16 %v6770_v35, %v6770_v35  ;;  %v20676_v61 = vld [vmem:[#allocation92_spill] sm:$0xff] }
 0x923   : > { %v14617_v36 = vpop.eup %14616  ;;  %14636 = vrcp.f32 %v18578_v2  ;;  %v6739_v42 = vmul.f32 %v14615_v19, %v20666_v29  ;;  %v6773_v7 = vmul.f32 %v6737_v18, %v20667_v54  ;;  %v18673_v31 = vpack.c.bf16 %v6771_v16, %v6771_v16  ;;  %v20677_v35 = vld [vmem:[#allocation56_spill] sm:$0xff]  ;;  %v20679_v19 = vld [vmem:[#allocation81_spill] sm:$0xff] }
 0x924   : > { %v14619_v44 = vpop.eup %14618  ;;  %14638 = vrcp.f32 %v18580_v40  ;;  %v6740_v15 = vmul.f32 %v14617_v36, %v20668_v3  ;;  %v6774_v4 = vmul.f32 %v6738_v50, %v20669_v41  ;;  %v18678_v37 = vpack.c.bf16 %v6772_v28, %v6772_v28  ;;  %v20680_v36 = vld [vmem:[#allocation96_spill] sm:$0xff] }
 0x925   : > { %v14621_v58 = vpop.eup %14620  ;;  %14640 = vrcp.f32 %v18583_v51  ;;  %v6741_v2 = vmul.f32 %v14619_v44, %v20670_v60  ;;  %v6775_v38 = vmul.f32 %v6739_v42, %v20671_v53  ;;  %v18683_v30 = vpack.c.bf16 %v6773_v7, %v6773_v7  ;;  %v20681_v42 = vld [vmem:[#allocation82_spill] sm:$0xff]  ;;  %v20684_v53 = vld [vmem:[#allocation100_spill] sm:$0xff] }
 0x926   : > { %v14623_v14 = vpop.eup %14622  ;;  %14642 = vrcp.f32 %v18587_v22  ;;  %v6742_v40 = vmul.f32 %v14621_v58, %v20672_v0  ;;  %v6776_v25 = vmul.f32 %v6740_v15, %v20673_v20  ;;  %v18688_v45 = vpack.c.bf16 %v6774_v4, %v6774_v4  ;;  %v20682_v15 = vld [vmem:[#allocation98_spill] sm:$0xff] }
 0x927   : > { %v14625_v17 = vpop.eup %14624  ;;  %v6743_v26 = vmul.f32 %v14623_v14, %v20674_v5  ;;  %v6777_v51 = vmul.f32 %v6741_v2, %v20675_v23  ;;  %v18692_v8 = vpack.c.bf16 %v6775_v38, %v6775_v38  ;;  %v6914_v43 = vshrl.u32 %v18593_v47, 16  ;;  %v20685_v14 = vld [vmem:[#allocation84_spill] sm:$0xff] }
 0x928   : > { %v14627_v1 = vpop.eup %14626  ;;  %v6744_v32 = vmul.f32 %v14625_v17, %v20676_v61  ;;  %v6778_v22 = vmul.f32 %v6742_v40, %v20677_v35  ;;  %v18697_v49 = vpack.c.bf16 %v6776_v25, %v6776_v25  ;;  %v6917_v11 = vshll.u32 %v18593_v47, 16  ;;  %v20683_v47 = vld [vmem:[#allocation83_spill] sm:$0xff]  ;;  %v20686_v17 = vld [vmem:[#allocation102_spill] sm:$0xff]  ;;  %v20688_v61 = vld [vmem:[#allocation104_spill] sm:$0xff] }
 0x929   : > { %v14629_v18 = vpop.eup %14628  ;;  %v6745_v16 = vmul.f32 %v14627_v1, %v20678_v10  ;;  %v6779_v48 = vmul.f32 %v6743_v26, %v20679_v19  ;;  %v18702_v50 = vpack.c.bf16 %v6777_v51, %v6777_v51  ;;  %v6916_v63 = vrot.slane %v6914_v43, 6  ;;  %v20687_v26 = vld [vmem:[#allocation85_spill] sm:$0xff] }
 0x92a   : > { %v14631_v28 = vpop.eup %14630  ;;  %v6746_v29 = vmul.f32 %v14629_v18, %v20680_v36  ;;  %v6780_v54 = vmul.f32 %v6744_v32, %v20681_v42  ;;  %v18706_v7 = vpack.c.bf16 %v6778_v22, %v6778_v22  ;;  %v6919_v44 = vrot.slane %v6917_v11, 7  ;;  %v20689_v35 = vld [vmem:[#allocation57_spill] sm:$0xff]  ;;  %v20692_v42 = vld [vmem:[#allocation106_spill] sm:$0xff] }
 0x92b   : > { %v14633_v3 = vpop.eup %14632  ;;  %v6747_v41 = vmul.f32 %v14631_v28, %v20682_v15  ;;  %v6781_v4 = vmul.f32 %v6745_v16, %v20683_v47  ;;  %v18710_v58 = vpack.c.bf16 %v6779_v48, %v6779_v48  ;;  %v6923_v60 = vshrl.u32 %v18597_v21, 16  ;;  %v20690_v16 = vld [vmem:[#allocation105_spill] sm:$0xff]  ;;  %v20691_v48 = vld [vmem:[#allocation58_spill] sm:$0xff]  ;;  %v20694_v47 = vld [vmem:[#allocation107_spill] sm:$0xff] }
 0x92c   : > { %v14635_v2 = vpop.eup %14634  ;;  %v6748_v38 = vmul.f32 %v14633_v3, %v20684_v53  ;;  %v6782_v0 = vmul.f32 %v6746_v29, %v20685_v14  ;;  %v18715_v40 = vpack.c.bf16 %v6780_v54, %v6780_v54  ;;  %v18717_v20 = vor.u32 %v6919_v44, %v6916_v63  ;;  %v20693_v44 = vld [vmem:[#allocation86_spill] sm:$0xff]  ;;  %v20696_v14 = vld [vmem:[#allocation88_spill] sm:$0xff] }
 0x92d   : > { %v14637_v25 = vpop.eup %14636  ;;  %v6749_v5 = vmul.f32 %v14635_v2, %v20686_v17  ;;  %v6783_v23 = vmul.f32 %v6747_v41, %v20687_v26  ;;  %v18721_v51 = vpack.c.bf16 %v6781_v4, %v6781_v4  ;;  %v6925_v43 = vrot.slane %v6923_v60, 6  ;;  %v20695_v60 = vld [vmem:[#allocation87_spill] sm:$0xff] }
 0x92e   : > { %v14639_v1 = vpop.eup %14638  ;;  %v6750_v32 = vmul.f32 %v14637_v25, %v20688_v61  ;;  %v6784_v22 = vmul.f32 %v6748_v38, %v20689_v35  ;;  %v18725_v11 = vpack.c.bf16 %v6782_v0, %v6782_v0  ;;  %v6921_v18 = vrot.slane %v18717_v20, 4 }
 0x92f   : > { %v14641_v10 = vpop.eup %14640  ;;  %v6751_v19 = vmul.f32 %v14639_v1, %v20690_v16  ;;  %v6785_v63 = vmul.f32 %v6749_v5, %v20691_v48  ;;  %v18730_v28 = vpack.c.bf16 %v6783_v23, %v6783_v23  ;;  %v6926_v36 = vshll.u32 %v18597_v21, 16  ;;  %v20697_v5 = vld [vmem:[#allocation89_spill] sm:$0xff] }
 0x930   : > { %v14643_v29 = vpop.eup %14642  ;;  %v6752_v54 = vmul.f32 %v14641_v10, %v20692_v42  ;;  %v6786_v3 = vmul.f32 %v6750_v32, %v20693_v44  ;;  %v18735_v15 = vpack.c.bf16 %v6784_v22, %v6784_v22  ;;  %v6933_v41 = vshrl.u32 %v18601_v13, 16 }
 0x931   : > { %v6753_v4 = vmul.f32 %v14643_v29, %v20694_v47  ;;  %v6787_v2 = vmul.f32 %v6751_v19, %v20695_v60  ;;  %v18740_v53 = vpack.c.bf16 %v6785_v63, %v6785_v63  ;;  %v6928_v38 = vrot.slane %v6926_v36, 7 }
 0x932   : > { %v6788_v0 = vmul.f32 %v6752_v54, %v20696_v14  ;;  %v18743_v25 = vpack.c.bf16 %v6786_v3, %v6786_v3  ;;  %v6935_v21 = vrot.slane %v6933_v41, 6  ;;  %v6936_v17 = vshll.u32 %v18601_v13, 16 }
 0x933   : > { %v6789_v26 = vmul.f32 %v6753_v4, %v20697_v5  ;;  %v18747_v23 = vpack.c.bf16 %v6787_v2, %v6787_v2  ;;  %v6929_v1 = vor.u32 %v6928_v38, %v6925_v43  ;;  %v6943_v61 = vshrl.u32 %v18605_v62, 16 }
 0x934   : > { %v18750_v32 = vpack.c.bf16 %v6788_v0, %v6788_v0  ;;  %v6938_v35 = vrot.slane %v6936_v17, 7  ;;  %v6946_v22 = vshll.u32 %v18605_v62, 16  ;;  %v6953_v10 = vshrl.u32 %v18609_v57, 16 }
 0x935   : > { %v18754_v16 = vpack.c.bf16 %v6789_v26, %v6789_v26  ;;  %v6930_v48 = vsel %vm16582_vm14, %v6921_v18, %v6929_v1  ;;  %v6931_v13 = vrot.slane %v6929_v1, 4  ;;  %v6945_v63 = vrot.slane %v6943_v61, 6 }
 0x936   : > { %v6939_v36 = vor.u32 %v6938_v35, %v6935_v21  ;;  %v6948_v29 = vrot.slane %v6946_v22, 7  ;;  %v6955_v42 = vrot.slane %v6953_v10, 6  ;;  %v6956_v43 = vshll.u32 %v18609_v57, 16  ;;  %7312 = vst.msk [vmem:[#allocation3 + $0xc] sm:$0xf] %vm6790_vm9, %v6930_v48 }
 0x937   : > { %v6963_v54 = vshrl.u32 %v18613_v27, 16  ;;  %v6966_v62 = vshll.u32 %v18613_v27, 16  ;;  %v6973_v44 = vshrl.u32 %v18618_v33, 16  ;;  %v6976_v3 = vshll.u32 %v18618_v33, 16 }
 0x938   : > { %v6940_v18 = vsel %vm16582_vm14, %v6931_v13, %v6939_v36  ;;  %v6941_v41 = vrot.slane %v6939_v36, 4  ;;  %v6949_v47 = vor.u32 %v6948_v29, %v6945_v63  ;;  %v6958_v4 = vrot.slane %v6956_v43, 7 }
 0x939   : > { %v6965_v60 = vrot.slane %v6963_v54, 6  ;;  %v6968_v2 = vrot.slane %v6966_v62, 7  ;;  %v6975_v38 = vrot.slane %v6973_v44, 6  ;;  %v6978_v57 = vrot.slane %v6976_v3, 7  ;;  %7313 = vst.msk [vmem:[#allocation3 + $0x10] sm:$0xf] %vm6790_vm9, %v6940_v18 }
 0x93a   : > { %v6950_v14 = vsel %vm16582_vm14, %v6941_v41, %v6949_v47  ;;  %v6951_v27 = vrot.slane %v6949_v47, 4  ;;  %v6959_v0 = vor.u32 %v6958_v4, %v6955_v42  ;;  %v6983_v21 = vshrl.u32 %v18623_v59, 16 }
 0x93b   : > { %v6969_v33 = vor.u32 %v6968_v2, %v6965_v60  ;;  %v6979_v17 = vor.u32 %v6978_v57, %v6975_v38  ;;  %v6986_v5 = vshll.u32 %v18623_v59, 16  ;;  %v6993_v26 = vshrl.u32 %v18628_v12, 16  ;;  %7314 = vst.msk [vmem:[#allocation3 + $0x14] sm:$0xf] %vm6790_vm9, %v6950_v14 }
 0x93c   : > { %v6960_v1 = vsel %vm16582_vm14, %v6951_v27, %v6959_v0  ;;  %v6961_v61 = vrot.slane %v6959_v0, 4  ;;  %v6985_v35 = vrot.slane %v6983_v21, 6  ;;  %v6996_v22 = vshll.u32 %v18628_v12, 16 }
 0x93d   : > { %v6971_v10 = vrot.slane %v6969_v33, 4  ;;  %v6981_v48 = vrot.slane %v6979_v17, 4  ;;  %v6988_v13 = vrot.slane %v6986_v5, 7  ;;  %v6995_v63 = vrot.slane %v6993_v26, 6  ;;  %7315 = vst.msk [vmem:[#allocation3 + $0x18] sm:$0xf] %vm6790_vm9, %v6960_v1 }
 0x93e   : > { %v6970_v59 = vsel %vm16582_vm14, %v6961_v61, %v6969_v33  ;;  %v6998_v36 = vrot.slane %v6996_v22, 7  ;;  %v7003_v29 = vshrl.u32 %v18633_v56, 16  ;;  %v7006_v42 = vshll.u32 %v18633_v56, 16 }
 0x93f   : > { %v6980_v43 = vsel %vm16582_vm14, %v6971_v10, %v6979_v17  ;;  %v6989_v54 = vor.u32 %v6988_v13, %v6985_v35  ;;  %v7013_v12 = vshrl.u32 %v18638_v9, 16  ;;  %v7016_v62 = vshll.u32 %v18638_v9, 16  ;;  %7316 = vst.msk [vmem:[#allocation3 + $0x1c] sm:$0xf] %vm6790_vm9, %v6970_v59 }
 0x940   : > { %v6999_v44 = vor.u32 %v6998_v36, %v6995_v63  ;;  %v7005_v3 = vrot.slane %v7003_v29, 6  ;;  %v7008_v18 = vrot.slane %v7006_v42, 7  ;;  %v7023_v41 = vshrl.u32 %v18643_v52, 16  ;;  %7317 = vst.msk [vmem:[#allocation3 + $0x20] sm:$0xf] %vm6790_vm9, %v6980_v43 }
 0x941   : > { %v6990_v56 = vsel %vm16582_vm14, %v6981_v48, %v6989_v54  ;;  %v6991_v47 = vrot.slane %v6989_v54, 4  ;;  %v7015_v4 = vrot.slane %v7013_v12, 6  ;;  %v7018_v60 = vrot.slane %v7016_v62, 7 }
 0x942   : > { %v7001_v2 = vrot.slane %v6999_v44, 4  ;;  %v7009_v38 = vor.u32 %v7008_v18, %v7005_v3  ;;  %v7025_v57 = vrot.slane %v7023_v41, 6  ;;  %v7026_v9 = vshll.u32 %v18643_v52, 16  ;;  %7318 = vst.msk [vmem:[#allocation3 + $0x24] sm:$0xf] %vm6790_vm9, %v6990_v56 }
 0x943   : > { %v7000_v14 = vsel %vm16582_vm14, %v6991_v47, %v6999_v44  ;;  %v7019_v27 = vor.u32 %v7018_v60, %v7015_v4  ;;  %v7033_v0 = vshrl.u32 %v18648_v24, 16  ;;  %v7036_v21 = vshll.u32 %v18648_v24, 16 }
 0x944   : > { %v7010_v33 = vsel %vm16582_vm14, %v7001_v2, %v7009_v38  ;;  %v7011_v17 = vrot.slane %v7009_v38, 4  ;;  %v7028_v5 = vrot.slane %v7026_v9, 7  ;;  %v7043_v26 = vshrl.u32 %v18653_v46, 16  ;;  %7319 = vst.msk [vmem:[#allocation3 + $0x28] sm:$0xf] %vm6790_vm9, %v7000_v14 }
 0x945   : > { %v7021_v52 = vrot.slane %v7019_v27, 4  ;;  %v7035_v1 = vrot.slane %v7033_v0, 6  ;;  %v7038_v61 = vrot.slane %v7036_v21, 7  ;;  %v7046_v35 = vshll.u32 %v18653_v46, 16  ;;  %7320 = vst.msk [vmem:[#allocation3 + $0x2c] sm:$0xf] %vm6790_vm9, %v7010_v33 }
 0x946   : > { %v7020_v22 = vsel %vm16582_vm14, %v7011_v17, %v7019_v27  ;;  %v7029_v24 = vor.u32 %v7028_v5, %v7025_v57  ;;  %v7045_v10 = vrot.slane %v7043_v26, 6  ;;  %v7053_v48 = vshrl.u32 %v18658_v39, 16 }
 0x947   : > { %v7039_v13 = vor.u32 %v7038_v61, %v7035_v1  ;;  %v7048_v63 = vrot.slane %v7046_v35, 7  ;;  %v7056_v59 = vshll.u32 %v18658_v39, 16  ;;  %v7063_v36 = vshrl.u32 %v18663_v34, 16  ;;  %7321 = vst.msk [vmem:[#allocation3 + $0x30] sm:$0xf] %vm6790_vm9, %v7020_v22 }
 0x948   : > { %v7030_v46 = vsel %vm16582_vm14, %v7021_v52, %v7029_v24  ;;  %v7031_v29 = vrot.slane %v7029_v24, 4  ;;  %v7055_v42 = vrot.slane %v7053_v48, 6  ;;  %v7066_v43 = vshll.u32 %v18663_v34, 16 }
 0x949   : > { %v7041_v54 = vrot.slane %v7039_v13, 4  ;;  %v7049_v12 = vor.u32 %v7048_v63, %v7045_v10  ;;  %v7058_v62 = vrot.slane %v7056_v59, 7  ;;  %v7065_v44 = vrot.slane %v7063_v36, 6  ;;  %7322 = vst.msk [vmem:[#allocation3 + $0x34] sm:$0xf] %vm6790_vm9, %v7030_v46 }
 0x94a   : > { %v7040_v39 = vsel %vm16582_vm14, %v7031_v29, %v7039_v13  ;;  %v7068_v3 = vrot.slane %v7066_v43, 7  ;;  %v7073_v18 = vshrl.u32 %v18668_v6, 16  ;;  %v7076_v41 = vshll.u32 %v18668_v6, 16 }
 0x94b   : > { %v7050_v56 = vsel %vm16582_vm14, %v7041_v54, %v7049_v12  ;;  %v7051_v47 = vrot.slane %v7049_v12, 4  ;;  %v7059_v4 = vor.u32 %v7058_v62, %v7055_v42  ;;  %v7083_v34 = vshrl.u32 %v18673_v31, 16  ;;  %7323 = vst.msk [vmem:[#allocation3 + $0x38] sm:$0xf] %vm6790_vm9, %v7040_v39 }
 0x94c   : > { %v7069_v60 = vor.u32 %v7068_v3, %v7065_v44  ;;  %v7075_v2 = vrot.slane %v7073_v18, 6  ;;  %v7078_v38 = vrot.slane %v7076_v41, 7  ;;  %v7086_v57 = vshll.u32 %v18673_v31, 16  ;;  %7324 = vst.msk [vmem:[#allocation3 + $0x3c] sm:$0xf] %vm6790_vm9, %v7050_v56 }
 0x94d   : > { %v7060_v9 = vsel %vm16582_vm14, %v7051_v47, %v7059_v4  ;;  %v7061_v6 = vrot.slane %v7059_v4, 4  ;;  %v7085_v14 = vrot.slane %v7083_v34, 6  ;;  %v7093_v27 = vshrl.u32 %v18678_v37, 16 }
 0x94e   : > { %v7071_v0 = vrot.slane %v7069_v60, 4  ;;  %v7079_v21 = vor.u32 %v7078_v38, %v7075_v2  ;;  %v7088_v33 = vrot.slane %v7086_v57, 7  ;;  %v7096_v17 = vshll.u32 %v18678_v37, 16  ;;  %7325 = vst.msk [vmem:[#allocation3 + $0x40] sm:$0xf] %vm6790_vm9, %v7060_v9 }
 0x94f   : > { %v7070_v5 = vsel %vm16582_vm14, %v7061_v6, %v7069_v60  ;;  %v7095_v31 = vrot.slane %v7093_v27, 6  ;;  %v7103_v26 = vshrl.u32 %v18683_v30, 16  ;;  %v7106_v52 = vshll.u32 %v18683_v30, 16 }
 0x950   : > { %v7080_v1 = vsel %vm16582_vm14, %v7071_v0, %v7079_v21  ;;  %v7081_v61 = vrot.slane %v7079_v21, 4  ;;  %v7089_v35 = vor.u32 %v7088_v33, %v7085_v14  ;;  %v7098_v22 = vrot.slane %v7096_v17, 7  ;;  %7326 = vst.msk [vmem:[#allocation3 + $0x44] sm:$0xf] %vm6790_vm9, %v7070_v5 }
 0x951   : > { %v7105_v24 = vrot.slane %v7103_v26, 6  ;;  %v7108_v37 = vrot.slane %v7106_v52, 7  ;;  %v7113_v10 = vshrl.u32 %v18688_v45, 16  ;;  %v7116_v48 = vshll.u32 %v18688_v45, 16  ;;  %7327 = vst.msk [vmem:[#allocation3 + $0x48] sm:$0xf] %vm6790_vm9, %v7080_v1 }
 0x952   : > { %v7090_v13 = vsel %vm16582_vm14, %v7081_v61, %v7089_v35  ;;  %v7091_v30 = vrot.slane %v7089_v35, 4  ;;  %v7099_v63 = vor.u32 %v7098_v22, %v7095_v31  ;;  %v7123_v59 = vshrl.u32 %v18692_v8, 16 }
 0x953   : > { %v7109_v36 = vor.u32 %v7108_v37, %v7105_v24  ;;  %v7115_v46 = vrot.slane %v7113_v10, 6  ;;  %v7118_v29 = vrot.slane %v7116_v48, 7  ;;  %v7126_v42 = vshll.u32 %v18692_v8, 16  ;;  %7328 = vst.msk [vmem:[#allocation3 + $0x4c] sm:$0xf] %vm6790_vm9, %v7090_v13 }
 0x954   : > { %v7100_v43 = vsel %vm16582_vm14, %v7091_v30, %v7099_v63  ;;  %v7101_v45 = vrot.slane %v7099_v63, 4  ;;  %v7125_v54 = vrot.slane %v7123_v59, 6  ;;  %v7133_v12 = vshrl.u32 %v18697_v49, 16 }
 0x955   : > { %v7111_v62 = vrot.slane %v7109_v36, 4  ;;  %v7119_v44 = vor.u32 %v7118_v29, %v7115_v46  ;;  %v7128_v39 = vrot.slane %v7126_v42, 7  ;;  %v7136_v3 = vshll.u32 %v18697_v49, 16  ;;  %7329 = vst.msk [vmem:[#allocation3 + $0x50] sm:$0xf] %vm6790_vm9, %v7100_v43 }
 0x956   : > { %v7110_v18 = vsel %vm16582_vm14, %v7101_v45, %v7109_v36  ;;  %v7135_v8 = vrot.slane %v7133_v12, 6  ;;  %v7143_v41 = vshrl.u32 %v18702_v50, 16  ;;  %v7146_v56 = vshll.u32 %v18702_v50, 16 }
 0x957   : > { %v7120_v47 = vsel %vm16582_vm14, %v7111_v62, %v7119_v44  ;;  %v7121_v4 = vrot.slane %v7119_v44, 4  ;;  %v7129_v34 = vor.u32 %v7128_v39, %v7125_v54  ;;  %v7138_v60 = vrot.slane %v7136_v3, 7  ;;  %7330 = vst.msk [vmem:[#allocation3 + $0x54] sm:$0xf] %vm6790_vm9, %v7110_v18 }
 0x958   : > { %v7145_v2 = vrot.slane %v7143_v41, 6  ;;  %v7148_v49 = vrot.slane %v7146_v56, 7  ;;  %v7153_v38 = vshrl.u32 %v18706_v7, 16  ;;  %v7156_v57 = vshll.u32 %v18706_v7, 16  ;;  %7331 = vst.msk [vmem:[#allocation3 + $0x58] sm:$0xf] %vm6790_vm9, %v7120_v47 }
 0x959   : > { %v7130_v9 = vsel %vm16582_vm14, %v7121_v4, %v7129_v34  ;;  %v7131_v50 = vrot.slane %v7129_v34, 4  ;;  %v7139_v6 = vor.u32 %v7138_v60, %v7135_v8  ;;  %v7163_v14 = vshrl.u32 %v18710_v58, 16 }
 0x95a   : > { %v7149_v27 = vor.u32 %v7148_v49, %v7145_v2  ;;  %v7155_v0 = vrot.slane %v7153_v38, 6  ;;  %v7158_v21 = vrot.slane %v7156_v57, 7  ;;  %v7166_v33 = vshll.u32 %v18710_v58, 16  ;;  %7332 = vst.msk [vmem:[#allocation3 + $0x5c] sm:$0xf] %vm6790_vm9, %v7130_v9 }
 0x95b   : > { %v7140_v17 = vsel %vm16582_vm14, %v7131_v50, %v7139_v6  ;;  %v7141_v7 = vrot.slane %v7139_v6, 4  ;;  %v7165_v5 = vrot.slane %v7163_v14, 6  ;;  %v7173_v31 = vshrl.u32 %v18715_v40, 16  ;;  %v7309_v14 = vld [vmem:[#allocation3 + $0x8] sm:$0xe] }
 0x95c   : > { %v7151_v26 = vrot.slane %v7149_v27, 4  ;;  %v7159_v52 = vor.u32 %v7158_v21, %v7155_v0  ;;  %v7168_v1 = vrot.slane %v7166_v33, 7  ;;  %v7176_v61 = vshll.u32 %v18715_v40, 16  ;;  %7333 = vst.msk [vmem:[#allocation3 + $0x60] sm:$0xf] %vm6790_vm9, %v7140_v17 }
 0x95d   : > { %v7150_v35 = vsel %vm16582_vm14, %v7141_v7, %v7149_v27  ;;  %v7175_v58 = vrot.slane %v7173_v31, 6  ;;  %v7183_v22 = vshrl.u32 %v18721_v51, 16  ;;  %v7186_v24 = vshll.u32 %v18721_v51, 16  ;;  %v18905_v31 = vld [vmem:[#allocation3 + $0x10] sm:$0xff]  }
 0x95e   : > { %v7160_v37 = vsel %vm16582_vm14, %v7151_v26, %v7159_v52  ;;  %v7161_v10 = vrot.slane %v7159_v52, 4  ;;  %v7169_v48 = vor.u32 %v7168_v1, %v7165_v5  ;;  %v7178_v13 = vrot.slane %v7176_v61, 7  ;;  %7334 = vst.msk [vmem:[#allocation3 + $0x64] sm:$0xf] %vm6790_vm9, %v7150_v35  ;;  %v18909_v35 = vld [vmem:[#allocation3 + $0x50] sm:$0xff]  }
 0x95f   : > { %v7185_v30 = vrot.slane %v7183_v22, 6  ;;  %v7188_v40 = vrot.slane %v7186_v24, 7  ;;  %v7193_v63 = vshrl.u32 %v18725_v11, 16  ;;  %v7196_v59 = vshll.u32 %v18725_v11, 16  ;;  %7335 = vst.msk [vmem:[#allocation3 + $0x68] sm:$0xf] %vm6790_vm9, %v7160_v37 }
 0x960   : > { %v7170_v36 = vsel %vm16582_vm14, %v7161_v10, %v7169_v48  ;;  %v7171_v51 = vrot.slane %v7169_v48, 4  ;;  %v7179_v46 = vor.u32 %v7178_v13, %v7175_v58  ;;  %v7203_v29 = vshrl.u32 %v18730_v28, 16 }
 0x961   : > { %v7189_v42 = vor.u32 %v7188_v40, %v7185_v30  ;;  %v7195_v43 = vrot.slane %v7193_v63, 6  ;;  %v7198_v45 = vrot.slane %v7196_v59, 7  ;;  %v7206_v54 = vshll.u32 %v18730_v28, 16  ;;  %7336 = vst.msk [vmem:[#allocation3 + $0x6c] sm:$0xf] %vm6790_vm9, %v7170_v36  ;;  %v18915_v37 = vld [vmem:[#allocation3 + $0x58] sm:$0xff]  }
 0x962   : > { %v7180_v12 = vsel %vm16582_vm14, %v7171_v51, %v7179_v46  ;;  %v7181_v11 = vrot.slane %v7179_v46, 4  ;;  %v7205_v62 = vrot.slane %v7203_v29, 6  ;;  %v7213_v44 = vshrl.u32 %v18735_v15, 16  ;;  %v7347_v51 = vld [vmem:[#allocation3 + $0x98] sm:$0x3] }
 0x963   : > { %v7191_v39 = vrot.slane %v7189_v42, 4  ;;  %v7199_v3 = vor.u32 %v7198_v45, %v7195_v43  ;;  %v7208_v18 = vrot.slane %v7206_v54, 7  ;;  %v7216_v8 = vshll.u32 %v18735_v15, 16  ;;  %7337 = vst.msk [vmem:[#allocation3 + $0x70] sm:$0xf] %vm6790_vm9, %v7180_v12 }
 0x964   : > { %v7190_v41 = vsel %vm16582_vm14, %v7181_v11, %v7189_v42  ;;  %v7215_v28 = vrot.slane %v7213_v44, 6  ;;  %v7223_v56 = vshrl.u32 %v18740_v53, 16  ;;  %v7226_v47 = vshll.u32 %v18740_v53, 16 }
 0x965   : > { %v7200_v4 = vsel %vm16582_vm14, %v7191_v39, %v7199_v3  ;;  %v7201_v34 = vrot.slane %v7199_v3, 4  ;;  %v7209_v60 = vor.u32 %v7208_v18, %v7205_v62  ;;  %v7218_v2 = vrot.slane %v7216_v8, 7  ;;  %7338 = vst.msk [vmem:[#allocation3 + $0x74] sm:$0xf] %vm6790_vm9, %v7190_v41  ;;  %v18925_v36 = vld [vmem:[#allocation3 + $0x60] sm:$0xff]  }
 0x966   : > { %v7225_v49 = vrot.slane %v7223_v56, 6  ;;  %v7228_v15 = vrot.slane %v7226_v47, 7  ;;  %v7233_v38 = vshrl.u32 %v18743_v25, 16  ;;  %v7236_v57 = vshll.u32 %v18743_v25, 16  ;;  %7339 = vst.msk [vmem:[#allocation3 + $0x78] sm:$0xf] %vm6790_vm9, %v7200_v4 }
 0x967   : > { %v7210_v9 = vsel %vm16582_vm14, %v7201_v34, %v7209_v60  ;;  %v7211_v53 = vrot.slane %v7209_v60, 4  ;;  %v7219_v50 = vor.u32 %v7218_v2, %v7215_v28  ;;  %v7243_v6 = vshrl.u32 %v18747_v23, 16  ;;  %v18946_v4 = vld [vmem:[#allocation3 + $0x18] sm:$0xff]  }
 0x968   : > { %v7229_v27 = vor.u32 %v7228_v15, %v7225_v49  ;;  %v7235_v0 = vrot.slane %v7233_v38, 6  ;;  %v7238_v21 = vrot.slane %v7236_v57, 7  ;;  %v7246_v33 = vshll.u32 %v18747_v23, 16  ;;  %7340 = vst.msk [vmem:[#allocation3 + $0x7c] sm:$0xf] %vm6790_vm9, %v7210_v9  ;;  %v18939_v3 = vld [vmem:[#allocation3 + $0x68] sm:$0xff]  }
 0x969   : > { %v7220_v25 = vsel %vm16582_vm14, %v7211_v53, %v7219_v50  ;;  %v7221_v17 = vrot.slane %v7219_v50, 4  ;;  %v7245_v7 = vrot.slane %v7243_v6, 6  ;;  %v7253_v5 = vshrl.u32 %v18750_v32, 16  ;;  %v18952_v38 = vld [vmem:[#allocation3 + $0x20] sm:$0xff]   ;;  %v19003_v60 = vld [vmem:[#allocation3 + $0x38] sm:$0xff]  }
 0x96a   : > { %v7231_v26 = vrot.slane %v7229_v27, 4  ;;  %v7239_v52 = vor.u32 %v7238_v21, %v7235_v0  ;;  %v7248_v1 = vrot.slane %v7246_v33, 7  ;;  %v7256_v61 = vshll.u32 %v18750_v32, 16  ;;  %7341 = vst.msk [vmem:[#allocation3 + $0x80] sm:$0xf] %vm6790_vm9, %v7220_v25  ;;  %v18954_v57 = vld [vmem:[#allocation25 + $0x10] sm:$0xff]  }
 0x96b   : > { %v7230_v23 = vsel %vm16582_vm14, %v7221_v17, %v7229_v27  ;;  %v7255_v58 = vrot.slane %v7253_v5, 6  ;;  %v7263_v22 = vshrl.u32 %v18754_v16, 16  ;;  %v7266_v24 = vshll.u32 %v18754_v16, 16 }
 0x96c   : > { %v7240_v10 = vsel %vm16582_vm14, %v7231_v26, %v7239_v52  ;;  %v7241_v48 = vrot.slane %v7239_v52, 4  ;;  %v7249_v13 = vor.u32 %v7248_v1, %v7245_v7  ;;  %v7258_v32 = vrot.slane %v7256_v61, 7  ;;  %7342 = vst.msk [vmem:[#allocation3 + $0x84] sm:$0xf] %vm6790_vm9, %v7230_v23  ;;  %v18959_v6 = vld [vmem:[#allocation3 + $0x70] sm:$0xff]  }
 0x96d   : > { %v7265_v30 = vrot.slane %v7263_v22, 6  ;;  %v7268_v40 = vrot.slane %v7266_v24, 7  ;;  %v7310_v59 = vsel %vm16068_vm11, %v18717_v20, %v7309_v14  ;;  %7343 = vst.msk [vmem:[#allocation3 + $0x88] sm:$0xf] %vm6790_vm9, %v7240_v10  ;;  %v7488_v16 = vshll.u32 %v18549_v55, 16  ;;  %v14657_v52 = vld [vmem:[#allocation25] sm:$0xff]  }
 0x96e   : > { %v7250_v46 = vsel %vm16582_vm14, %v7241_v48, %v7249_v13  ;;  %v7251_v29 = vrot.slane %v7249_v13, 4  ;;  %v7259_v42 = vor.u32 %v7258_v32, %v7255_v58  ;;  %7311 = vst [vmem:[#allocation3 + $0x8] sm:$0xe] %v7310_v59  ;;  %v7565_v43 = vshll.u32 %v18909_v35, 16  ;;  %v18977_v10 = vld [vmem:[#allocation3 + $0x28] sm:$0xff]  }
 0x96f   : > { %v7269_v45 = vor.u32 %v7268_v40, %v7265_v30  ;;  %7344 = vst.msk [vmem:[#allocation3 + $0x8c] sm:$0xf] %vm6790_vm9, %v7250_v46  ;;  %v7486_v20 = vshrl.u32 %v18549_v55, 16  ;;  %v7501_v54 = vshll.u32 %v18905_v31, 16  ;;  %v7573_v12 = vshll.u32 %v18915_v37, 16  ;;  %v18965_v0 = vld [vmem:[#allocation3 + $0x78] sm:$0xff]  }
 0x970   : > { %v7260_v11 = vsel %vm16582_vm14, %v7251_v29, %v7259_v42  ;;  %v7261_v62 = vrot.slane %v7259_v42, 4  ;;  %v18936_v44 = vrot.slane %v7565_v43, 1  ;;  %v7569_v39 = vshrl.u32 %v18909_v35, 16  ;;  %v8089_v13 = vld [vmem:[#allocation3] sm:$0xe]  ;;  %v18985_v46 = vld [vmem:[#allocation3 + $0x30] sm:$0xff]  }
 0x971   : > { %v7271_v18 = vrot.slane %v7269_v45, 4  ;;  %7345 = vst.msk [vmem:[#allocation3 + $0x90] sm:$0xf] %vm6790_vm9, %v7260_v11  ;;  %v7490_v8 = vrot.slane %v7488_v16, 1  ;;  %v7575_v41 = vrot.slane %v7573_v12, 1  ;;  %v7577_v28 = vshrl.u32 %v18915_v37, 16 }
 0x972   : > { %v7270_v56 = vsel %vm16582_vm14, %v7261_v62, %v7269_v45  ;;  %v7571_v47 = vor.u32 %v7569_v39, %v18936_v44  ;;  %v7581_v34 = vshll.u32 %v18925_v36, 16  ;;  %v7503_v49 = vrot.slane %v7501_v54, 1  ;;  %v14658_v11 = vld [vmem:[#allocation3 + $0x4] sm:$0xf] }
 0x973   : > { %7346 = vst.msk [vmem:[#allocation3 + $0x94] sm:$0xf] %vm6790_vm9, %v7270_v56  ;;  %v7348_v2 = vsel %vm16049_vm10, %v7271_v18, %v7347_v51  ;;  %v7579_v15 = vor.u32 %v7577_v28, %v7575_v41  ;;  %v7585_v53 = vshrl.u32 %v18925_v36, 16  ;;  %v7589_v50 = vshll.u32 %v18939_v3, 16  ;;  %v18982_v59 = vld [vmem:[#allocation3 + $0x80] sm:$0xff]  }
 0x974   : > { %7349 = vst [vmem:[#allocation3 + $0x98] sm:$0x3] %v7348_v2  ;;  %v7576_v19 = vsel %vm2509_vm2, %v7571_v47, %v7575_v41  ;;  %v7583_v9 = vrot.slane %v7581_v34, 1  ;;  %v7505_v27 = vshrl.u32 %v18905_v31, 16  ;;  %v7509_v21 = vshll.u32 %v18946_v4, 16 }
 0x975   : > { %v18961_v14 = vld [vmem:[#allocation3 + $0x8] sm:$0xff]   ;;  %12931 = vmatprep.mubr.msk.bf16.mxu1 %vm6030_vm12, %v7576_v19  ;;  %v7591_v17 = vrot.slane %v7589_v50, 1  ;;  %v7491_v7 = vor.u32 %v7490_v8, %v7486_v20  ;;  %v7517_v61 = vshll.u32 %v18952_v38, 16  ;;  %v7593_v23 = vshrl.u32 %v18939_v3, 16 }
 0x976   : > { %v7584_v33 = vsel %vm2509_vm2, %v7579_v15, %v7583_v9  ;;  %v7587_v25 = vor.u32 %v7585_v53, %v7583_v9  ;;  %v7493_v5 = vshll.u32 %v18961_v14, 16  ;;  %v7507_v26 = vor.u32 %v7505_v27, %v7503_v49  ;;  %v18991_v12 = vld [vmem:[#allocation3 + $0x88] sm:$0xff]  }
 0x977   : > { %12932 = vmatmul.mubr.msk.bf16.vlgmr.msra.gmra.mrb[8].mxu1 %vm6030_vm12, %v7584_v33  ;;  %v7597_v58 = vshll.u32 %v18959_v6, 16  ;;  %v7497_v24 = vshrl.u32 %v18961_v14, 16  ;;  %v7605_v48 = vshll.u32 %v18965_v0, 16  ;;  %v7511_v32 = vrot.slane %v7509_v21, 1 }
 0x978   : > { %12948 = vmatpush3.bf16.msra.mxu1 %v14657_v52  ;;  %v7592_v1 = vsel %vm2509_vm2, %v7587_v25, %v7591_v17  ;;  %v7495_v22 = vrot.slane %v7493_v5, 1  ;;  %v7595_v30 = vor.u32 %v7593_v23, %v7591_v17  ;;  %v7601_v63 = vshrl.u32 %v18959_v6, 16  ;;  %v19008_v9 = vld [vmem:[#allocation3 + $0x90] ss:$0 sps:$4 sm:$0x11]   ;;  %v19014_v5 = vld [vmem:[#allocation3 + $0x48] sm:$0xff]  }
 0x979   : > { %12935 = vmatprep.mubr.msk.bf16.mxu1 %vm6030_vm12, %v7592_v1  ;;  %12985 = vmatprep.subr.bf16.mxu1 %v18954_v57  ;;  %v7599_v40 = vrot.slane %v7597_v58, 1  ;;  %v7512_v29 = vsel %vm2509_vm2, %v7507_v26, %v7511_v32  ;;  %v7519_v42 = vrot.slane %v7517_v61, 1  ;;  %v7513_v20 = vshrl.u32 %v18946_v4, 16 }
 0x97a   : > { %v7496_v16 = vsel %vm2509_vm2, %v7491_v7, %v7495_v22  ;;  %v7499_v51 = vor.u32 %v7497_v24, %v7495_v22  ;;  %v7607_v54 = vrot.slane %v7605_v48, 1  ;;  %v11885_v62 = vcombine.low %v8089_v13, %v14658_v11  ;;  %v19012_v7 = vld [vmem:[#allocation3 + $0x40] sm:$0xff]  }
 0x97b   : > { %12911 = vmatprep.mubr.msk.bf16.mxu0 %vm6030_vm12, %v7496_v16  ;;  %v7603_v43 = vor.u32 %v7601_v63, %v7599_v40  ;;  %v7521_v39 = vshrl.u32 %v18952_v38, 16  ;;  %v7525_v18 = vshll.u32 %v18977_v10, 16  ;;  %v7600_v8 = vsel %vm2509_vm2, %v7595_v30, %v7599_v40 }
 0x97c   : > { %v7504_v45 = vsel %vm2509_vm2, %v7499_v51, %v7503_v49  ;;  %v7613_v41 = vshll.u32 %v18982_v59, 16  ;;  %v7533_v56 = vshll.u32 %v18985_v46, 16  ;;  %v7515_v47 = vor.u32 %v7513_v20, %v7511_v32 }
 0x97d   : > { %12912 = vmatmul.mubr.msk.bf16.vlgmr.msra.gmra.mrb[40].mxu0 %vm6030_vm12, %v7504_v45  ;;  %v7608_v28 = vsel %vm2509_vm2, %v7603_v43, %v7607_v54  ;;  %v7523_v34 = vor.u32 %v7521_v39, %v7519_v42  ;;  %v7609_v2 = vshrl.u32 %v18965_v0, 16  ;;  %v7617_v15 = vshrl.u32 %v18982_v59, 16 }
 0x97e   : > { %12915 = vmatprep.mubr.msk.bf16.mxu0 %vm6030_vm12, %v7512_v29  ;;  %v7615_v49 = vrot.slane %v7613_v41, 1  ;;  %v7621_v19 = vshll.u32 %v18991_v12, 16  ;;  %v7527_v53 = vrot.slane %v7525_v18, 1  ;;  %v8096_v27 = vrot.slane %v11885_v62, 1 }
 0x97f   : > { %12936 = vmatmul.mubr.msk.bf16.gmra.mrb[12].mxu1 %vm6030_vm12, %v7600_v8  ;;  %v7611_v50 = vor.u32 %v7609_v2, %v7607_v54  ;;  %v7529_v21 = vshrl.u32 %v18977_v10, 16  ;;  %v7535_v33 = vrot.slane %v7533_v56, 1  ;;  %v7537_v25 = vshrl.u32 %v18985_v46, 16 }
 0x980   : > { %12939 = vmatprep.mubr.msk.bf16.mxu1 %vm6030_vm12, %v7608_v28  ;;  %v7619_v17 = vor.u32 %v7617_v15, %v7615_v49  ;;  %v7520_v26 = vsel %vm2509_vm2, %v7515_v47, %v7519_v42  ;;  %v7528_v52 = vsel %vm2509_vm2, %v7523_v34, %v7527_v53  ;;  %v7541_v1 = vshll.u32 %v19003_v60, 16 }
 0x981   : > { %v8097_v61 = vrot.slane %v18961_v14, 1  ;;  %v7623_v23 = vrot.slane %v7621_v19, 1  ;;  %v7625_v58 = vshrl.u32 %v18991_v12, 16  ;;  %v8099_v22 = vrot.slane %v18905_v31, 1 }
 0x982   : > { %v8101_v24 = vrot.slane %v18946_v4, 1  ;;  %v7616_v48 = vsel %vm2509_vm2, %v7611_v50, %v7615_v49  ;;  %v8103_v32 = vrot.slane %v18952_v38, 1  ;;  %v8105_v30 = vrot.slane %v18977_v10, 1 }
 0x983   : > { %v19026_v13 = vsel %vm3115_vm7, %v8096_v27, %v8097_v61  ;;  %v7624_v40 = vsel %vm2509_vm2, %v7619_v17, %v7623_v23  ;;  %v7629_v63 = vshll.u32 %v19008_v9, 16  ;;  %v19035_v16 = vsel %vm3115_vm7, %v8097_v61, %v8099_v22  ;;  %v19083_v61 = vld [vmem:[#allocation3 + $0x10] sm:$0xff]  }
 0x984   : > { %v8107_v51 = vrot.slane %v18985_v46, 1  ;;  %v19040_v29 = vsel %vm3115_vm7, %v8099_v22, %v8101_v24  ;;  %v19043_v42 = vsel %vm3115_vm7, %v8101_v24, %v8103_v32  ;;  %v19046_v43 = vsel %vm3115_vm7, %v8103_v32, %v8105_v30  ;;  %v19086_v22 = vld [vmem:[#allocation25 + $0x18] sm:$0xff]   ;;  %v19088_v24 = vld [vmem:[#allocation3 + $0x18] sm:$0xff]  }
 0x985   : > { %12916 = vmatmul.mubr.msk.bf16.gmra.mrb[44].mxu0 %vm6030_vm12, %v7520_v26  ;;  %v8109_v45 = vrot.slane %v19003_v60, 1  ;;  %v7531_v20 = vor.u32 %v7529_v21, %v7527_v53  ;;  %v8111_v11 = vrot.slane %v19012_v7, 1  ;;  %v20285_v62 = vrot.slane %v19014_v5, 1  ;;  %v8406_v26 = vld [vmem:[#allocation3 + $0x8] sm:$0xe] }
 0x986   : > { %12919 = vmatprep.mubr.msk.bf16.mxu0 %vm6030_vm12, %v7528_v52  ;;  %v19050_v54 = vsel %vm3115_vm7, %v8105_v30, %v8107_v51  ;;  %v7539_v39 = vor.u32 %v7537_v25, %v7535_v33  ;;  %v7549_v18 = vshll.u32 %v19012_v7, 16  ;;  %v7627_v8 = vor.u32 %v7625_v58, %v7623_v23  ;;  %v19077_v25 = vld [vmem:[#allocation3 + $0xc] sm:$0xf] }
 0x987   : > { %12940 = vmatmul.mubr.msk.bf16.gmra.mrb[16].mxu1 %vm6030_vm12, %v7616_v48  ;;  %v19056_v41 = vsel %vm3115_vm7, %v8107_v51, %v8109_v45  ;;  %v19059_v28 = vsel %vm3115_vm7, %v8109_v45, %v8111_v11  ;;  %v19064_v56 = vsel %vm3115_vm7, %v8111_v11, %v20285_v62  ;;  %v7543_v47 = vrot.slane %v7541_v1, 1  ;;  %v19092_v48 = vld [vmem:[#allocation3 + $0x20] sm:$0xff]   ;;  %v19100_v32 = vld [vmem:[#allocation3 + $0x28] sm:$0xff]   ;;  %v19108_v45 = vld [vmem:[#allocation3 + $0x30] sm:$0xff]  }
 0x988   : > { %12943 = vmatprep.mubr.msk.bf16.mxu1 %vm6030_vm12, %v7624_v40  ;;  %v7631_v34 = vrot.slane %v7629_v63, 1  ;;  %v7536_v2 = vsel %vm2509_vm2, %v7531_v20, %v7535_v33  ;;  %v7557_v49 = vshll.u32 %v19014_v5, 16  ;;  %v7551_v19 = vrot.slane %v7549_v18, 1  ;;  %v19113_v20 = vld [vmem:[#allocation3 + $0x38] sm:$0xff]  }
 0x989   : > { %v7544_v15 = vsel %vm2509_vm2, %v7539_v39, %v7543_v47  ;;  %v7545_v50 = vshrl.u32 %v19003_v60, 16  ;;  %v7553_v27 = vshrl.u32 %v19012_v7, 16  ;;  %v7561_v52 = vshrl.u32 %v19014_v5, 16 }
 0x98a   : > { %v7632_v53 = vsel %vm2509_vm2, %v7627_v8, %v7631_v34  ;;  %v7559_v33 = vrot.slane %v7557_v49, 1  ;;  %v19081_v1 = vcombine.low %v8406_v26, %v19077_v25  ;;  %v8865_v63 = vshrl.u32 %v19083_v61, 16 }
 0x98b   : > { %v7547_v21 = vor.u32 %v7545_v50, %v7543_v47  ;;  %v7555_v17 = vor.u32 %v7553_v27, %v7551_v19  ;;  %v8883_v8 = vshrl.u32 %v19092_v48, 16  ;;  %v19119_v50 = vld [vmem:[#allocation3 + $0x40] sm:$0xff]   ;;  %v19121_v27 = vld [vmem:[#allocation3 + $0x48] sm:$0xff]   ;;  %v8901_v26 = vshrl.u32 %v19108_v45, 16 }
 0x98c   : > { %v7563_v58 = vor.u32 %v7561_v52, %v7559_v33  ;;  %v8857_v30 = vshrl.u32 %v19081_v1, 16  ;;  %v8860_v40 = vshll.u32 %v19081_v1, 16  ;;  %v8867_v18 = vrot.slane %v8865_v63, 1 }
 0x98d   : > { %12920 = vmatmul.mubr.msk.bf16.gmra.mrb[48].mxu0 %vm6030_vm12, %v7536_v2  ;;  %v7552_v23 = vsel %vm2509_vm2, %v7547_v21, %v7551_v19  ;;  %v8886_v2 = vshll.u32 %v19092_v48, 16  ;;  %v8892_v19 = vshrl.u32 %v19100_v32, 16 }
 0x98e   : > { %12923 = vmatprep.mubr.msk.bf16.mxu0 %vm6030_vm12, %v7544_v15  ;;  %v7568_v51 = vsel %vm2509_vm2, %v7563_v58, %v18936_v44  ;;  %v8859_v11 = vrot.slane %v8857_v30, 1  ;;  %v8862_v39 = vrot.slane %v8860_v40, 2  ;;  %v8885_v15 = vrot.slane %v8883_v8, 1  ;;  %v19129_v30 = vld [vmem:[#allocation3 + $0x50] sm:$0xff]  }
 0x98f   : > { %12944 = vmatmul.mubr.msk.bf16.gmra.mrb[20].mxu1 %vm6030_vm12, %v7632_v53  ;;  %v8895_v53 = vshll.u32 %v19100_v32, 16  ;;  %v8894_v52 = vrot.slane %v8892_v19, 1  ;;  %v8904_v58 = vshll.u32 %v19108_v45, 16  ;;  %v8919_v8 = vshrl.u32 %v19119_v50, 16 }
 0x990   : > { %12949 = vmatprep.mubr.msk.bf16.mxu1 %vm6030_vm12, %v18549_v55  ;;  %v7560_v55 = vsel %vm2509_vm2, %v7555_v17, %v7559_v33  ;;  %v8863_v49 = vor.u32 %v8862_v39, %v8859_v11  ;;  %v8888_v17 = vrot.slane %v8886_v2, 2  ;;  %v8913_v39 = vshll.u32 %v19113_v20, 16 }
 0x991   : > { %v8921_v19 = vrot.slane %v8919_v8, 1  ;;  %v19165_v8 = vld [vmem:[#allocation3 + $0x78] sm:$0xff]  }
 0x992   : > { %20708 = vst [vmem:[#allocation114_spill] sm:$0xff] %v19165_v8 }
 0x995   : > { %12924 = vmatmul.mubr.msk.bf16.gmra.mrb[52].mxu0 %vm6030_vm12, %v7552_v23  ;;  %v8897_v23 = vrot.slane %v8895_v53, 2 }
 0x996   : > { %12927 = vmatprep.mubr.msk.bf16.mxu0 %vm6030_vm12, %v7560_v55  ;;  %v8910_v55 = vshrl.u32 %v19113_v20, 16 }
 0x997   : > { %12950 = vmatmul.mubr.msk.bf16.vlgmr.msra.gmra.mrb[24].mxu1 %vm6030_vm12, %v18961_v14  ;;  %v8874_v14 = vshrl.u32 %v19088_v24, 16 }
 0x998   : > { %12986 = vmatpush3.bf16.msra.mxu1 %v18954_v57  ;;  %12953 = vmatprep.mubr.msk.bf16.mxu1 %vm6030_vm12, %v18905_v31  ;;  %v8868_v57 = vshll.u32 %v19083_v61, 16  ;;  %v8877_v31 = vshll.u32 %v19088_v24, 16  ;;  %v8912_v11 = vrot.slane %v8910_v55, 1  ;;  %v19161_v55 = vld [vmem:[#allocation3 + $0x70] sm:$0xff]  }
 0x999   : > { %13023 = vmatprep.subr.bf16.mxu1 %v19086_v22  ;;  %v8876_v34 = vrot.slane %v8874_v14, 1  ;;  %v8903_v14 = vrot.slane %v8901_v26, 1  ;;  %20707 = vst [vmem:[#allocation112_spill] sm:$0xff] %v19161_v55 }
 0x99a   : > { %v8870_v47 = vrot.slane %v8868_v57, 2  ;;  %v8879_v44 = vrot.slane %v8877_v31, 2  ;;  %v8889_v57 = vor.u32 %v8888_v17, %v8885_v15  ;;  %v8906_v31 = vrot.slane %v8904_v58, 2  ;;  %v19155_v17 = vld [vmem:[#allocation3 + $0x68] sm:$0xff]  }
 0x99b   : > { %v8931_v15 = vshll.u32 %v19121_v27, 16  ;;  %20705 = vst [vmem:[#allocation113_spill] sm:$0xff] %v19155_v17  ;;  %v8940_v58 = vshll.u32 %v19129_v30, 16 }
 0x99c   : > { %v8871_v21 = vor.u32 %v8870_v47, %v8867_v18  ;;  %v8880_v33 = vor.u32 %v8879_v44, %v8876_v34  ;;  %v19140_v18 = vld [vmem:[#allocation3 + $0x58] sm:$0xff]   ;;  %v8922_v47 = vshll.u32 %v19119_v50, 16  ;;  %v8928_v34 = vshrl.u32 %v19121_v27, 16  ;;  %v19148_v44 = vld [vmem:[#allocation3 + $0x60] sm:$0xff]  }
 0x99d   : > { %12928 = vmatmul.mubr.msk.bf16.gmra.mrb[56].mxu0 %vm6030_vm12, %v7568_v51  ;;  %v8898_v51 = vor.u32 %v8897_v23, %v8894_v52  ;;  %v8907_v2 = vor.u32 %v8906_v31, %v8903_v14  ;;  %v8933_v23 = vrot.slane %v8931_v15, 2  ;;  %v8946_v31 = vshrl.u32 %v19140_v18, 16 }
 0x99e   : > { %v19132_v40 = vsel %vm3868_vm3, %v8863_v49, %v8871_v21  ;;  %v19135_v63 = vsel %vm3868_vm3, %v8871_v21, %v8880_v33  ;;  %v8915_v49 = vrot.slane %v8913_v39, 2  ;;  %v8924_v53 = vrot.slane %v8922_v47, 2 }
 0x99f   : > { %12954 = vmatmul.mubr.msk.bf16.gmra.mrb[28].mxu1 %vm6030_vm12, %v18946_v4  ;;  %20701 = vst [vmem:[#allocation108_spill] sm:$0xff] %v19132_v40  ;;  %20702 = vst [vmem:[#allocation109_spill] sm:$0xff] %v19135_v63  ;;  %v19143_v4 = vsel %vm3868_vm3, %v8880_v33, %v8889_v57  ;;  %v8930_v21 = vrot.slane %v8928_v34, 1  ;;  %v8937_v33 = vshrl.u32 %v19129_v30, 16  ;;  %v19158_v26 = vsel %vm3868_vm3, %v8898_v51, %v8907_v2 }
 0x9a0   : > { %12957 = vmatprep.mubr.msk.bf16.mxu1 %vm6030_vm12, %v18952_v38  ;;  %20703 = vst [vmem:[#allocation118_spill] sm:$0xff] %v19143_v4  ;;  %v19151_v38 = vsel %vm3868_vm3, %v8889_v57, %v8898_v51  ;;  %20706 = vst [vmem:[#allocation111_spill] sm:$0xff] %v19158_v26  ;;  %v8916_v52 = vor.u32 %v8915_v49, %v8912_v11  ;;  %v8925_v57 = vor.u32 %v8924_v53, %v8921_v19 }
 0x9a1   : > { %20704 = vst [vmem:[#allocation110_spill] sm:$0xff] %v19151_v38  ;;  %v8939_v14 = vrot.slane %v8937_v33, 1  ;;  %v8949_v39 = vshll.u32 %v19140_v18, 16  ;;  %v8934_v34 = vor.u32 %v8933_v23, %v8930_v21  ;;  %v8942_v51 = vrot.slane %v8940_v58, 2  ;;  %v19179_v33 = vld [vmem:[#allocation3 + $0x80] sm:$0xff]  }
 0x9a2   : > { %v19168_v47 = vsel %vm3868_vm3, %v8907_v2, %v8916_v52  ;;  %v8955_v11 = vshrl.u32 %v19148_v44, 16  ;;  %v19174_v49 = vsel %vm3868_vm3, %v8916_v52, %v8925_v57  ;;  %v8948_v15 = vrot.slane %v8946_v31, 1  ;;  %20711 = vst [vmem:[#allocation117_spill] sm:$0xff] %v19179_v33 }
 0x9a3   : > { %20709 = vst [vmem:[#allocation115_spill] sm:$0xff] %v19168_v47  ;;  %20710 = vst [vmem:[#allocation116_spill] sm:$0xff] %v19174_v49  ;;  %v8951_v19 = vrot.slane %v8949_v39, 2  ;;  %v8958_v53 = vshll.u32 %v19148_v44, 16  ;;  %v19182_v2 = vsel %vm3868_vm3, %v8925_v57, %v8934_v34  ;;  %v8943_v21 = vor.u32 %v8942_v51, %v8939_v14  ;;  %v19194_v14 = vld [vmem:[#allocation3 + $0x90] sm:$0xff]  }
 0x9a4   : > { %20712 = vst [vmem:[#allocation119_spill] sm:$0xff] %v19182_v2  ;;  %v8957_v23 = vrot.slane %v8955_v11, 1  ;;  %v8964_v58 = vshrl.u32 %v19155_v17, 16  ;;  %v8967_v31 = vshll.u32 %v19155_v17, 16  ;;  %v8973_v39 = vshrl.u32 %v19161_v55, 16  ;;  %20715 = vst [vmem:[#allocation122_spill] sm:$0xff] %v19194_v14 }
 0x9a5   : > { %v8952_v52 = vor.u32 %v8951_v19, %v8948_v15  ;;  %v8960_v62 = vrot.slane %v8958_v53, 2  ;;  %v19190_v49 = vsel %vm3868_vm3, %v8934_v34, %v8943_v21  ;;  %v8976_v47 = vshll.u32 %v19161_v55, 16 }
 0x9a6   : > { %20714 = vst [vmem:[#allocation121_spill] sm:$0xff] %v19190_v49  ;;  %v8982_v57 = vshrl.u32 %v19165_v8, 16  ;;  %v8969_v15 = vrot.slane %v8967_v31, 2  ;;  %v8975_v19 = vrot.slane %v8973_v39, 1  ;;  %v8985_v26 = vshll.u32 %v19165_v8, 16 }
 0x9a7   : > { %12958 = vmatmul.mubr.msk.bf16.gmra.mrb[32].mxu1 %vm6030_vm12, %v18977_v10  ;;  %v19185_v10 = vld [vmem:[#allocation3 + $0x88] sm:$0xff]   ;;  %v19197_v51 = vsel %vm3868_vm3, %v8943_v21, %v8952_v52  ;;  %v8961_v11 = vor.u32 %v8960_v62, %v8957_v23  ;;  %v8978_v53 = vrot.slane %v8976_v47, 2  ;;  %v8991_v34 = vshrl.u32 %v19179_v33, 16 }
 0x9a8   : > { %12961 = vmatprep.mubr.msk.bf16.mxu1 %vm6030_vm12, %v18985_v46  ;;  %20713 = vst [vmem:[#allocation120_spill] sm:$0xff] %v19185_v10  ;;  %v8966_v46 = vrot.slane %v8964_v58, 1  ;;  %20716 = vst [vmem:[#allocation123_spill] sm:$0xff] %v19197_v51  ;;  %v8984_v2 = vrot.slane %v8982_v57, 1  ;;  %v8994_v38 = vshll.u32 %v19179_v33, 16  ;;  %v9000_v4 = vshrl.u32 %v19185_v10, 16 }
 0x9a9   : > { %v19202_v58 = vsel %vm3868_vm3, %v8952_v52, %v8961_v11  ;;  %v8979_v63 = vor.u32 %v8978_v53, %v8975_v19  ;;  %v8987_v21 = vrot.slane %v8985_v26, 2  ;;  %v8993_v51 = vrot.slane %v8991_v34, 1 }
 0x9aa   : > { %20717 = vst [vmem:[#allocation124_spill] sm:$0xff] %v19202_v58  ;;  %v8970_v49 = vor.u32 %v8969_v15, %v8966_v46  ;;  %v9003_v62 = vshll.u32 %v19185_v10, 16  ;;  %v8996_v23 = vrot.slane %v8994_v38, 2  ;;  %v9002_v31 = vrot.slane %v9000_v4, 1 }
 0x9ab   : > { %v9009_v52 = vshrl.u32 %v19194_v14, 16  ;;  %v8988_v26 = vor.u32 %v8987_v21, %v8984_v2  ;;  %v9012_v57 = vshll.u32 %v19194_v14, 16  ;;  %v9309_v21 = vrot.slane %v19088_v24, 2 }
 0x9ac   : > { %v19210_v47 = vsel %vm3868_vm3, %v8961_v11, %v8970_v49  ;;  %v19216_v39 = vsel %vm3868_vm3, %v8970_v49, %v8979_v63  ;;  %v9005_v46 = vrot.slane %v9003_v62, 2  ;;  %v8997_v15 = vor.u32 %v8996_v23, %v8993_v51 }
 0x9ad   : > { %20718 = vst [vmem:[#allocation125_spill] sm:$0xff] %v19210_v47  ;;  %20719 = vst [vmem:[#allocation126_spill] sm:$0xff] %v19216_v39  ;;  %v9011_v19 = vrot.slane %v9009_v52, 1  ;;  %v19220_v11 = vsel %vm3868_vm3, %v8979_v63, %v8988_v26  ;;  %v9014_v4 = vrot.slane %v9012_v57, 2  ;;  %v9311_v63 = vrot.slane %v19092_v48, 2  ;;  %v19351_v39 = vld [vmem:[#allocation3 + $0x50] sm:$0xff]  }
 0x9ae   : > { %20720 = vst [vmem:[#allocation127_spill] sm:$0xff] %v19220_v11  ;;  %v9006_v38 = vor.u32 %v9005_v46, %v9002_v31  ;;  %v19224_v34 = vsel %vm3868_vm3, %v8988_v26, %v8997_v15  ;;  %v9313_v62 = vrot.slane %v19100_v32, 2  ;;  %v9315_v23 = vrot.slane %v19108_v45, 2  ;;  %v19368_v47 = vld [vmem:[#allocation3 + $0x60] sm:$0xff]  }
 0x9af   : > { %12962 = vmatmul.mubr.msk.bf16.gmra.mrb[36].mxu1 %vm6030_vm12, %v19003_v60  ;;  %v9299_v60 = vld [vmem:[#allocation3 + $0x8] sm:$0xc]  ;;  %20721 = vst [vmem:[#allocation128_spill] sm:$0xff] %v19224_v34  ;;  %v19230_v2 = vor.u32 %v9014_v4, %v9011_v19  ;;  %v9317_v26 = vrot.slane %v19113_v20, 2  ;;  %v19250_v46 = vsel %vm4315_vm4, %v9309_v21, %v9311_v63  ;;  %v9321_v4 = vrot.slane %v19121_v27, 2 }
 0x9b0   : > { %12965 = vmatprep.mubr.msk.bf16.mxu1 %vm6030_vm12, %v19012_v7  ;;  %v11963_v53 = vcombine.low %v9299_v60, %v19077_v25  ;;  %v9307_v7 = vrot.slane %v19083_v61, 2  ;;  %v19228_v49 = vsel %vm3868_vm3, %v8997_v15, %v9006_v38  ;;  %20727 = vst [vmem:[#allocation134_spill] sm:$0xff] %v19250_v46  ;;  %v19253_v57 = vsel %vm4315_vm4, %v9311_v63, %v9313_v62  ;;  %v19260_v19 = vld [vmem:[#allocation3 + $0x98] ss:$0 sps:$4 sm:$0x33]  }
 0x9b1   : > { %20722 = vst [vmem:[#allocation129_spill] sm:$0xff] %v19228_v49  ;;  %20723 = vst [vmem:[#allocation130_spill] sm:$0xff] %v19230_v2  ;;  %v19238_v25 = vsel %vm3868_vm3, %v9006_v38, %v19230_v2  ;;  %v19256_v15 = vsel %vm4315_vm4, %v9313_v62, %v9315_v23  ;;  %v19263_v60 = vsel %vm4315_vm4, %v9315_v23, %v9317_v26  ;;  %v9319_v38 = vrot.slane %v19119_v50, 2 }
 0x9b2   : > { %v9306_v51 = vrot.slane %v11963_v53, 2  ;;  %20724 = vst [vmem:[#allocation132_spill] sm:$0xff] %v19238_v25  ;;  %v19244_v52 = vsel %vm4315_vm4, %v9307_v7, %v9309_v21  ;;  %20728 = vst [vmem:[#allocation135_spill] sm:$0xff] %v19253_v57  ;;  %v9323_v53 = vrot.slane %v19129_v30, 2  ;;  %v9329_v21 = vrot.slane %v19155_v17, 2 }
 0x9b3   : > { %20726 = vst [vmem:[#allocation133_spill] sm:$0xff] %v19244_v52  ;;  %20729 = vst [vmem:[#allocation136_spill] sm:$0xff] %v19256_v15  ;;  %v9331_v63 = vrot.slane %v19161_v55, 2  ;;  %v19276_v62 = vsel %vm4315_vm4, %v9319_v38, %v9321_v4 }
 0x9b4   : > { %v19241_v31 = vsel %vm4315_vm4, %v9306_v51, %v9307_v7  ;;  %20730 = vst [vmem:[#allocation137_spill] sm:$0xff] %v19260_v19  ;;  %20731 = vst [vmem:[#allocation138_spill] sm:$0xff] %v19263_v60  ;;  %v9325_v7 = vrot.slane %v19140_v18, 2  ;;  %v9327_v51 = vrot.slane %v19148_v44, 2  ;;  %v19279_v23 = vsel %vm4315_vm4, %v9321_v4, %v9323_v53 }
 0x9b5   : > { %20725 = vst [vmem:[#allocation131_spill] sm:$0xff] %v19241_v31  ;;  %20733 = vst [vmem:[#allocation140_spill] sm:$0xff] %v19276_v62  ;;  %v9333_v60 = vrot.slane %v19165_v8, 2  ;;  %v9335_v4 = vrot.slane %v19179_v33, 2  ;;  %v9339_v62 = vrot.slane %v19194_v14, 2 }
 0x9b6   : > { %20734 = vst [vmem:[#allocation141_spill] sm:$0xff] %v19279_v23  ;;  %v19283_v15 = vsel %vm4315_vm4, %v9323_v53, %v9325_v7  ;;  %v19286_v57 = vsel %vm4315_vm4, %v9325_v7, %v9327_v51  ;;  %v19289_v46 = vsel %vm4315_vm4, %v9327_v51, %v9329_v21  ;;  %v9337_v23 = vrot.slane %v19185_v10, 2 }
 0x9b7   : > { %12966 = vmatmul.mubr.msk.bf16.gmra.mrb[40].mxu1 %vm6030_vm12, %v19014_v5  ;;  %20735 = vst [vmem:[#allocation142_spill] sm:$0xff] %v19283_v15  ;;  %20736 = vst [vmem:[#allocation143_spill] sm:$0xff] %v19286_v57  ;;  %v9341_v53 = vrot.slane %v19260_v19, 2  ;;  %v19302_v7 = vsel %vm4315_vm4, %v9333_v60, %v9335_v4  ;;  %v19347_v19 = vld [vmem:[#allocation3 + $0x48] sm:$0xff]  }
 0x9b8   : > { %12969 = vmatprep.mubr.msk.bf16.mxu1 %vm6030_vm12, %v18909_v35  ;;  %v19273_v35 = vsel %vm4315_vm4, %v9317_v26, %v9319_v38  ;;  %20737 = vst [vmem:[#allocation144_spill] sm:$0xff] %v19289_v46  ;;  %v19292_v26 = vsel %vm4315_vm4, %v9329_v21, %v9331_v63  ;;  %v19295_v38 = vsel %vm4315_vm4, %v9331_v63, %v9333_v60  ;;  %20740 = vst [vmem:[#allocation147_spill] sm:$0xff] %v19302_v7  ;;  %v19341_v7 = vld [vmem:[#allocation3 + $0x40] sm:$0xff]  }
 0x9b9   : > { %20732 = vst [vmem:[#allocation139_spill] sm:$0xff] %v19273_v35  ;;  %20738 = vst [vmem:[#allocation145_spill] sm:$0xff] %v19292_v26  ;;  %v19305_v51 = vsel %vm4315_vm4, %v9335_v4, %v9337_v23  ;;  %v19308_v21 = vsel %vm4315_vm4, %v9337_v23, %v9339_v62  ;;  %v19313_v63 = vsel %vm4315_vm4, %v9339_v62, %v9341_v53  ;;  %v19317_v26 = vld [vmem:[#allocation3 + $0x14] sm:$0xf]  ;;  %v19322_v4 = vld [vmem:[#allocation3 + $0x18] sm:$0xff]  }
 0x9ba   : > { %20739 = vst [vmem:[#allocation146_spill] sm:$0xff] %v19295_v38  ;;  %20741 = vst [vmem:[#allocation148_spill] sm:$0xff] %v19305_v51  ;;  %v9616_v38 = vld [vmem:[#allocation3 + $0x10] sm:$0xc]  ;;  %v19324_v51 = vld [vmem:[#allocation3 + $0x20] sm:$0xff]   ;;  %v10075_v53 = vshrl.u32 %v19322_v4, 16 }
 0x9bb   : > { %20742 = vst [vmem:[#allocation149_spill] sm:$0xff] %v19308_v21  ;;  %20743 = vst [vmem:[#allocation150_spill] sm:$0xff] %v19313_v63  ;;  %v19320_v60 = vcombine.low %v9616_v38, %v19317_v26  ;;  %v19326_v23 = vld [vmem:[#allocation3 + $0x28] sm:$0xff]   ;;  %v19336_v38 = vld [vmem:[#allocation3 + $0x38] sm:$0xff]   ;;  %v10078_v63 = vshll.u32 %v19322_v4, 16  ;;  %v10084_v21 = vshrl.u32 %v19324_v51, 16 }
 0x9bc   : > { %v10087_v57 = vshll.u32 %v19324_v51, 16  ;;  %v10093_v15 = vshrl.u32 %v19326_v23, 16 }
 0x9bd   : > { %20744 = vst [vmem:[#allocation151_spill] sm:$0xff] %v19320_v60  ;;  %v10067_v62 = vshrl.u32 %v19320_v60, 16  ;;  %v10080_v35 = vrot.slane %v10078_v63, 3  ;;  %v10086_v52 = vrot.slane %v10084_v21, 2  ;;  %v10114_v21 = vshll.u32 %v19336_v38, 16 }
 0x9be   : > { %v10089_v2 = vrot.slane %v10087_v57, 3  ;;  %v10095_v25 = vrot.slane %v10093_v15, 2  ;;  %v19355_v57 = vld [vmem:[#allocation3 + $0x58] sm:$0xff]  }
 0x9bf   : > { %12970 = vmatmul.mubr.msk.bf16.gmra.mrb[8].mxu1 %vm6030_vm12, %v18915_v37  ;;  %v19330_v37 = vld [vmem:[#allocation3 + $0x30] sm:$0xff]   ;;  %v10150_v14 = vshll.u32 %v19355_v57, 16 }
 0x9c0   : > { %12973 = vmatprep.mubr.msk.bf16.mxu1 %vm6030_vm12, %v18925_v36  ;;  %v10070_v36 = vshll.u32 %v19320_v60, 16  ;;  %v10077_v60 = vrot.slane %v10075_v53, 2  ;;  %v10102_v49 = vshrl.u32 %v19330_v37, 16  ;;  %v10090_v53 = vor.u32 %v10089_v2, %v10086_v52 }
 0x9c1   : > { %v10116_v2 = vrot.slane %v10114_v21, 3  ;;  %v10123_v52 = vshll.u32 %v19341_v7, 16  ;;  %v10138_v21 = vshrl.u32 %v19351_v39, 16 }
 0x9c2   : > { %v10072_v46 = vrot.slane %v10070_v36, 3  ;;  %v10081_v34 = vor.u32 %v10080_v35, %v10077_v60  ;;  %v10111_v36 = vshrl.u32 %v19336_v38, 16  ;;  %v10104_v63 = vrot.slane %v10102_v49, 2 }
 0x9c3   : > { %v10140_v58 = vrot.slane %v10138_v21, 2  ;;  %v10152_v21 = vrot.slane %v10150_v14, 3 }
 0x9c4   : > { %v10113_v60 = vrot.slane %v10111_v36, 2  ;;  %v10125_v36 = vrot.slane %v10123_v52, 3 }
 0x9c7   : > { %12974 = vmatmul.mubr.msk.bf16.gmra.mrb[12].mxu1 %vm6030_vm12, %v18939_v3  ;;  %v10069_v3 = vrot.slane %v10067_v62, 2  ;;  %v10105_v62 = vshll.u32 %v19330_v37, 16 }
 0x9c8   : > { %12977 = vmatprep.mubr.msk.bf16.mxu1 %vm6030_vm12, %v18959_v6  ;;  %v10096_v6 = vshll.u32 %v19326_v23, 16 }
 0x9c9   : > { %v10073_v31 = vor.u32 %v10072_v46, %v10069_v3  ;;  %v10120_v46 = vshrl.u32 %v19341_v7, 16  ;;  %v10107_v35 = vrot.slane %v10105_v62, 3  ;;  %v19375_v62 = vld [vmem:[#allocation3 + $0x68] sm:$0xff]  }
 0x9ca   : > { %v10098_v11 = vrot.slane %v10096_v6, 3  ;;  %v19363_v6 = vsel %vm5068_vm5, %v10081_v34, %v10090_v53 }
 0x9cb   : > { %v19358_v15 = vsel %vm5068_vm5, %v10073_v31, %v10081_v34  ;;  %20746 = vst [vmem:[#allocation153_spill] sm:$0xff] %v19363_v6  ;;  %v10122_v49 = vrot.slane %v10120_v46, 2  ;;  %v10117_v34 = vor.u32 %v10116_v2, %v10113_v60  ;;  %v10141_v46 = vshll.u32 %v19351_v39, 16  ;;  %v19388_v2 = vld [vmem:[#allocation3 + $0x78] sm:$0xff]  }
 0x9cc   : > { %20745 = vst [vmem:[#allocation152_spill] sm:$0xff] %v19358_v15  ;;  %v10099_v3 = vor.u32 %v10098_v11, %v10095_v25  ;;  %v10108_v11 = vor.u32 %v10107_v35, %v10104_v63  ;;  %v10129_v25 = vshrl.u32 %v19347_v19, 16  ;;  %v19383_v63 = vld [vmem:[#allocation3 + $0x70] sm:$0xff]  }
 0x9cd   : > { %v10143_v60 = vrot.slane %v10141_v46, 3 }
 0x9ce   : > { %v19371_v31 = vsel %vm5068_vm5, %v10090_v53, %v10099_v3  ;;  %v10131_v6 = vrot.slane %v10129_v25, 2  ;;  %v10147_v53 = vshrl.u32 %v19355_v57, 16  ;;  %v19386_v35 = vsel %vm5068_vm5, %v10108_v11, %v10117_v34  ;;  %v19392_v25 = vld [vmem:[#allocation3 + $0x80] sm:$0xff]  }
 0x9cf   : > { %12978 = vmatmul.mubr.msk.bf16.gmra.mrb[16].mxu1 %vm6030_vm12, %v18965_v0  ;;  %20747 = vst [vmem:[#allocation154_spill] sm:$0xff] %v19371_v31  ;;  %v10132_v0 = vshll.u32 %v19347_v19, 16  ;;  %20749 = vst [vmem:[#allocation156_spill] sm:$0xff] %v19386_v35  ;;  %v10126_v31 = vor.u32 %v10125_v36, %v10122_v49  ;;  %v10165_v49 = vshrl.u32 %v19375_v62, 16 }
 0x9d0   : > { %12981 = vmatprep.mubr.msk.bf16.mxu1 %vm6030_vm12, %v18982_v59  ;;  %v19380_v59 = vsel %vm5068_vm5, %v10099_v3, %v10108_v11  ;;  %v10149_v40 = vrot.slane %v10147_v53, 2  ;;  %v10156_v3 = vshrl.u32 %v19368_v47, 16  ;;  %v10159_v11 = vshll.u32 %v19368_v47, 16 }
 0x9d1   : > { %20748 = vst [vmem:[#allocation155_spill] sm:$0xff] %v19380_v59  ;;  %v10134_v15 = vrot.slane %v10132_v0, 3  ;;  %v19395_v0 = vsel %vm5068_vm5, %v10117_v34, %v10126_v31  ;;  %v10144_v59 = vor.u32 %v10143_v60, %v10140_v58  ;;  %v10167_v53 = vrot.slane %v10165_v49, 2  ;;  %v19411_v60 = vld [vmem:[#allocation3 + $0x88] sm:$0xff]  }
 0x9d2   : > { %20750 = vst [vmem:[#allocation59_spill] sm:$0xff] %v19395_v0  ;;  %v10161_v34 = vrot.slane %v10159_v11, 3  ;;  %v10174_v58 = vshrl.u32 %v19383_v63, 16  ;;  %v19415_v0 = vld [vmem:[#allocation3 + $0x90] sm:$0xff]   ;;  %v10186_v11 = vshll.u32 %v19388_v2, 16  ;;  %v10192_v49 = vshrl.u32 %v19392_v25, 16 }
 0x9d3   : > { %v10135_v52 = vor.u32 %v10134_v15, %v10131_v6  ;;  %v10158_v15 = vrot.slane %v10156_v3, 2  ;;  %v10168_v6 = vshll.u32 %v19375_v62, 16  ;;  %v10177_v3 = vshll.u32 %v19383_v63, 16 }
 0x9d4   : > { %v10188_v33 = vrot.slane %v10186_v11, 3  ;;  %v10194_v8 = vrot.slane %v10192_v49, 2  ;;  %v10201_v55 = vshrl.u32 %v19411_v60, 16  ;;  %v10204_v17 = vshll.u32 %v19411_v60, 16 }
 0x9d5   : > { %v19400_v36 = vsel %vm5068_vm5, %v10126_v31, %v10135_v52  ;;  %v19406_v46 = vsel %vm5068_vm5, %v10135_v52, %v10144_v59  ;;  %v10153_v31 = vor.u32 %v10152_v21, %v10149_v40  ;;  %v10170_v14 = vrot.slane %v10168_v6, 3 }
 0x9d6   : > { %20751 = vst [vmem:[#allocation60_spill] sm:$0xff] %v19400_v36  ;;  %20752 = vst [vmem:[#allocation62_spill] sm:$0xff] %v19406_v46  ;;  %v10183_v36 = vshrl.u32 %v19388_v2, 16  ;;  %v10162_v35 = vor.u32 %v10161_v34, %v10158_v15  ;;  %v10176_v52 = vrot.slane %v10174_v58, 2  ;;  %v19419_v46 = vld [vmem:[#allocation3 + $0x98] sm:$0xff]   ;;  %v10179_v40 = vrot.slane %v10177_v3, 3 }
 0x9d7   : > { %12982 = vmatmul.mubr.msk.bf16.gmra.mrb[20].mxu1 %vm6030_vm12, %v18991_v12  ;;  %v10171_v10 = vor.u32 %v10170_v14, %v10167_v53  ;;  %v10195_v15 = vshll.u32 %v19392_v25, 16  ;;  %v10203_v11 = vrot.slane %v10201_v55, 2  ;;  %v10206_v49 = vrot.slane %v10204_v17, 3 }
 0x9d8   : > { %12987 = vmatprep.mubr.msk.bf16.mxu1 %vm6030_vm12, %v19026_v13  ;;  %v19422_v13 = vsel %vm5068_vm5, %v10144_v59, %v10153_v31  ;;  %v10185_v21 = vrot.slane %v10183_v36, 2  ;;  %v19425_v6 = vsel %vm5068_vm5, %v10153_v31, %v10162_v35  ;;  %v10180_v58 = vor.u32 %v10179_v40, %v10176_v52  ;;  %v19433_v59 = vld [vmem:[#allocation25 + $0x20] sm:$0xff]  }
 0x9d9   : > { %v19429_v34 = vsel %vm5068_vm5, %v10162_v35, %v10171_v10  ;;  %v10197_v14 = vrot.slane %v10195_v15, 3  ;;  %v10210_v36 = vshrl.u32 %v19415_v0, 16  ;;  %v10213_v31 = vshll.u32 %v19415_v0, 16  ;;  %v10509_v52 = vld [vmem:[#allocation3 + $0x10] sm:$0x8] }
 0x9da   : > { %v10189_v53 = vor.u32 %v10188_v33, %v10185_v21  ;;  %v19438_v3 = vsel %vm5068_vm5, %v10171_v10, %v10180_v58  ;;  %v10219_v35 = vshrl.u32 %v19419_v46, 16  ;;  %v10207_v10 = vor.u32 %v10206_v49, %v10203_v11 }
 0x9db   : > { %20753 = vst [vmem:[#allocation61_spill] sm:$0xff] %v19438_v3  ;;  %v10198_v33 = vor.u32 %v10197_v14, %v10194_v8  ;;  %v10212_v21 = vrot.slane %v10210_v36, 2  ;;  %v10215_v15 = vrot.slane %v10213_v31, 3  ;;  %v10222_v17 = vshll.u32 %v19419_v46, 16 }
 0x9dc   : > { %v19444_v40 = vsel %vm5068_vm5, %v10180_v58, %v10189_v53  ;;  %v10221_v55 = vrot.slane %v10219_v35, 2  ;;  %v12041_v58 = vcombine.low %v10509_v52, %v19317_v26  ;;  %v10519_v31 = vrot.slane %v19324_v51, 3 }
 0x9dd   : > { %v19452_v3 = vsel %vm5068_vm5, %v10189_v53, %v10198_v33  ;;  %v19456_v8 = vsel %vm5068_vm5, %v10198_v33, %v10207_v10  ;;  %v10224_v14 = vrot.slane %v10222_v17, 3  ;;  %v10521_v53 = vrot.slane %v19326_v23, 3  ;;  %v19490_v17 = vld [vmem:[#allocation3 + $0xa0] ss:$0 sps:$4 sm:$0x77]  }
 0x9de   : > { %v10516_v36 = vrot.slane %v12041_v58, 3  ;;  %v10523_v49 = vrot.slane %v19330_v37, 3  ;;  %v10525_v26 = vrot.slane %v19336_v38, 3  ;;  %v10527_v33 = vrot.slane %v19341_v7, 3 }
 0x9df   : > { %12988 = vmatmul.mubr.msk.bf16.vlgmr.msra.gmra.mrb[24].mxu1 %vm6030_vm12, %v19035_v16  ;;  %v10216_v16 = vor.u32 %v10215_v15, %v10212_v21  ;;  %v19463_v11 = vor.u32 %v10224_v14, %v10221_v55  ;;  %v19480_v15 = vsel %vm5515_vm6, %v10519_v31, %v10521_v53  ;;  %v10531_v14 = vrot.slane %v19351_v39, 3 }
 0x9e0   : > { %13024 = vmatpush3.bf16.msra.mxu1 %v19086_v22  ;;  %12991 = vmatprep.mubr.msk.bf16.mxu1 %vm6030_vm12, %v19040_v29  ;;  %v10517_v22 = vrot.slane %v19322_v4, 3  ;;  %20754 = vst [vmem:[#allocation63_spill] sm:$0xff] %v19480_v15  ;;  %v19486_v55 = vsel %vm5515_vm6, %v10523_v49, %v10525_v26  ;;  %v19493_v58 = vsel %vm5515_vm6, %v10525_v26, %v10527_v33  ;;  %v10541_v26 = vrot.slane %v19388_v2, 3 }
 0x9e1   : > { %13061 = vmatprep.subr.bf16.mxu1 %v19433_v59  ;;  %v19460_v29 = vsel %vm5068_vm5, %v10207_v10, %v10216_v16  ;;  %v19477_v21 = vsel %vm5068_vm5, %v10216_v16, %v19463_v11  ;;  %v19483_v10 = vsel %vm5515_vm6, %v10521_v53, %v10523_v49  ;;  %20756 = vst [vmem:[#allocation65_spill] sm:$0xff] %v19486_v55  ;;  %20757 = vst [vmem:[#allocation66_spill] sm:$0xff] %v19493_v58 }
 0x9e2   : > { %v19469_v35 = vsel %vm5515_vm6, %v10516_v36, %v10517_v22  ;;  %v19472_v52 = vsel %vm5515_vm6, %v10517_v22, %v10519_v31  ;;  %20755 = vst [vmem:[#allocation64_spill] sm:$0xff] %v19483_v10  ;;  %v10529_v16 = vrot.slane %v19347_v19, 3  ;;  %v10533_v22 = vrot.slane %v19355_v57, 3 }
 0x9e3   : > { %v10535_v36 = vrot.slane %v19368_v47, 3  ;;  %v10537_v31 = vrot.slane %v19375_v62, 3  ;;  %v10543_v58 = vrot.slane %v19392_v25, 3 }
 0x9e4   : > { %v19504_v53 = vsel %vm5515_vm6, %v10527_v33, %v10529_v16  ;;  %v19507_v49 = vsel %vm5515_vm6, %v10529_v16, %v10531_v14 }
 0x9e5   : > { %20758 = vst [vmem:[#allocation67_spill] sm:$0xff] %v19507_v49  ;;  %v19515_v55 = vsel %vm5515_vm6, %v10533_v22, %v10535_v36  ;;  %v19518_v10 = vsel %vm5515_vm6, %v10535_v36, %v10537_v31  ;;  %v19527_v16 = vsel %vm5515_vm6, %v10541_v26, %v10543_v58  ;;  %v10545_v49 = vrot.slane %v19411_v60, 3 }
 0x9e7   : > { %12992 = vmatmul.mubr.msk.bf16.gmra.mrb[28].mxu1 %vm6030_vm12, %v19043_v42  ;;  %v10539_v42 = vrot.slane %v19383_v63, 3  ;;  %v19534_v36 = vsel %vm5515_vm6, %v10543_v58, %v10545_v49  ;;  %v14659_v58 = vld [vmem:[#allocation3 + $0x50] sm:$0xff]  }
 0x9e8   : > { %12995 = vmatprep.mubr.msk.bf16.mxu1 %vm6030_vm12, %v19046_v43  ;;  %v19512_v43 = vsel %vm5515_vm6, %v10531_v14, %v10533_v22  ;;  %v10547_v14 = vrot.slane %v19415_v0, 3  ;;  %v10551_v22 = vrot.slane %v19490_v17, 3 }
 0x9e9   : > { %20759 = vst [vmem:[#allocation69_spill] sm:$0xff] %v19512_v43  ;;  %v19521_v15 = vsel %vm5515_vm6, %v10537_v31, %v10539_v42  ;;  %v19524_v33 = vsel %vm5515_vm6, %v10539_v42, %v10541_v26  ;;  %v10549_v43 = vrot.slane %v19419_v46, 3 }
 0x9ea   : > { %v19537_v31 = vsel %vm5515_vm6, %v10545_v49, %v10547_v14  ;;  %v8115_v49 = vrot.slane %v14659_v58, 1  ;;  %v14664_v58 = vld [vmem:[#allocation3 + $0x78] sm:$0xff]  }
 0x9eb   : > { %20760 = vst [vmem:[#allocation70_spill] sm:$0xff] %v19537_v31  ;;  %v19540_v42 = vsel %vm5515_vm6, %v10547_v14, %v10549_v43  ;;  %v19543_v26 = vsel %vm5515_vm6, %v10549_v43, %v10551_v22  ;;  %v14660_v31 = vld [vmem:[#allocation3 + $0x58] sm:$0xff]  }
 0x9ec   : > { %20761 = vst [vmem:[#allocation71_spill] sm:$0xff] %v19540_v42  ;;  %20762 = vst [vmem:[#allocation72_spill] sm:$0xff] %v19543_v26  ;;  %v8117_v14 = vrot.slane %v14660_v31, 1  ;;  %v20763_v42 = vrot.slane %v19014_v5, 1  ;;  %v14663_v5 = vld [vmem:[#allocation3 + $0x70] sm:$0xff]  }
 0x9ee   : > { %v8116_v43 = vsel %vm3115_vm7, %v20763_v42, %v8115_v49  ;;  %v8123_v42 = vrot.slane %v14663_v5, 1  ;;  %v8540_v5 = vrot.slane %v19083_v61, 1  ;;  %v8546_v61 = vrot.slane %v19100_v32, 1 }
 0x9ef   : > { %12996 = vmatmul.mubr.msk.bf16.gmra.mrb[32].mxu1 %vm6030_vm12, %v19050_v54  ;;  %v8118_v54 = vsel %vm3115_vm7, %v8115_v49, %v8117_v14 }
 0x9f0   : > { %12999 = vmatprep.mubr.msk.bf16.mxu1 %vm6030_vm12, %v19056_v41  ;;  %v14661_v41 = vld [vmem:[#allocation3 + $0x60] sm:$0xff]  }
 0x9f1   : > { %v8119_v22 = vrot.slane %v14661_v41, 1  ;;  %v14665_v41 = vld [vmem:[#allocation3 + $0x80] sm:$0xff]  }
 0x9f7   : > { %13000 = vmatmul.mubr.msk.bf16.gmra.mrb[36].mxu1 %vm6030_vm12, %v19059_v28  ;;  %v14662_v28 = vld [vmem:[#allocation3 + $0x68] sm:$0xff]  }
 0x9f8   : > { %13003 = vmatprep.mubr.msk.bf16.mxu1 %vm6030_vm12, %v19064_v56  ;;  %v8121_v26 = vrot.slane %v14662_v28, 1  ;;  %v8120_v56 = vsel %vm3115_vm7, %v8117_v14, %v8119_v22  ;;  %v8127_v14 = vrot.slane %v14665_v41, 1  ;;  %v8129_v28 = vrot.slane %v18991_v12, 1 }
 0x9f9   : > { %v8550_v41 = vrot.slane %v19113_v20, 1 }
 0x9fa   : > { %v8122_v31 = vsel %vm3115_vm7, %v8119_v22, %v8121_v26  ;;  %v8124_v49 = vsel %vm3115_vm7, %v8121_v26, %v8123_v42  ;;  %v8131_v26 = vrot.slane %v19008_v9, 1 }
 0x9ff   : > { %13004 = vmatmul.mubr.msk.bf16.gmra.mrb[40].mxu1 %vm6030_vm12, %v8116_v43  ;;  %v8125_v43 = vrot.slane %v14664_v58, 1  ;;  %v8542_v58 = vrot.slane %v19088_v24, 1  ;;  %v8548_v24 = vrot.slane %v19108_v45, 1  ;;  %v8554_v45 = vrot.slane %v19121_v27, 1 }
 0xa00   : > { %13007 = vmatprep.mubr.msk.bf16.mxu1 %vm6030_vm12, %v8118_v54 }
 0xa01   : > { %v8126_v54 = vsel %vm3115_vm7, %v8123_v42, %v8125_v43  ;;  %v8128_v22 = vsel %vm3115_vm7, %v8125_v43, %v8127_v14  ;;  %v8132_v42 = vsel %vm3115_vm7, %v8129_v28, %v8131_v26  ;;  %v8544_v43 = vrot.slane %v19092_v48, 1 }
 0xa02   : > { %v8543_v9 = vsel %vm3115_vm7, %v8540_v5, %v8542_v58 }
 0xa03   : > { %v8547_v48 = vsel %vm3115_vm7, %v8544_v43, %v8546_v61 }
 0xa07   : > { %13008 = vmatmul.mubr.msk.bf16.gmra.mrb[8].mxu1 %vm6030_vm12, %v8120_v56  ;;  %v8130_v56 = vsel %vm3115_vm7, %v8127_v14, %v8129_v28  ;;  %v8551_v14 = vsel %vm3115_vm7, %v8548_v24, %v8550_v41  ;;  %v8556_v28 = vrot.slane %v19129_v30, 1  ;;  %v20764_v30 = vld [vmem:[#allocation113_spill] sm:$0xff] }
 0xa08   : > { %13011 = vmatprep.mubr.msk.bf16.mxu1 %vm6030_vm12, %v8122_v31  ;;  %v8539_v31 = vrot.slane %v19081_v1, 1  ;;  %v8545_v1 = vsel %vm3115_vm7, %v8542_v58, %v8544_v43  ;;  %v20766_v43 = vld [vmem:[#allocation114_spill] sm:$0xff] }
 0xa09   : > { %v8557_v20 = vsel %vm3115_vm7, %v8554_v45, %v8556_v28 }
 0xa0a   : > { %v8541_v12 = vsel %vm3115_vm7, %v8539_v31, %v8540_v5  ;;  %v8562_v31 = vrot.slane %v20764_v30, 1  ;;  %v20765_v5 = vld [vmem:[#allocation112_spill] sm:$0xff] }
 0xa0f   : > { %13012 = vmatmul.mubr.msk.bf16.gmra.mrb[12].mxu1 %vm6030_vm12, %v8124_v49  ;;  %v19581_v49 = vld [vmem:[#allocation25 + $0x28] sm:$0xff]  }
 0xa10   : > { %13015 = vmatprep.mubr.msk.bf16.mxu1 %vm6030_vm12, %v8126_v54  ;;  %v8549_v54 = vsel %vm3115_vm7, %v8546_v61, %v8548_v24  ;;  %v20767_v61 = vld [vmem:[#allocation117_spill] sm:$0xff] }
 0xa11   : > { %v8568_v24 = vrot.slane %v20767_v61, 1 }
 0xa17   : > { %13016 = vmatmul.mubr.msk.bf16.gmra.mrb[16].mxu1 %vm6030_vm12, %v8128_v22 }
 0xa18   : > { %13019 = vmatprep.mubr.msk.bf16.mxu1 %vm6030_vm12, %v8130_v56  ;;  %v8560_v56 = vrot.slane %v19148_v44, 1 }
 0xa1f   : > { %13020 = vmatmul.mubr.msk.bf16.gmra.mrb[20].mxu1 %vm6030_vm12, %v8132_v42  ;;  %v8564_v42 = vrot.slane %v20765_v5, 1 }
 0xa20   : > { %13025 = vmatprep.mubr.msk.bf16.mxu1 %vm6030_vm12, %v8541_v12  ;;  %v8563_v12 = vsel %vm3115_vm7, %v8560_v56, %v8562_v31 }
 0xa27   : > { %13026 = vmatmul.mubr.msk.bf16.vlgmr.msra.gmra.mrb[24].mxu1 %vm6030_vm12, %v8543_v9  ;;  %v8566_v9 = vrot.slane %v20766_v43, 1  ;;  %v20770_v43 = vld [vmem:[#allocation108_spill] sm:$0xff] }
 0xa28   : > { %13062 = vmatpush3.bf16.msra.mxu1 %v19433_v59  ;;  %13029 = vmatprep.mubr.msk.bf16.mxu1 %vm6030_vm12, %v8545_v1  ;;  %v8552_v59 = vrot.slane %v19119_v50, 1  ;;  %v8558_v50 = vrot.slane %v19140_v18, 1  ;;  %v8565_v18 = vsel %vm3115_vm7, %v8562_v31, %v8564_v42 }
 0xa29   : > { %13099 = vmatprep.subr.bf16.mxu1 %v19581_v49 }
 0xa2a   : > { %v8553_v32 = vsel %vm3115_vm7, %v8550_v41, %v8552_v59  ;;  %v8555_v22 = vsel %vm3115_vm7, %v8552_v59, %v8554_v45  ;;  %v8559_v26 = vsel %vm3115_vm7, %v8556_v28, %v8558_v50  ;;  %v8561_v27 = vsel %vm3115_vm7, %v8558_v50, %v8560_v56 }
 0xa2b   : > { %v8569_v41 = vsel %vm3115_vm7, %v8566_v9, %v8568_v24 }
 0xa2f   : > { %13030 = vmatmul.mubr.msk.bf16.gmra.mrb[28].mxu1 %vm6030_vm12, %v8547_v48 }
 0xa30   : > { %13033 = vmatprep.mubr.msk.bf16.mxu1 %vm6030_vm12, %v8549_v54  ;;  %v8567_v54 = vsel %vm3115_vm7, %v8564_v42, %v8566_v9 }
 0xa37   : > { %13034 = vmatmul.mubr.msk.bf16.gmra.mrb[32].mxu1 %vm6030_vm12, %v8551_v14 }
 0xa38   : > { %13037 = vmatprep.mubr.msk.bf16.mxu1 %vm6030_vm12, %v8553_v32  ;;  %v20768_v32 = vld [vmem:[#allocation120_spill] sm:$0xff] }
 0xa39   : > { %v8570_v45 = vrot.slane %v20768_v32, 1  ;;  %v20773_v32 = vld [vmem:[#allocation109_spill] sm:$0xff] }
 0xa3b   : > { %v8571_v56 = vsel %vm3115_vm7, %v8568_v24, %v8570_v45 }
 0xa3f   : > { %13038 = vmatmul.mubr.msk.bf16.gmra.mrb[36].mxu1 %vm6030_vm12, %v8555_v22  ;;  %v20769_v22 = vld [vmem:[#allocation122_spill] sm:$0xff] }
 0xa40   : > { %13041 = vmatprep.mubr.msk.bf16.mxu1 %vm6030_vm12, %v8557_v20  ;;  %v8572_v20 = vrot.slane %v20769_v22, 1 }
 0xa47   : > { %13042 = vmatmul.mubr.msk.bf16.gmra.mrb[40].mxu1 %vm6030_vm12, %v8559_v26  ;;  %v14320_v26 = vld [vmem:[#allocation3 + $0x98] ss:$0 sps:$4 sm:$0x11]  }
 0xa48   : > { %13045 = vmatprep.mubr.msk.bf16.mxu1 %vm6030_vm12, %v8561_v27  ;;  %v8573_v27 = vsel %vm3115_vm7, %v8570_v45, %v8572_v20  ;;  %v8574_v5 = vrot.slane %v14320_v26, 1  ;;  %v20774_v45 = vld [vmem:[#allocation118_spill] sm:$0xff] }
 0xa4f   : > { %13046 = vmatmul.mubr.msk.bf16.gmra.mrb[8].mxu1 %vm6030_vm12, %v8563_v12 }
 0xa50   : > { %13049 = vmatprep.mubr.msk.bf16.mxu1 %vm6030_vm12, %v8565_v18  ;;  %v19619_v44 = vpop.f32.mrb[40].mxu0  ;;  %v8575_v18 = vsel %vm3115_vm7, %v8572_v20, %v8574_v5  ;;  %v20780_v5 = vld [vmem:[#allocation111_spill] sm:$0xff] }
 0xa51   : > { %v19621_v58 = vpop.f32.mrb[41].mxu0 }
 0xa52   : > { %v19624_v1 = vpop.f32.mrb[42].mxu0 }
 0xa53   : > { %v19627_v48 = vpop.f32.mrb[43].mxu0 }
 0xa57   : > { %13050 = vmatmul.mubr.msk.bf16.gmra.mrb[12].mxu1 %vm6030_vm12, %v8567_v54 }
 0xa58   : > { %13053 = vmatprep.mubr.msk.bf16.mxu1 %vm6030_vm12, %v8569_v41  ;;  %v19633_v59 = vpop.f32.mrb[44].mxu0  ;;  %v14324_v41 = vld [vmem:[#allocation25 + $0x30] sm:$0xff]  }
 0xa59   : > { %v19635_v14 = vpop.f32.mrb[45].mxu0 }
 0xa5a   : > { %v19638_v28 = vpop.f32.mrb[46].mxu0 }
 0xa5b   : > { %v19641_v50 = vpop.f32.mrb[47].mxu0 }
 0xa5f   : > { %13054 = vmatmul.mubr.msk.bf16.gmra.mrb[16].mxu1 %vm6030_vm12, %v8571_v56 }
 0xa60   : > { %13057 = vmatprep.mubr.msk.bf16.mxu1 %vm6030_vm12, %v8573_v27  ;;  %v19647_v30 = vpop.f32.mrb[48].mxu0  ;;  %v20779_v27 = vld [vmem:[#allocation110_spill] sm:$0xff] }
 0xa61   : > { %v19649_v31 = vpop.f32.mrb[49].mxu0 }
 0xa62   : > { %v19651_v42 = vpop.f32.mrb[50].mxu0 }
 0xa63   : > { %v19653_v12 = vpop.f32.mrb[51].mxu0 }
 0xa67   : > { %13058 = vmatmul.mubr.msk.bf16.gmra.mrb[20].mxu1 %vm6030_vm12, %v8575_v18  ;;  %v20781_v18 = vld [vmem:[#allocation115_spill] sm:$0xff] }
 0xa68   : > { %13063 = vmatprep.mubr.msk.bf16.mxu1 %vm6030_vm12, %v20770_v43  ;;  %v19659_v9 = vpop.f32.mrb[52].mxu0  ;;  %v20783_v43 = vld [vmem:[#allocation119_spill] sm:$0xff] }
 0xa69   : > { %v19661_v61 = vpop.f32.mrb[53].mxu0 }
 0xa6a   : > { %v19663_v24 = vpop.f32.mrb[54].mxu0 }
 0xa6b   : > { %20771 = vst [vmem:[#allocation74_spill] sm:$0xff] %v19663_v24  ;;  %v19665_v54 = vpop.f32.mrb[55].mxu0  ;;  %v20796_v24 = vld [vmem:[#allocation133_spill] sm:$0xff] }
 0xa6c   : > { %20772 = vst [vmem:[#allocation75_spill] sm:$0xff] %v19665_v54 }
 0xa6f   : > { %13064 = vmatmul.mubr.msk.bf16.vlgmr.msra.gmra.mrb[24].mxu1 %vm6030_vm12, %v20773_v32  ;;  %v20784_v32 = vld [vmem:[#allocation121_spill] sm:$0xff] }
 0xa70   : > { %13100 = vmatpush3.bf16.msra.mxu1 %v19581_v49  ;;  %13067 = vmatprep.mubr.msk.bf16.mxu1 %vm6030_vm12, %v20774_v45  ;;  %v19672_v22 = vpop.f32.mrb[56].mxu0  ;;  %v20782_v49 = vld [vmem:[#allocation116_spill] sm:$0xff]  ;;  %v20785_v45 = vld [vmem:[#allocation123_spill] sm:$0xff] }
 0xa71   : > { %20775 = vst [vmem:[#allocation76_spill] sm:$0xff] %v19672_v22  ;;  %13137 = vmatprep.subr.bf16.mxu1 %v14324_v41  ;;  %v19674_v20 = vpop.f32.mrb[57].mxu0  ;;  %v20792_v22 = vld [vmem:[#allocation129_spill] sm:$0xff] }
 0xa72   : > { %20776 = vst [vmem:[#allocation93_spill] sm:$0xff] %v19674_v20  ;;  %v19676_v56 = vpop.f32.mrb[58].mxu0 }
 0xa73   : > { %20777 = vst [vmem:[#allocation77_spill] sm:$0xff] %v19676_v56  ;;  %v19678_v26 = vpop.f32.mrb[59].mxu0 }
 0xa74   : > { %20778 = vst [vmem:[#allocation95_spill] sm:$0xff] %v19678_v26  ;;  %v20786_v26 = vld [vmem:[#allocation124_spill] sm:$0xff] }
 0xa77   : > { %13068 = vmatmul.mubr.msk.bf16.gmra.mrb[28].mxu1 %vm6030_vm12, %v20779_v27  ;;  %v20787_v27 = vld [vmem:[#allocation125_spill] sm:$0xff] }
 0xa78   : > { %13071 = vmatprep.mubr.msk.bf16.mxu1 %vm6030_vm12, %v20780_v5  ;;  %v20788_v5 = vld [vmem:[#allocation126_spill] sm:$0xff] }
 0xa7f   : > { %13072 = vmatmul.mubr.msk.bf16.gmra.mrb[32].mxu1 %vm6030_vm12, %v20781_v18  ;;  %v20789_v18 = vld [vmem:[#allocation127_spill] sm:$0xff] }
 0xa80   : > { %13075 = vmatprep.mubr.msk.bf16.mxu1 %vm6030_vm12, %v20782_v49  ;;  %v20790_v49 = vld [vmem:[#allocation128_spill] sm:$0xff] }
 0xa87   : > { %13076 = vmatmul.mubr.msk.bf16.gmra.mrb[36].mxu1 %vm6030_vm12, %v20783_v43  ;;  %v20791_v43 = vld [vmem:[#allocation137_spill] sm:$0xff] }
 0xa88   : > { %13079 = vmatprep.mubr.msk.bf16.mxu1 %vm6030_vm12, %v20784_v32  ;;  %v9018_v32 = vshrl.u32 %v20791_v43, 16  ;;  %v9021_v56 = vshll.u32 %v20791_v43, 16  ;;  %v20800_v43 = vld [vmem:[#allocation138_spill] sm:$0xff] }
 0xa8a   : > { %v9023_v20 = vrot.slane %v9021_v56, 2  ;;  %v20797_v56 = vld [vmem:[#allocation134_spill] sm:$0xff] }
 0xa8f   : > { %13080 = vmatmul.mubr.msk.bf16.gmra.mrb[40].mxu1 %vm6030_vm12, %v20785_v45  ;;  %v9020_v45 = vrot.slane %v9018_v32, 1  ;;  %v20802_v32 = vld [vmem:[#allocation140_spill] sm:$0xff] }
 0xa90   : > { %13083 = vmatprep.mubr.msk.bf16.mxu1 %vm6030_vm12, %v20786_v26  ;;  %v20793_v26 = vld [vmem:[#allocation132_spill] sm:$0xff] }
 0xa97   : > { %13084 = vmatmul.mubr.msk.bf16.gmra.mrb[8].mxu1 %vm6030_vm12, %v20787_v27  ;;  %v9024_v27 = vor.u32 %v9023_v20, %v9020_v45  ;;  %v20799_v20 = vld [vmem:[#allocation136_spill] sm:$0xff]  ;;  %v20805_v45 = vld [vmem:[#allocation143_spill] sm:$0xff] }
 0xa98   : > { %13087 = vmatprep.mubr.msk.bf16.mxu1 %vm6030_vm12, %v20788_v5  ;;  %v20794_v5 = vld [vmem:[#allocation130_spill] sm:$0xff] }
 0xa99   : > { %v9025_v54 = vsel %vm3868_vm3, %v20794_v5, %v9024_v27  ;;  %v20807_v27 = vld [vmem:[#allocation145_spill] sm:$0xff]  ;;  %v20808_v5 = vld [vmem:[#allocation146_spill] sm:$0xff] }
 0xa9f   : > { %13088 = vmatmul.mubr.msk.bf16.gmra.mrb[12].mxu1 %vm6030_vm12, %v20789_v18  ;;  %v20795_v18 = vld [vmem:[#allocation131_spill] sm:$0xff] }
 0xaa0   : > { %13091 = vmatprep.mubr.msk.bf16.mxu1 %vm6030_vm12, %v20790_v49  ;;  %v14327_v49 = vld [vmem:[#allocation25 + $0x38] sm:$0xff]  }
 0xaa7   : > { %13092 = vmatmul.mubr.msk.bf16.gmra.mrb[16].mxu1 %vm6030_vm12, %v20792_v22  ;;  %v20798_v22 = vld [vmem:[#allocation135_spill] sm:$0xff] }
 0xaa8   : > { %13095 = vmatprep.mubr.msk.bf16.mxu1 %vm6030_vm12, %v20793_v26  ;;  %v20806_v26 = vld [vmem:[#allocation144_spill] sm:$0xff] }
 0xaaf   : > { %13096 = vmatmul.mubr.msk.bf16.gmra.mrb[20].mxu1 %vm6030_vm12, %v9025_v54  ;;  %v20801_v54 = vld [vmem:[#allocation139_spill] sm:$0xff] }
 0xab0   : > { %13101 = vmatprep.mubr.msk.bf16.mxu1 %vm6030_vm12, %v20795_v18  ;;  %v20809_v18 = vld [vmem:[#allocation147_spill] sm:$0xff] }
 0xab7   : > { %13102 = vmatmul.mubr.msk.bf16.vlgmr.msra.gmra.mrb[24].mxu1 %vm6030_vm12, %v20796_v24  ;;  %v20803_v24 = vld [vmem:[#allocation141_spill] sm:$0xff] }
 0xab8   : > { %13138 = vmatpush3.bf16.msra.mxu1 %v14324_v41  ;;  %13105 = vmatprep.mubr.msk.bf16.mxu1 %vm6030_vm12, %v20797_v56  ;;  %v20804_v41 = vld [vmem:[#allocation142_spill] sm:$0xff]  ;;  %v20810_v56 = vld [vmem:[#allocation148_spill] sm:$0xff] }
 0xab9   : > { %13175 = vmatprep.subr.bf16.mxu1 %v14327_v49 }
 0xabf   : > { %13106 = vmatmul.mubr.msk.bf16.gmra.mrb[28].mxu1 %vm6030_vm12, %v20798_v22  ;;  %v20811_v22 = vld [vmem:[#allocation149_spill] sm:$0xff] }
 0xac0   : > { %13109 = vmatprep.mubr.msk.bf16.mxu1 %vm6030_vm12, %v20799_v20  ;;  %v20812_v20 = vld [vmem:[#allocation151_spill] sm:$0xff] }
 0xac7   : > { %13110 = vmatmul.mubr.msk.bf16.gmra.mrb[32].mxu1 %vm6030_vm12, %v20800_v43  ;;  %v9749_v43 = vrot.slane %v20812_v20, 2  ;;  %v9766_v20 = vrot.slane %v19355_v57, 2  ;;  %v9772_v57 = vrot.slane %v19383_v63, 2 }
 0xac8   : > { %13113 = vmatprep.mubr.msk.bf16.mxu1 %vm6030_vm12, %v20801_v54  ;;  %v9750_v54 = vrot.slane %v19322_v4, 2  ;;  %v9756_v4 = vrot.slane %v19330_v37, 2 }
 0xacf   : > { %13114 = vmatmul.mubr.msk.bf16.gmra.mrb[36].mxu1 %vm6030_vm12, %v20802_v32  ;;  %v20813_v32 = vld [vmem:[#allocation150_spill] sm:$0xff] }
 0xad0   : > { %13117 = vmatprep.mubr.msk.bf16.mxu1 %vm6030_vm12, %v20803_v24  ;;  %v9751_v24 = vsel %vm4315_vm4, %v9749_v43, %v9750_v54 }
 0xad7   : > { %13118 = vmatmul.mubr.msk.bf16.gmra.mrb[40].mxu1 %vm6030_vm12, %v20804_v41  ;;  %v9752_v41 = vrot.slane %v19324_v51, 2 }
 0xad8   : > { %13121 = vmatprep.mubr.msk.bf16.mxu1 %vm6030_vm12, %v20805_v45  ;;  %v9754_v45 = vrot.slane %v19326_v23, 2  ;;  %v9760_v23 = vrot.slane %v19341_v7, 2 }
 0xadf   : > { %13122 = vmatmul.mubr.msk.bf16.gmra.mrb[8].mxu1 %vm6030_vm12, %v20806_v26  ;;  %v14345_v26 = vld [vmem:[#allocation25 + $0x40] sm:$0xff]  }
 0xae0   : > { %13125 = vmatprep.mubr.msk.bf16.mxu1 %vm6030_vm12, %v20807_v27  ;;  %v9753_v27 = vsel %vm4315_vm4, %v9750_v54, %v9752_v41  ;;  %v9770_v54 = vrot.slane %v19375_v62, 2  ;;  %v9776_v62 = vrot.slane %v19392_v25, 2 }
 0xae7   : > { %13126 = vmatmul.mubr.msk.bf16.gmra.mrb[12].mxu1 %vm6030_vm12, %v20808_v5  ;;  %v9755_v5 = vsel %vm4315_vm4, %v9752_v41, %v9754_v45  ;;  %v9773_v41 = vsel %vm4315_vm4, %v9770_v54, %v9772_v57 }
 0xae8   : > { %13129 = vmatprep.mubr.msk.bf16.mxu1 %vm6030_vm12, %v20809_v18  ;;  %v9758_v18 = vrot.slane %v19336_v38, 2  ;;  %v9764_v38 = vrot.slane %v19351_v39, 2 }
 0xaea   : > { %v9759_v51 = vsel %vm4315_vm4, %v9756_v4, %v9758_v18  ;;  %v9767_v7 = vsel %vm4315_vm4, %v9764_v38, %v9766_v20 }
 0xaef   : > { %13130 = vmatmul.mubr.msk.bf16.gmra.mrb[16].mxu1 %vm6030_vm12, %v20810_v56  ;;  %v9757_v56 = vsel %vm4315_vm4, %v9754_v45, %v9756_v4  ;;  %v9778_v45 = vrot.slane %v19411_v60, 2 }
 0xaf0   : > { %13133 = vmatprep.mubr.msk.bf16.mxu1 %vm6030_vm12, %v20811_v22  ;;  %v9762_v22 = vrot.slane %v19347_v19, 2  ;;  %v9768_v19 = vrot.slane %v19368_v47, 2 }
 0xaf1   : > { %v9779_v63 = vsel %vm4315_vm4, %v9776_v62, %v9778_v45 }
 0xaf2   : > { %v9763_v37 = vsel %vm4315_vm4, %v9760_v23, %v9762_v22  ;;  %v9765_v43 = vsel %vm4315_vm4, %v9762_v22, %v9764_v38  ;;  %v9771_v39 = vsel %vm4315_vm4, %v9768_v19, %v9770_v54  ;;  %v20817_v22 = vld [vmem:[#allocation155_spill] sm:$0xff]  ;;  %v20820_v38 = vld [vmem:[#allocation60_spill] sm:$0xff] }
 0xaf3   : > { %v10874_v54 = vld [vmem:[%s15865_s5 + $0x28] sm:$0xff] }
 0xaf7   : > { %13134 = vmatmul.mubr.msk.bf16.gmra.mrb[20].mxu1 %vm6030_vm12, %v20813_v32  ;;  %v9769_v32 = vsel %vm4315_vm4, %v9766_v20, %v9768_v19  ;;  %v20821_v20 = vld [vmem:[#allocation62_spill] sm:$0xff] }
 0xaf8   : > { %13139 = vmatprep.mubr.msk.bf16.mxu1 %vm6030_vm12, %v9751_v24  ;;  %v9774_v24 = vrot.slane %v19388_v2, 2  ;;  %v9780_v2 = vrot.slane %v19415_v0, 2  ;;  %v10923_v0 = vld [vmem:[#allocation28] sm:$0xf]  ;;  %v10873_v19 = vld [vmem:[%s15865_s5 + $0x20] sm:$0xff] }
 0xafa   : > { %v9775_v47 = vsel %vm4315_vm4, %v9772_v57, %v9774_v24  ;;  %v9781_v4 = vsel %vm4315_vm4, %v9778_v45, %v9780_v2  ;;  %v10875_v57 = vld [vmem:[%s15865_s5 + $0x30] sm:$0xff] }
 0xaff   : > { %13140 = vmatmul.mubr.msk.bf16.vlgmr.msra.gmra.mrb[24].mxu1 %vm6030_vm12, %v9753_v27  ;;  %v9777_v27 = vsel %vm4315_vm4, %v9774_v24, %v9776_v62  ;;  %v10876_v24 = vld [vmem:[%s15865_s5 + $0x38] sm:$0xff] }
 0xb00   : > { %13176 = vmatpush3.bf16.msra.mxu1 %v14327_v49  ;;  %13143 = vmatprep.mubr.msk.bf16.mxu1 %vm6030_vm12, %v9755_v5  ;;  %v9761_v49 = vsel %vm4315_vm4, %v9758_v18, %v9760_v23  ;;  %v9782_v5 = vrot.slane %v19419_v46, 2  ;;  %v14344_v18 = vld [vmem:[#allocation3 + $0xa0] ss:$0 sps:$4 sm:$0x33]   ;;  %v20816_v46 = vld [vmem:[#allocation154_spill] sm:$0xff]  ;;  %v10908_v62 = vpack.c.bf16 %v10876_v24, %v10875_v57 }
 0xb01   : > { %13213 = vmatprep.subr.bf16.mxu1 %v14345_v26  ;;  %v9784_v60 = vrot.slane %v14344_v18, 2  ;;  %v20815_v23 = vld [vmem:[#allocation153_spill] sm:$0xff] }
 0xb02   : > { %v9783_v25 = vsel %vm4315_vm4, %v9780_v2, %v9782_v5  ;;  %v10881_v2 = vld [vmem:[%s15865_s5 + $0x60] sm:$0xff] }
 0xb07   : > { %13144 = vmatmul.mubr.msk.bf16.gmra.mrb[28].mxu1 %vm6030_vm12, %v9757_v56  ;;  %v9785_v56 = vsel %vm4315_vm4, %v9782_v5, %v9784_v60  ;;  %v10882_v5 = vld [vmem:[%s15865_s5 + $0x68] sm:$0xff]  ;;  %v10884_v60 = vld [vmem:[%s15865_s5 + $0x78] sm:$0xff] }
 0xb08   : > { %13147 = vmatprep.mubr.msk.bf16.mxu1 %vm6030_vm12, %v9759_v51  ;;  %v20814_v51 = vld [vmem:[#allocation152_spill] sm:$0xff]  ;;  %v10911_v18 = vpack.c.bf16 %v10882_v5, %v10881_v2 }
 0xb0f   : > { %13148 = vmatmul.mubr.msk.bf16.gmra.mrb[32].mxu1 %vm6030_vm12, %v9761_v49  ;;  %v20818_v49 = vld [vmem:[#allocation156_spill] sm:$0xff] }
 0xb10   : > { %13151 = vmatprep.mubr.msk.bf16.mxu1 %vm6030_vm12, %v9763_v37  ;;  %v20819_v37 = vld [vmem:[#allocation59_spill] sm:$0xff] }
 0xb17   : > { %13152 = vmatmul.mubr.msk.bf16.gmra.mrb[36].mxu1 %vm6030_vm12, %v9765_v43  ;;  %v10231_v43 = vshll.u32 %v19490_v17, 16 }
 0xb18   : > { %13155 = vmatprep.mubr.msk.bf16.mxu1 %vm6030_vm12, %v9767_v7 }
 0xb19   : > { %v10233_v7 = vrot.slane %v10231_v43, 3  ;;  %v10893_v43 = vld [vmem:[%s15865_s5 + $0xc0] sm:$0xff] }
 0xb1f   : > { %13156 = vmatmul.mubr.msk.bf16.gmra.mrb[40].mxu1 %vm6030_vm12, %v9769_v32 }
 0xb20   : > { %13159 = vmatprep.mubr.msk.bf16.mxu1 %vm6030_vm12, %v9771_v39  ;;  %v10907_v39 = vpack.c.bf16 %v10874_v54, %v10873_v19 }
 0xb27   : > { %13160 = vmatmul.mubr.msk.bf16.gmra.mrb[8].mxu1 %vm6030_vm12, %v9773_v41  ;;  %v10877_v41 = vld [vmem:[%s15865_s5 + $0x40] sm:$0xff] }
 0xb28   : > { %13163 = vmatprep.mubr.msk.bf16.mxu1 %vm6030_vm12, %v9775_v47  ;;  %v10878_v47 = vld [vmem:[%s15865_s5 + $0x48] sm:$0xff] }
 0xb29   : > { %v10909_v45 = vpack.c.bf16 %v10878_v47, %v10877_v41 }
 0xb2f   : > { %13164 = vmatmul.mubr.msk.bf16.gmra.mrb[12].mxu1 %vm6030_vm12, %v9777_v27  ;;  %v10879_v27 = vld [vmem:[%s15865_s5 + $0x50] sm:$0xff] }
 0xb30   : > { %13167 = vmatprep.mubr.msk.bf16.mxu1 %vm6030_vm12, %v9779_v63  ;;  %v10880_v63 = vld [vmem:[%s15865_s5 + $0x58] sm:$0xff] }
 0xb37   : > { %13168 = vmatmul.mubr.msk.bf16.gmra.mrb[16].mxu1 %vm6030_vm12, %v9781_v4  ;;  %v10910_v4 = vpack.c.bf16 %v10880_v63, %v10879_v27 }
 0xb38   : > { %13171 = vmatprep.mubr.msk.bf16.mxu1 %vm6030_vm12, %v9783_v25  ;;  %v10883_v25 = vld [vmem:[%s15865_s5 + $0x70] sm:$0xff] }
 0xb3f   : > { %13172 = vmatmul.mubr.msk.bf16.gmra.mrb[20].mxu1 %vm6030_vm12, %v9785_v56  ;;  %v10885_v56 = vld [vmem:[%s15865_s5 + $0x80] sm:$0xff] }
 0xb40   : > { %13177 = vmatprep.mubr.msk.bf16.mxu1 %vm6030_vm12, %v20814_v51  ;;  %v10886_v51 = vld [vmem:[%s15865_s5 + $0x88] sm:$0xff] }
 0xb47   : > { %13178 = vmatmul.mubr.msk.bf16.vlgmr.msra.gmra.mrb[24].mxu1 %vm6030_vm12, %v20815_v23  ;;  %v10913_v23 = vpack.c.bf16 %v10886_v51, %v10885_v56 }
 0xb48   : > { %13214 = vmatpush3.bf16.msra.mxu1 %v14345_v26  ;;  %13181 = vmatprep.mubr.msk.bf16.mxu1 %vm6030_vm12, %v20816_v46  ;;  %v20822_v26 = vld [vmem:[#allocation61_spill] sm:$0xff]  ;;  %v10887_v46 = vld [vmem:[%s15865_s5 + $0x90] sm:$0xff] }
 0xb49   : > { %13996 = vmatprep.subr.msk.bf16.mxu1 %vm2712_vm15, %v10923_v0 }
 0xb4f   : > { %13182 = vmatmul.mubr.msk.bf16.gmra.mrb[28].mxu1 %vm6030_vm12, %v20817_v22  ;;  %v10888_v22 = vld [vmem:[%s15865_s5 + $0x98] sm:$0xff] }
 0xb50   : > { %13185 = vmatprep.mubr.msk.bf16.mxu1 %vm6030_vm12, %v20818_v49  ;;  %v10889_v49 = vld [vmem:[%s15865_s5 + $0xa0] sm:$0xff] }
 0xb57   : > { %13186 = vmatmul.mubr.msk.bf16.gmra.mrb[32].mxu1 %vm6030_vm12, %v20819_v37  ;;  %v10890_v37 = vld [vmem:[%s15865_s5 + $0xa8] sm:$0xff] }
 0xb58   : > { %13189 = vmatprep.mubr.msk.bf16.mxu1 %vm6030_vm12, %v20820_v38  ;;  %v10914_v38 = vpack.c.bf16 %v10888_v22, %v10887_v46 }
 0xb5f   : > { %13190 = vmatmul.mubr.msk.bf16.gmra.mrb[36].mxu1 %vm6030_vm12, %v20821_v20  ;;  %v10915_v20 = vpack.c.bf16 %v10890_v37, %v10889_v49 }
 0xb60   : > { %13193 = vmatprep.mubr.msk.bf16.mxu1 %vm6030_vm12, %v19422_v13  ;;  %v10228_v13 = vshrl.u32 %v19490_v17, 16  ;;  %v20829_v17 = vld [vmem:[#allocation70_spill] sm:$0xff] }
 0xb67   : > { %13194 = vmatmul.mubr.msk.bf16.gmra.mrb[40].mxu1 %vm6030_vm12, %v19425_v6  ;;  %v10230_v6 = vrot.slane %v10228_v13, 2  ;;  %v10892_v13 = vld [vmem:[%s15865_s5 + $0xb8] sm:$0xff] }
 0xb68   : > { %13197 = vmatprep.mubr.msk.bf16.mxu1 %vm6030_vm12, %v19429_v34 }
 0xb69   : > { %v10234_v34 = vor.u32 %v10233_v7, %v10230_v6  ;;  %v10894_v6 = vld [vmem:[%s15865_s5 + $0xc8] sm:$0xff] }
 0xb6f   : > { %13198 = vmatmul.mubr.msk.bf16.gmra.mrb[8].mxu1 %vm6030_vm12, %v20822_v26  ;;  %v10891_v26 = vld [vmem:[%s15865_s5 + $0xb0] sm:$0xff] }
 0xb70   : > { %13201 = vmatprep.mubr.msk.bf16.mxu1 %vm6030_vm12, %v19444_v40  ;;  %v10235_v40 = vsel %vm5068_vm5, %v19463_v11, %v10234_v34  ;;  %v20825_v11 = vld [vmem:[#allocation65_spill] sm:$0xff]  ;;  %v10916_v7 = vpack.c.bf16 %v10892_v13, %v10891_v26  ;;  %v10917_v34 = vpack.c.bf16 %v10894_v6, %v10893_v43 }
 0xb77   : > { %13202 = vmatmul.mubr.msk.bf16.gmra.mrb[12].mxu1 %vm6030_vm12, %v19452_v3  ;;  %v10986_v3 = vsel %vm2712_vm15, %v10923_v0, 0  ;;  %v10912_v0 = vpack.c.bf16 %v10884_v60, %v10883_v25 }
 0xb78   : > { %13205 = vmatprep.mubr.msk.bf16.mxu1 %vm6030_vm12, %v19456_v8  ;;  %v20823_v8 = vld [vmem:[#allocation63_spill] sm:$0xff] }
 0xb7f   : > { %13206 = vmatmul.mubr.msk.bf16.gmra.mrb[16].mxu1 %vm6030_vm12, %v19460_v29  ;;  %v20824_v29 = vld [vmem:[#allocation64_spill] sm:$0xff] }
 0xb80   : > { %13209 = vmatprep.mubr.msk.bf16.mxu1 %vm6030_vm12, %v19477_v21  ;;  %v20826_v21 = vld [vmem:[#allocation66_spill] sm:$0xff] }
 0xb87   : > { %13210 = vmatmul.mubr.msk.bf16.gmra.mrb[20].mxu1 %vm6030_vm12, %v10235_v40  ;;  %v10895_v40 = vld [vmem:[%s15865_s5 + $0xd0] sm:$0xff] }
 0xb88   : > { %13215 = vmatprep.mubr.msk.bf16.mxu1 %vm6030_vm12, %v19469_v35  ;;  %v20827_v35 = vld [vmem:[#allocation67_spill] sm:$0xff] }
 0xb8f   : > { %13216 = vmatmul.mubr.msk.bf16.vlgmr.msra.gmra.mrb[24].mxu1 %vm6030_vm12, %v19472_v52  ;;  %v20828_v52 = vld [vmem:[#allocation69_spill] sm:$0xff] }
 0xb90   : > { %13252 = vmatpush3.bf16.msra.mxu1 %v10986_v3  ;;  %13219 = vmatprep.mubr.msk.bf16.mxu1 %vm6030_vm12, %v20823_v8  ;;  %v10896_v3 = vld [vmem:[%s15865_s5 + $0xd8] sm:$0xff]  ;;  %v10897_v8 = vld [vmem:[%s15865_s5 + $0xe0] sm:$0xff] }
 0xb97   : > { %13220 = vmatmul.mubr.msk.bf16.gmra.mrb[28].mxu1 %vm6030_vm12, %v20824_v29  ;;  %v10898_v29 = vld [vmem:[%s15865_s5 + $0xe8] sm:$0xff] }
 0xb98   : > { %13223 = vmatprep.mubr.msk.bf16.mxu1 %vm6030_vm12, %v20825_v11  ;;  %v10918_v11 = vpack.c.bf16 %v10896_v3, %v10895_v40 }
 0xb9f   : > { %13224 = vmatmul.mubr.msk.bf16.gmra.mrb[32].mxu1 %vm6030_vm12, %v20826_v21  ;;  %v10919_v21 = vpack.c.bf16 %v10898_v29, %v10897_v8 }
 0xba0   : > { %13227 = vmatprep.mubr.msk.bf16.mxu1 %vm6030_vm12, %v19504_v53 }
 0xba7   : > { %13228 = vmatmul.mubr.msk.bf16.gmra.mrb[36].mxu1 %vm6030_vm12, %v20827_v35  ;;  %v10899_v35 = vld [vmem:[%s15865_s5 + $0xf0] sm:$0xff] }
 0xba8   : > { %13231 = vmatprep.mubr.msk.bf16.mxu1 %vm6030_vm12, %v20828_v52  ;;  %v10900_v52 = vld [vmem:[%s15865_s5 + $0xf8] sm:$0xff] }
 0xbaf   : > { %13232 = vmatmul.mubr.msk.bf16.gmra.mrb[40].mxu1 %vm6030_vm12, %v19515_v55  ;;  %v20830_v55 = vld [vmem:[#allocation71_spill] sm:$0xff] }
 0xbb0   : > { %13235 = vmatprep.mubr.msk.bf16.mxu1 %vm6030_vm12, %v19518_v10  ;;  %v10869_v10 = vld [vmem:[%s15865_s5] sm:$0xff] }
 0xbb7   : > { %13236 = vmatmul.mubr.msk.bf16.gmra.mrb[8].mxu1 %vm6030_vm12, %v19521_v15  ;;  %v10870_v15 = vld [vmem:[%s15865_s5 + $0x8] sm:$0xff] }
 0xbb8   : > { %13239 = vmatprep.mubr.msk.bf16.mxu1 %vm6030_vm12, %v19524_v33  ;;  %v10905_v53 = vpack.c.bf16 %v10870_v15, %v10869_v10  ;;  %v20831_v33 = vld [vmem:[#allocation72_spill] sm:$0xff]  ;;  %v10920_v10 = vpack.c.bf16 %v10900_v52, %v10899_v35  ;;  %v20833_v52 = vld [vmem:[#allocation75_spill] sm:$0xff] }
 0xbbf   : > { %13240 = vmatmul.mubr.msk.bf16.gmra.mrb[12].mxu1 %vm6030_vm12, %v19527_v16  ;;  %v10871_v16 = vld [vmem:[%s15865_s5 + $0x10] sm:$0xff] }
 0xbc0   : > { %13243 = vmatprep.mubr.msk.bf16.mxu1 %vm6030_vm12, %v19534_v36  ;;  %v10872_v36 = vld [vmem:[%s15865_s5 + $0x18] sm:$0xff] }
 0xbc1   : > { %v10906_v32 = vpack.c.bf16 %v10872_v36, %v10871_v16  ;;  %v19934_v36 = vld [vmem:[#allocation27] ss:$0 sm:$0xff] }
 0xbc2   : > { %v13309_v19 = vadd.f32 %v19624_v1, %v19934_v36  ;;  %v13312_v54 = vadd.f32 %v19934_v36, %v19627_v48  ;;  %v13306_v57 = vadd.f32 %v19934_v36, %v19621_v58  ;;  %v13315_v48 = vadd.f32 %v19633_v59, %v19934_v36 }
 0xbc3   : > { %v13318_v58 = vadd.f32 %v19934_v36, %v19635_v14  ;;  %v13324_v59 = vadd.f32 %v19934_v36, %v19641_v50  ;;  %v13327_v46 = vadd.f32 %v19647_v30, %v19934_v36  ;;  %v13330_v37 = vadd.f32 %v19934_v36, %v19649_v31 }
 0xbc4   : > { %v13336_v26 = vadd.f32 %v19934_v36, %v19653_v12  ;;  %v13339_v12 = vadd.f32 %v19659_v9, %v19934_v36  ;;  %v13342_v29 = vadd.f32 %v19934_v36, %v19661_v61 }
 0xbc7   : > { %13244 = vmatmul.mubr.msk.bf16.gmra.mrb[16].mxu1 %vm6030_vm12, %v20829_v17  ;;  %v10901_v17 = vld [vmem:[%s15865_s5 + $0x100] sm:$0xff] }
 0xbc8   : > { %13247 = vmatprep.mubr.msk.bf16.mxu1 %vm6030_vm12, %v20830_v55  ;;  %v10902_v55 = vld [vmem:[%s15865_s5 + $0x108] sm:$0xff] }
 0xbc9   : > { %v10921_v15 = vpack.c.bf16 %v10902_v55, %v10901_v17  ;;  %v13348_v17 = vadd.f32 %v19934_v36, %v20833_v52 }
 0xbcf   : > { %13248 = vmatmul.mubr.msk.bf16.gmra.mrb[20].mxu1 %vm6030_vm12, %v20831_v33  ;;  %v10904_v33 = vld [vmem:[%s15865_s5 + $0x118] sm:$0xff] }
 0xbd0   : > { %13253 = vmatprep.mubr.msk.bf16.mxu1 %vm873_vm1, %v10905_v53  ;;  %v10903_v53 = vld [vmem:[%s15865_s5 + $0x110] sm:$0xff] }
 0xbd1   : > { %v10922_v16 = vpack.c.bf16 %v10904_v33, %v10903_v53 }
 0xbd7   : > { %13254 = vmatmul.mubr.msk.bf16.vlgmr.msra.gmra.mrb[24].mxu1 %vm873_vm1, %v10906_v32  ;;  %v19940_v32 = vld [vmem:[#allocation30] ss:$0 sm:$0xff] }
 0xbd8   : > { %13257 = vmatprep.mubr.msk.bf16.mxu1 %vm873_vm1, %v10907_v39  ;;  %v13303_v39 = vadd.f32 %v19619_v44, %v19934_v36  ;;  %v13313_v1 = vadd.f32 %v13312_v54, %v19940_v32  ;;  %v13316_v14 = vadd.f32 %v13315_v48, %v19940_v32  ;;  %v13319_v25 = vadd.f32 %v13318_v58, %v19940_v32  ;;  %v20834_v54 = vld [vmem:[#allocation76_spill] sm:$0xff] }
 0xbd9   : > { %v13325_v50 = vadd.f32 %v13324_v59, %v19940_v32  ;;  %v13328_v30 = vadd.f32 %v13327_v46, %v19940_v32  ;;  %v13331_v31 = vadd.f32 %v13330_v37, %v19940_v32  ;;  %v13337_v40 = vadd.f32 %v13336_v26, %v19940_v32 }
 0xbda   : > { %v13340_v9 = vadd.f32 %v13339_v12, %v19940_v32  ;;  %v13343_v61 = vadd.f32 %v13342_v29, %v19940_v32 }
 0xbdf   : > { %13258 = vmatmul.mubr.msk.bf16.gmra.mrb[28].mxu1 %vm873_vm1, %v10908_v62  ;;  %v13310_v62 = vadd.f32 %v13309_v19, %v19940_v32  ;;  %v13349_v19 = vadd.f32 %v13348_v17, %v19940_v32 }
 0xbe0   : > { %13261 = vmatprep.mubr.msk.bf16.mxu1 %vm873_vm1, %v10909_v45 }
 0xbe7   : > { %13262 = vmatmul.mubr.msk.bf16.gmra.mrb[32].mxu1 %vm873_vm1, %v10910_v4 }
 0xbe8   : > { %13265 = vmatprep.mubr.msk.bf16.mxu1 %vm873_vm1, %v10911_v18  ;;  %v13321_v18 = vadd.f32 %v19638_v28, %v19934_v36 }
 0xbea   : > { %v13322_v51 = vadd.f32 %v13321_v18, %v19940_v32 }
 0xbef   : > { %13266 = vmatmul.mubr.msk.bf16.gmra.mrb[36].mxu1 %vm873_vm1, %v10912_v0 }
 0xbf0   : > { %13269 = vmatprep.mubr.msk.bf16.mxu1 %vm873_vm1, %v10913_v23 }
 0xbf7   : > { %13270 = vmatmul.mubr.msk.bf16.gmra.mrb[40].mxu1 %vm873_vm1, %v10914_v38 }
 0xbf8   : > { %13273 = vmatprep.mubr.msk.bf16.mxu1 %vm873_vm1, %v10915_v20  ;;  %v13333_v20 = vadd.f32 %v19651_v42, %v19934_v36 }
 0xbff   : > { %13274 = vmatmul.mubr.msk.bf16.gmra.mrb[8].mxu1 %vm873_vm1, %v10916_v7  ;;  %v13334_v7 = vadd.f32 %v13333_v20, %v19940_v32 }
 0xc00   : > { %13277 = vmatprep.mubr.msk.bf16.mxu1 %vm873_vm1, %v10917_v34 }
 0xc07   : > { %13278 = vmatmul.mubr.msk.bf16.gmra.mrb[12].mxu1 %vm873_vm1, %v10918_v11 }
 0xc08   : > { %13281 = vmatprep.mubr.msk.bf16.mxu1 %vm873_vm1, %v10919_v21  ;;  %v20832_v21 = vld [vmem:[#allocation74_spill] sm:$0xff] }
 0xc09   : > { %v13345_v35 = vadd.f32 %v20832_v21, %v19934_v36 }
 0xc0b   : > { %v13346_v53 = vadd.f32 %v13345_v35, %v19940_v32 }
 0xc0f   : > { %13282 = vmatmul.mubr.msk.bf16.gmra.mrb[16].mxu1 %vm873_vm1, %v10920_v10 }
 0xc10   : > { %13285 = vmatprep.mubr.msk.bf16.mxu1 %vm873_vm1, %v10921_v15 }
 0xc17   : > { %13286 = vmatmul.mubr.msk.bf16.gmra.mrb[20].mxu1 %vm873_vm1, %v10922_v16 }
 0xcaa   : > { %v13255_v24 = vpop.f32.mrb[24].mxu1 }
 0xcab   : > { %v13304_v41 = vadd.f32 %v13303_v39, %v13255_v24  ;;  %v11022_v47 = vpop.f32.mrb[25].mxu1  ;;  %v13351_v39 = vadd.f32 %v20834_v54, %v19934_v36 }
 0xcac   : > { %v13307_v45 = vadd.f32 %v13306_v57, %v11022_v47  ;;  %v13256_v27 = vpop.f32.mrb[26].mxu1 }
 0xcad   : > { %v13305_v63 = vadd.f32 %v13304_v41, %v19940_v32  ;;  %v13311_v2 = vadd.f32 %v13310_v62, %v13256_v27  ;;  %v11025_v44 = vpop.f32.mrb[27].mxu1  ;;  %v20835_v41 = vld [vmem:[#allocation93_spill] sm:$0xff] }
 0xcae   : > { %v13308_v5 = vadd.f32 %v13307_v45, %v19940_v32  ;;  %v13314_v4 = vadd.f32 %v13313_v1, %v11025_v44  ;;  %v13354_v47 = vadd.f32 %v19934_v36, %v20835_v41  ;;  %v20836_v45 = vld [vmem:[#allocation77_spill] sm:$0xff]  ;;  %v20837_v1 = vld [vmem:[#allocation95_spill] sm:$0xff] }
 0xcaf   : > { %11203 = vst.msk [vmem:[%s19958_s29 + $0x10] sm:$0xff] %vm6030_vm12, %v13305_v63  ;;  %11204 = vst.msk [vmem:[%s19958_s29 + $0x18] sm:$0xff] %vm6030_vm12, %v13311_v2  ;;  %v13357_v27 = vadd.f32 %v20836_v45, %v19934_v36  ;;  %v13360_v48 = vadd.f32 %v19934_v36, %v20837_v1  ;;  %v13352_v63 = vadd.f32 %v13351_v39, %v19940_v32 }
 0xcb0   : > { %11201 = vst.msk [vmem:[%s19958_s29] sm:$0xff] %vm6030_vm12, %v13308_v5  ;;  %11202 = vst.msk [vmem:[%s19958_s29 + $0x8] sm:$0xff] %vm6030_vm12, %v13314_v4  ;;  %v13355_v44 = vadd.f32 %v13354_v47, %v19940_v32 }
 0xcb1   : > { %v13358_v4 = vadd.f32 %v13357_v27, %v19940_v32 }
 0xcb2   : > { %v13259_v28 = vpop.f32.mrb[28].mxu1 }
 0xcb3   : > { %v13317_v60 = vadd.f32 %v13316_v14, %v13259_v28  ;;  %v11038_v56 = vpop.f32.mrb[29].mxu1  ;;  %v13361_v14 = vadd.f32 %v13360_v48, %v19940_v32 }
 0xcb4   : > { %v13320_v0 = vadd.f32 %v13319_v25, %v11038_v56  ;;  %v13260_v23 = vpop.f32.mrb[30].mxu1  ;;  %v13365_v56 = vadd.f32 %v19940_v32, %v19934_v36 }
 0xcb5   : > { %11207 = vst.msk [vmem:[%s19958_s29 + $0x30] sm:$0xff] %vm6030_vm12, %v13317_v60  ;;  %v13323_v22 = vadd.f32 %v13322_v51, %v13260_v23  ;;  %v11041_v49 = vpop.f32.mrb[31].mxu1 }
 0xcb6   : > { %11205 = vst.msk [vmem:[%s19958_s29 + $0x20] sm:$0xff] %vm6030_vm12, %v13320_v0  ;;  %v13326_v38 = vadd.f32 %v13325_v50, %v11041_v49 }
 0xcb7   : > { %11208 = vst.msk [vmem:[%s19958_s29 + $0x38] sm:$0xff] %vm6030_vm12, %v13323_v22 }
 0xcb8   : > { %11206 = vst.msk [vmem:[%s19958_s29 + $0x28] sm:$0xff] %vm6030_vm12, %v13326_v38 }
 0xcba   : > { %v13263_v13 = vpop.f32.mrb[32].mxu1 }
 0xcbb   : > { %v13329_v43 = vadd.f32 %v13328_v30, %v13263_v13  ;;  %v11054_v6 = vpop.f32.mrb[33].mxu1 }
 0xcbc   : > { %v13332_v42 = vadd.f32 %v13331_v31, %v11054_v6  ;;  %v13264_v34 = vpop.f32.mrb[34].mxu1 }
 0xcbd   : > { %11211 = vst.msk [vmem:[%s19958_s29 + $0x50] sm:$0xff] %vm6030_vm12, %v13329_v43  ;;  %v13335_v3 = vadd.f32 %v13334_v7, %v13264_v34  ;;  %v11057_v8 = vpop.f32.mrb[35].mxu1 }
 0xcbe   : > { %11209 = vst.msk [vmem:[%s19958_s29 + $0x40] sm:$0xff] %vm6030_vm12, %v13332_v42  ;;  %v13338_v11 = vadd.f32 %v13337_v40, %v11057_v8 }
 0xcbf   : > { %11212 = vst.msk [vmem:[%s19958_s29 + $0x58] sm:$0xff] %vm6030_vm12, %v13335_v3 }
 0xcc0   : > { %11210 = vst.msk [vmem:[%s19958_s29 + $0x48] sm:$0xff] %vm6030_vm12, %v13338_v11 }
 0xcc2   : > { %v13267_v55 = vpop.f32.mrb[36].mxu1 }
 0xcc3   : > { %v13341_v10 = vadd.f32 %v13340_v9, %v13267_v55  ;;  %v11070_v15 = vpop.f32.mrb[37].mxu1 }
 0xcc4   : > { %v13344_v33 = vadd.f32 %v13343_v61, %v11070_v15  ;;  %v13268_v16 = vpop.f32.mrb[38].mxu1 }
 0xcc5   : > { %11215 = vst.msk [vmem:[%s19958_s29 + $0x70] sm:$0xff] %vm6030_vm12, %v13341_v10  ;;  %v13347_v57 = vadd.f32 %v13346_v53, %v13268_v16  ;;  %v11073_v24 = vpop.f32.mrb[39].mxu1 }
 0xcc6   : > { %11213 = vst.msk [vmem:[%s19958_s29 + $0x60] sm:$0xff] %vm6030_vm12, %v13344_v33  ;;  %v13350_v62 = vadd.f32 %v13349_v19, %v11073_v24 }
 0xcc7   : > { %11216 = vst.msk [vmem:[%s19958_s29 + $0x78] sm:$0xff] %vm6030_vm12, %v13347_v57 }
 0xcc8   : > { %11214 = vst.msk [vmem:[%s19958_s29 + $0x68] sm:$0xff] %vm6030_vm12, %v13350_v62 }
 0xcca   : > { %v13271_v2 = vpop.f32.mrb[40].mxu1 }
 0xccb   : > { %v13353_v58 = vadd.f32 %v13352_v63, %v13271_v2  ;;  %v11086_v5 = vpop.f32.mrb[41].mxu1 }
 0xccc   : > { %v13356_v18 = vadd.f32 %v13355_v44, %v11086_v5  ;;  %v13272_v59 = vpop.f32.mrb[42].mxu1 }
 0xccd   : > { %11219 = vst.msk [vmem:[%s19958_s29 + $0x90] sm:$0xff] %vm6030_vm12, %v13353_v58  ;;  %v13359_v28 = vadd.f32 %v13358_v4, %v13272_v59  ;;  %v11089_v25 = vpop.f32.mrb[43].mxu1 }
 0xcce   : > { %11217 = vst.msk [vmem:[%s19958_s29 + $0x80] sm:$0xff] %vm6030_vm12, %v13356_v18  ;;  %v13362_v60 = vadd.f32 %v13361_v14, %v11089_v25 }
 0xccf   : > { %11220 = vst.msk [vmem:[%s19958_s29 + $0x98] sm:$0xff] %vm6030_vm12, %v13359_v28 }
 0xcd0   : > { %11218 = vst.msk [vmem:[%s19958_s29 + $0x88] sm:$0xff] %vm6030_vm12, %v13362_v60 }
 0xcd2   : > { %v13275_v51 = vpop.f32.mrb[8].mxu1 }
 0xcd3   : > { %v13364_v0 = vadd.f32 %v13365_v56, %v13275_v51  ;;  %v11102_v23 = vpop.f32.mrb[9].mxu1 }
 0xcd4   : > { %v13366_v50 = vadd.f32 %v13365_v56, %v11102_v23  ;;  %v13276_v46 = vpop.f32.mrb[10].mxu1 }
 0xcd5   : > { %11223 = vst.msk [vmem:[%s19958_s29 + $0xb0] sm:$0xff] %vm6030_vm12, %v13364_v0  ;;  %v13368_v22 = vadd.f32 %v13365_v56, %v13276_v46  ;;  %v11105_v49 = vpop.f32.mrb[11].mxu1 }
 0xcd6   : > { %11221 = vst.msk [vmem:[%s19958_s29 + $0xa0] sm:$0xff] %vm6030_vm12, %v13366_v50  ;;  %v13370_v37 = vadd.f32 %v13365_v56, %v11105_v49 }
 0xcd7   : > { %11224 = vst.msk [vmem:[%s19958_s29 + $0xb8] sm:$0xff] %vm6030_vm12, %v13368_v22 }
 0xcd8   : > { %11222 = vst.msk [vmem:[%s19958_s29 + $0xa8] sm:$0xff] %vm6030_vm12, %v13370_v37 }
 0xcda   : > { %v13279_v36 = vpop.f32.mrb[12].mxu1 }
 0xcdb   : > { %v13372_v32 = vadd.f32 %v13365_v56, %v13279_v36  ;;  %v11118_v38 = vpop.f32.mrb[13].mxu1 }
 0xcdc   : > { %v13374_v20 = vadd.f32 %v13365_v56, %v11118_v38  ;;  %v13280_v26 = vpop.f32.mrb[14].mxu1 }
 0xcdd   : > { %11227 = vst.msk [vmem:[%s19958_s29 + $0xd0] sm:$0xff] %vm6030_vm12, %v13372_v32  ;;  %v13376_v30 = vadd.f32 %v13365_v56, %v13280_v26  ;;  %v11121_v13 = vpop.f32.mrb[15].mxu1 }
 0xcde   : > { %11225 = vst.msk [vmem:[%s19958_s29 + $0xc0] sm:$0xff] %vm6030_vm12, %v13374_v20  ;;  %v13378_v31 = vadd.f32 %v13365_v56, %v11121_v13 }
 0xcdf   : > { %11228 = vst.msk [vmem:[%s19958_s29 + $0xd8] sm:$0xff] %vm6030_vm12, %v13376_v30 }
 0xce0   : > { %11226 = vst.msk [vmem:[%s19958_s29 + $0xc8] sm:$0xff] %vm6030_vm12, %v13378_v31 }
 0xce2   : > { %v13283_v43 = vpop.f32.mrb[16].mxu1 }
 0xce3   : > { %v13380_v6 = vadd.f32 %v13365_v56, %v13283_v43  ;;  %v11134_v7 = vpop.f32.mrb[17].mxu1 }
 0xce4   : > { %v13382_v42 = vadd.f32 %v13365_v56, %v11134_v7  ;;  %v13284_v34 = vpop.f32.mrb[18].mxu1 }
 0xce5   : > { %11231 = vst.msk [vmem:[%s19958_s29 + $0xf0] sm:$0xff] %vm6030_vm12, %v13380_v6  ;;  %v13384_v40 = vadd.f32 %v13365_v56, %v13284_v34  ;;  %v11137_v12 = vpop.f32.mrb[19].mxu1 }
 0xce6   : > { %11229 = vst.msk [vmem:[%s19958_s29 + $0xe0] sm:$0xff] %vm6030_vm12, %v13382_v42  ;;  %v13386_v3 = vadd.f32 %v13365_v56, %v11137_v12 }
 0xce7   : > { %11232 = vst.msk [vmem:[%s19958_s29 + $0xf8] sm:$0xff] %vm6030_vm12, %v13384_v40 }
 0xce8   : > { %11230 = vst.msk [vmem:[%s19958_s29 + $0xe8] sm:$0xff] %vm6030_vm12, %v13386_v3 }
 0xcea   : > { %v13287_v8 = vpop.f32.mrb[20].mxu1 }
 0xceb   : > { %v13388_v29 = vadd.f32 %v13365_v56, %v13287_v8  ;;  %v11150_v11 = vpop.f32.mrb[21].mxu1 }
 0xcec   : > { %v13390_v21 = vadd.f32 %v13365_v56, %v11150_v11  ;;  %v13288_v35 = vpop.f32.mrb[22].mxu1 }
 0xced   : > { %11235 = vst.msk [vmem:[%s19958_s29 + $0x110] sm:$0xff] %vm6030_vm12, %v13388_v29  ;;  %v13392_v52 = vadd.f32 %v13365_v56, %v13288_v35  ;;  %v11153_v17 = vpop.f32.mrb[23].mxu1 }
 0xcee   : > { %11233 = vst.msk [vmem:[%s19958_s29 + $0x100] sm:$0xff] %vm6030_vm12, %v13390_v21  ;;  %v13394_v9 = vadd.f32 %v13365_v56, %v11153_v17 }
 0xcef   : > { %11236 = vst.msk [vmem:[%s19958_s29 + $0x118] sm:$0xff] %vm6030_vm12, %v13392_v52 }
 0xcf0   : > { %11234 = vst.msk [vmem:[%s19958_s29 + $0x108] sm:$0xff] %vm6030_vm12, %v13394_v9 }
 0xcf1   : > { %15159 = shalt.err (!%p15156_p10)
}
 0xcf2   : > { %s15160_s5 = scalar_lea.hbm %s20075_s6, 4608  ;;  %s15164_s3 = scalar_lea.hbm %s20838_s19, 9216 }
 0xcf3   : > { %p15161_p5 = scmp.ne.s32.totalorder %s20075_s6, %s15160_s5  ;;  %p15165_p7 = scmp.lt.u32.totalorder %s20075_s6, %s20838_s19 }
 0xcf4   : > { %p15166_p11 = scmp.lt.u32.totalorder %s15164_s3, %s15160_s5  ;;  %p15168_p4 = scmp.lt.u32.totalorder %s15160_s5, %s20075_s6 }
 0xcf5   : > { %p15162_p9 = pnand %p15161_p5, %p20839_p12 }
 0xcf6   : > { %p15167_p8 = por %p15166_p11, %p15165_p7 }
 0xcf7   : > { %p15163_p0 = pneg %p15162_p9 }
 0xcf8   : > { %p15169_p13 = por %p15168_p4, %p15167_p8 }
 0xcfa   : > { %p15170_p1 = pnand %p15169_p13, %p15163_p0 }
 0xcfc   : > { %15173 = shalt.err (!%p15170_p1)
}
 0xcfd   : > { %s15276_s23 = smov 128   ;;  %s15277_s27 = smov 8  }
 0xcfe   : > { %14065 = dma.vmem_to_hbm [thread:$0]  (%p20839_p12), %s20079_s0, 4608, %s20075_s6, %s11238_s28, %s15276_s23, %s15276_s23, %s15277_s27  }
 0xcff PF: > { %s20840_s26 = sld [smem:[#allocation43_spill]]  ;;  %s20841_s8 = sld [smem:[#allocation46_spill]] }
 0xd00   : > { %p20842_p3 = scmp.ne.s32.totalorder %s20332_s24, 0 }
 0xd05   : > { %s11266_s25 = sand.u32 1, %s20840_s26   ;;  %p20843_p2 = scmp.ge.s32.totalorder %s20841_s8, 2 }
 0xd06   : > { %s11267_s7 = scalar_lea.sflag [#allocation6], %s11266_s25 }
 0xd07   : > { %p14121_p6 = pnand %p20843_p2, %p20842_p3 }
 0xd09   : > { %15231 = dma.done.wait (!%p14121_p6), %s11267_s7, 4608  }
 0xd0a   : > { %15233 = vsyncadd (!%p14121_p6), %s11267_s7, 4294962688  ;;  %s20844_s24 = sld [smem:[#allocation44_spill]]  ;;  %s20845_s25 = sld [smem:[#allocation45_spill]] }
 0xd0b   : > { %p40_p10 = scmp.ge.s32.totalorder %s15751_s1, 4   ;;  %s20846_s26 = smov %s15763_s17 }
 0xd0c   : > { %s20847_s27 = smov %s15751_s1 }
 0xd0d   :  { %42 = sbr.rel (!%p40_p10) target bundleno = 25 (0x19), region = 222 }
 0xd14   :  { %11272 = vsyncpa [#allocation5], 1 }
 0xd15   :  { %11274 = vsyncpa [#allocation5 + $0x1], 1 }
 0xd16   :  { %11275 = vsyncpa [#allocation8], 1 }
 0xd17   :  { %11277 = vsyncpa [#allocation8 + $0x1], 1 }
 0xd18   :  { %11278 = vsyncpa [#allocation11], 1 }
 0xd19   :  { %11279 = vsyncpa [#allocation14], 1 }
 0xd1a   :  { %11280 = vsyncpa [#allocation17], 1 }
 0xd1b   :  { %11281 = vsyncpa [#allocation20], 1 }
 0xd1c   :  { %11282 = vsyncpa [#allocation23], 1 }
 0xd1d   :  { %11283 = vsyncpa [#allocation26], 1 }
 0xd1e   :  { %11284 = vsyncpa [#allocation29], 1 }
 0xd1f   :  { %11285 = vsyncpa [#allocation6], 1 }
 0xd20   :  { %11287 = vsyncpa [#allocation6 + $0x1], 1 }

</bundles_post_ra>
